<compile_context>
chip_gen: v5e
topology: v5e:2x2
jax: 0.10.0
libtpu: 0.0.40
codegen_flags: <defaults>
</compile_context>

<pallas_src>
import functools

import jax
import jax.numpy as jnp
from jax import lax
from jax.experimental import pallas as pl
from jax.experimental.pallas import tpu as pltpu

DISTANCE_CUTOFF = 5.0  # skimage _nl_means_denoising.pyx


# ---------------------------------------------------------------------------
# Glue: skimage.restoration.estimate_sigma (db2 wavelet HH + MAD), plain JAX.
# Scalar parameter setup; the hot path (NL-means) is the Pallas kernel below.
# ---------------------------------------------------------------------------
_DB2_DEC_HI = jnp.array(
    [-0.48296291314469025, 0.836516303737469,
     -0.22414386804185735, -0.12940952255092145], dtype=jnp.float32)
_MAD_DENOM = 0.6744897501960817  # scipy.stats.norm.ppf(0.75)


def _dwt_hi(x, axis):
    """Single-level pywt-style high-pass DWT (db2, mode='symmetric') along axis."""
    x = jnp.moveaxis(x, axis, -1)
    n = x.shape[-1]
    f = 4
    out_len = (n + f - 1) // 2
    ext = jnp.pad(x, [(0, 0)] * (x.ndim - 1) + [(3, 3)], mode="symmetric")
    out = jnp.zeros(x.shape[:-1] + (out_len,), x.dtype)
    for j in range(f):
        seg = ext[..., 4 - j::2][..., :out_len]
        out = out + _DB2_DEC_HI[j] * seg
    return jnp.moveaxis(out, -1, axis)


def _estimate_sigma_mean(x_hwc):
    """np.mean(skimage.restoration.estimate_sigma(x, channel_axis=-1))."""
    sigmas = []
    for c in range(x_hwc.shape[-1]):
        hh = _dwt_hi(_dwt_hi(x_hwc[..., c], axis=1), axis=0)
        # TODO(synk): skimage drops exactly-zero detail coeffs before the
        # median (irrelevant for generic float inputs).
        sigmas.append(jnp.median(jnp.abs(hh)) / _MAD_DENOM)
    return jnp.mean(jnp.stack(sigmas))


# ---------------------------------------------------------------------------
# pltpu.roll is used for all lane (column) shifts.  Probe its rotation
# direction once (tiny kernel) so the main kernel is robust either way.
# ---------------------------------------------------------------------------
def _detect_roll_sign():
    def probe(o_ref):
        o_ref[...] = pltpu.roll(
            lax.broadcasted_iota(jnp.int32, (8, 128), 1), 1, axis=1)
    try:
        r = pl.pallas_call(
            probe, out_shape=jax.ShapeDtypeStruct((8, 128), jnp.int32))()
        # jnp.roll convention: out[j] == in[j - 1]  =>  out[0, 1] == 0.
        return 1 if int(r[0, 1]) == 0 else -1
    except Exception:  # conservative fallback
        return 1


_ROLL_SIGN = _detect_roll_sign()


# ---------------------------------------------------------------------------
# Pallas kernel: classic (fast_mode=False) 2-D multichannel non-local means,
# one output-row tile per grid step.
# ---------------------------------------------------------------------------
def _nlm_kernel(gr_ref, gc_ref, var_ref, padded_ref, sq_ref, out_ref,
                wsum_ref, num_ref, *, C, H, W, TH, S, D, OFF, PAD, WPADR):
    """padded_ref: (C, HPADR, WPADR) reflect(OFF)+zero(D) padded image (CHW).
    sq_ref: (HPADR, WPADR) = sum_c padded**2.  out_ref: (C, TH, W) row tile.
    wsum_ref: (TH, WPADR), num_ref: (C, TH, WPADR) scratch accumulators."""
    t = pl.program_id(0)
    var_term = var_ref[0]
    gr = [gr_ref[k] for k in range(S)]   # row taps (carry the 1/norm factor)
    gc = [gc_ref[k] for k in range(S)]   # column taps

    HSLAB = TH + 2 * OFF                 # patch-support rows for this tile
    r0 = t * TH + PAD                    # padded row of first output row

    def lroll(v, shift):
        # Lane (last-axis) rotation on the XLU; static shift, jnp.roll
        # semantics: result[..., j] == v[..., j - shift].
        shift = (_ROLL_SIGN * shift) % v.shape[-1]
        return v if shift == 0 else pltpu.roll(v, shift, axis=v.ndim - 1)

    # Reference-patch side (independent of the search offset): loaded once.
    pa2 = [padded_ref[c, pl.ds(r0 - OFF, HSLAB), :] * (-2.0) for c in range(C)]
    sqa = sq_ref[pl.ds(r0 - OFF, HSLAB), :]

    row_ids = t * TH + lax.broadcasted_iota(jnp.int32, (TH, WPADR), 0)
    col_ids = lax.broadcasted_iota(jnp.int32, (TH, WPADR), 1) - PAD  # = x

    wsum_ref[...] = jnp.zeros_like(wsum_ref)
    num_ref[...] = jnp.zeros_like(num_ref)

    @pl.loop(0, 2 * D + 1)
    def _(it):
        di = it - D
        # Candidate-patch rows / candidate-centre rows for this row shift.
        pb = [padded_ref[c, pl.ds(r0 - OFF + di, HSLAB), :] for c in range(C)]
        cb = [padded_ref[c, pl.ds(r0 + di, TH), :] for c in range(C)]
        sqb = sq_ref[pl.ds(r0 - OFF + di, HSLAB), :]
        row_ok = (row_ids + di >= 0) & (row_ids + di < H)

        wsum_d = jnp.zeros((TH, WPADR), jnp.float32)
        num_d = [jnp.zeros((TH, WPADR), jnp.float32) for _ in range(C)]

        for dj in range(-D, D + 1):
            # channel-summed squared patch difference field:
            #   e = |A|^2 + |B<<dj|^2 - 2 * <A, B<<dj>
            cross2 = pa2[0] * lroll(pb[0], -dj)
            for c in range(1, C):
                cross2 = cross2 + pa2[c] * lroll(pb[c], -dj)
            e = sqa + lroll(sqb, -dj) + cross2               # (HSLAB, WPADR)

            # Separable 5x5 Gaussian patch filter: lane pass then sublane pass.
            ec = gc[OFF] * e
            for q in range(1, OFF + 1):
                ec = ec + gc[OFF + q] * lroll(e, -q) + gc[OFF - q] * lroll(e, q)
            dist = gr[0] * ec[0:TH, :]
            for p in range(1, S):
                dist = dist + gr[p] * ec[p:p + TH, :]
            dist = dist - var_term

            # TODO(synk): skimage early-exits when a per-patch-row prefix sum
            # exceeds 5.0; here the cutoff is applied to the full distance.
            col_ok = (col_ids + dj >= 0) & (col_ids + dj < W)
            weight = jnp.where(row_ok & col_ok & (dist <= DISTANCE_CUTOFF),
                               jnp.exp(-jnp.maximum(dist, 0.0)), 0.0)

            wsum_d = wsum_d + weight
            for c in range(C):
                num_d[c] = num_d[c] + weight * lroll(cb[c], -dj)

        wsum_ref[...] += wsum_d
        for c in range(C):
            num_ref[c, :, :] += num_d[c]

    # Normalise and write the interior of the tile (one misaligned slice).
    inv = pl.reciprocal(wsum_ref[:, PAD:PAD + W], approx=False)
    out_ref[...] = num_ref[:, :, PAD:PAD + W] * inv[None, :, :]


# ---------------------------------------------------------------------------
# Wrapper reproducing Denoise.forward
# ---------------------------------------------------------------------------
def _round_up(x, m):
    return (x + m - 1) // m * m


def _pick_tile_h(H):
    for th in (128, 64, 32, 16, 8):
        if H % th == 0:
            return th
    return H


def denoise_forward(x_hwc, h_weight=100.0, patch_size=5, patch_distance=6):
    x = x_hwc.astype(jnp.float32)
    H, W, C = x.shape
    s, d = patch_size, patch_distance
    off = s // 2
    pad = off + d

    sigma = _estimate_sigma_mean(x)              # est_sigma
    h = h_weight * sigma                         # h = h_weight * est_sigma
    var = 2.0 * sigma * sigma                    # skimage: var = sigma^2, *= 2

    # Separable 5-tap Gaussian patch kernel, normalised exactly as skimage:
    #   w[p, q] = g[p] * g[q] / (C * sum(g (x) g) * h^2) = gr[p] * gc[q]
    a = (s - 1.0) / 4.0
    rng = jnp.arange(-off, off + 1, dtype=jnp.float32)
    g = jnp.exp(-(rng * rng) / (2.0 * a * a))
    w_sum = jnp.sum(g) ** 2
    norm = C * w_sum * h * h
    gr = (g / norm).astype(jnp.float32)          # row taps (carry 1/norm)
    gc = g.astype(jnp.float32)                   # column taps
    var_term = (var * C * (w_sum / norm)).astype(jnp.float32)

    # CHW; reflect pad by `off` (as skimage), zero ring of `d` so shifted reads
    # stay in bounds (masked anyway); pad rows to a multiple of 8 and the lane
    # (column) axis to a multiple of 128.
    th = _pick_tile_h(H)
    hpad, wpad = H + 2 * pad, W + 2 * pad
    hpad_r, wpad_r = _round_up(hpad, 8), _round_up(wpad, 128)
    x_chw = jnp.transpose(x, (2, 0, 1))
    padded = jnp.pad(x_chw, ((0, 0), (off, off), (off, off)), mode="reflect")
    padded = jnp.pad(
        padded, ((0, 0), (d, d + hpad_r - hpad), (d, d + wpad_r - wpad)))
    sq = jnp.sum(padded * padded, axis=0)        # (hpad_r, wpad_r)

    kernel = functools.partial(_nlm_kernel, C=C, H=H, W=W, TH=th, S=s, D=d,
                               OFF=off, PAD=pad, WPADR=wpad_r)
    grid = (H // th,)

    # Advisory cost + VMEM sizing.
    n_off = (2 * d + 1) ** 2
    slab = (th + 2 * off) * wpad_r
    cost = pl.CostEstimate(
        flops=int(grid[0] * n_off * (2 * C + 4 * s + 14) * slab),
        transcendentals=int(grid[0] * n_off * th * wpad_r),
        bytes_accessed=int(4 * ((C + 1) * hpad_r * wpad_r + C * H * W)))
    vmem_est = 4 * ((C + 1) * hpad_r * wpad_r        # resident padded + sq
                    + (C + 1) * th * wpad_r          # accumulator scratch
                    + 20 * slab                      # live temporaries
                    + 2 * C * th * W)                # double-buffered out block
    vmem_limit = int(min(60 * 2**20, max(32 * 2**20, 2 * vmem_est)))

    out_chw = pl.pallas_call(
        kernel,
        out_shape=jax.ShapeDtypeStruct((C, H, W), jnp.float32),
        grid=grid,
        in_specs=[
            pl.BlockSpec(memory_space=pltpu.MemorySpace.SMEM),   # gr (5,)
            pl.BlockSpec(memory_space=pltpu.MemorySpace.SMEM),   # gc (5,)
            pl.BlockSpec(memory_space=pltpu.MemorySpace.SMEM),   # var_term (1,)
            pl.BlockSpec(memory_space=pltpu.MemorySpace.VMEM),   # padded image
            pl.BlockSpec(memory_space=pltpu.MemorySpace.VMEM),   # sum-of-squares
        ],
        out_specs=pl.BlockSpec((C, th, W), lambda t: (0, t, 0)),
        scratch_shapes=[
            pltpu.VMEM((th, wpad_r), jnp.float32),       # wsum accumulator
            pltpu.VMEM((C, th, wpad_r), jnp.float32),    # numerator accumulator
        ],
        compiler_params=pltpu.CompilerParams(
            dimension_semantics=("parallel",),
            vmem_limit_bytes=vmem_limit),
        cost_estimate=cost,
    )(gr, gc, jnp.reshape(var_term, (1,)), padded, sq)

    # TODO(synk): for very small W (< 128 lanes) the output store is
    # lane-masked; folding rows into the lane axis would need a different
    # neighbourhood layout and is not attempted here.
    return jnp.transpose(out_chw, (1, 2, 0))  # back to HWC


denoise = jax.jit(denoise_forward,
                  static_argnames=("patch_size", "patch_distance"))


# ---------------------------------------------------------------------------
# Plain-JAX reference (same math, direct transcription) used as a self-check.
# ---------------------------------------------------------------------------
@jax.jit
def _patch_corr(e, w):
    s = w.shape[0]
    Ho = e.shape[0] - (s - 1)
    Wo = e.shape[1] - (s - 1)
    out = jnp.zeros((Ho, Wo), e.dtype)
    for p in range(s):
        for q in range(s):
            out = out + w[p, q] * e[p:p + Ho, q:q + Wo]
    return out


def _nlm_reference(x_hwc, h_weight=100.0, patch_size=5, patch_distance=6):
    x = x_hwc.astype(jnp.float32)
    H, W, C = x.shape
    s, d = patch_size, patch_distance
    off = s // 2
    pad = off + d
    sigma = _estimate_sigma_mean(x)
    h = h_weight * sigma
    var = 2.0 * sigma * sigma
    a = (s - 1.0) / 4.0
    rng = jnp.arange(-off, off + 1, dtype=jnp.float32)
    xr, xc = jnp.meshgrid(rng, rng, indexing="ij")
    w = jnp.exp(-(xr * xr + xc * xc) / (2.0 * a * a))
    w = w / (C * jnp.sum(w) * h * h)
    var_term = var * C * jnp.sum(w)

    padded = jnp.pad(x, ((off, off), (off, off), (0, 0)), mode="reflect")
    padded = jnp.pad(padded, ((d, d), (d, d), (0, 0)))
    rows = jnp.arange(H)[:, None]
    cols = jnp.arange(W)[None, :]
    br = pad - off
    A = padded[br:br + H + 2 * off, br:br + W + 2 * off, :]
    num = jnp.zeros((H, W, C), jnp.float32)
    den = jnp.zeros((H, W), jnp.float32)
    for di in range(-d, d + 1):
        for dj in range(-d, d + 1):
            B = padded[br + di:br + di + H + 2 * off,
                       br + dj:br + dj + W + 2 * off, :]
            e = jnp.sum((A - B) ** 2, axis=-1)
            dist = _patch_corr(e, w) - var_term
            valid = ((rows + di >= 0) & (rows + di < H)
                     & (cols + dj >= 0) & (cols + dj < W))
            wt = jnp.where(valid & (dist <= DISTANCE_CUTOFF),
                           jnp.exp(-jnp.maximum(dist, 0.0)), 0.0)
            den = den + wt
            cand = padded[pad + di:pad + di + H, pad + dj:pad + dj + W, :]
            num = num + wt[:, :, None] * cand
    return num / den[:, :, None]


if __name__ == "__main__":
    key = jax.random.PRNGKey(0)
    # Small 2-D multichannel image, channels last (skimage channel_axis=-1).
    x = jax.random.uniform(key, (48, 48, 3), dtype=jnp.float32)

    # Module defaults (h_weight=100).
    y = denoise(x, h_weight=100.0)
    jax.block_until_ready(y)
    assert y.shape == x.shape and y.dtype == jnp.float32
    assert bool(jnp.all(jnp.isfinite(y)))

    # Self-check against a plain-JAX transcription of the same math, at a
    # smaller h so that the weights actually vary.
    y2 = denoise(x, h_weight=2.0)
    ref2 = _nlm_reference(x, h_weight=2.0)
    err = float(jnp.max(jnp.abs(y2 - ref2)))
    assert err < 2e-3, f"kernel/reference mismatch: max abs err = {err}"

    print("KERNEL_OK")
</pallas_src>

<mosaic_0001>
module attributes {stable_mosaic.version = 11 : i64} {
  func.func @_nlm_kernel(%arg0: i32, %arg1: memref<5xf32, #tpu.memory_space<smem>>, %arg2: memref<5xf32, #tpu.memory_space<smem>>, %arg3: memref<1xf32, #tpu.memory_space<smem>>, %arg4: memref<3x64x128xf32, #tpu.memory_space<vmem>>, %arg5: memref<64x128xf32, #tpu.memory_space<vmem>>, %arg6: memref<3x16x48xf32, #tpu.memory_space<vmem>>, %arg7: memref<16x128xf32, #tpu.memory_space<vmem>>, %arg8: memref<3x16x128xf32, #tpu.memory_space<vmem>>) attributes {dimension_semantics = [#tpu.dimension_semantics<parallel>], iteration_bounds = array<i64: 3>, scalar_prefetch = 0 : i64, scratch_operands = 2 : i64, tpu.core_type = #tpu.core_type<tc>, window_params = [{transform_indices = @transform_0, window_bounds = array<i64: 5>}, {transform_indices = @transform_1, window_bounds = array<i64: 5>}, {transform_indices = @transform_2, window_bounds = array<i64: 1>}, {pipeline_mode = #tpu.pipeline_mode<synchronous>, transform_indices = @transform_3, window_bounds = array<i64: 3, 64, 128>}, {pipeline_mode = #tpu.pipeline_mode<synchronous>, transform_indices = @transform_4, window_bounds = array<i64: 64, 128>}, {transform_indices = @transform_5, window_bounds = array<i64: 3, 16, 48>}]} {
    %c0 = arith.constant 0 : index
    %0 = memref.load %arg3[%c0] : memref<1xf32, #tpu.memory_space<smem>>
    %c0_0 = arith.constant 0 : index
    %1 = memref.load %arg1[%c0_0] : memref<5xf32, #tpu.memory_space<smem>>
    %c1 = arith.constant 1 : index
    %2 = memref.load %arg1[%c1] : memref<5xf32, #tpu.memory_space<smem>>
    %c2 = arith.constant 2 : index
    %3 = memref.load %arg1[%c2] : memref<5xf32, #tpu.memory_space<smem>>
    %c3 = arith.constant 3 : index
    %4 = memref.load %arg1[%c3] : memref<5xf32, #tpu.memory_space<smem>>
    %c4 = arith.constant 4 : index
    %5 = memref.load %arg1[%c4] : memref<5xf32, #tpu.memory_space<smem>>
    %c0_1 = arith.constant 0 : index
    %6 = memref.load %arg2[%c0_1] : memref<5xf32, #tpu.memory_space<smem>>
    %c1_2 = arith.constant 1 : index
    %7 = memref.load %arg2[%c1_2] : memref<5xf32, #tpu.memory_space<smem>>
    %c2_3 = arith.constant 2 : index
    %8 = memref.load %arg2[%c2_3] : memref<5xf32, #tpu.memory_space<smem>>
    %c3_4 = arith.constant 3 : index
    %9 = memref.load %arg2[%c3_4] : memref<5xf32, #tpu.memory_space<smem>>
    %c4_5 = arith.constant 4 : index
    %10 = memref.load %arg2[%c4_5] : memref<5xf32, #tpu.memory_space<smem>>
    %c16_i32 = arith.constant 16 : i32
    %11 = arith.muli %arg0, %c16_i32 : i32
    %c8_i32 = arith.constant 8 : i32
    %12 = arith.addi %11, %c8_i32 : i32
    %c2_i32 = arith.constant 2 : i32
    %13 = arith.subi %12, %c2_i32 : i32
    %c0_6 = arith.constant 0 : index
    %14 = arith.index_cast %13 : i32 to index
    %c0_7 = arith.constant 0 : index
    %15 = vector.load %arg4[%c0_6, %14, %c0_7] : memref<3x64x128xf32, #tpu.memory_space<vmem>>, vector<1x20x128xf32>
    %16 = vector.shape_cast %15 : vector<1x20x128xf32> to vector<20x128xf32>
    %cst = arith.constant -2.000000e+00 : f32
    %17 = vector.broadcast %cst : f32 to vector<20x128xf32>
    %18 = arith.mulf %16, %17 : vector<20x128xf32>
    %c2_i32_8 = arith.constant 2 : i32
    %19 = arith.subi %12, %c2_i32_8 : i32
    %c1_9 = arith.constant 1 : index
    %20 = arith.index_cast %19 : i32 to index
    %c0_10 = arith.constant 0 : index
    %21 = vector.load %arg4[%c1_9, %20, %c0_10] : memref<3x64x128xf32, #tpu.memory_space<vmem>>, vector<1x20x128xf32>
    %22 = vector.shape_cast %21 : vector<1x20x128xf32> to vector<20x128xf32>
    %cst_11 = arith.constant -2.000000e+00 : f32
    %23 = vector.broadcast %cst_11 : f32 to vector<20x128xf32>
    %24 = arith.mulf %22, %23 : vector<20x128xf32>
    %c2_i32_12 = arith.constant 2 : i32
    %25 = arith.subi %12, %c2_i32_12 : i32
    %c2_13 = arith.constant 2 : index
    %26 = arith.index_cast %25 : i32 to index
    %c0_14 = arith.constant 0 : index
    %27 = vector.load %arg4[%c2_13, %26, %c0_14] : memref<3x64x128xf32, #tpu.memory_space<vmem>>, vector<1x20x128xf32>
    %28 = vector.shape_cast %27 : vector<1x20x128xf32> to vector<20x128xf32>
    %cst_15 = arith.constant -2.000000e+00 : f32
    %29 = vector.broadcast %cst_15 : f32 to vector<20x128xf32>
    %30 = arith.mulf %28, %29 : vector<20x128xf32>
    %c2_i32_16 = arith.constant 2 : i32
    %31 = arith.subi %12, %c2_i32_16 : i32
    %32 = arith.index_cast %31 : i32 to index
    %c0_17 = arith.constant 0 : index
    %33 = vector.load %arg5[%32, %c0_17] : memref<64x128xf32, #tpu.memory_space<vmem>>, vector<20x128xf32>
    %c16_i32_18 = arith.constant 16 : i32
    %34 = arith.muli %arg0, %c16_i32_18 : i32
    %35 = tpu.iota {dimensions = array<i32: 0>} : vector<16x128xi32>
    %36 = vector.broadcast %34 : i32 to vector<16x128xi32>
    %37 = arith.addi %36, %35 : vector<16x128xi32>
    %38 = tpu.iota {dimensions = array<i32: 1>} : vector<16x128xi32>
    %c8_i32_19 = arith.constant 8 : i32
    %39 = vector.broadcast %c8_i32_19 : i32 to vector<16x128xi32>
    %40 = arith.subi %38, %39 : vector<16x128xi32>
    %cst_20 = arith.constant 0.000000e+00 : f32
    %41 = vector.broadcast %cst_20 : f32 to vector<16x128xf32>
    %c0_21 = arith.constant 0 : index
    %c0_22 = arith.constant 0 : index
    %42 = vector.load %arg7[%c0_21, %c0_22] : memref<16x128xf32, #tpu.memory_space<vmem>>, vector<16x128xf32>
    tpu.vector_store %arg7[%c0_21, %c0_22], %41 {strides = array<i32>} : memref<16x128xf32, #tpu.memory_space<vmem>>, vector<16x128xf32>,
    %cst_23 = arith.constant 0.000000e+00 : f32
    %43 = vector.broadcast %cst_23 : f32 to vector<3x16x128xf32>
    %c0_24 = arith.constant 0 : index
    %c0_25 = arith.constant 0 : index
    %c0_26 = arith.constant 0 : index
    %44 = vector.load %arg8[%c0_24, %c0_25, %c0_26] : memref<3x16x128xf32, #tpu.memory_space<vmem>>, vector<3x16x128xf32>
    tpu.vector_store %arg8[%c0_24, %c0_25, %c0_26], %43 {strides = array<i32>} : memref<3x16x128xf32, #tpu.memory_space<vmem>>, vector<3x16x128xf32>,
    %c0_i32 = arith.constant 0 : i32
    %c13_i32 = arith.constant 13 : i32
    %45 = arith.addi %c0_i32, %c13_i32 : i32
    %c1_i32 = arith.constant 1 : i32
    scf.for %arg9 = %c0_i32 to %45 step %c1_i32  : i32 {
      %c1_i32_35 = arith.constant 1 : i32
      %53 = arith.muli %arg9, %c1_i32_35 : i32
      %c0_i32_36 = arith.constant 0 : i32
      %54 = arith.addi %c0_i32_36, %53 : i32
      %c6_i32 = arith.constant 6 : i32
      %55 = arith.subi %54, %c6_i32 : i32
      %c2_i32_37 = arith.constant 2 : i32
      %56 = arith.subi %12, %c2_i32_37 : i32
      %57 = arith.addi %56, %55 : i32
      %c0_38 = arith.constant 0 : index
      %58 = arith.index_cast %57 : i32 to index
      %c0_39 = arith.constant 0 : index
      %59 = vector.load %arg4[%c0_38, %58, %c0_39] : memref<3x64x128xf32, #tpu.memory_space<vmem>>, vector<1x20x128xf32>
      %60 = vector.shape_cast %59 : vector<1x20x128xf32> to vector<20x128xf32>
      %c2_i32_40 = arith.constant 2 : i32
      %61 = arith.subi %12, %c2_i32_40 : i32
      %62 = arith.addi %61, %55 : i32
      %c1_41 = arith.constant 1 : index
      %63 = arith.index_cast %62 : i32 to index
      %c0_42 = arith.constant 0 : index
      %64 = vector.load %arg4[%c1_41, %63, %c0_42] : memref<3x64x128xf32, #tpu.memory_space<vmem>>, vector<1x20x128xf32>
      %65 = vector.shape_cast %64 : vector<1x20x128xf32> to vector<20x128xf32>
      %c2_i32_43 = arith.constant 2 : i32
      %66 = arith.subi %12, %c2_i32_43 : i32
      %67 = arith.addi %66, %55 : i32
      %c2_44 = arith.constant 2 : index
      %68 = arith.index_cast %67 : i32 to index
      %c0_45 = arith.constant 0 : index
      %69 = vector.load %arg4[%c2_44, %68, %c0_45] : memref<3x64x128xf32, #tpu.memory_space<vmem>>, vector<1x20x128xf32>
      %70 = vector.shape_cast %69 : vector<1x20x128xf32> to vector<20x128xf32>
      %71 = arith.addi %12, %55 : i32
      %c0_46 = arith.constant 0 : index
      %72 = arith.index_cast %71 : i32 to index
      %c0_47 = arith.constant 0 : index
      %73 = vector.load %arg4[%c0_46, %72, %c0_47] : memref<3x64x128xf32, #tpu.memory_space<vmem>>, vector<1x16x128xf32>
      %74 = vector.shape_cast %73 : vector<1x16x128xf32> to vector<16x128xf32>
      %75 = arith.addi %12, %55 : i32
      %c1_48 = arith.constant 1 : index
      %76 = arith.index_cast %75 : i32 to index
      %c0_49 = arith.constant 0 : index
      %77 = vector.load %arg4[%c1_48, %76, %c0_49] : memref<3x64x128xf32, #tpu.memory_space<vmem>>, vector<1x16x128xf32>
      %78 = vector.shape_cast %77 : vector<1x16x128xf32> to vector<16x128xf32>
      %79 = arith.addi %12, %55 : i32
      %c2_50 = arith.constant 2 : index
      %80 = arith.index_cast %79 : i32 to index
      %c0_51 = arith.constant 0 : index
      %81 = vector.load %arg4[%c2_50, %80, %c0_51] : memref<3x64x128xf32, #tpu.memory_space<vmem>>, vector<1x16x128xf32>
      %82 = vector.shape_cast %81 : vector<1x16x128xf32> to vector<16x128xf32>
      %c2_i32_52 = arith.constant 2 : i32
      %83 = arith.subi %12, %c2_i32_52 : i32
      %84 = arith.addi %83, %55 : i32
      %85 = arith.index_cast %84 : i32 to index
      %c0_53 = arith.constant 0 : index
      %86 = vector.load %arg5[%85, %c0_53] : memref<64x128xf32, #tpu.memory_space<vmem>>, vector<20x128xf32>
      %87 = vector.broadcast %55 : i32 to vector<16x128xi32>
      %88 = arith.addi %37, %87 : vector<16x128xi32>
      %c0_i32_54 = arith.constant 0 : i32
      %89 = vector.broadcast %c0_i32_54 : i32 to vector<16x128xi32>
      %90 = arith.cmpi sge, %88, %89 : vector<16x128xi32>
      %91 = vector.broadcast %55 : i32 to vector<16x128xi32>
      %92 = arith.addi %37, %91 : vector<16x128xi32>
      %c48_i32 = arith.constant 48 : i32
      %93 = vector.broadcast %c48_i32 : i32 to vector<16x128xi32>
      %94 = arith.cmpi slt, %92, %93 : vector<16x128xi32>
      %95 = arith.andi %90, %94 : vector<16x128xi1>
      %cst_55 = arith.constant 0.000000e+00 : f32
      %96 = vector.broadcast %cst_55 : f32 to vector<16x128xf32>
      %cst_56 = arith.constant 0.000000e+00 : f32
      %97 = vector.broadcast %cst_56 : f32 to vector<16x128xf32>
      %cst_57 = arith.constant 0.000000e+00 : f32
      %98 = vector.broadcast %cst_57 : f32 to vector<16x128xf32>
      %cst_58 = arith.constant 0.000000e+00 : f32
      %99 = vector.broadcast %cst_58 : f32 to vector<16x128xf32>
      %c6_i32_59 = arith.constant 6 : i32
      %100 = tpu.dynamic_rotate %60 by %c6_i32_59 dim 1 : vector<20x128xf32>, i32 -> vector<20x128xf32>
      %101 = arith.mulf %18, %100 : vector<20x128xf32>
      %c6_i32_60 = arith.constant 6 : i32
      %102 = tpu.dynamic_rotate %65 by %c6_i32_60 dim 1 : vector<20x128xf32>, i32 -> vector<20x128xf32>
      %103 = arith.mulf %24, %102 : vector<20x128xf32>
      %104 = arith.addf %101, %103 : vector<20x128xf32>
      %c6_i32_61 = arith.constant 6 : i32
      %105 = tpu.dynamic_rotate %70 by %c6_i32_61 dim 1 : vector<20x128xf32>, i32 -> vector<20x128xf32>
      %106 = arith.mulf %30, %105 : vector<20x128xf32>
      %107 = arith.addf %104, %106 : vector<20x128xf32>
      %c6_i32_62 = arith.constant 6 : i32
      %108 = tpu.dynamic_rotate %86 by %c6_i32_62 dim 1 : vector<20x128xf32>, i32 -> vector<20x128xf32>
      %109 = arith.addf %33, %108 : vector<20x128xf32>
      %110 = arith.addf %109, %107 : vector<20x128xf32>
      %111 = vector.broadcast %8 : f32 to vector<20x128xf32>
      %112 = arith.mulf %111, %110 : vector<20x128xf32>
      %c127_i32 = arith.constant 127 : i32
      %113 = tpu.dynamic_rotate %110 by %c127_i32 dim 1 : vector<20x128xf32>, i32 -> vector<20x128xf32>
      %114 = vector.broadcast %9 : f32 to vector<20x128xf32>
      %115 = arith.mulf %114, %113 : vector<20x128xf32>
      %116 = arith.addf %112, %115 : vector<20x128xf32>
      %c1_i32_63 = arith.constant 1 : i32
      %117 = tpu.dynamic_rotate %110 by %c1_i32_63 dim 1 : vector<20x128xf32>, i32 -> vector<20x128xf32>
      %118 = vector.broadcast %7 : f32 to vector<20x128xf32>
      %119 = arith.mulf %118, %117 : vector<20x128xf32>
      %120 = arith.addf %116, %119 : vector<20x128xf32>
      %c126_i32 = arith.constant 126 : i32
      %121 = tpu.dynamic_rotate %110 by %c126_i32 dim 1 : vector<20x128xf32>, i32 -> vector<20x128xf32>
      %122 = vector.broadcast %10 : f32 to vector<20x128xf32>
      %123 = arith.mulf %122, %121 : vector<20x128xf32>
      %124 = arith.addf %120, %123 : vector<20x128xf32>
      %c2_i32_64 = arith.constant 2 : i32
      %125 = tpu.dynamic_rotate %110 by %c2_i32_64 dim 1 : vector<20x128xf32>, i32 -> vector<20x128xf32>
      %126 = vector.broadcast %6 : f32 to vector<20x128xf32>
      %127 = arith.mulf %126, %125 : vector<20x128xf32>
      %128 = arith.addf %124, %127 : vector<20x128xf32>
      %129 = vector.extract_strided_slice %128 {offsets = [0, 0], sizes = [16, 128], strides = [1, 1]} : vector<20x128xf32> to vector<16x128xf32>
      %130 = vector.broadcast %1 : f32 to vector<16x128xf32>
      %131 = arith.mulf %130, %129 : vector<16x128xf32>
      %132 = vector.extract_strided_slice %128 {offsets = [1, 0], sizes = [16, 128], strides = [1, 1]} : vector<20x128xf32> to vector<16x128xf32>
      %133 = vector.broadcast %2 : f32 to vector<16x128xf32>
      %134 = arith.mulf %133, %132 : vector<16x128xf32>
      %135 = arith.addf %131, %134 : vector<16x128xf32>
      %136 = vector.extract_strided_slice %128 {offsets = [2, 0], sizes = [16, 128], strides = [1, 1]} : vector<20x128xf32> to vector<16x128xf32>
      %137 = vector.broadcast %3 : f32 to vector<16x128xf32>
      %138 = arith.mulf %137, %136 : vector<16x128xf32>
      %139 = arith.addf %135, %138 : vector<16x128xf32>
      %140 = vector.extract_strided_slice %128 {offsets = [3, 0], sizes = [16, 128], strides = [1, 1]} : vector<20x128xf32> to vector<16x128xf32>
      %141 = vector.broadcast %4 : f32 to vector<16x128xf32>
      %142 = arith.mulf %141, %140 : vector<16x128xf32>
      %143 = arith.addf %139, %142 : vector<16x128xf32>
      %144 = vector.extract_strided_slice %128 {offsets = [4, 0], sizes = [16, 128], strides = [1, 1]} : vector<20x128xf32> to vector<16x128xf32>
      %145 = vector.broadcast %5 : f32 to vector<16x128xf32>
      %146 = arith.mulf %145, %144 : vector<16x128xf32>
      %147 = arith.addf %143, %146 : vector<16x128xf32>
      %148 = vector.broadcast %0 : f32 to vector<16x128xf32>
      %149 = arith.subf %147, %148 : vector<16x128xf32>
      %c-6_i32 = arith.constant -6 : i32
      %150 = vector.broadcast %c-6_i32 : i32 to vector<16x128xi32>
      %151 = arith.addi %40, %150 : vector<16x128xi32>
      %c0_i32_65 = arith.constant 0 : i32
      %152 = vector.broadcast %c0_i32_65 : i32 to vector<16x128xi32>
      %153 = arith.cmpi sge, %151, %152 : vector<16x128xi32>
      %c-6_i32_66 = arith.constant -6 : i32
      %154 = vector.broadcast %c-6_i32_66 : i32 to vector<16x128xi32>
      %155 = arith.addi %40, %154 : vector<16x128xi32>
      %c48_i32_67 = arith.constant 48 : i32
      %156 = vector.broadcast %c48_i32_67 : i32 to vector<16x128xi32>
      %157 = arith.cmpi slt, %155, %156 : vector<16x128xi32>
      %158 = arith.andi %153, %157 : vector<16x128xi1>
      %159 = arith.andi %95, %158 : vector<16x128xi1>
      %cst_68 = arith.constant 5.000000e+00 : f32
      %160 = vector.broadcast %cst_68 : f32 to vector<16x128xf32>
      %161 = arith.cmpf ole, %149, %160 : vector<16x128xf32>
      %162 = arith.andi %159, %161 : vector<16x128xi1>
      %cst_69 = arith.constant 0.000000e+00 : f32
      %163 = vector.broadcast %cst_69 : f32 to vector<16x128xf32>
      %164 = arith.maximumf %149, %163 : vector<16x128xf32>
      %cst_70 = arith.constant 0.000000e+00 : f32
      %165 = vector.broadcast %cst_70 : f32 to vector<16x128xf32>
      %166 = arith.subf %165, %164 : vector<16x128xf32>
      %167 = math.exp %166 : vector<16x128xf32>
      %cst_71 = arith.constant 0.000000e+00 : f32
      %168 = vector.broadcast %cst_71 : f32 to vector<16x128xf32>
      %169 = arith.select %162, %167, %168 : vector<16x128xi1>, vector<16x128xf32>
      %170 = arith.addf %96, %169 : vector<16x128xf32>
      %c6_i32_72 = arith.constant 6 : i32
      %171 = tpu.dynamic_rotate %74 by %c6_i32_72 dim 1 : vector<16x128xf32>, i32 -> vector<16x128xf32>
      %172 = arith.mulf %169, %171 : vector<16x128xf32>
      %173 = arith.addf %97, %172 : vector<16x128xf32>
      %c6_i32_73 = arith.constant 6 : i32
      %174 = tpu.dynamic_rotate %78 by %c6_i32_73 dim 1 : vector<16x128xf32>, i32 -> vector<16x128xf32>
      %175 = arith.mulf %169, %174 : vector<16x128xf32>
      %176 = arith.addf %98, %175 : vector<16x128xf32>
      %c6_i32_74 = arith.constant 6 : i32
      %177 = tpu.dynamic_rotate %82 by %c6_i32_74 dim 1 : vector<16x128xf32>, i32 -> vector<16x128xf32>
      %178 = arith.mulf %169, %177 : vector<16x128xf32>
      %179 = arith.addf %99, %178 : vector<16x128xf32>
      %c5_i32 = arith.constant 5 : i32
      %180 = tpu.dynamic_rotate %60 by %c5_i32 dim 1 : vector<20x128xf32>, i32 -> vector<20x128xf32>
      %181 = arith.mulf %18, %180 : vector<20x128xf32>
      %c5_i32_75 = arith.constant 5 : i32
      %182 = tpu.dynamic_rotate %65 by %c5_i32_75 dim 1 : vector<20x128xf32>, i32 -> vector<20x128xf32>
      %183 = arith.mulf %24, %182 : vector<20x128xf32>
      %184 = arith.addf %181, %183 : vector<20x128xf32>
      %c5_i32_76 = arith.constant 5 : i32
      %185 = tpu.dynamic_rotate %70 by %c5_i32_76 dim 1 : vector<20x128xf32>, i32 -> vector<20x128xf32>
      %186 = arith.mulf %30, %185 : vector<20x128xf32>
      %187 = arith.addf %184, %186 : vector<20x128xf32>
      %c5_i32_77 = arith.constant 5 : i32
      %188 = tpu.dynamic_rotate %86 by %c5_i32_77 dim 1 : vector<20x128xf32>, i32 -> vector<20x128xf32>
      %189 = arith.addf %33, %188 : vector<20x128xf32>
      %190 = arith.addf %189, %187 : vector<20x128xf32>
      %191 = vector.broadcast %8 : f32 to vector<20x128xf32>
      %192 = arith.mulf %191, %190 : vector<20x128xf32>
      %c127_i32_78 = arith.constant 127 : i32
      %193 = tpu.dynamic_rotate %190 by %c127_i32_78 dim 1 : vector<20x128xf32>, i32 -> vector<20x128xf32>
      %194 = vector.broadcast %9 : f32 to vector<20x128xf32>
      %195 = arith.mulf %194, %193 : vector<20x128xf32>
      %196 = arith.addf %192, %195 : vector<20x128xf32>
      %c1_i32_79 = arith.constant 1 : i32
      %197 = tpu.dynamic_rotate %190 by %c1_i32_79 dim 1 : vector<20x128xf32>, i32 -> vector<20x128xf32>
      %198 = vector.broadcast %7 : f32 to vector<20x128xf32>
      %199 = arith.mulf %198, %197 : vector<20x128xf32>
      %200 = arith.addf %196, %199 : vector<20x128xf32>
      %c126_i32_80 = arith.constant 126 : i32
      %201 = tpu.dynamic_rotate %190 by %c126_i32_80 dim 1 : vector<20x128xf32>, i32 -> vector<20x128xf32>
      %202 = vector.broadcast %10 : f32 to vector<20x128xf32>
      %203 = arith.mulf %202, %201 : vector<20x128xf32>
      %204 = arith.addf %200, %203 : vector<20x128xf32>
      %c2_i32_81 = arith.constant 2 : i32
      %205 = tpu.dynamic_rotate %190 by %c2_i32_81 dim 1 : vector<20x128xf32>, i32 -> vector<20x128xf32>
      %206 = vector.broadcast %6 : f32 to vector<20x128xf32>
      %207 = arith.mulf %206, %205 : vector<20x128xf32>
      %208 = arith.addf %204, %207 : vector<20x128xf32>
      %209 = vector.extract_strided_slice %208 {offsets = [0, 0], sizes = [16, 128], strides = [1, 1]} : vector<20x128xf32> to vector<16x128xf32>
      %210 = vector.broadcast %1 : f32 to vector<16x128xf32>
      %211 = arith.mulf %210, %209 : vector<16x128xf32>
      %212 = vector.extract_strided_slice %208 {offsets = [1, 0], sizes = [16, 128], strides = [1, 1]} : vector<20x128xf32> to vector<16x128xf32>
      %213 = vector.broadcast %2 : f32 to vector<16x128xf32>
      %214 = arith.mulf %213, %212 : vector<16x128xf32>
      %215 = arith.addf %211, %214 : vector<16x128xf32>
      %216 = vector.extract_strided_slice %208 {offsets = [2, 0], sizes = [16, 128], strides = [1, 1]} : vector<20x128xf32> to vector<16x128xf32>
      %217 = vector.broadcast %3 : f32 to vector<16x128xf32>
      %218 = arith.mulf %217, %216 : vector<16x128xf32>
      %219 = arith.addf %215, %218 : vector<16x128xf32>
      %220 = vector.extract_strided_slice %208 {offsets = [3, 0], sizes = [16, 128], strides = [1, 1]} : vector<20x128xf32> to vector<16x128xf32>
      %221 = vector.broadcast %4 : f32 to vector<16x128xf32>
      %222 = arith.mulf %221, %220 : vector<16x128xf32>
      %223 = arith.addf %219, %222 : vector<16x128xf32>
      %224 = vector.extract_strided_slice %208 {offsets = [4, 0], sizes = [16, 128], strides = [1, 1]} : vector<20x128xf32> to vector<16x128xf32>
      %225 = vector.broadcast %5 : f32 to vector<16x128xf32>
      %226 = arith.mulf %225, %224 : vector<16x128xf32>
      %227 = arith.addf %223, %226 : vector<16x128xf32>
      %228 = vector.broadcast %0 : f32 to vector<16x128xf32>
      %229 = arith.subf %227, %228 : vector<16x128xf32>
      %c-5_i32 = arith.constant -5 : i32
      %230 = vector.broadcast %c-5_i32 : i32 to vector<16x128xi32>
      %231 = arith.addi %40, %230 : vector<16x128xi32>
      %c0_i32_82 = arith.constant 0 : i32
      %232 = vector.broadcast %c0_i32_82 : i32 to vector<16x128xi32>
      %233 = arith.cmpi sge, %231, %232 : vector<16x128xi32>
      %c-5_i32_83 = arith.constant -5 : i32
      %234 = vector.broadcast %c-5_i32_83 : i32 to vector<16x128xi32>
      %235 = arith.addi %40, %234 : vector<16x128xi32>
      %c48_i32_84 = arith.constant 48 : i32
      %236 = vector.broadcast %c48_i32_84 : i32 to vector<16x128xi32>
      %237 = arith.cmpi slt, %235, %236 : vector<16x128xi32>
      %238 = arith.andi %233, %237 : vector<16x128xi1>
      %239 = arith.andi %95, %238 : vector<16x128xi1>
      %cst_85 = arith.constant 5.000000e+00 : f32
      %240 = vector.broadcast %cst_85 : f32 to vector<16x128xf32>
      %241 = arith.cmpf ole, %229, %240 : vector<16x128xf32>
      %242 = arith.andi %239, %241 : vector<16x128xi1>
      %cst_86 = arith.constant 0.000000e+00 : f32
      %243 = vector.broadcast %cst_86 : f32 to vector<16x128xf32>
      %244 = arith.maximumf %229, %243 : vector<16x128xf32>
      %cst_87 = arith.constant 0.000000e+00 : f32
      %245 = vector.broadcast %cst_87 : f32 to vector<16x128xf32>
      %246 = arith.subf %245, %244 : vector<16x128xf32>
      %247 = math.exp %246 : vector<16x128xf32>
      %cst_88 = arith.constant 0.000000e+00 : f32
      %248 = vector.broadcast %cst_88 : f32 to vector<16x128xf32>
      %249 = arith.select %242, %247, %248 : vector<16x128xi1>, vector<16x128xf32>
      %250 = arith.addf %170, %249 : vector<16x128xf32>
      %c5_i32_89 = arith.constant 5 : i32
      %251 = tpu.dynamic_rotate %74 by %c5_i32_89 dim 1 : vector<16x128xf32>, i32 -> vector<16x128xf32>
      %252 = arith.mulf %249, %251 : vector<16x128xf32>
      %253 = arith.addf %173, %252 : vector<16x128xf32>
      %c5_i32_90 = arith.constant 5 : i32
      %254 = tpu.dynamic_rotate %78 by %c5_i32_90 dim 1 : vector<16x128xf32>, i32 -> vector<16x128xf32>
      %255 = arith.mulf %249, %254 : vector<16x128xf32>
      %256 = arith.addf %176, %255 : vector<16x128xf32>
      %c5_i32_91 = arith.constant 5 : i32
      %257 = tpu.dynamic_rotate %82 by %c5_i32_91 dim 1 : vector<16x128xf32>, i32 -> vector<16x128xf32>
      %258 = arith.mulf %249, %257 : vector<16x128xf32>
      %259 = arith.addf %179, %258 : vector<16x128xf32>
      %c4_i32 = arith.constant 4 : i32
      %260 = tpu.dynamic_rotate %60 by %c4_i32 dim 1 : vector<20x128xf32>, i32 -> vector<20x128xf32>
      %261 = arith.mulf %18, %260 : vector<20x128xf32>
      %c4_i32_92 = arith.constant 4 : i32
      %262 = tpu.dynamic_rotate %65 by %c4_i32_92 dim 1 : vector<20x128xf32>, i32 -> vector<20x128xf32>
      %263 = arith.mulf %24, %262 : vector<20x128xf32>
      %264 = arith.addf %261, %263 : vector<20x128xf32>
      %c4_i32_93 = arith.constant 4 : i32
      %265 = tpu.dynamic_rotate %70 by %c4_i32_93 dim 1 : vector<20x128xf32>, i32 -> vector<20x128xf32>
      %266 = arith.mulf %30, %265 : vector<20x128xf32>
      %267 = arith.addf %264, %266 : vector<20x128xf32>
      %c4_i32_94 = arith.constant 4 : i32
      %268 = tpu.dynamic_rotate %86 by %c4_i32_94 dim 1 : vector<20x128xf32>, i32 -> vector<20x128xf32>
      %269 = arith.addf %33, %268 : vector<20x128xf32>
      %270 = arith.addf %269, %267 : vector<20x128xf32>
      %271 = vector.broadcast %8 : f32 to vector<20x128xf32>
      %272 = arith.mulf %271, %270 : vector<20x128xf32>
      %c127_i32_95 = arith.constant 127 : i32
      %273 = tpu.dynamic_rotate %270 by %c127_i32_95 dim 1 : vector<20x128xf32>, i32 -> vector<20x128xf32>
      %274 = vector.broadcast %9 : f32 to vector<20x128xf32>
      %275 = arith.mulf %274, %273 : vector<20x128xf32>
      %276 = arith.addf %272, %275 : vector<20x128xf32>
      %c1_i32_96 = arith.constant 1 : i32
      %277 = tpu.dynamic_rotate %270 by %c1_i32_96 dim 1 : vector<20x128xf32>, i32 -> vector<20x128xf32>
      %278 = vector.broadcast %7 : f32 to vector<20x128xf32>
      %279 = arith.mulf %278, %277 : vector<20x128xf32>
      %280 = arith.addf %276, %279 : vector<20x128xf32>
      %c126_i32_97 = arith.constant 126 : i32
      %281 = tpu.dynamic_rotate %270 by %c126_i32_97 dim 1 : vector<20x128xf32>, i32 -> vector<20x128xf32>
      %282 = vector.broadcast %10 : f32 to vector<20x128xf32>
      %283 = arith.mulf %282, %281 : vector<20x128xf32>
      %284 = arith.addf %280, %283 : vector<20x128xf32>
      %c2_i32_98 = arith.constant 2 : i32
      %285 = tpu.dynamic_rotate %270 by %c2_i32_98 dim 1 : vector<20x128xf32>, i32 -> vector<20x128xf32>
      %286 = vector.broadcast %6 : f32 to vector<20x128xf32>
      %287 = arith.mulf %286, %285 : vector<20x128xf32>
      %288 = arith.addf %284, %287 : vector<20x128xf32>
      %289 = vector.extract_strided_slice %288 {offsets = [0, 0], sizes = [16, 128], strides = [1, 1]} : vector<20x128xf32> to vector<16x128xf32>
      %290 = vector.broadcast %1 : f32 to vector<16x128xf32>
      %291 = arith.mulf %290, %289 : vector<16x128xf32>
      %292 = vector.extract_strided_slice %288 {offsets = [1, 0], sizes = [16, 128], strides = [1, 1]} : vector<20x128xf32> to vector<16x128xf32>
      %293 = vector.broadcast %2 : f32 to vector<16x128xf32>
      %294 = arith.mulf %293, %292 : vector<16x128xf32>
      %295 = arith.addf %291, %294 : vector<16x128xf32>
      %296 = vector.extract_strided_slice %288 {offsets = [2, 0], sizes = [16, 128], strides = [1, 1]} : vector<20x128xf32> to vector<16x128xf32>
      %297 = vector.broadcast %3 : f32 to vector<16x128xf32>
      %298 = arith.mulf %297, %296 : vector<16x128xf32>
      %299 = arith.addf %295, %298 : vector<16x128xf32>
      %300 = vector.extract_strided_slice %288 {offsets = [3, 0], sizes = [16, 128], strides = [1, 1]} : vector<20x128xf32> to vector<16x128xf32>
      %301 = vector.broadcast %4 : f32 to vector<16x128xf32>
      %302 = arith.mulf %301, %300 : vector<16x128xf32>
      %303 = arith.addf %299, %302 : vector<16x128xf32>
      %304 = vector.extract_strided_slice %288 {offsets = [4, 0], sizes = [16, 128], strides = [1, 1]} : vector<20x128xf32> to vector<16x128xf32>
      %305 = vector.broadcast %5 : f32 to vector<16x128xf32>
      %306 = arith.mulf %305, %304 : vector<16x128xf32>
      %307 = arith.addf %303, %306 : vector<16x128xf32>
      %308 = vector.broadcast %0 : f32 to vector<16x128xf32>
      %309 = arith.subf %307, %308 : vector<16x128xf32>
      %c-4_i32 = arith.constant -4 : i32
      %310 = vector.broadcast %c-4_i32 : i32 to vector<16x128xi32>
      %311 = arith.addi %40, %310 : vector<16x128xi32>
      %c0_i32_99 = arith.constant 0 : i32
      %312 = vector.broadcast %c0_i32_99 : i32 to vector<16x128xi32>
      %313 = arith.cmpi sge, %311, %312 : vector<16x128xi32>
      %c-4_i32_100 = arith.constant -4 : i32
      %314 = vector.broadcast %c-4_i32_100 : i32 to vector<16x128xi32>
      %315 = arith.addi %40, %314 : vector<16x128xi32>
      %c48_i32_101 = arith.constant 48 : i32
      %316 = vector.broadcast %c48_i32_101 : i32 to vector<16x128xi32>
      %317 = arith.cmpi slt, %315, %316 : vector<16x128xi32>
      %318 = arith.andi %313, %317 : vector<16x128xi1>
      %319 = arith.andi %95, %318 : vector<16x128xi1>
      %cst_102 = arith.constant 5.000000e+00 : f32
      %320 = vector.broadcast %cst_102 : f32 to vector<16x128xf32>
      %321 = arith.cmpf ole, %309, %320 : vector<16x128xf32>
      %322 = arith.andi %319, %321 : vector<16x128xi1>
      %cst_103 = arith.constant 0.000000e+00 : f32
      %323 = vector.broadcast %cst_103 : f32 to vector<16x128xf32>
      %324 = arith.maximumf %309, %323 : vector<16x128xf32>
      %cst_104 = arith.constant 0.000000e+00 : f32
      %325 = vector.broadcast %cst_104 : f32 to vector<16x128xf32>
      %326 = arith.subf %325, %324 : vector<16x128xf32>
      %327 = math.exp %326 : vector<16x128xf32>
      %cst_105 = arith.constant 0.000000e+00 : f32
      %328 = vector.broadcast %cst_105 : f32 to vector<16x128xf32>
      %329 = arith.select %322, %327, %328 : vector<16x128xi1>, vector<16x128xf32>
      %330 = arith.addf %250, %329 : vector<16x128xf32>
      %c4_i32_106 = arith.constant 4 : i32
      %331 = tpu.dynamic_rotate %74 by %c4_i32_106 dim 1 : vector<16x128xf32>, i32 -> vector<16x128xf32>
      %332 = arith.mulf %329, %331 : vector<16x128xf32>
      %333 = arith.addf %253, %332 : vector<16x128xf32>
      %c4_i32_107 = arith.constant 4 : i32
      %334 = tpu.dynamic_rotate %78 by %c4_i32_107 dim 1 : vector<16x128xf32>, i32 -> vector<16x128xf32>
      %335 = arith.mulf %329, %334 : vector<16x128xf32>
      %336 = arith.addf %256, %335 : vector<16x128xf32>
      %c4_i32_108 = arith.constant 4 : i32
      %337 = tpu.dynamic_rotate %82 by %c4_i32_108 dim 1 : vector<16x128xf32>, i32 -> vector<16x128xf32>
      %338 = arith.mulf %329, %337 : vector<16x128xf32>
      %339 = arith.addf %259, %338 : vector<16x128xf32>
      %c3_i32 = arith.constant 3 : i32
      %340 = tpu.dynamic_rotate %60 by %c3_i32 dim 1 : vector<20x128xf32>, i32 -> vector<20x128xf32>
      %341 = arith.mulf %18, %340 : vector<20x128xf32>
      %c3_i32_109 = arith.constant 3 : i32
      %342 = tpu.dynamic_rotate %65 by %c3_i32_109 dim 1 : vector<20x128xf32>, i32 -> vector<20x128xf32>
      %343 = arith.mulf %24, %342 : vector<20x128xf32>
      %344 = arith.addf %341, %343 : vector<20x128xf32>
      %c3_i32_110 = arith.constant 3 : i32
      %345 = tpu.dynamic_rotate %70 by %c3_i32_110 dim 1 : vector<20x128xf32>, i32 -> vector<20x128xf32>
      %346 = arith.mulf %30, %345 : vector<20x128xf32>
      %347 = arith.addf %344, %346 : vector<20x128xf32>
      %c3_i32_111 = arith.constant 3 : i32
      %348 = tpu.dynamic_rotate %86 by %c3_i32_111 dim 1 : vector<20x128xf32>, i32 -> vector<20x128xf32>
      %349 = arith.addf %33, %348 : vector<20x128xf32>
      %350 = arith.addf %349, %347 : vector<20x128xf32>
      %351 = vector.broadcast %8 : f32 to vector<20x128xf32>
      %352 = arith.mulf %351, %350 : vector<20x128xf32>
      %c127_i32_112 = arith.constant 127 : i32
      %353 = tpu.dynamic_rotate %350 by %c127_i32_112 dim 1 : vector<20x128xf32>, i32 -> vector<20x128xf32>
      %354 = vector.broadcast %9 : f32 to vector<20x128xf32>
      %355 = arith.mulf %354, %353 : vector<20x128xf32>
      %356 = arith.addf %352, %355 : vector<20x128xf32>
      %c1_i32_113 = arith.constant 1 : i32
      %357 = tpu.dynamic_rotate %350 by %c1_i32_113 dim 1 : vector<20x128xf32>, i32 -> vector<20x128xf32>
      %358 = vector.broadcast %7 : f32 to vector<20x128xf32>
      %359 = arith.mulf %358, %357 : vector<20x128xf32>
      %360 = arith.addf %356, %359 : vector<20x128xf32>
      %c126_i32_114 = arith.constant 126 : i32
      %361 = tpu.dynamic_rotate %350 by %c126_i32_114 dim 1 : vector<20x128xf32>, i32 -> vector<20x128xf32>
      %362 = vector.broadcast %10 : f32 to vector<20x128xf32>
      %363 = arith.mulf %362, %361 : vector<20x128xf32>
      %364 = arith.addf %360, %363 : vector<20x128xf32>
      %c2_i32_115 = arith.constant 2 : i32
      %365 = tpu.dynamic_rotate %350 by %c2_i32_115 dim 1 : vector<20x128xf32>, i32 -> vector<20x128xf32>
      %366 = vector.broadcast %6 : f32 to vector<20x128xf32>
      %367 = arith.mulf %366, %365 : vector<20x128xf32>
      %368 = arith.addf %364, %367 : vector<20x128xf32>
      %369 = vector.extract_strided_slice %368 {offsets = [0, 0], sizes = [16, 128], strides = [1, 1]} : vector<20x128xf32> to vector<16x128xf32>
      %370 = vector.broadcast %1 : f32 to vector<16x128xf32>
      %371 = arith.mulf %370, %369 : vector<16x128xf32>
      %372 = vector.extract_strided_slice %368 {offsets = [1, 0], sizes = [16, 128], strides = [1, 1]} : vector<20x128xf32> to vector<16x128xf32>
      %373 = vector.broadcast %2 : f32 to vector<16x128xf32>
      %374 = arith.mulf %373, %372 : vector<16x128xf32>
      %375 = arith.addf %371, %374 : vector<16x128xf32>
      %376 = vector.extract_strided_slice %368 {offsets = [2, 0], sizes = [16, 128], strides = [1, 1]} : vector<20x128xf32> to vector<16x128xf32>
      %377 = vector.broadcast %3 : f32 to vector<16x128xf32>
      %378 = arith.mulf %377, %376 : vector<16x128xf32>
      %379 = arith.addf %375, %378 : vector<16x128xf32>
      %380 = vector.extract_strided_slice %368 {offsets = [3, 0], sizes = [16, 128], strides = [1, 1]} : vector<20x128xf32> to vector<16x128xf32>
      %381 = vector.broadcast %4 : f32 to vector<16x128xf32>
      %382 = arith.mulf %381, %380 : vector<16x128xf32>
      %383 = arith.addf %379, %382 : vector<16x128xf32>
      %384 = vector.extract_strided_slice %368 {offsets = [4, 0], sizes = [16, 128], strides = [1, 1]} : vector<20x128xf32> to vector<16x128xf32>
      %385 = vector.broadcast %5 : f32 to vector<16x128xf32>
      %386 = arith.mulf %385, %384 : vector<16x128xf32>
      %387 = arith.addf %383, %386 : vector<16x128xf32>
      %388 = vector.broadcast %0 : f32 to vector<16x128xf32>
      %389 = arith.subf %387, %388 : vector<16x128xf32>
      %c-3_i32 = arith.constant -3 : i32
      %390 = vector.broadcast %c-3_i32 : i32 to vector<16x128xi32>
      %391 = arith.addi %40, %390 : vector<16x128xi32>
      %c0_i32_116 = arith.constant 0 : i32
      %392 = vector.broadcast %c0_i32_116 : i32 to vector<16x128xi32>
      %393 = arith.cmpi sge, %391, %392 : vector<16x128xi32>
      %c-3_i32_117 = arith.constant -3 : i32
      %394 = vector.broadcast %c-3_i32_117 : i32 to vector<16x128xi32>
      %395 = arith.addi %40, %394 : vector<16x128xi32>
      %c48_i32_118 = arith.constant 48 : i32
      %396 = vector.broadcast %c48_i32_118 : i32 to vector<16x128xi32>
      %397 = arith.cmpi slt, %395, %396 : vector<16x128xi32>
      %398 = arith.andi %393, %397 : vector<16x128xi1>
      %399 = arith.andi %95, %398 : vector<16x128xi1>
      %cst_119 = arith.constant 5.000000e+00 : f32
      %400 = vector.broadcast %cst_119 : f32 to vector<16x128xf32>
      %401 = arith.cmpf ole, %389, %400 : vector<16x128xf32>
      %402 = arith.andi %399, %401 : vector<16x128xi1>
      %cst_120 = arith.constant 0.000000e+00 : f32
      %403 = vector.broadcast %cst_120 : f32 to vector<16x128xf32>
      %404 = arith.maximumf %389, %403 : vector<16x128xf32>
      %cst_121 = arith.constant 0.000000e+00 : f32
      %405 = vector.broadcast %cst_121 : f32 to vector<16x128xf32>
      %406 = arith.subf %405, %404 : vector<16x128xf32>
      %407 = math.exp %406 : vector<16x128xf32>
      %cst_122 = arith.constant 0.000000e+00 : f32
      %408 = vector.broadcast %cst_122 : f32 to vector<16x128xf32>
      %409 = arith.select %402, %407, %408 : vector<16x128xi1>, vector<16x128xf32>
      %410 = arith.addf %330, %409 : vector<16x128xf32>
      %c3_i32_123 = arith.constant 3 : i32
      %411 = tpu.dynamic_rotate %74 by %c3_i32_123 dim 1 : vector<16x128xf32>, i32 -> vector<16x128xf32>
      %412 = arith.mulf %409, %411 : vector<16x128xf32>
      %413 = arith.addf %333, %412 : vector<16x128xf32>
      %c3_i32_124 = arith.constant 3 : i32
      %414 = tpu.dynamic_rotate %78 by %c3_i32_124 dim 1 : vector<16x128xf32>, i32 -> vector<16x128xf32>
      %415 = arith.mulf %409, %414 : vector<16x128xf32>
      %416 = arith.addf %336, %415 : vector<16x128xf32>
      %c3_i32_125 = arith.constant 3 : i32
      %417 = tpu.dynamic_rotate %82 by %c3_i32_125 dim 1 : vector<16x128xf32>, i32 -> vector<16x128xf32>
      %418 = arith.mulf %409, %417 : vector<16x128xf32>
      %419 = arith.addf %339, %418 : vector<16x128xf32>
      %c2_i32_126 = arith.constant 2 : i32
      %420 = tpu.dynamic_rotate %60 by %c2_i32_126 dim 1 : vector<20x128xf32>, i32 -> vector<20x128xf32>
      %421 = arith.mulf %18, %420 : vector<20x128xf32>
      %c2_i32_127 = arith.constant 2 : i32
      %422 = tpu.dynamic_rotate %65 by %c2_i32_127 dim 1 : vector<20x128xf32>, i32 -> vector<20x128xf32>
      %423 = arith.mulf %24, %422 : vector<20x128xf32>
      %424 = arith.addf %421, %423 : vector<20x128xf32>
      %c2_i32_128 = arith.constant 2 : i32
      %425 = tpu.dynamic_rotate %70 by %c2_i32_128 dim 1 : vector<20x128xf32>, i32 -> vector<20x128xf32>
      %426 = arith.mulf %30, %425 : vector<20x128xf32>
      %427 = arith.addf %424, %426 : vector<20x128xf32>
      %c2_i32_129 = arith.constant 2 : i32
      %428 = tpu.dynamic_rotate %86 by %c2_i32_129 dim 1 : vector<20x128xf32>, i32 -> vector<20x128xf32>
      %429 = arith.addf %33, %428 : vector<20x128xf32>
      %430 = arith.addf %429, %427 : vector<20x128xf32>
      %431 = vector.broadcast %8 : f32 to vector<20x128xf32>
      %432 = arith.mulf %431, %430 : vector<20x128xf32>
      %c127_i32_130 = arith.constant 127 : i32
      %433 = tpu.dynamic_rotate %430 by %c127_i32_130 dim 1 : vector<20x128xf32>, i32 -> vector<20x128xf32>
      %434 = vector.broadcast %9 : f32 to vector<20x128xf32>
      %435 = arith.mulf %434, %433 : vector<20x128xf32>
      %436 = arith.addf %432, %435 : vector<20x128xf32>
      %c1_i32_131 = arith.constant 1 : i32
      %437 = tpu.dynamic_rotate %430 by %c1_i32_131 dim 1 : vector<20x128xf32>, i32 -> vector<20x128xf32>
      %438 = vector.broadcast %7 : f32 to vector<20x128xf32>
      %439 = arith.mulf %438, %437 : vector<20x128xf32>
      %440 = arith.addf %436, %439 : vector<20x128xf32>
      %c126_i32_132 = arith.constant 126 : i32
      %441 = tpu.dynamic_rotate %430 by %c126_i32_132 dim 1 : vector<20x128xf32>, i32 -> vector<20x128xf32>
      %442 = vector.broadcast %10 : f32 to vector<20x128xf32>
      %443 = arith.mulf %442, %441 : vector<20x128xf32>
      %444 = arith.addf %440, %443 : vector<20x128xf32>
      %c2_i32_133 = arith.constant 2 : i32
      %445 = tpu.dynamic_rotate %430 by %c2_i32_133 dim 1 : vector<20x128xf32>, i32 -> vector<20x128xf32>
      %446 = vector.broadcast %6 : f32 to vector<20x128xf32>
      %447 = arith.mulf %446, %445 : vector<20x128xf32>
      %448 = arith.addf %444, %447 : vector<20x128xf32>
      %449 = vector.extract_strided_slice %448 {offsets = [0, 0], sizes = [16, 128], strides = [1, 1]} : vector<20x128xf32> to vector<16x128xf32>
      %450 = vector.broadcast %1 : f32 to vector<16x128xf32>
      %451 = arith.mulf %450, %449 : vector<16x128xf32>
      %452 = vector.extract_strided_slice %448 {offsets = [1, 0], sizes = [16, 128], strides = [1, 1]} : vector<20x128xf32> to vector<16x128xf32>
      %453 = vector.broadcast %2 : f32 to vector<16x128xf32>
      %454 = arith.mulf %453, %452 : vector<16x128xf32>
      %455 = arith.addf %451, %454 : vector<16x128xf32>
      %456 = vector.extract_strided_slice %448 {offsets = [2, 0], sizes = [16, 128], strides = [1, 1]} : vector<20x128xf32> to vector<16x128xf32>
      %457 = vector.broadcast %3 : f32 to vector<16x128xf32>
      %458 = arith.mulf %457, %456 : vector<16x128xf32>
      %459 = arith.addf %455, %458 : vector<16x128xf32>
      %460 = vector.extract_strided_slice %448 {offsets = [3, 0], sizes = [16, 128], strides = [1, 1]} : vector<20x128xf32> to vector<16x128xf32>
      %461 = vector.broadcast %4 : f32 to vector<16x128xf32>
      %462 = arith.mulf %461, %460 : vector<16x128xf32>
      %463 = arith.addf %459, %462 : vector<16x128xf32>
      %464 = vector.extract_strided_slice %448 {offsets = [4, 0], sizes = [16, 128], strides = [1, 1]} : vector<20x128xf32> to vector<16x128xf32>
      %465 = vector.broadcast %5 : f32 to vector<16x128xf32>
      %466 = arith.mulf %465, %464 : vector<16x128xf32>
      %467 = arith.addf %463, %466 : vector<16x128xf32>
      %468 = vector.broadcast %0 : f32 to vector<16x128xf32>
      %469 = arith.subf %467, %468 : vector<16x128xf32>
      %c-2_i32 = arith.constant -2 : i32
      %470 = vector.broadcast %c-2_i32 : i32 to vector<16x128xi32>
      %471 = arith.addi %40, %470 : vector<16x128xi32>
      %c0_i32_134 = arith.constant 0 : i32
      %472 = vector.broadcast %c0_i32_134 : i32 to vector<16x128xi32>
      %473 = arith.cmpi sge, %471, %472 : vector<16x128xi32>
      %c-2_i32_135 = arith.constant -2 : i32
      %474 = vector.broadcast %c-2_i32_135 : i32 to vector<16x128xi32>
      %475 = arith.addi %40, %474 : vector<16x128xi32>
      %c48_i32_136 = arith.constant 48 : i32
      %476 = vector.broadcast %c48_i32_136 : i32 to vector<16x128xi32>
      %477 = arith.cmpi slt, %475, %476 : vector<16x128xi32>
      %478 = arith.andi %473, %477 : vector<16x128xi1>
      %479 = arith.andi %95, %478 : vector<16x128xi1>
      %cst_137 = arith.constant 5.000000e+00 : f32
      %480 = vector.broadcast %cst_137 : f32 to vector<16x128xf32>
      %481 = arith.cmpf ole, %469, %480 : vector<16x128xf32>
      %482 = arith.andi %479, %481 : vector<16x128xi1>
      %cst_138 = arith.constant 0.000000e+00 : f32
      %483 = vector.broadcast %cst_138 : f32 to vector<16x128xf32>
      %484 = arith.maximumf %469, %483 : vector<16x128xf32>
      %cst_139 = arith.constant 0.000000e+00 : f32
      %485 = vector.broadcast %cst_139 : f32 to vector<16x128xf32>
      %486 = arith.subf %485, %484 : vector<16x128xf32>
      %487 = math.exp %486 : vector<16x128xf32>
      %cst_140 = arith.constant 0.000000e+00 : f32
      %488 = vector.broadcast %cst_140 : f32 to vector<16x128xf32>
      %489 = arith.select %482, %487, %488 : vector<16x128xi1>, vector<16x128xf32>
      %490 = arith.addf %410, %489 : vector<16x128xf32>
      %c2_i32_141 = arith.constant 2 : i32
      %491 = tpu.dynamic_rotate %74 by %c2_i32_141 dim 1 : vector<16x128xf32>, i32 -> vector<16x128xf32>
      %492 = arith.mulf %489, %491 : vector<16x128xf32>
      %493 = arith.addf %413, %492 : vector<16x128xf32>
      %c2_i32_142 = arith.constant 2 : i32
      %494 = tpu.dynamic_rotate %78 by %c2_i32_142 dim 1 : vector<16x128xf32>, i32 -> vector<16x128xf32>
      %495 = arith.mulf %489, %494 : vector<16x128xf32>
      %496 = arith.addf %416, %495 : vector<16x128xf32>
      %c2_i32_143 = arith.constant 2 : i32
      %497 = tpu.dynamic_rotate %82 by %c2_i32_143 dim 1 : vector<16x128xf32>, i32 -> vector<16x128xf32>
      %498 = arith.mulf %489, %497 : vector<16x128xf32>
      %499 = arith.addf %419, %498 : vector<16x128xf32>
      %c1_i32_144 = arith.constant 1 : i32
      %500 = tpu.dynamic_rotate %60 by %c1_i32_144 dim 1 : vector<20x128xf32>, i32 -> vector<20x128xf32>
      %501 = arith.mulf %18, %500 : vector<20x128xf32>
      %c1_i32_145 = arith.constant 1 : i32
      %502 = tpu.dynamic_rotate %65 by %c1_i32_145 dim 1 : vector<20x128xf32>, i32 -> vector<20x128xf32>
      %503 = arith.mulf %24, %502 : vector<20x128xf32>
      %504 = arith.addf %501, %503 : vector<20x128xf32>
      %c1_i32_146 = arith.constant 1 : i32
      %505 = tpu.dynamic_rotate %70 by %c1_i32_146 dim 1 : vector<20x128xf32>, i32 -> vector<20x128xf32>
      %506 = arith.mulf %30, %505 : vector<20x128xf32>
      %507 = arith.addf %504, %506 : vector<20x128xf32>
      %c1_i32_147 = arith.constant 1 : i32
      %508 = tpu.dynamic_rotate %86 by %c1_i32_147 dim 1 : vector<20x128xf32>, i32 -> vector<20x128xf32>
      %509 = arith.addf %33, %508 : vector<20x128xf32>
      %510 = arith.addf %509, %507 : vector<20x128xf32>
      %511 = vector.broadcast %8 : f32 to vector<20x128xf32>
      %512 = arith.mulf %511, %510 : vector<20x128xf32>
      %c127_i32_148 = arith.constant 127 : i32
      %513 = tpu.dynamic_rotate %510 by %c127_i32_148 dim 1 : vector<20x128xf32>, i32 -> vector<20x128xf32>
      %514 = vector.broadcast %9 : f32 to vector<20x128xf32>
      %515 = arith.mulf %514, %513 : vector<20x128xf32>
      %516 = arith.addf %512, %515 : vector<20x128xf32>
      %c1_i32_149 = arith.constant 1 : i32
      %517 = tpu.dynamic_rotate %510 by %c1_i32_149 dim 1 : vector<20x128xf32>, i32 -> vector<20x128xf32>
      %518 = vector.broadcast %7 : f32 to vector<20x128xf32>
      %519 = arith.mulf %518, %517 : vector<20x128xf32>
      %520 = arith.addf %516, %519 : vector<20x128xf32>
      %c126_i32_150 = arith.constant 126 : i32
      %521 = tpu.dynamic_rotate %510 by %c126_i32_150 dim 1 : vector<20x128xf32>, i32 -> vector<20x128xf32>
      %522 = vector.broadcast %10 : f32 to vector<20x128xf32>
      %523 = arith.mulf %522, %521 : vector<20x128xf32>
      %524 = arith.addf %520, %523 : vector<20x128xf32>
      %c2_i32_151 = arith.constant 2 : i32
      %525 = tpu.dynamic_rotate %510 by %c2_i32_151 dim 1 : vector<20x128xf32>, i32 -> vector<20x128xf32>
      %526 = vector.broadcast %6 : f32 to vector<20x128xf32>
      %527 = arith.mulf %526, %525 : vector<20x128xf32>
      %528 = arith.addf %524, %527 : vector<20x128xf32>
      %529 = vector.extract_strided_slice %528 {offsets = [0, 0], sizes = [16, 128], strides = [1, 1]} : vector<20x128xf32> to vector<16x128xf32>
      %530 = vector.broadcast %1 : f32 to vector<16x128xf32>
      %531 = arith.mulf %530, %529 : vector<16x128xf32>
      %532 = vector.extract_strided_slice %528 {offsets = [1, 0], sizes = [16, 128], strides = [1, 1]} : vector<20x128xf32> to vector<16x128xf32>
      %533 = vector.broadcast %2 : f32 to vector<16x128xf32>
      %534 = arith.mulf %533, %532 : vector<16x128xf32>
      %535 = arith.addf %531, %534 : vector<16x128xf32>
      %536 = vector.extract_strided_slice %528 {offsets = [2, 0], sizes = [16, 128], strides = [1, 1]} : vector<20x128xf32> to vector<16x128xf32>
      %537 = vector.broadcast %3 : f32 to vector<16x128xf32>
      %538 = arith.mulf %537, %536 : vector<16x128xf32>
      %539 = arith.addf %535, %538 : vector<16x128xf32>
      %540 = vector.extract_strided_slice %528 {offsets = [3, 0], sizes = [16, 128], strides = [1, 1]} : vector<20x128xf32> to vector<16x128xf32>
      %541 = vector.broadcast %4 : f32 to vector<16x128xf32>
      %542 = arith.mulf %541, %540 : vector<16x128xf32>
      %543 = arith.addf %539, %542 : vector<16x128xf32>
      %544 = vector.extract_strided_slice %528 {offsets = [4, 0], sizes = [16, 128], strides = [1, 1]} : vector<20x128xf32> to vector<16x128xf32>
      %545 = vector.broadcast %5 : f32 to vector<16x128xf32>
      %546 = arith.mulf %545, %544 : vector<16x128xf32>
      %547 = arith.addf %543, %546 : vector<16x128xf32>
      %548 = vector.broadcast %0 : f32 to vector<16x128xf32>
      %549 = arith.subf %547, %548 : vector<16x128xf32>
      %c-1_i32 = arith.constant -1 : i32
      %550 = vector.broadcast %c-1_i32 : i32 to vector<16x128xi32>
      %551 = arith.addi %40, %550 : vector<16x128xi32>
      %c0_i32_152 = arith.constant 0 : i32
      %552 = vector.broadcast %c0_i32_152 : i32 to vector<16x128xi32>
      %553 = arith.cmpi sge, %551, %552 : vector<16x128xi32>
      %c-1_i32_153 = arith.constant -1 : i32
      %554 = vector.broadcast %c-1_i32_153 : i32 to vector<16x128xi32>
      %555 = arith.addi %40, %554 : vector<16x128xi32>
      %c48_i32_154 = arith.constant 48 : i32
      %556 = vector.broadcast %c48_i32_154 : i32 to vector<16x128xi32>
      %557 = arith.cmpi slt, %555, %556 : vector<16x128xi32>
      %558 = arith.andi %553, %557 : vector<16x128xi1>
      %559 = arith.andi %95, %558 : vector<16x128xi1>
      %cst_155 = arith.constant 5.000000e+00 : f32
      %560 = vector.broadcast %cst_155 : f32 to vector<16x128xf32>
      %561 = arith.cmpf ole, %549, %560 : vector<16x128xf32>
      %562 = arith.andi %559, %561 : vector<16x128xi1>
      %cst_156 = arith.constant 0.000000e+00 : f32
      %563 = vector.broadcast %cst_156 : f32 to vector<16x128xf32>
      %564 = arith.maximumf %549, %563 : vector<16x128xf32>
      %cst_157 = arith.constant 0.000000e+00 : f32
      %565 = vector.broadcast %cst_157 : f32 to vector<16x128xf32>
      %566 = arith.subf %565, %564 : vector<16x128xf32>
      %567 = math.exp %566 : vector<16x128xf32>
      %cst_158 = arith.constant 0.000000e+00 : f32
      %568 = vector.broadcast %cst_158 : f32 to vector<16x128xf32>
      %569 = arith.select %562, %567, %568 : vector<16x128xi1>, vector<16x128xf32>
      %570 = arith.addf %490, %569 : vector<16x128xf32>
      %c1_i32_159 = arith.constant 1 : i32
      %571 = tpu.dynamic_rotate %74 by %c1_i32_159 dim 1 : vector<16x128xf32>, i32 -> vector<16x128xf32>
      %572 = arith.mulf %569, %571 : vector<16x128xf32>
      %573 = arith.addf %493, %572 : vector<16x128xf32>
      %c1_i32_160 = arith.constant 1 : i32
      %574 = tpu.dynamic_rotate %78 by %c1_i32_160 dim 1 : vector<16x128xf32>, i32 -> vector<16x128xf32>
      %575 = arith.mulf %569, %574 : vector<16x128xf32>
      %576 = arith.addf %496, %575 : vector<16x128xf32>
      %c1_i32_161 = arith.constant 1 : i32
      %577 = tpu.dynamic_rotate %82 by %c1_i32_161 dim 1 : vector<16x128xf32>, i32 -> vector<16x128xf32>
      %578 = arith.mulf %569, %577 : vector<16x128xf32>
      %579 = arith.addf %499, %578 : vector<16x128xf32>
      %580 = arith.mulf %18, %60 : vector<20x128xf32>
      %581 = arith.mulf %24, %65 : vector<20x128xf32>
      %582 = arith.addf %580, %581 : vector<20x128xf32>
      %583 = arith.mulf %30, %70 : vector<20x128xf32>
      %584 = arith.addf %582, %583 : vector<20x128xf32>
      %585 = arith.addf %33, %86 : vector<20x128xf32>
      %586 = arith.addf %585, %584 : vector<20x128xf32>
      %587 = vector.broadcast %8 : f32 to vector<20x128xf32>
      %588 = arith.mulf %587, %586 : vector<20x128xf32>
      %c127_i32_162 = arith.constant 127 : i32
      %589 = tpu.dynamic_rotate %586 by %c127_i32_162 dim 1 : vector<20x128xf32>, i32 -> vector<20x128xf32>
      %590 = vector.broadcast %9 : f32 to vector<20x128xf32>
      %591 = arith.mulf %590, %589 : vector<20x128xf32>
      %592 = arith.addf %588, %591 : vector<20x128xf32>
      %c1_i32_163 = arith.constant 1 : i32
      %593 = tpu.dynamic_rotate %586 by %c1_i32_163 dim 1 : vector<20x128xf32>, i32 -> vector<20x128xf32>
      %594 = vector.broadcast %7 : f32 to vector<20x128xf32>
      %595 = arith.mulf %594, %593 : vector<20x128xf32>
      %596 = arith.addf %592, %595 : vector<20x128xf32>
      %c126_i32_164 = arith.constant 126 : i32
      %597 = tpu.dynamic_rotate %586 by %c126_i32_164 dim 1 : vector<20x128xf32>, i32 -> vector<20x128xf32>
      %598 = vector.broadcast %10 : f32 to vector<20x128xf32>
      %599 = arith.mulf %598, %597 : vector<20x128xf32>
      %600 = arith.addf %596, %599 : vector<20x128xf32>
      %c2_i32_165 = arith.constant 2 : i32
      %601 = tpu.dynamic_rotate %586 by %c2_i32_165 dim 1 : vector<20x128xf32>, i32 -> vector<20x128xf32>
      %602 = vector.broadcast %6 : f32 to vector<20x128xf32>
      %603 = arith.mulf %602, %601 : vector<20x128xf32>
      %604 = arith.addf %600, %603 : vector<20x128xf32>
      %605 = vector.extract_strided_slice %604 {offsets = [0, 0], sizes = [16, 128], strides = [1, 1]} : vector<20x128xf32> to vector<16x128xf32>
      %606 = vector.broadcast %1 : f32 to vector<16x128xf32>
      %607 = arith.mulf %606, %605 : vector<16x128xf32>
      %608 = vector.extract_strided_slice %604 {offsets = [1, 0], sizes = [16, 128], strides = [1, 1]} : vector<20x128xf32> to vector<16x128xf32>
      %609 = vector.broadcast %2 : f32 to vector<16x128xf32>
      %610 = arith.mulf %609, %608 : vector<16x128xf32>
      %611 = arith.addf %607, %610 : vector<16x128xf32>
      %612 = vector.extract_strided_slice %604 {offsets = [2, 0], sizes = [16, 128], strides = [1, 1]} : vector<20x128xf32> to vector<16x128xf32>
      %613 = vector.broadcast %3 : f32 to vector<16x128xf32>
      %614 = arith.mulf %613, %612 : vector<16x128xf32>
      %615 = arith.addf %611, %614 : vector<16x128xf32>
      %616 = vector.extract_strided_slice %604 {offsets = [3, 0], sizes = [16, 128], strides = [1, 1]} : vector<20x128xf32> to vector<16x128xf32>
      %617 = vector.broadcast %4 : f32 to vector<16x128xf32>
      %618 = arith.mulf %617, %616 : vector<16x128xf32>
      %619 = arith.addf %615, %618 : vector<16x128xf32>
      %620 = vector.extract_strided_slice %604 {offsets = [4, 0], sizes = [16, 128], strides = [1, 1]} : vector<20x128xf32> to vector<16x128xf32>
      %621 = vector.broadcast %5 : f32 to vector<16x128xf32>
      %622 = arith.mulf %621, %620 : vector<16x128xf32>
      %623 = arith.addf %619, %622 : vector<16x128xf32>
      %624 = vector.broadcast %0 : f32 to vector<16x128xf32>
      %625 = arith.subf %623, %624 : vector<16x128xf32>
      %c0_i32_166 = arith.constant 0 : i32
      %626 = vector.broadcast %c0_i32_166 : i32 to vector<16x128xi32>
      %627 = arith.addi %40, %626 : vector<16x128xi32>
      %c0_i32_167 = arith.constant 0 : i32
      %628 = vector.broadcast %c0_i32_167 : i32 to vector<16x128xi32>
      %629 = arith.cmpi sge, %627, %628 : vector<16x128xi32>
      %c0_i32_168 = arith.constant 0 : i32
      %630 = vector.broadcast %c0_i32_168 : i32 to vector<16x128xi32>
      %631 = arith.addi %40, %630 : vector<16x128xi32>
      %c48_i32_169 = arith.constant 48 : i32
      %632 = vector.broadcast %c48_i32_169 : i32 to vector<16x128xi32>
      %633 = arith.cmpi slt, %631, %632 : vector<16x128xi32>
      %634 = arith.andi %629, %633 : vector<16x128xi1>
      %635 = arith.andi %95, %634 : vector<16x128xi1>
      %cst_170 = arith.constant 5.000000e+00 : f32
      %636 = vector.broadcast %cst_170 : f32 to vector<16x128xf32>
      %637 = arith.cmpf ole, %625, %636 : vector<16x128xf32>
      %638 = arith.andi %635, %637 : vector<16x128xi1>
      %cst_171 = arith.constant 0.000000e+00 : f32
      %639 = vector.broadcast %cst_171 : f32 to vector<16x128xf32>
      %640 = arith.maximumf %625, %639 : vector<16x128xf32>
      %cst_172 = arith.constant 0.000000e+00 : f32
      %641 = vector.broadcast %cst_172 : f32 to vector<16x128xf32>
      %642 = arith.subf %641, %640 : vector<16x128xf32>
      %643 = math.exp %642 : vector<16x128xf32>
      %cst_173 = arith.constant 0.000000e+00 : f32
      %644 = vector.broadcast %cst_173 : f32 to vector<16x128xf32>
      %645 = arith.select %638, %643, %644 : vector<16x128xi1>, vector<16x128xf32>
      %646 = arith.addf %570, %645 : vector<16x128xf32>
      %647 = arith.mulf %645, %74 : vector<16x128xf32>
      %648 = arith.addf %573, %647 : vector<16x128xf32>
      %649 = arith.mulf %645, %78 : vector<16x128xf32>
      %650 = arith.addf %576, %649 : vector<16x128xf32>
      %651 = arith.mulf %645, %82 : vector<16x128xf32>
      %652 = arith.addf %579, %651 : vector<16x128xf32>
      %c127_i32_174 = arith.constant 127 : i32
      %653 = tpu.dynamic_rotate %60 by %c127_i32_174 dim 1 : vector<20x128xf32>, i32 -> vector<20x128xf32>
      %654 = arith.mulf %18, %653 : vector<20x128xf32>
      %c127_i32_175 = arith.constant 127 : i32
      %655 = tpu.dynamic_rotate %65 by %c127_i32_175 dim 1 : vector<20x128xf32>, i32 -> vector<20x128xf32>
      %656 = arith.mulf %24, %655 : vector<20x128xf32>
      %657 = arith.addf %654, %656 : vector<20x128xf32>
      %c127_i32_176 = arith.constant 127 : i32
      %658 = tpu.dynamic_rotate %70 by %c127_i32_176 dim 1 : vector<20x128xf32>, i32 -> vector<20x128xf32>
      %659 = arith.mulf %30, %658 : vector<20x128xf32>
      %660 = arith.addf %657, %659 : vector<20x128xf32>
      %c127_i32_177 = arith.constant 127 : i32
      %661 = tpu.dynamic_rotate %86 by %c127_i32_177 dim 1 : vector<20x128xf32>, i32 -> vector<20x128xf32>
      %662 = arith.addf %33, %661 : vector<20x128xf32>
      %663 = arith.addf %662, %660 : vector<20x128xf32>
      %664 = vector.broadcast %8 : f32 to vector<20x128xf32>
      %665 = arith.mulf %664, %663 : vector<20x128xf32>
      %c127_i32_178 = arith.constant 127 : i32
      %666 = tpu.dynamic_rotate %663 by %c127_i32_178 dim 1 : vector<20x128xf32>, i32 -> vector<20x128xf32>
      %667 = vector.broadcast %9 : f32 to vector<20x128xf32>
      %668 = arith.mulf %667, %666 : vector<20x128xf32>
      %669 = arith.addf %665, %668 : vector<20x128xf32>
      %c1_i32_179 = arith.constant 1 : i32
      %670 = tpu.dynamic_rotate %663 by %c1_i32_179 dim 1 : vector<20x128xf32>, i32 -> vector<20x128xf32>
      %671 = vector.broadcast %7 : f32 to vector<20x128xf32>
      %672 = arith.mulf %671, %670 : vector<20x128xf32>
      %673 = arith.addf %669, %672 : vector<20x128xf32>
      %c126_i32_180 = arith.constant 126 : i32
      %674 = tpu.dynamic_rotate %663 by %c126_i32_180 dim 1 : vector<20x128xf32>, i32 -> vector<20x128xf32>
      %675 = vector.broadcast %10 : f32 to vector<20x128xf32>
      %676 = arith.mulf %675, %674 : vector<20x128xf32>
      %677 = arith.addf %673, %676 : vector<20x128xf32>
      %c2_i32_181 = arith.constant 2 : i32
      %678 = tpu.dynamic_rotate %663 by %c2_i32_181 dim 1 : vector<20x128xf32>, i32 -> vector<20x128xf32>
      %679 = vector.broadcast %6 : f32 to vector<20x128xf32>
      %680 = arith.mulf %679, %678 : vector<20x128xf32>
      %681 = arith.addf %677, %680 : vector<20x128xf32>
      %682 = vector.extract_strided_slice %681 {offsets = [0, 0], sizes = [16, 128], strides = [1, 1]} : vector<20x128xf32> to vector<16x128xf32>
      %683 = vector.broadcast %1 : f32 to vector<16x128xf32>
      %684 = arith.mulf %683, %682 : vector<16x128xf32>
      %685 = vector.extract_strided_slice %681 {offsets = [1, 0], sizes = [16, 128], strides = [1, 1]} : vector<20x128xf32> to vector<16x128xf32>
      %686 = vector.broadcast %2 : f32 to vector<16x128xf32>
      %687 = arith.mulf %686, %685 : vector<16x128xf32>
      %688 = arith.addf %684, %687 : vector<16x128xf32>
      %689 = vector.extract_strided_slice %681 {offsets = [2, 0], sizes = [16, 128], strides = [1, 1]} : vector<20x128xf32> to vector<16x128xf32>
      %690 = vector.broadcast %3 : f32 to vector<16x128xf32>
      %691 = arith.mulf %690, %689 : vector<16x128xf32>
      %692 = arith.addf %688, %691 : vector<16x128xf32>
      %693 = vector.extract_strided_slice %681 {offsets = [3, 0], sizes = [16, 128], strides = [1, 1]} : vector<20x128xf32> to vector<16x128xf32>
      %694 = vector.broadcast %4 : f32 to vector<16x128xf32>
      %695 = arith.mulf %694, %693 : vector<16x128xf32>
      %696 = arith.addf %692, %695 : vector<16x128xf32>
      %697 = vector.extract_strided_slice %681 {offsets = [4, 0], sizes = [16, 128], strides = [1, 1]} : vector<20x128xf32> to vector<16x128xf32>
      %698 = vector.broadcast %5 : f32 to vector<16x128xf32>
      %699 = arith.mulf %698, %697 : vector<16x128xf32>
      %700 = arith.addf %696, %699 : vector<16x128xf32>
      %701 = vector.broadcast %0 : f32 to vector<16x128xf32>
      %702 = arith.subf %700, %701 : vector<16x128xf32>
      %c1_i32_182 = arith.constant 1 : i32
      %703 = vector.broadcast %c1_i32_182 : i32 to vector<16x128xi32>
      %704 = arith.addi %40, %703 : vector<16x128xi32>
      %c0_i32_183 = arith.constant 0 : i32
      %705 = vector.broadcast %c0_i32_183 : i32 to vector<16x128xi32>
      %706 = arith.cmpi sge, %704, %705 : vector<16x128xi32>
      %c1_i32_184 = arith.constant 1 : i32
      %707 = vector.broadcast %c1_i32_184 : i32 to vector<16x128xi32>
      %708 = arith.addi %40, %707 : vector<16x128xi32>
      %c48_i32_185 = arith.constant 48 : i32
      %709 = vector.broadcast %c48_i32_185 : i32 to vector<16x128xi32>
      %710 = arith.cmpi slt, %708, %709 : vector<16x128xi32>
      %711 = arith.andi %706, %710 : vector<16x128xi1>
      %712 = arith.andi %95, %711 : vector<16x128xi1>
      %cst_186 = arith.constant 5.000000e+00 : f32
      %713 = vector.broadcast %cst_186 : f32 to vector<16x128xf32>
      %714 = arith.cmpf ole, %702, %713 : vector<16x128xf32>
      %715 = arith.andi %712, %714 : vector<16x128xi1>
      %cst_187 = arith.constant 0.000000e+00 : f32
      %716 = vector.broadcast %cst_187 : f32 to vector<16x128xf32>
      %717 = arith.maximumf %702, %716 : vector<16x128xf32>
      %cst_188 = arith.constant 0.000000e+00 : f32
      %718 = vector.broadcast %cst_188 : f32 to vector<16x128xf32>
      %719 = arith.subf %718, %717 : vector<16x128xf32>
      %720 = math.exp %719 : vector<16x128xf32>
      %cst_189 = arith.constant 0.000000e+00 : f32
      %721 = vector.broadcast %cst_189 : f32 to vector<16x128xf32>
      %722 = arith.select %715, %720, %721 : vector<16x128xi1>, vector<16x128xf32>
      %723 = arith.addf %646, %722 : vector<16x128xf32>
      %c127_i32_190 = arith.constant 127 : i32
      %724 = tpu.dynamic_rotate %74 by %c127_i32_190 dim 1 : vector<16x128xf32>, i32 -> vector<16x128xf32>
      %725 = arith.mulf %722, %724 : vector<16x128xf32>
      %726 = arith.addf %648, %725 : vector<16x128xf32>
      %c127_i32_191 = arith.constant 127 : i32
      %727 = tpu.dynamic_rotate %78 by %c127_i32_191 dim 1 : vector<16x128xf32>, i32 -> vector<16x128xf32>
      %728 = arith.mulf %722, %727 : vector<16x128xf32>
      %729 = arith.addf %650, %728 : vector<16x128xf32>
      %c127_i32_192 = arith.constant 127 : i32
      %730 = tpu.dynamic_rotate %82 by %c127_i32_192 dim 1 : vector<16x128xf32>, i32 -> vector<16x128xf32>
      %731 = arith.mulf %722, %730 : vector<16x128xf32>
      %732 = arith.addf %652, %731 : vector<16x128xf32>
      %c126_i32_193 = arith.constant 126 : i32
      %733 = tpu.dynamic_rotate %60 by %c126_i32_193 dim 1 : vector<20x128xf32>, i32 -> vector<20x128xf32>
      %734 = arith.mulf %18, %733 : vector<20x128xf32>
      %c126_i32_194 = arith.constant 126 : i32
      %735 = tpu.dynamic_rotate %65 by %c126_i32_194 dim 1 : vector<20x128xf32>, i32 -> vector<20x128xf32>
      %736 = arith.mulf %24, %735 : vector<20x128xf32>
      %737 = arith.addf %734, %736 : vector<20x128xf32>
      %c126_i32_195 = arith.constant 126 : i32
      %738 = tpu.dynamic_rotate %70 by %c126_i32_195 dim 1 : vector<20x128xf32>, i32 -> vector<20x128xf32>
      %739 = arith.mulf %30, %738 : vector<20x128xf32>
      %740 = arith.addf %737, %739 : vector<20x128xf32>
      %c126_i32_196 = arith.constant 126 : i32
      %741 = tpu.dynamic_rotate %86 by %c126_i32_196 dim 1 : vector<20x128xf32>, i32 -> vector<20x128xf32>
      %742 = arith.addf %33, %741 : vector<20x128xf32>
      %743 = arith.addf %742, %740 : vector<20x128xf32>
      %744 = vector.broadcast %8 : f32 to vector<20x128xf32>
      %745 = arith.mulf %744, %743 : vector<20x128xf32>
      %c127_i32_197 = arith.constant 127 : i32
      %746 = tpu.dynamic_rotate %743 by %c127_i32_197 dim 1 : vector<20x128xf32>, i32 -> vector<20x128xf32>
      %747 = vector.broadcast %9 : f32 to vector<20x128xf32>
      %748 = arith.mulf %747, %746 : vector<20x128xf32>
      %749 = arith.addf %745, %748 : vector<20x128xf32>
      %c1_i32_198 = arith.constant 1 : i32
      %750 = tpu.dynamic_rotate %743 by %c1_i32_198 dim 1 : vector<20x128xf32>, i32 -> vector<20x128xf32>
      %751 = vector.broadcast %7 : f32 to vector<20x128xf32>
      %752 = arith.mulf %751, %750 : vector<20x128xf32>
      %753 = arith.addf %749, %752 : vector<20x128xf32>
      %c126_i32_199 = arith.constant 126 : i32
      %754 = tpu.dynamic_rotate %743 by %c126_i32_199 dim 1 : vector<20x128xf32>, i32 -> vector<20x128xf32>
      %755 = vector.broadcast %10 : f32 to vector<20x128xf32>
      %756 = arith.mulf %755, %754 : vector<20x128xf32>
      %757 = arith.addf %753, %756 : vector<20x128xf32>
      %c2_i32_200 = arith.constant 2 : i32
      %758 = tpu.dynamic_rotate %743 by %c2_i32_200 dim 1 : vector<20x128xf32>, i32 -> vector<20x128xf32>
      %759 = vector.broadcast %6 : f32 to vector<20x128xf32>
      %760 = arith.mulf %759, %758 : vector<20x128xf32>
      %761 = arith.addf %757, %760 : vector<20x128xf32>
      %762 = vector.extract_strided_slice %761 {offsets = [0, 0], sizes = [16, 128], strides = [1, 1]} : vector<20x128xf32> to vector<16x128xf32>
      %763 = vector.broadcast %1 : f32 to vector<16x128xf32>
      %764 = arith.mulf %763, %762 : vector<16x128xf32>
      %765 = vector.extract_strided_slice %761 {offsets = [1, 0], sizes = [16, 128], strides = [1, 1]} : vector<20x128xf32> to vector<16x128xf32>
      %766 = vector.broadcast %2 : f32 to vector<16x128xf32>
      %767 = arith.mulf %766, %765 : vector<16x128xf32>
      %768 = arith.addf %764, %767 : vector<16x128xf32>
      %769 = vector.extract_strided_slice %761 {offsets = [2, 0], sizes = [16, 128], strides = [1, 1]} : vector<20x128xf32> to vector<16x128xf32>
      %770 = vector.broadcast %3 : f32 to vector<16x128xf32>
      %771 = arith.mulf %770, %769 : vector<16x128xf32>
      %772 = arith.addf %768, %771 : vector<16x128xf32>
      %773 = vector.extract_strided_slice %761 {offsets = [3, 0], sizes = [16, 128], strides = [1, 1]} : vector<20x128xf32> to vector<16x128xf32>
      %774 = vector.broadcast %4 : f32 to vector<16x128xf32>
      %775 = arith.mulf %774, %773 : vector<16x128xf32>
      %776 = arith.addf %772, %775 : vector<16x128xf32>
      %777 = vector.extract_strided_slice %761 {offsets = [4, 0], sizes = [16, 128], strides = [1, 1]} : vector<20x128xf32> to vector<16x128xf32>
      %778 = vector.broadcast %5 : f32 to vector<16x128xf32>
      %779 = arith.mulf %778, %777 : vector<16x128xf32>
      %780 = arith.addf %776, %779 : vector<16x128xf32>
      %781 = vector.broadcast %0 : f32 to vector<16x128xf32>
      %782 = arith.subf %780, %781 : vector<16x128xf32>
      %c2_i32_201 = arith.constant 2 : i32
      %783 = vector.broadcast %c2_i32_201 : i32 to vector<16x128xi32>
      %784 = arith.addi %40, %783 : vector<16x128xi32>
      %c0_i32_202 = arith.constant 0 : i32
      %785 = vector.broadcast %c0_i32_202 : i32 to vector<16x128xi32>
      %786 = arith.cmpi sge, %784, %785 : vector<16x128xi32>
      %c2_i32_203 = arith.constant 2 : i32
      %787 = vector.broadcast %c2_i32_203 : i32 to vector<16x128xi32>
      %788 = arith.addi %40, %787 : vector<16x128xi32>
      %c48_i32_204 = arith.constant 48 : i32
      %789 = vector.broadcast %c48_i32_204 : i32 to vector<16x128xi32>
      %790 = arith.cmpi slt, %788, %789 : vector<16x128xi32>
      %791 = arith.andi %786, %790 : vector<16x128xi1>
      %792 = arith.andi %95, %791 : vector<16x128xi1>
      %cst_205 = arith.constant 5.000000e+00 : f32
      %793 = vector.broadcast %cst_205 : f32 to vector<16x128xf32>
      %794 = arith.cmpf ole, %782, %793 : vector<16x128xf32>
      %795 = arith.andi %792, %794 : vector<16x128xi1>
      %cst_206 = arith.constant 0.000000e+00 : f32
      %796 = vector.broadcast %cst_206 : f32 to vector<16x128xf32>
      %797 = arith.maximumf %782, %796 : vector<16x128xf32>
      %cst_207 = arith.constant 0.000000e+00 : f32
      %798 = vector.broadcast %cst_207 : f32 to vector<16x128xf32>
      %799 = arith.subf %798, %797 : vector<16x128xf32>
      %800 = math.exp %799 : vector<16x128xf32>
      %cst_208 = arith.constant 0.000000e+00 : f32
      %801 = vector.broadcast %cst_208 : f32 to vector<16x128xf32>
      %802 = arith.select %795, %800, %801 : vector<16x128xi1>, vector<16x128xf32>
      %803 = arith.addf %723, %802 : vector<16x128xf32>
      %c126_i32_209 = arith.constant 126 : i32
      %804 = tpu.dynamic_rotate %74 by %c126_i32_209 dim 1 : vector<16x128xf32>, i32 -> vector<16x128xf32>
      %805 = arith.mulf %802, %804 : vector<16x128xf32>
      %806 = arith.addf %726, %805 : vector<16x128xf32>
      %c126_i32_210 = arith.constant 126 : i32
      %807 = tpu.dynamic_rotate %78 by %c126_i32_210 dim 1 : vector<16x128xf32>, i32 -> vector<16x128xf32>
      %808 = arith.mulf %802, %807 : vector<16x128xf32>
      %809 = arith.addf %729, %808 : vector<16x128xf32>
      %c126_i32_211 = arith.constant 126 : i32
      %810 = tpu.dynamic_rotate %82 by %c126_i32_211 dim 1 : vector<16x128xf32>, i32 -> vector<16x128xf32>
      %811 = arith.mulf %802, %810 : vector<16x128xf32>
      %812 = arith.addf %732, %811 : vector<16x128xf32>
      %c125_i32 = arith.constant 125 : i32
      %813 = tpu.dynamic_rotate %60 by %c125_i32 dim 1 : vector<20x128xf32>, i32 -> vector<20x128xf32>
      %814 = arith.mulf %18, %813 : vector<20x128xf32>
      %c125_i32_212 = arith.constant 125 : i32
      %815 = tpu.dynamic_rotate %65 by %c125_i32_212 dim 1 : vector<20x128xf32>, i32 -> vector<20x128xf32>
      %816 = arith.mulf %24, %815 : vector<20x128xf32>
      %817 = arith.addf %814, %816 : vector<20x128xf32>
      %c125_i32_213 = arith.constant 125 : i32
      %818 = tpu.dynamic_rotate %70 by %c125_i32_213 dim 1 : vector<20x128xf32>, i32 -> vector<20x128xf32>
      %819 = arith.mulf %30, %818 : vector<20x128xf32>
      %820 = arith.addf %817, %819 : vector<20x128xf32>
      %c125_i32_214 = arith.constant 125 : i32
      %821 = tpu.dynamic_rotate %86 by %c125_i32_214 dim 1 : vector<20x128xf32>, i32 -> vector<20x128xf32>
      %822 = arith.addf %33, %821 : vector<20x128xf32>
      %823 = arith.addf %822, %820 : vector<20x128xf32>
      %824 = vector.broadcast %8 : f32 to vector<20x128xf32>
      %825 = arith.mulf %824, %823 : vector<20x128xf32>
      %c127_i32_215 = arith.constant 127 : i32
      %826 = tpu.dynamic_rotate %823 by %c127_i32_215 dim 1 : vector<20x128xf32>, i32 -> vector<20x128xf32>
      %827 = vector.broadcast %9 : f32 to vector<20x128xf32>
      %828 = arith.mulf %827, %826 : vector<20x128xf32>
      %829 = arith.addf %825, %828 : vector<20x128xf32>
      %c1_i32_216 = arith.constant 1 : i32
      %830 = tpu.dynamic_rotate %823 by %c1_i32_216 dim 1 : vector<20x128xf32>, i32 -> vector<20x128xf32>
      %831 = vector.broadcast %7 : f32 to vector<20x128xf32>
      %832 = arith.mulf %831, %830 : vector<20x128xf32>
      %833 = arith.addf %829, %832 : vector<20x128xf32>
      %c126_i32_217 = arith.constant 126 : i32
      %834 = tpu.dynamic_rotate %823 by %c126_i32_217 dim 1 : vector<20x128xf32>, i32 -> vector<20x128xf32>
      %835 = vector.broadcast %10 : f32 to vector<20x128xf32>
      %836 = arith.mulf %835, %834 : vector<20x128xf32>
      %837 = arith.addf %833, %836 : vector<20x128xf32>
      %c2_i32_218 = arith.constant 2 : i32
      %838 = tpu.dynamic_rotate %823 by %c2_i32_218 dim 1 : vector<20x128xf32>, i32 -> vector<20x128xf32>
      %839 = vector.broadcast %6 : f32 to vector<20x128xf32>
      %840 = arith.mulf %839, %838 : vector<20x128xf32>
      %841 = arith.addf %837, %840 : vector<20x128xf32>
      %842 = vector.extract_strided_slice %841 {offsets = [0, 0], sizes = [16, 128], strides = [1, 1]} : vector<20x128xf32> to vector<16x128xf32>
      %843 = vector.broadcast %1 : f32 to vector<16x128xf32>
      %844 = arith.mulf %843, %842 : vector<16x128xf32>
      %845 = vector.extract_strided_slice %841 {offsets = [1, 0], sizes = [16, 128], strides = [1, 1]} : vector<20x128xf32> to vector<16x128xf32>
      %846 = vector.broadcast %2 : f32 to vector<16x128xf32>
      %847 = arith.mulf %846, %845 : vector<16x128xf32>
      %848 = arith.addf %844, %847 : vector<16x128xf32>
      %849 = vector.extract_strided_slice %841 {offsets = [2, 0], sizes = [16, 128], strides = [1, 1]} : vector<20x128xf32> to vector<16x128xf32>
      %850 = vector.broadcast %3 : f32 to vector<16x128xf32>
      %851 = arith.mulf %850, %849 : vector<16x128xf32>
      %852 = arith.addf %848, %851 : vector<16x128xf32>
      %853 = vector.extract_strided_slice %841 {offsets = [3, 0], sizes = [16, 128], strides = [1, 1]} : vector<20x128xf32> to vector<16x128xf32>
      %854 = vector.broadcast %4 : f32 to vector<16x128xf32>
      %855 = arith.mulf %854, %853 : vector<16x128xf32>
      %856 = arith.addf %852, %855 : vector<16x128xf32>
      %857 = vector.extract_strided_slice %841 {offsets = [4, 0], sizes = [16, 128], strides = [1, 1]} : vector<20x128xf32> to vector<16x128xf32>
      %858 = vector.broadcast %5 : f32 to vector<16x128xf32>
      %859 = arith.mulf %858, %857 : vector<16x128xf32>
      %860 = arith.addf %856, %859 : vector<16x128xf32>
      %861 = vector.broadcast %0 : f32 to vector<16x128xf32>
      %862 = arith.subf %860, %861 : vector<16x128xf32>
      %c3_i32_219 = arith.constant 3 : i32
      %863 = vector.broadcast %c3_i32_219 : i32 to vector<16x128xi32>
      %864 = arith.addi %40, %863 : vector<16x128xi32>
      %c0_i32_220 = arith.constant 0 : i32
      %865 = vector.broadcast %c0_i32_220 : i32 to vector<16x128xi32>
      %866 = arith.cmpi sge, %864, %865 : vector<16x128xi32>
      %c3_i32_221 = arith.constant 3 : i32
      %867 = vector.broadcast %c3_i32_221 : i32 to vector<16x128xi32>
      %868 = arith.addi %40, %867 : vector<16x128xi32>
      %c48_i32_222 = arith.constant 48 : i32
      %869 = vector.broadcast %c48_i32_222 : i32 to vector<16x128xi32>
      %870 = arith.cmpi slt, %868, %869 : vector<16x128xi32>
      %871 = arith.andi %866, %870 : vector<16x128xi1>
      %872 = arith.andi %95, %871 : vector<16x128xi1>
      %cst_223 = arith.constant 5.000000e+00 : f32
      %873 = vector.broadcast %cst_223 : f32 to vector<16x128xf32>
      %874 = arith.cmpf ole, %862, %873 : vector<16x128xf32>
      %875 = arith.andi %872, %874 : vector<16x128xi1>
      %cst_224 = arith.constant 0.000000e+00 : f32
      %876 = vector.broadcast %cst_224 : f32 to vector<16x128xf32>
      %877 = arith.maximumf %862, %876 : vector<16x128xf32>
      %cst_225 = arith.constant 0.000000e+00 : f32
      %878 = vector.broadcast %cst_225 : f32 to vector<16x128xf32>
      %879 = arith.subf %878, %877 : vector<16x128xf32>
      %880 = math.exp %879 : vector<16x128xf32>
      %cst_226 = arith.constant 0.000000e+00 : f32
      %881 = vector.broadcast %cst_226 : f32 to vector<16x128xf32>
      %882 = arith.select %875, %880, %881 : vector<16x128xi1>, vector<16x128xf32>
      %883 = arith.addf %803, %882 : vector<16x128xf32>
      %c125_i32_227 = arith.constant 125 : i32
      %884 = tpu.dynamic_rotate %74 by %c125_i32_227 dim 1 : vector<16x128xf32>, i32 -> vector<16x128xf32>
      %885 = arith.mulf %882, %884 : vector<16x128xf32>
      %886 = arith.addf %806, %885 : vector<16x128xf32>
      %c125_i32_228 = arith.constant 125 : i32
      %887 = tpu.dynamic_rotate %78 by %c125_i32_228 dim 1 : vector<16x128xf32>, i32 -> vector<16x128xf32>
      %888 = arith.mulf %882, %887 : vector<16x128xf32>
      %889 = arith.addf %809, %888 : vector<16x128xf32>
      %c125_i32_229 = arith.constant 125 : i32
      %890 = tpu.dynamic_rotate %82 by %c125_i32_229 dim 1 : vector<16x128xf32>, i32 -> vector<16x128xf32>
      %891 = arith.mulf %882, %890 : vector<16x128xf32>
      %892 = arith.addf %812, %891 : vector<16x128xf32>
      %c124_i32 = arith.constant 124 : i32
      %893 = tpu.dynamic_rotate %60 by %c124_i32 dim 1 : vector<20x128xf32>, i32 -> vector<20x128xf32>
      %894 = arith.mulf %18, %893 : vector<20x128xf32>
      %c124_i32_230 = arith.constant 124 : i32
      %895 = tpu.dynamic_rotate %65 by %c124_i32_230 dim 1 : vector<20x128xf32>, i32 -> vector<20x128xf32>
      %896 = arith.mulf %24, %895 : vector<20x128xf32>
      %897 = arith.addf %894, %896 : vector<20x128xf32>
      %c124_i32_231 = arith.constant 124 : i32
      %898 = tpu.dynamic_rotate %70 by %c124_i32_231 dim 1 : vector<20x128xf32>, i32 -> vector<20x128xf32>
      %899 = arith.mulf %30, %898 : vector<20x128xf32>
      %900 = arith.addf %897, %899 : vector<20x128xf32>
      %c124_i32_232 = arith.constant 124 : i32
      %901 = tpu.dynamic_rotate %86 by %c124_i32_232 dim 1 : vector<20x128xf32>, i32 -> vector<20x128xf32>
      %902 = arith.addf %33, %901 : vector<20x128xf32>
      %903 = arith.addf %902, %900 : vector<20x128xf32>
      %904 = vector.broadcast %8 : f32 to vector<20x128xf32>
      %905 = arith.mulf %904, %903 : vector<20x128xf32>
      %c127_i32_233 = arith.constant 127 : i32
      %906 = tpu.dynamic_rotate %903 by %c127_i32_233 dim 1 : vector<20x128xf32>, i32 -> vector<20x128xf32>
      %907 = vector.broadcast %9 : f32 to vector<20x128xf32>
      %908 = arith.mulf %907, %906 : vector<20x128xf32>
      %909 = arith.addf %905, %908 : vector<20x128xf32>
      %c1_i32_234 = arith.constant 1 : i32
      %910 = tpu.dynamic_rotate %903 by %c1_i32_234 dim 1 : vector<20x128xf32>, i32 -> vector<20x128xf32>
      %911 = vector.broadcast %7 : f32 to vector<20x128xf32>
      %912 = arith.mulf %911, %910 : vector<20x128xf32>
      %913 = arith.addf %909, %912 : vector<20x128xf32>
      %c126_i32_235 = arith.constant 126 : i32
      %914 = tpu.dynamic_rotate %903 by %c126_i32_235 dim 1 : vector<20x128xf32>, i32 -> vector<20x128xf32>
      %915 = vector.broadcast %10 : f32 to vector<20x128xf32>
      %916 = arith.mulf %915, %914 : vector<20x128xf32>
      %917 = arith.addf %913, %916 : vector<20x128xf32>
      %c2_i32_236 = arith.constant 2 : i32
      %918 = tpu.dynamic_rotate %903 by %c2_i32_236 dim 1 : vector<20x128xf32>, i32 -> vector<20x128xf32>
      %919 = vector.broadcast %6 : f32 to vector<20x128xf32>
      %920 = arith.mulf %919, %918 : vector<20x128xf32>
      %921 = arith.addf %917, %920 : vector<20x128xf32>
      %922 = vector.extract_strided_slice %921 {offsets = [0, 0], sizes = [16, 128], strides = [1, 1]} : vector<20x128xf32> to vector<16x128xf32>
      %923 = vector.broadcast %1 : f32 to vector<16x128xf32>
      %924 = arith.mulf %923, %922 : vector<16x128xf32>
      %925 = vector.extract_strided_slice %921 {offsets = [1, 0], sizes = [16, 128], strides = [1, 1]} : vector<20x128xf32> to vector<16x128xf32>
      %926 = vector.broadcast %2 : f32 to vector<16x128xf32>
      %927 = arith.mulf %926, %925 : vector<16x128xf32>
      %928 = arith.addf %924, %927 : vector<16x128xf32>
      %929 = vector.extract_strided_slice %921 {offsets = [2, 0], sizes = [16, 128], strides = [1, 1]} : vector<20x128xf32> to vector<16x128xf32>
      %930 = vector.broadcast %3 : f32 to vector<16x128xf32>
      %931 = arith.mulf %930, %929 : vector<16x128xf32>
      %932 = arith.addf %928, %931 : vector<16x128xf32>
      %933 = vector.extract_strided_slice %921 {offsets = [3, 0], sizes = [16, 128], strides = [1, 1]} : vector<20x128xf32> to vector<16x128xf32>
      %934 = vector.broadcast %4 : f32 to vector<16x128xf32>
      %935 = arith.mulf %934, %933 : vector<16x128xf32>
      %936 = arith.addf %932, %935 : vector<16x128xf32>
      %937 = vector.extract_strided_slice %921 {offsets = [4, 0], sizes = [16, 128], strides = [1, 1]} : vector<20x128xf32> to vector<16x128xf32>
      %938 = vector.broadcast %5 : f32 to vector<16x128xf32>
      %939 = arith.mulf %938, %937 : vector<16x128xf32>
      %940 = arith.addf %936, %939 : vector<16x128xf32>
      %941 = vector.broadcast %0 : f32 to vector<16x128xf32>
      %942 = arith.subf %940, %941 : vector<16x128xf32>
      %c4_i32_237 = arith.constant 4 : i32
      %943 = vector.broadcast %c4_i32_237 : i32 to vector<16x128xi32>
      %944 = arith.addi %40, %943 : vector<16x128xi32>
      %c0_i32_238 = arith.constant 0 : i32
      %945 = vector.broadcast %c0_i32_238 : i32 to vector<16x128xi32>
      %946 = arith.cmpi sge, %944, %945 : vector<16x128xi32>
      %c4_i32_239 = arith.constant 4 : i32
      %947 = vector.broadcast %c4_i32_239 : i32 to vector<16x128xi32>
      %948 = arith.addi %40, %947 : vector<16x128xi32>
      %c48_i32_240 = arith.constant 48 : i32
      %949 = vector.broadcast %c48_i32_240 : i32 to vector<16x128xi32>
      %950 = arith.cmpi slt, %948, %949 : vector<16x128xi32>
      %951 = arith.andi %946, %950 : vector<16x128xi1>
      %952 = arith.andi %95, %951 : vector<16x128xi1>
      %cst_241 = arith.constant 5.000000e+00 : f32
      %953 = vector.broadcast %cst_241 : f32 to vector<16x128xf32>
      %954 = arith.cmpf ole, %942, %953 : vector<16x128xf32>
      %955 = arith.andi %952, %954 : vector<16x128xi1>
      %cst_242 = arith.constant 0.000000e+00 : f32
      %956 = vector.broadcast %cst_242 : f32 to vector<16x128xf32>
      %957 = arith.maximumf %942, %956 : vector<16x128xf32>
      %cst_243 = arith.constant 0.000000e+00 : f32
      %958 = vector.broadcast %cst_243 : f32 to vector<16x128xf32>
      %959 = arith.subf %958, %957 : vector<16x128xf32>
      %960 = math.exp %959 : vector<16x128xf32>
      %cst_244 = arith.constant 0.000000e+00 : f32
      %961 = vector.broadcast %cst_244 : f32 to vector<16x128xf32>
      %962 = arith.select %955, %960, %961 : vector<16x128xi1>, vector<16x128xf32>
      %963 = arith.addf %883, %962 : vector<16x128xf32>
      %c124_i32_245 = arith.constant 124 : i32
      %964 = tpu.dynamic_rotate %74 by %c124_i32_245 dim 1 : vector<16x128xf32>, i32 -> vector<16x128xf32>
      %965 = arith.mulf %962, %964 : vector<16x128xf32>
      %966 = arith.addf %886, %965 : vector<16x128xf32>
      %c124_i32_246 = arith.constant 124 : i32
      %967 = tpu.dynamic_rotate %78 by %c124_i32_246 dim 1 : vector<16x128xf32>, i32 -> vector<16x128xf32>
      %968 = arith.mulf %962, %967 : vector<16x128xf32>
      %969 = arith.addf %889, %968 : vector<16x128xf32>
      %c124_i32_247 = arith.constant 124 : i32
      %970 = tpu.dynamic_rotate %82 by %c124_i32_247 dim 1 : vector<16x128xf32>, i32 -> vector<16x128xf32>
      %971 = arith.mulf %962, %970 : vector<16x128xf32>
      %972 = arith.addf %892, %971 : vector<16x128xf32>
      %c123_i32 = arith.constant 123 : i32
      %973 = tpu.dynamic_rotate %60 by %c123_i32 dim 1 : vector<20x128xf32>, i32 -> vector<20x128xf32>
      %974 = arith.mulf %18, %973 : vector<20x128xf32>
      %c123_i32_248 = arith.constant 123 : i32
      %975 = tpu.dynamic_rotate %65 by %c123_i32_248 dim 1 : vector<20x128xf32>, i32 -> vector<20x128xf32>
      %976 = arith.mulf %24, %975 : vector<20x128xf32>
      %977 = arith.addf %974, %976 : vector<20x128xf32>
      %c123_i32_249 = arith.constant 123 : i32
      %978 = tpu.dynamic_rotate %70 by %c123_i32_249 dim 1 : vector<20x128xf32>, i32 -> vector<20x128xf32>
      %979 = arith.mulf %30, %978 : vector<20x128xf32>
      %980 = arith.addf %977, %979 : vector<20x128xf32>
      %c123_i32_250 = arith.constant 123 : i32
      %981 = tpu.dynamic_rotate %86 by %c123_i32_250 dim 1 : vector<20x128xf32>, i32 -> vector<20x128xf32>
      %982 = arith.addf %33, %981 : vector<20x128xf32>
      %983 = arith.addf %982, %980 : vector<20x128xf32>
      %984 = vector.broadcast %8 : f32 to vector<20x128xf32>
      %985 = arith.mulf %984, %983 : vector<20x128xf32>
      %c127_i32_251 = arith.constant 127 : i32
      %986 = tpu.dynamic_rotate %983 by %c127_i32_251 dim 1 : vector<20x128xf32>, i32 -> vector<20x128xf32>
      %987 = vector.broadcast %9 : f32 to vector<20x128xf32>
      %988 = arith.mulf %987, %986 : vector<20x128xf32>
      %989 = arith.addf %985, %988 : vector<20x128xf32>
      %c1_i32_252 = arith.constant 1 : i32
      %990 = tpu.dynamic_rotate %983 by %c1_i32_252 dim 1 : vector<20x128xf32>, i32 -> vector<20x128xf32>
      %991 = vector.broadcast %7 : f32 to vector<20x128xf32>
      %992 = arith.mulf %991, %990 : vector<20x128xf32>
      %993 = arith.addf %989, %992 : vector<20x128xf32>
      %c126_i32_253 = arith.constant 126 : i32
      %994 = tpu.dynamic_rotate %983 by %c126_i32_253 dim 1 : vector<20x128xf32>, i32 -> vector<20x128xf32>
      %995 = vector.broadcast %10 : f32 to vector<20x128xf32>
      %996 = arith.mulf %995, %994 : vector<20x128xf32>
      %997 = arith.addf %993, %996 : vector<20x128xf32>
      %c2_i32_254 = arith.constant 2 : i32
      %998 = tpu.dynamic_rotate %983 by %c2_i32_254 dim 1 : vector<20x128xf32>, i32 -> vector<20x128xf32>
      %999 = vector.broadcast %6 : f32 to vector<20x128xf32>
      %1000 = arith.mulf %999, %998 : vector<20x128xf32>
      %1001 = arith.addf %997, %1000 : vector<20x128xf32>
      %1002 = vector.extract_strided_slice %1001 {offsets = [0, 0], sizes = [16, 128], strides = [1, 1]} : vector<20x128xf32> to vector<16x128xf32>
      %1003 = vector.broadcast %1 : f32 to vector<16x128xf32>
      %1004 = arith.mulf %1003, %1002 : vector<16x128xf32>
      %1005 = vector.extract_strided_slice %1001 {offsets = [1, 0], sizes = [16, 128], strides = [1, 1]} : vector<20x128xf32> to vector<16x128xf32>
      %1006 = vector.broadcast %2 : f32 to vector<16x128xf32>
      %1007 = arith.mulf %1006, %1005 : vector<16x128xf32>
      %1008 = arith.addf %1004, %1007 : vector<16x128xf32>
      %1009 = vector.extract_strided_slice %1001 {offsets = [2, 0], sizes = [16, 128], strides = [1, 1]} : vector<20x128xf32> to vector<16x128xf32>
      %1010 = vector.broadcast %3 : f32 to vector<16x128xf32>
      %1011 = arith.mulf %1010, %1009 : vector<16x128xf32>
      %1012 = arith.addf %1008, %1011 : vector<16x128xf32>
      %1013 = vector.extract_strided_slice %1001 {offsets = [3, 0], sizes = [16, 128], strides = [1, 1]} : vector<20x128xf32> to vector<16x128xf32>
      %1014 = vector.broadcast %4 : f32 to vector<16x128xf32>
      %1015 = arith.mulf %1014, %1013 : vector<16x128xf32>
      %1016 = arith.addf %1012, %1015 : vector<16x128xf32>
      %1017 = vector.extract_strided_slice %1001 {offsets = [4, 0], sizes = [16, 128], strides = [1, 1]} : vector<20x128xf32> to vector<16x128xf32>
      %1018 = vector.broadcast %5 : f32 to vector<16x128xf32>
      %1019 = arith.mulf %1018, %1017 : vector<16x128xf32>
      %1020 = arith.addf %1016, %1019 : vector<16x128xf32>
      %1021 = vector.broadcast %0 : f32 to vector<16x128xf32>
      %1022 = arith.subf %1020, %1021 : vector<16x128xf32>
      %c5_i32_255 = arith.constant 5 : i32
      %1023 = vector.broadcast %c5_i32_255 : i32 to vector<16x128xi32>
      %1024 = arith.addi %40, %1023 : vector<16x128xi32>
      %c0_i32_256 = arith.constant 0 : i32
      %1025 = vector.broadcast %c0_i32_256 : i32 to vector<16x128xi32>
      %1026 = arith.cmpi sge, %1024, %1025 : vector<16x128xi32>
      %c5_i32_257 = arith.constant 5 : i32
      %1027 = vector.broadcast %c5_i32_257 : i32 to vector<16x128xi32>
      %1028 = arith.addi %40, %1027 : vector<16x128xi32>
      %c48_i32_258 = arith.constant 48 : i32
      %1029 = vector.broadcast %c48_i32_258 : i32 to vector<16x128xi32>
      %1030 = arith.cmpi slt, %1028, %1029 : vector<16x128xi32>
      %1031 = arith.andi %1026, %1030 : vector<16x128xi1>
      %1032 = arith.andi %95, %1031 : vector<16x128xi1>
      %cst_259 = arith.constant 5.000000e+00 : f32
      %1033 = vector.broadcast %cst_259 : f32 to vector<16x128xf32>
      %1034 = arith.cmpf ole, %1022, %1033 : vector<16x128xf32>
      %1035 = arith.andi %1032, %1034 : vector<16x128xi1>
      %cst_260 = arith.constant 0.000000e+00 : f32
      %1036 = vector.broadcast %cst_260 : f32 to vector<16x128xf32>
      %1037 = arith.maximumf %1022, %1036 : vector<16x128xf32>
      %cst_261 = arith.constant 0.000000e+00 : f32
      %1038 = vector.broadcast %cst_261 : f32 to vector<16x128xf32>
      %1039 = arith.subf %1038, %1037 : vector<16x128xf32>
      %1040 = math.exp %1039 : vector<16x128xf32>
      %cst_262 = arith.constant 0.000000e+00 : f32
      %1041 = vector.broadcast %cst_262 : f32 to vector<16x128xf32>
      %1042 = arith.select %1035, %1040, %1041 : vector<16x128xi1>, vector<16x128xf32>
      %1043 = arith.addf %963, %1042 : vector<16x128xf32>
      %c123_i32_263 = arith.constant 123 : i32
      %1044 = tpu.dynamic_rotate %74 by %c123_i32_263 dim 1 : vector<16x128xf32>, i32 -> vector<16x128xf32>
      %1045 = arith.mulf %1042, %1044 : vector<16x128xf32>
      %1046 = arith.addf %966, %1045 : vector<16x128xf32>
      %c123_i32_264 = arith.constant 123 : i32
      %1047 = tpu.dynamic_rotate %78 by %c123_i32_264 dim 1 : vector<16x128xf32>, i32 -> vector<16x128xf32>
      %1048 = arith.mulf %1042, %1047 : vector<16x128xf32>
      %1049 = arith.addf %969, %1048 : vector<16x128xf32>
      %c123_i32_265 = arith.constant 123 : i32
      %1050 = tpu.dynamic_rotate %82 by %c123_i32_265 dim 1 : vector<16x128xf32>, i32 -> vector<16x128xf32>
      %1051 = arith.mulf %1042, %1050 : vector<16x128xf32>
      %1052 = arith.addf %972, %1051 : vector<16x128xf32>
      %c122_i32 = arith.constant 122 : i32
      %1053 = tpu.dynamic_rotate %60 by %c122_i32 dim 1 : vector<20x128xf32>, i32 -> vector<20x128xf32>
      %1054 = arith.mulf %18, %1053 : vector<20x128xf32>
      %c122_i32_266 = arith.constant 122 : i32
      %1055 = tpu.dynamic_rotate %65 by %c122_i32_266 dim 1 : vector<20x128xf32>, i32 -> vector<20x128xf32>
      %1056 = arith.mulf %24, %1055 : vector<20x128xf32>
      %1057 = arith.addf %1054, %1056 : vector<20x128xf32>
      %c122_i32_267 = arith.constant 122 : i32
      %1058 = tpu.dynamic_rotate %70 by %c122_i32_267 dim 1 : vector<20x128xf32>, i32 -> vector<20x128xf32>
      %1059 = arith.mulf %30, %1058 : vector<20x128xf32>
      %1060 = arith.addf %1057, %1059 : vector<20x128xf32>
      %c122_i32_268 = arith.constant 122 : i32
      %1061 = tpu.dynamic_rotate %86 by %c122_i32_268 dim 1 : vector<20x128xf32>, i32 -> vector<20x128xf32>
      %1062 = arith.addf %33, %1061 : vector<20x128xf32>
      %1063 = arith.addf %1062, %1060 : vector<20x128xf32>
      %1064 = vector.broadcast %8 : f32 to vector<20x128xf32>
      %1065 = arith.mulf %1064, %1063 : vector<20x128xf32>
      %c127_i32_269 = arith.constant 127 : i32
      %1066 = tpu.dynamic_rotate %1063 by %c127_i32_269 dim 1 : vector<20x128xf32>, i32 -> vector<20x128xf32>
      %1067 = vector.broadcast %9 : f32 to vector<20x128xf32>
      %1068 = arith.mulf %1067, %1066 : vector<20x128xf32>
      %1069 = arith.addf %1065, %1068 : vector<20x128xf32>
      %c1_i32_270 = arith.constant 1 : i32
      %1070 = tpu.dynamic_rotate %1063 by %c1_i32_270 dim 1 : vector<20x128xf32>, i32 -> vector<20x128xf32>
      %1071 = vector.broadcast %7 : f32 to vector<20x128xf32>
      %1072 = arith.mulf %1071, %1070 : vector<20x128xf32>
      %1073 = arith.addf %1069, %1072 : vector<20x128xf32>
      %c126_i32_271 = arith.constant 126 : i32
      %1074 = tpu.dynamic_rotate %1063 by %c126_i32_271 dim 1 : vector<20x128xf32>, i32 -> vector<20x128xf32>
      %1075 = vector.broadcast %10 : f32 to vector<20x128xf32>
      %1076 = arith.mulf %1075, %1074 : vector<20x128xf32>
      %1077 = arith.addf %1073, %1076 : vector<20x128xf32>
      %c2_i32_272 = arith.constant 2 : i32
      %1078 = tpu.dynamic_rotate %1063 by %c2_i32_272 dim 1 : vector<20x128xf32>, i32 -> vector<20x128xf32>
      %1079 = vector.broadcast %6 : f32 to vector<20x128xf32>
      %1080 = arith.mulf %1079, %1078 : vector<20x128xf32>
      %1081 = arith.addf %1077, %1080 : vector<20x128xf32>
      %1082 = vector.extract_strided_slice %1081 {offsets = [0, 0], sizes = [16, 128], strides = [1, 1]} : vector<20x128xf32> to vector<16x128xf32>
      %1083 = vector.broadcast %1 : f32 to vector<16x128xf32>
      %1084 = arith.mulf %1083, %1082 : vector<16x128xf32>
      %1085 = vector.extract_strided_slice %1081 {offsets = [1, 0], sizes = [16, 128], strides = [1, 1]} : vector<20x128xf32> to vector<16x128xf32>
      %1086 = vector.broadcast %2 : f32 to vector<16x128xf32>
      %1087 = arith.mulf %1086, %1085 : vector<16x128xf32>
      %1088 = arith.addf %1084, %1087 : vector<16x128xf32>
      %1089 = vector.extract_strided_slice %1081 {offsets = [2, 0], sizes = [16, 128], strides = [1, 1]} : vector<20x128xf32> to vector<16x128xf32>
      %1090 = vector.broadcast %3 : f32 to vector<16x128xf32>
      %1091 = arith.mulf %1090, %1089 : vector<16x128xf32>
      %1092 = arith.addf %1088, %1091 : vector<16x128xf32>
      %1093 = vector.extract_strided_slice %1081 {offsets = [3, 0], sizes = [16, 128], strides = [1, 1]} : vector<20x128xf32> to vector<16x128xf32>
      %1094 = vector.broadcast %4 : f32 to vector<16x128xf32>
      %1095 = arith.mulf %1094, %1093 : vector<16x128xf32>
      %1096 = arith.addf %1092, %1095 : vector<16x128xf32>
      %1097 = vector.extract_strided_slice %1081 {offsets = [4, 0], sizes = [16, 128], strides = [1, 1]} : vector<20x128xf32> to vector<16x128xf32>
      %1098 = vector.broadcast %5 : f32 to vector<16x128xf32>
      %1099 = arith.mulf %1098, %1097 : vector<16x128xf32>
      %1100 = arith.addf %1096, %1099 : vector<16x128xf32>
      %1101 = vector.broadcast %0 : f32 to vector<16x128xf32>
      %1102 = arith.subf %1100, %1101 : vector<16x128xf32>
      %c6_i32_273 = arith.constant 6 : i32
      %1103 = vector.broadcast %c6_i32_273 : i32 to vector<16x128xi32>
      %1104 = arith.addi %40, %1103 : vector<16x128xi32>
      %c0_i32_274 = arith.constant 0 : i32
      %1105 = vector.broadcast %c0_i32_274 : i32 to vector<16x128xi32>
      %1106 = arith.cmpi sge, %1104, %1105 : vector<16x128xi32>
      %c6_i32_275 = arith.constant 6 : i32
      %1107 = vector.broadcast %c6_i32_275 : i32 to vector<16x128xi32>
      %1108 = arith.addi %40, %1107 : vector<16x128xi32>
      %c48_i32_276 = arith.constant 48 : i32
      %1109 = vector.broadcast %c48_i32_276 : i32 to vector<16x128xi32>
      %1110 = arith.cmpi slt, %1108, %1109 : vector<16x128xi32>
      %1111 = arith.andi %1106, %1110 : vector<16x128xi1>
      %1112 = arith.andi %95, %1111 : vector<16x128xi1>
      %cst_277 = arith.constant 5.000000e+00 : f32
      %1113 = vector.broadcast %cst_277 : f32 to vector<16x128xf32>
      %1114 = arith.cmpf ole, %1102, %1113 : vector<16x128xf32>
      %1115 = arith.andi %1112, %1114 : vector<16x128xi1>
      %cst_278 = arith.constant 0.000000e+00 : f32
      %1116 = vector.broadcast %cst_278 : f32 to vector<16x128xf32>
      %1117 = arith.maximumf %1102, %1116 : vector<16x128xf32>
      %cst_279 = arith.constant 0.000000e+00 : f32
      %1118 = vector.broadcast %cst_279 : f32 to vector<16x128xf32>
      %1119 = arith.subf %1118, %1117 : vector<16x128xf32>
      %1120 = math.exp %1119 : vector<16x128xf32>
      %cst_280 = arith.constant 0.000000e+00 : f32
      %1121 = vector.broadcast %cst_280 : f32 to vector<16x128xf32>
      %1122 = arith.select %1115, %1120, %1121 : vector<16x128xi1>, vector<16x128xf32>
      %1123 = arith.addf %1043, %1122 : vector<16x128xf32>
      %c122_i32_281 = arith.constant 122 : i32
      %1124 = tpu.dynamic_rotate %74 by %c122_i32_281 dim 1 : vector<16x128xf32>, i32 -> vector<16x128xf32>
      %1125 = arith.mulf %1122, %1124 : vector<16x128xf32>
      %1126 = arith.addf %1046, %1125 : vector<16x128xf32>
      %c122_i32_282 = arith.constant 122 : i32
      %1127 = tpu.dynamic_rotate %78 by %c122_i32_282 dim 1 : vector<16x128xf32>, i32 -> vector<16x128xf32>
      %1128 = arith.mulf %1122, %1127 : vector<16x128xf32>
      %1129 = arith.addf %1049, %1128 : vector<16x128xf32>
      %c122_i32_283 = arith.constant 122 : i32
      %1130 = tpu.dynamic_rotate %82 by %c122_i32_283 dim 1 : vector<16x128xf32>, i32 -> vector<16x128xf32>
      %1131 = arith.mulf %1122, %1130 : vector<16x128xf32>
      %1132 = arith.addf %1052, %1131 : vector<16x128xf32>
      %c0_284 = arith.constant 0 : index
      %c0_285 = arith.constant 0 : index
      %1133 = vector.load %arg7[%c0_284, %c0_285] : memref<16x128xf32, #tpu.memory_space<vmem>>, vector<16x128xf32>
      %1134 = arith.addf %1133, %1123 : vector<16x128xf32>
      %c0_286 = arith.constant 0 : index
      %c0_287 = arith.constant 0 : index
      %1135 = vector.load %arg7[%c0_286, %c0_287] : memref<16x128xf32, #tpu.memory_space<vmem>>, vector<16x128xf32>
      tpu.vector_store %arg7[%c0_286, %c0_287], %1134 {strides = array<i32>} : memref<16x128xf32, #tpu.memory_space<vmem>>, vector<16x128xf32>,
      %c0_288 = arith.constant 0 : index
      %c0_289 = arith.constant 0 : index
      %c0_290 = arith.constant 0 : index
      %1136 = vector.load %arg8[%c0_288, %c0_289, %c0_290] : memref<3x16x128xf32, #tpu.memory_space<vmem>>, vector<1x16x128xf32>
      %1137 = vector.shape_cast %1136 : vector<1x16x128xf32> to vector<16x128xf32>
      %1138 = arith.addf %1137, %1126 : vector<16x128xf32>
      %c0_291 = arith.constant 0 : index
      %c0_292 = arith.constant 0 : index
      %c0_293 = arith.constant 0 : index
      %1139 = vector.load %arg8[%c0_291, %c0_292, %c0_293] : memref<3x16x128xf32, #tpu.memory_space<vmem>>, vector<1x16x128xf32>
      %1140 = vector.shape_cast %1139 : vector<1x16x128xf32> to vector<16x128xf32>
      %1141 = vector.shape_cast %1138 : vector<16x128xf32> to vector<1x16x128xf32>
      tpu.vector_store %arg8[%c0_291, %c0_292, %c0_293], %1141 {strides = array<i32>} : memref<3x16x128xf32, #tpu.memory_space<vmem>>, vector<1x16x128xf32>,
      %c1_294 = arith.constant 1 : index
      %c0_295 = arith.constant 0 : index
      %c0_296 = arith.constant 0 : index
      %1142 = vector.load %arg8[%c1_294, %c0_295, %c0_296] : memref<3x16x128xf32, #tpu.memory_space<vmem>>, vector<1x16x128xf32>
      %1143 = vector.shape_cast %1142 : vector<1x16x128xf32> to vector<16x128xf32>
      %1144 = arith.addf %1143, %1129 : vector<16x128xf32>
      %c1_297 = arith.constant 1 : index
      %c0_298 = arith.constant 0 : index
      %c0_299 = arith.constant 0 : index
      %1145 = vector.load %arg8[%c1_297, %c0_298, %c0_299] : memref<3x16x128xf32, #tpu.memory_space<vmem>>, vector<1x16x128xf32>
      %1146 = vector.shape_cast %1145 : vector<1x16x128xf32> to vector<16x128xf32>
      %1147 = vector.shape_cast %1144 : vector<16x128xf32> to vector<1x16x128xf32>
      tpu.vector_store %arg8[%c1_297, %c0_298, %c0_299], %1147 {strides = array<i32>} : memref<3x16x128xf32, #tpu.memory_space<vmem>>, vector<1x16x128xf32>,
      %c2_300 = arith.constant 2 : index
      %c0_301 = arith.constant 0 : index
      %c0_302 = arith.constant 0 : index
      %1148 = vector.load %arg8[%c2_300, %c0_301, %c0_302] : memref<3x16x128xf32, #tpu.memory_space<vmem>>, vector<1x16x128xf32>
      %1149 = vector.shape_cast %1148 : vector<1x16x128xf32> to vector<16x128xf32>
      %1150 = arith.addf %1149, %1132 : vector<16x128xf32>
      %c2_303 = arith.constant 2 : index
      %c0_304 = arith.constant 0 : index
      %c0_305 = arith.constant 0 : index
      %1151 = vector.load %arg8[%c2_303, %c0_304, %c0_305] : memref<3x16x128xf32, #tpu.memory_space<vmem>>, vector<1x16x128xf32>
      %1152 = vector.shape_cast %1151 : vector<1x16x128xf32> to vector<16x128xf32>
      %1153 = vector.shape_cast %1150 : vector<16x128xf32> to vector<1x16x128xf32>
      tpu.vector_store %arg8[%c2_303, %c0_304, %c0_305], %1153 {strides = array<i32>} : memref<3x16x128xf32, #tpu.memory_space<vmem>>, vector<1x16x128xf32>,
    }
    %c13_i32_27 = arith.constant 13 : i32
    %c0_28 = arith.constant 0 : index
    %c8 = arith.constant 8 : index
    %46 = vector.load %arg7[%c0_28, %c8] : memref<16x128xf32, #tpu.memory_space<vmem>>, vector<16x48xf32>
    %47 = tpu.reciprocal %46 : vector<16x48xf32> -> vector<16x48xf32>
    %c0_29 = arith.constant 0 : index
    %c0_30 = arith.constant 0 : index
    %c8_31 = arith.constant 8 : index
    %48 = vector.load %arg8[%c0_29, %c0_30, %c8_31] : memref<3x16x128xf32, #tpu.memory_space<vmem>>, vector<3x16x48xf32>
    %49 = vector.shape_cast %47 : vector<16x48xf32> to vector<1x16x48xf32>
    %50 = vector.broadcast %49 : vector<1x16x48xf32> to vector<3x16x48xf32>
    %51 = arith.mulf %48, %50 : vector<3x16x48xf32>
    %c0_32 = arith.constant 0 : index
    %c0_33 = arith.constant 0 : index
    %c0_34 = arith.constant 0 : index
    %52 = vector.load %arg6[%c0_32, %c0_33, %c0_34] : memref<3x16x48xf32, #tpu.memory_space<vmem>>, vector<3x16x48xf32>
    tpu.vector_store %arg6[%c0_32, %c0_33, %c0_34], %51 {strides = array<i32>} : memref<3x16x48xf32, #tpu.memory_space<vmem>>, vector<3x16x48xf32>,
    return
  }
  func.func @transform_0(%arg0: i32) -> i32 {
    %c0_i32 = arith.constant 0 : i32
    %c0_i32_0 = arith.constant 0 : i32
    return %c0_i32 : i32
  }
  func.func @transform_1(%arg0: i32) -> i32 {
    %c0_i32 = arith.constant 0 : i32
    %c0_i32_0 = arith.constant 0 : i32
    return %c0_i32 : i32
  }
  func.func @transform_2(%arg0: i32) -> i32 {
    %c0_i32 = arith.constant 0 : i32
    %c0_i32_0 = arith.constant 0 : i32
    return %c0_i32 : i32
  }
  func.func @transform_3(%arg0: i32) -> (i32, i32, i32) {
    %c0_i32 = arith.constant 0 : i32
    %c0_i32_0 = arith.constant 0 : i32
    %c0_i32_1 = arith.constant 0 : i32
    %c0_i32_2 = arith.constant 0 : i32
    return %c0_i32, %c0_i32_0, %c0_i32_1 : i32, i32, i32
  }
  func.func @transform_4(%arg0: i32) -> (i32, i32) {
    %c0_i32 = arith.constant 0 : i32
    %c0_i32_0 = arith.constant 0 : i32
    %c0_i32_1 = arith.constant 0 : i32
    return %c0_i32, %c0_i32_0 : i32, i32
  }
  func.func @transform_5(%arg0: i32) -> (i32, i32, i32) {
    %c0_i32 = arith.constant 0 : i32
    %c0_i32_0 = arith.constant 0 : i32
    %c0_i32_1 = arith.constant 0 : i32
    return %c0_i32, %arg0, %c0_i32_0 : i32, i32, i32
  }
}

</mosaic_0001>

<bundles_post_ra>
// kernel: denoise_forward.1
= control target key start
LH: loop header
LB: loop body
LE: loop exit
PB: predicated region body
PF: predicated region fallthrough
CT: control target
= control target key end

     0   :  { %s6165_s0 = inlined_call_operand.vmem [shape: f32[5], index: 0, kind: input, shape index: {}]   ;;  %s6166_s1 = inlined_call_operand.vmem [shape: f32[5], index: 1, kind: input, shape index: {}]   ;;  %s6167_s2 = inlined_call_operand.<no memory space> [shape: f32[1], index: 2, kind: input, shape index: {}]   ;;  %s6168_s3 = inlined_call_operand.vmem [shape: f32[3,64,128], index: 3, kind: input, shape index: {}]   ;;  %s6169_s4 = inlined_call_operand.vmem [shape: f32[64,128], index: 4, kind: input, shape index: {}]   ;;  %s6170_s5 = inlined_call_operand.hbm [shape: f32[3,48,48], index: 5, kind: output, shape index: {}]  }
   0x1   :  { %6350 = sst [smem:[#allocation58_spill]] %s6165_s0 }
   0x2   :  { %6351 = sst [smem:[#allocation59_spill]] %s6166_s1 }
   0x3   :  { %6352 = sst [smem:[#allocation60_spill]] %s6168_s3 }
   0x4   :  { %10 = sst [smem:[#allocation4]] %s6167_s2 }
   0x5   :  { %11 = vsyncpa [#allocation7], 0 }
   0x6   :  { %12 = vsyncpa [#allocation9], 0 }
   0x7   :  { %13 = vsyncpa [#allocation6], 0 }
   0x8   :  { %15 = vsyncpa [#allocation6 + $0x1], 0  ;;  %s3656_s20 = smov 0   ;;  %s3658_s21 = smov 0  }
   0x9   :  { %s3660_s22 = smov 0   ;;  %s3662_s23 = smov 0  }
   0xa LB: > { %s3677_s2 = sadd.s32 4294967295, %s3594_s23   ;;  %s3248_s24 = sadd.s32 4294967294, %s3594_s23   ;;  %s3594_s23 = sphi %s3662_s23, %s6658_s23   ;;  %s3590_s22 = sphi %s3660_s22, %s6657_s22   ;;  %s3586_s21 = sphi %s3658_s21, %s6656_s21   ;;  %s3582_s20 = sphi %s3656_s20, %s6655_s20  }
   0xb   : > { %s3681_s25 = sadd.s32 1, %s3594_s23   ;;  %s133_s26 = sadd.s32 1, %s3590_s22 }
   0xc   : > { %s130_s27 = ssub.s32 %s3594_s23, %s3681_s25  ;;  %p143_p0 = scmp.ne.s32.totalorder %s3590_s22, %s3586_s21 }
   0xd   : > { %p131_p1 = scmp.eq.s32.totalorder %s130_s27, 0  ;;  %p144_p2 = scmp.eq.s32.totalorder %s3677_s2, 2 }
   0xe   : > { %p149_p3 = scmp.ne.s32.totalorder %s3586_s21, %s3582_s20  ;;  %p150_p4 = scmp.eq.s32.totalorder %s3248_s24, 2 }
   0xf   : > { %s3692_s28 = scalar_select %p131_p1, %s3590_s22, %s133_s26  }
  0x10   : > { %p3694_p5 = por %p144_p2, %p143_p0  ;;  %p3698_p6 = por %p150_p4, %p149_p3 }
  0x11   : > { %p3249_p7 = scmp.ge.s32.totalorder %s3594_s23, 1  ;;  %p157_p8 = scmp.lt.s32.totalorder %s3594_s23, 4 }
  0x12   : > { %p3340_p9 = scmp.eq.s32.totalorder %s3677_s2, 0  ;;  %s6355_s0 = sld [smem:[#allocation58_spill]] }
  0x13   : > { %p158_p10 = pnand %p3249_p7, %p157_p8  ;;  %s6356_s1 = sld [smem:[#allocation59_spill]] }
  0x14   : > { %s3600_s12 = smov [#allocation5]   ;;  %s3601_s13 = smov [#allocation8]  }
  0x15   : > { %p3329_p11 = pneg %p158_p10 }
  0x17   : > { %p3330_p12 = pnand %p3340_p9, %p3329_p11  ;;  %201 = sbr.rel (%p158_p10) target bundleno = 2510 (0x9ce), region = 40 }
  0x18   : > { %s169_s8 = sshll.u32 %s6355_s0, 4  ;;  %s170_s8 = int_to_ptr.vmem [resolvable:$true] %s169_s8 }
  0x19   : > { %s179_s11 = sshll.u32 %s6356_s1, 4  ;;  %s180_s11 = int_to_ptr.vmem [resolvable:$true] %s179_s11 }
  0x1a   : > { %3332 = dma.vmem_to_smem (!%p3330_p12), %s170_s8, 16, %s3600_s12, [#allocation7]  }
  0x1b   : > { %3335 = dma.vmem_to_smem (!%p3330_p12), %s180_s11, 16, %s3601_s13, [#allocation9]  }
  0x1c   : > { %3569 = dma.done.wait (%p3340_p9), [#allocation7], 16  }
  0x1d   : > { %3571 = vsyncadd (%p3340_p9), [#allocation7], 4294967280 }
  0x1e   : > { %3573 = dma.done.wait (%p3340_p9), [#allocation9], 16  }
  0x1f   : > { %3575 = vsyncadd (%p3340_p9), [#allocation9], 4294967280 }
  0x20   : > { %213 = sfence }
  0x21   : > { %s6171_s14 = sand.u32 1, %s3586_s21   ;;  %s3722_s15 = sld [smem:[#allocation4]]  ;;  %v273_v0 = vlaneseq  ;;  %v3602_v1 = vmov 0.0  }
  0x22   : > { %s3726_s16 = smul.u32 48, %s6171_s14  ;;  %s3728_s17 = sld [smem:[#allocation5]]  ;;  %282 = vst [vmem:[#allocation2] sm:$0xff] %v3602_v1 }
  0x23   : > { %s3730_s18 = sld [smem:[#allocation5 + $0x1]]  ;;  %s3733_s19 = sshll.u32 %s3677_s2, 4  ;;  %v274_v2 = vshrl.u32 %v273_v0, 7  ;;  %v280_v3 = vand.u32 127, %v273_v0  ;;  %283 = vst [vmem:[#allocation2 + $0x8] sm:$0xff] %v3602_v1 }
  0x24   : > { %s3735_s24 = sld [smem:[#allocation5 + $0x2]]  ;;  %v276_v4 = vstv %s3733_s19  ;;  %284 = vst [vmem:[#allocation3 + $0x28] sm:$0xff] %v3602_v1  ;;  %s3172_s12 = scalar_lea.vmem %s6169_s4, %s3733_s19 }
  0x25   : > { %s3738_s26 = sld [smem:[#allocation5 + $0x3]]  ;;  %v275_v5 = vadd.s32 8, %v274_v2  ;;  %v3744_v6 = vadd.s32 %v276_v4, %v274_v2  ;;  %v3746_v7 = vadd.s32 4294967288, %v280_v3  ;;  %285 = vst [vmem:[#allocation3 + $0x10] sm:$0xff] %v3602_v1  ;;  %v3784_v27 = vld [vmem:[%s3172_s12 + $0x6] sm:$0xff]  ;;  %v3786_v28 = vld [vmem:[%s3172_s12 + $0xe] sm:$0xff] }
  0x26   : > { %s6357_s3 = sld [smem:[#allocation60_spill]]  ;;  %6367 = vst [vmem:[#allocation25_spill] sm:$0xff] %v3784_v27  ;;  %v3788_v29 = vld [vmem:[%s3172_s12 + $0x16] sm:$0xf]  ;;  %s3791_s10 = scalar_lea.vmem [#allocation10], %s3726_s16 }
  0x27   : > { %6358 = vst [vmem:[#allocation16_spill] sm:$0xff] %v3744_v6  ;;  %s3748_s2 = sld [smem:[#allocation5 + $0x4]]  ;;  %v3758_v15 = vadd.s32 %v276_v4, %v275_v5 }
  0x28   : > { %s3750_s8 = sld [smem:[#allocation8]]  ;;  %6368 = vst [vmem:[#allocation26_spill] sm:$0xff] %v3786_v28 }
  0x29   : > { %6361 = vst [vmem:[#allocation19_spill] sm:$0xff] %v3758_v15  ;;  %s3760_s9 = sld [smem:[#allocation8 + $0x1]] }
  0x2a   : > { %s3768_s13 = sld [smem:[#allocation8 + $0x2]]  ;;  %286 = vst [vmem:[#allocation3 + $0x8] sm:$0xff] %v3602_v1 }
  0x2b   : > { %s3774_s27 = sld [smem:[#allocation8 + $0x3]]  ;;  %6369 = vst [vmem:[#allocation27_spill] sm:$0xff] %v3788_v29 }
  0x2c   : > { %s3163_s7 = scalar_lea.vmem %s6357_s3, %s3733_s19  ;;  %s3780_s6 = sld [smem:[#allocation8 + $0x4]]  ;;  %287 = vst [vmem:[#allocation3] sm:$0xff] %v3602_v1 }
  0x2d   : > { %6359 = sst [smem:[#allocation17_spill]] %s3748_s2  ;;  %v3265_v8 = vld [vmem:[%s3163_s7 + $0x6] sm:$0xff]  ;;  %v3266_v9 = vld [vmem:[%s3163_s7 + $0xe] sm:$0xff]  ;;  %v3267_v10 = vld [vmem:[%s3163_s7 + $0x16] sm:$0xf]  ;;  %288 = vst [vmem:[#allocation3 + $0x18] sm:$0xff] %v3602_v1 }
  0x2e   : > { %v3752_v11 = vmul.f32 -2.0, %v3265_v8  ;;  %v3754_v12 = vmul.f32 -2.0, %v3266_v9  ;;  %v3756_v13 = vmul.f32 -2.0, %v3267_v10  ;;  %v3269_v14 = vld [vmem:[%s3163_s7 + $0x46] sm:$0xff]  ;;  %v3270_v16 = vld [vmem:[%s3163_s7 + $0x4e] sm:$0xff]  ;;  %289 = vst [vmem:[#allocation3 + $0x20] sm:$0xff] %v3602_v1 }
  0x2f   : > { %v3271_v17 = vld [vmem:[%s3163_s7 + $0x56] sm:$0xf]  ;;  %v3762_v18 = vmul.f32 -2.0, %v3269_v14  ;;  %v3770_v19 = vmul.f32 -2.0, %v3270_v16  ;;  %v3273_v21 = vld [vmem:[%s3163_s7 + $0x86] sm:$0xff]  ;;  %v3274_v22 = vld [vmem:[%s3163_s7 + $0x8e] sm:$0xff] }
  0x30   : > { %6360 = vst [vmem:[#allocation18_spill] sm:$0xff] %v3756_v13  ;;  %v3772_v20 = vmul.f32 -2.0, %v3271_v17  ;;  %v3275_v23 = vld [vmem:[%s3163_s7 + $0x96] sm:$0xf]  ;;  %v3776_v24 = vmul.f32 -2.0, %v3273_v21  ;;  %v3778_v25 = vmul.f32 -2.0, %v3274_v22 }
  0x31   : > { %6362 = vst [vmem:[#allocation20_spill] sm:$0xff] %v3762_v18  ;;  %v3782_v26 = vmul.f32 -2.0, %v3275_v23  ;;  %s3793_s7 = smov 0  }
  0x32   : > { %6363 = vst [vmem:[#allocation21_spill] sm:$0xff] %v3772_v20 }
  0x33   : > { %6364 = vst [vmem:[#allocation22_spill] sm:$0xff] %v3776_v24 }
  0x34   : > { %6365 = vst [vmem:[#allocation23_spill] sm:$0xff] %v3778_v25 }
  0x35   : > { %6366 = vst [vmem:[#allocation24_spill] sm:$0xff] %v3782_v26 }
  0x36 LB: >> { %v6375_v29 = vld [vmem:[#allocation27_spill] sm:$0xff]  ;;  %v6377_v28 = vld [vmem:[#allocation26_spill] sm:$0xff]  ;;  %v6378_v27 = vld [vmem:[#allocation25_spill] sm:$0xff]  ;;  %s6172_s11 = sadd.s32 4294967290, %s3598_s7  ;;  %s6379_s3 = sld [smem:[#allocation60_spill]]  ;;  %vm448_vm0 = vcmask 1046528   ;;  %s3598_s7 = sphi %s3793_s7, %s295_s7  }
  0x37   : >> { %v6372_v13 = vld [vmem:[#allocation18_spill] sm:$0xff]  ;;  %s3175_s14 = sadd.s32 %s6172_s11, %s3733_s19  ;;  %s3603_s16 = smov 6   ;;  %vm465_vm1 = vcmask 1045504   ;;  %vm482_vm2 = vcmask 1044480   ;;  %vm6211_vm3 = vcmask 1043456   ;;  %v6412_v15 = vld [vmem:[#allocation19_spill] sm:$0xff] }
  0x38   : >> { %v6371_v18 = vld [vmem:[#allocation20_spill] sm:$0xff]  ;;  %s3855_s11 = scalar_lea.vmem %s6169_s4, %s3175_s14  ;;  %s6320_s0 = smov 1   ;;  %v6413_v6 = vld [vmem:[#allocation16_spill] sm:$0xff] }
  0x39   : >> { %v6373_v20 = vld [vmem:[#allocation21_spill] sm:$0xff]  ;;  %v3858_v39 = vld [vmem:[%s3855_s11 + $0xe] sm:$0xff]  ;;  %v3864_v41 = vld [vmem:[%s3855_s11 + $0x16] sm:$0xf]  ;;  %s6175_s12 = smov 126   ;;  %s6405_s2 = sld [smem:[#allocation17_spill]] }
  0x3a   : >> { %v6376_v24 = vld [vmem:[#allocation22_spill] sm:$0xff]  ;;  %6389 = vst [vmem:[#allocation37_spill] sm:$0xff] %v3858_v39 }
  0x3b   : >> { %v6370_v25 = vld [vmem:[#allocation23_spill] sm:$0xff]  ;;  %v3861_v40 = vld [vmem:[%s3855_s11 + $0x6] sm:$0xff]  ;;  %6391 = vst [vmem:[#allocation39_spill] sm:$0xff] %v3864_v41 }
  0x3c   : >> { %v6374_v26 = vld [vmem:[#allocation24_spill] sm:$0xff]  ;;  %s3805_s1 = scalar_lea.vmem %s6379_s3, %s3175_s14  ;;  %6390 = vst [vmem:[#allocation38_spill] sm:$0xff] %v3861_v40  ;;  %s6173_s14 = smov 5  }
  0x3d   : >> { %v3808_v30 = vld [vmem:[%s3805_s1 + $0x16] sm:$0xf]  ;;  %v3811_v31 = vld [vmem:[%s3805_s1 + $0x6] sm:$0xff]  ;;  %v3814_v32 = vld [vmem:[%s3805_s1 + $0x4e] sm:$0xff]  ;;  %s6399_s3 = smov 126  }
  0x3e   : >> { %6380 = vst [vmem:[#allocation28_spill] sm:$0xff] %v3808_v30  ;;  %341 = vrot.lane.b32.xlu1 %v3808_v30, %s3603_s16  ;;  %337 = vrot.lane.b32.xlu0 %v3811_v31, %s3603_s16  ;;  %v3823_v33 = vld [vmem:[%s3805_s1 + $0x46] sm:$0xff]  ;;  %v3826_v34 = vld [vmem:[%s3805_s1 + $0xe] sm:$0xff] }
  0x3f   : >> { %6381 = vst [vmem:[#allocation29_spill] sm:$0xff] %v3811_v31  ;;  %348 = vrot.lane.b32.xlu2 %v3814_v32, %s3603_s16  ;;  %v3829_v35 = vld [vmem:[%s3805_s1 + $0x56] sm:$0xf]  ;;  %v3838_v36 = vld [vmem:[%s3805_s1 + $0x8e] sm:$0xff]  ;;  %v3841_v37 = vld [vmem:[%s3805_s1 + $0x86] sm:$0xff] }
  0x40   : >> { %6382 = vst [vmem:[#allocation30_spill] sm:$0xff] %v3814_v32  ;;  %v3844_v38 = vld [vmem:[%s3805_s1 + $0x96] sm:$0xf]  ;;  %v3876_v43 = vld [vmem:[%s3805_s1 + $0x8] sm:$0xff] }
  0x41   : >> { %6383 = vst [vmem:[#allocation31_spill] sm:$0xff] %v3823_v33  ;;  %v3873_v42 = vld [vmem:[%s3805_s1 + $0x10] sm:$0xff]  ;;  %v3883_v44 = vld [vmem:[%s3805_s1 + $0x48] sm:$0xff] }
  0x42   : >> { %6384 = vst [vmem:[#allocation32_spill] sm:$0xff] %v3826_v34  ;;  %v3888_v45 = vld [vmem:[%s3805_s1 + $0x88] sm:$0xff]  ;;  %v3891_v46 = vld [vmem:[%s3805_s1 + $0x50] sm:$0xff] }
  0x43   : >> { %6385 = vst [vmem:[#allocation33_spill] sm:$0xff] %v3829_v35  ;;  %v3898_v47 = vld [vmem:[%s3805_s1 + $0x90] sm:$0xff] }
  0x44   : >> { %6386 = vst [vmem:[#allocation34_spill] sm:$0xff] %v3838_v36 }
  0x45   : >> { %6387 = vst [vmem:[#allocation35_spill] sm:$0xff] %v3841_v37 }
  0x46   : >> { %346 = vrot.lane.b32.xlu1 %v3823_v33, %s3603_s16  ;;  %339 = vrot.lane.b32.xlu0 %v3826_v34, %s3603_s16  ;;  %6388 = vst [vmem:[#allocation36_spill] sm:$0xff] %v3844_v38 }
  0x47   : >> { %350 = vrot.lane.b32.xlu2 %v3829_v35, %s3603_s16  ;;  %6392 = vst [vmem:[#allocation40_spill] sm:$0xff] %v3873_v42 }
  0x48   : >> { %6393 = vst [vmem:[#allocation41_spill] sm:$0xff] %v3876_v43 }
  0x49   : >> { %6394 = vst [vmem:[#allocation42_spill] sm:$0xff] %v3883_v44 }
  0x4a   : >> { %6395 = vst [vmem:[#allocation43_spill] sm:$0xff] %v3888_v45 }
  0x4b   : >> { %6396 = vst [vmem:[#allocation44_spill] sm:$0xff] %v3891_v46 }
  0x4c   : >> { %6397 = vst [vmem:[#allocation45_spill] sm:$0xff] %v3898_v47 }
  0x4e   : >> { %360 = vrot.lane.b32.xlu1 %v3838_v36, %s3603_s16  ;;  %358 = vrot.lane.b32.xlu0 %v3841_v37, %s3603_s16 }
  0x4f   : >> { %362 = vrot.lane.b32.xlu2 %v3844_v38, %s3603_s16 }
  0x56   : >> { %372 = vrot.lane.b32.xlu1 %v3858_v39, %s3603_s16  ;;  %370 = vrot.lane.b32.xlu0 %v3861_v40, %s3603_s16 }
  0x57   : >> { %374 = vrot.lane.b32.xlu2 %v3864_v41, %s3603_s16 }
  0x5e   : >> { %536 = vrot.lane.b32.xlu1 %v3873_v42, %s3603_s16  ;;  %534 = vrot.lane.b32.xlu0 %v3876_v43, %s3603_s16 }
  0x5f   : >> { %542 = vrot.lane.b32.xlu2 %v3883_v44, %s3603_s16 }
  0x66   : >> { %550 = vrot.lane.b32.xlu1 %v3888_v45, %s3603_s16  ;;  %544 = vrot.lane.b32.xlu0 %v3891_v46, %s3603_s16 }
  0x67   : >> { %552 = vrot.lane.b32.xlu2 %v3898_v47, %s3603_s16  ;;  %s6177_s16 = smov 127  }
  0x6e   : >> { %560 = vrot.lane.b32.xlu1 %v3826_v34, %s6173_s14  ;;  %558 = vrot.lane.b32.xlu0 %v3811_v31, %s6173_s14 }
  0x6f   : >> { %562 = vrot.lane.b32.xlu2 %v3808_v30, %s6173_s14 }
  0x76   : >> { %569 = vrot.lane.b32.xlu1 %v3814_v32, %s6173_s14  ;;  %567 = vrot.lane.b32.xlu0 %v3823_v33, %s6173_s14 }
  0x77   : >> { %571 = vrot.lane.b32.xlu2 %v3829_v35, %s6173_s14 }
  0x7e   : >> { %581 = vrot.lane.b32.xlu1 %v3838_v36, %s6173_s14  ;;  %579 = vrot.lane.b32.xlu0 %v3841_v37, %s6173_s14 }
  0x7f   : >> { %583 = vrot.lane.b32.xlu2 %v3844_v38, %s6173_s14 }
  0x86   : >> { %593 = vrot.lane.b32.xlu1 %v3858_v39, %s6173_s14  ;;  %591 = vrot.lane.b32.xlu0 %v3861_v40, %s6173_s14 }
  0x87   : >> { %595 = vrot.lane.b32.xlu2 %v3864_v41, %s6173_s14  ;;  %s6212_s14 = smov 2  }
  0x99   : >> { %v349_v48 = vpop.permute.xlu2 %348 }
  0x9a   : >> { %v353_v2 = vmul.f32 %v349_v48, %v3770_v19 }
  0xa1   : >> { %v351_v49 = vpop.permute.xlu2 %350 }
  0xa2   : >> { %v354_v51 = vmul.f32 %v351_v49, %v6373_v20 }
  0xa9   : >> { %v363_v50 = vpop.permute.xlu2 %362 }
  0xaa   : >> { %v366_v54 = vmul.f32 %v363_v50, %v6374_v26 }
  0xb0   : >> { %v342_v52 = vpop.permute.xlu1 %341  ;;  %v338_v53 = vpop.permute.xlu0 %337 }
  0xb1   : >> { %v345_v55 = vmul.f32 %v342_v52, %v6372_v13  ;;  %v375_v56 = vpop.permute.xlu2 %374  ;;  %v343_v5 = vmul.f32 %v338_v53, %v3752_v11 }
  0xb2   : >> { %v378_v58 = vadd.f32 %v6375_v29, %v375_v56 }
  0xb3   : >> { %v357_v57 = vadd.f32 %v354_v51, %v345_v55 }
  0xb5   : >> { %v369_v59 = vadd.f32 %v366_v54, %v357_v57 }
  0xb7   : >> { %v3930_v60 = vadd.f32 %v378_v58, %v369_v59 }
  0xb8   : >> { %v347_v61 = vpop.permute.xlu1 %346  ;;  %v340_v62 = vpop.permute.xlu0 %339 }
  0xb9   : >> { %390 = vrot.lane.b32.xlu2 %v3930_v60, %s6177_s16  ;;  %v3934_v63 = vpop.permute.xlu2 %542  ;;  %v352_v3 = vmul.f32 %v347_v61, %v6371_v18  ;;  %v344_v4 = vmul.f32 %v340_v62, %v3754_v12 }
  0xbb   : >> { %v355_v14 = vadd.f32 %v352_v3, %v343_v5  ;;  %v356_v16 = vadd.f32 %v353_v2, %v344_v4 }
  0xc0   : >> { %v361_v0 = vpop.permute.xlu1 %360  ;;  %v359_v1 = vpop.permute.xlu0 %358 }
  0xc1   : >> { %403 = vrot.lane.b32.xlu2 %v3930_v60, %s6320_s0  ;;  %v365_v8 = vmul.f32 %v361_v0, %v6370_v25  ;;  %v364_v9 = vmul.f32 %v359_v1, %v6376_v24  ;;  %v3944_v10 = vpop.permute.xlu2 %552 }
  0xc3   : >> { %v368_v22 = vadd.f32 %v365_v8, %v356_v16  ;;  %v367_v23 = vadd.f32 %v364_v9, %v355_v14 }
  0xc8   : >> { %v373_v17 = vpop.permute.xlu1 %372  ;;  %v371_v21 = vpop.permute.xlu0 %370 }
  0xc9   : >> { %v377_v48 = vadd.f32 %v6377_v28, %v373_v17  ;;  %v376_v49 = vadd.f32 %v6378_v27, %v371_v21  ;;  %416 = vrot.lane.b32.xlu2 %v3930_v60, %s6175_s12  ;;  %v563_v52 = vpop.permute.xlu2 %562 }
  0xca   : >> { %v566_v58 = vmul.f32 %v563_v52, %v6372_v13 }
  0xcb   : >> { %v3950_v50 = vadd.f32 %v377_v48, %v368_v22  ;;  %v3952_v51 = vadd.f32 %v376_v49, %v367_v23 }
  0xcd   : >> { %388 = vrot.lane.b32.xlu1 %v3950_v50, %s6177_s16  ;;  %386 = vrot.lane.b32.xlu0 %v3952_v51, %s6177_s16 }
  0xd0   : >> { %v3958_v53 = vpop.permute.xlu1 %536  ;;  %v3960_v54 = vpop.permute.xlu0 %534 }
  0xd1   : >> { %429 = vrot.lane.b32.xlu2 %v3930_v60, %s6212_s14  ;;  %v572_v55 = vpop.permute.xlu2 %571 }
  0xd2   : >> { %v575_v59 = vmul.f32 %v572_v55, %v6373_v20 }
  0xd4   : >> { %v578_v1 = vadd.f32 %v575_v59, %v566_v58 }
  0xd5   : >> { %401 = vrot.lane.b32.xlu1 %v3950_v50, %s6320_s0  ;;  %399 = vrot.lane.b32.xlu0 %v3952_v51, %s6320_s0 }
  0xd8   : >> { %v3968_v56 = vpop.permute.xlu1 %550  ;;  %v3970_v57 = vpop.permute.xlu0 %544 }
  0xd9   : >> { %v584_v61 = vpop.permute.xlu2 %583 }
  0xda   : >> { %v587_v2 = vmul.f32 %v584_v61, %v6374_v26 }
  0xdc   : >> { %v590_v3 = vadd.f32 %v587_v2, %v578_v1 }
  0xdd   : >> { %414 = vrot.lane.b32.xlu1 %v3950_v50, %s6175_s12  ;;  %412 = vrot.lane.b32.xlu0 %v3952_v51, %s6175_s12 }
  0xe0   : >> { %v561_v62 = vpop.permute.xlu1 %560  ;;  %v559_v0 = vpop.permute.xlu0 %558 }
  0xe1   : >> { %v596_v4 = vpop.permute.xlu2 %595  ;;  %v565_v23 = vmul.f32 %v561_v62, %v3754_v12  ;;  %v564_v48 = vmul.f32 %v559_v0, %v3752_v11 }
  0xe2   : >> { %v599_v5 = vadd.f32 %v6375_v29, %v596_v4 }
  0xe4   : >> { %v3984_v14 = vadd.f32 %v599_v5, %v590_v3 }
  0xe5   : >> { %427 = vrot.lane.b32.xlu1 %v3950_v50, %s6212_s14  ;;  %425 = vrot.lane.b32.xlu0 %v3952_v51, %s6212_s14 }
  0xe6   : >> { %610 = vrot.lane.b32.xlu2 %v3984_v14, %s6177_s16 }
  0xe8   : >> { %v570_v8 = vpop.permute.xlu1 %569  ;;  %v568_v9 = vpop.permute.xlu0 %567 }
  0xe9   : >> { %v574_v21 = vmul.f32 %v570_v8, %v3770_v19  ;;  %v573_v22 = vmul.f32 %v568_v9, %v6371_v18 }
  0xeb   : >> { %v577_v55 = vadd.f32 %v574_v21, %v565_v23  ;;  %v576_v58 = vadd.f32 %v573_v22, %v564_v48  ;;  %v4055_v22 = vstv %s3774_s27  ;;  %v4062_v23 = vstv %s3768_s13 }
  0xec   : >> { %6400 = vst [vmem:[#allocation46_spill] sm:$0xff] %v4055_v22  ;;  %v4065_v48 = vstv %s3760_s9 }
  0xed   : >> { %6401 = vst [vmem:[#allocation47_spill] sm:$0xff] %v4062_v23 }
  0xee   : >> { %622 = vrot.lane.b32.xlu2 %v3984_v14, %s6320_s0  ;;  %6402 = vst [vmem:[#allocation48_spill] sm:$0xff] %v4065_v48 }
  0xf0   : >> { %v582_v16 = vpop.permute.xlu1 %581  ;;  %v580_v17 = vpop.permute.xlu0 %579 }
  0xf1   : >> { %v586_v49 = vmul.f32 %v582_v16, %v6370_v25  ;;  %v585_v52 = vmul.f32 %v580_v17, %v6376_v24 }
  0xf3   : >> { %v589_v1 = vadd.f32 %v586_v49, %v577_v55  ;;  %v588_v2 = vadd.f32 %v585_v52, %v576_v58 }
  0xf6   : >> { %634 = vrot.lane.b32.xlu2 %v3984_v14, %s6175_s12  ;;  %s6398_s12 = smov 5  }
  0xf8   : >> { %v594_v59 = vpop.permute.xlu1 %593  ;;  %v592_v61 = vpop.permute.xlu0 %591 }
  0xf9   : >> { %v598_v3 = vadd.f32 %v6377_v28, %v594_v59  ;;  %v597_v4 = vadd.f32 %v6378_v27, %v592_v61  ;;  %v4071_v59 = vstv %s3780_s6  ;;  %v385_v61 = vmul.f32 %v4062_v23, %v3930_v60 }
  0xfa   : >> { %6403 = vst [vmem:[#allocation49_spill] sm:$0xff] %v4071_v59 }
  0xfb   : >> { %v4000_v62 = vadd.f32 %v598_v3, %v589_v1  ;;  %v4002_v0 = vadd.f32 %v597_v4, %v588_v2  ;;  %v4077_v2 = vstv %s3750_s8 }
  0xfc   : >> { %6404 = vst [vmem:[#allocation50_spill] sm:$0xff] %v4077_v2 }
  0xfd   : >> { %608 = vrot.lane.b32.xlu1 %v4000_v62, %s6177_s16  ;;  %606 = vrot.lane.b32.xlu0 %v4002_v0, %s6177_s16  ;;  %s3609_s16 = smov 4  }
  0xfe   : >> { %646 = vrot.lane.b32.xlu2 %v3984_v14, %s6212_s14 }
 0x105   : >> { %620 = vrot.lane.b32.xlu1 %v4000_v62, %s6320_s0  ;;  %618 = vrot.lane.b32.xlu0 %v4002_v0, %s6320_s0 }
 0x106   : >> { %748 = vrot.lane.b32.xlu2 %v3883_v44, %s6398_s12 }
 0x10d   : >> { %632 = vrot.lane.b32.xlu1 %v4000_v62, %s6399_s3  ;;  %630 = vrot.lane.b32.xlu0 %v4002_v0, %s6399_s3 }
 0x10e   : >> { %758 = vrot.lane.b32.xlu2 %v3898_v47, %s6398_s12 }
 0x113   : >> { %v391_v5 = vpop.permute.xlu2 %390 }
 0x114   : >> { %v395_v52 = vmul.f32 %v4055_v22, %v391_v5 }
 0x115   : >> { %644 = vrot.lane.b32.xlu1 %v4000_v62, %s6212_s14  ;;  %642 = vrot.lane.b32.xlu0 %v4002_v0, %s6212_s14 }
 0x116   : >> { %768 = vrot.lane.b32.xlu2 %v3808_v30, %s3609_s16  ;;  %v398_v3 = vadd.f32 %v395_v52, %v385_v61  ;;  %v384_v52 = vmul.f32 %v4062_v23, %v3950_v50  ;;  %v4090_v61 = vstv %s3730_s18 }
 0x117   : >> { %6406 = vst [vmem:[#allocation51_spill] sm:$0xff] %v4090_v61 }
 0x11b   : >> { %v404_v8 = vpop.permute.xlu2 %403 }
 0x11c   : >> { %v408_v1 = vmul.f32 %v4065_v48, %v404_v8 }
 0x11d   : >> { %742 = vrot.lane.b32.xlu1 %v3873_v42, %s6398_s12  ;;  %740 = vrot.lane.b32.xlu0 %v3876_v43, %s6398_s12  ;;  %v4114_v43 = vstv %s3728_s17 }
 0x11e   : >> { %777 = vrot.lane.b32.xlu2 %v3829_v35, %s3609_s16  ;;  %6410 = vst [vmem:[#allocation55_spill] sm:$0xff] %v4114_v43 }
 0x123   : >> { %v417_v9 = vpop.permute.xlu2 %416 }
 0x124   : >> { %v421_v4 = vmul.f32 %v4071_v59, %v417_v9  ;;  %v383_v9 = vmul.f32 %v4062_v23, %v3952_v51 }
 0x125   : >> { %756 = vrot.lane.b32.xlu1 %v3888_v45, %s6398_s12  ;;  %750 = vrot.lane.b32.xlu0 %v3891_v46, %s6398_s12  ;;  %s6411_s12 = sadd.s32 4294967290, %s3598_s7  ;;  %s295_s7 = sadd.s32 1, %s3598_s7  }
 0x126   : >> { %789 = vrot.lane.b32.xlu2 %v3844_v38, %s3609_s16  ;;  %p292_p13 = scmp.ge.s32.totalorder %s295_s7, 13  }
 0x12b   : >> { %v430_v16 = vpop.permute.xlu2 %429 }
 0x12c   : >> { %v434_v5 = vmul.f32 %v4077_v2, %v430_v16 }
 0x12d   : >> { %766 = vrot.lane.b32.xlu1 %v3826_v34, %s3609_s16  ;;  %764 = vrot.lane.b32.xlu0 %v3811_v31, %s3609_s16 }
 0x12e   : >> { %801 = vrot.lane.b32.xlu2 %v3864_v41, %s3609_s16 }
 0x135   : >> { %775 = vrot.lane.b32.xlu1 %v3814_v32, %s3609_s16  ;;  %773 = vrot.lane.b32.xlu0 %v3823_v33, %s3609_s16 }
 0x13d   : >> { %787 = vrot.lane.b32.xlu1 %v3838_v36, %s3609_s16  ;;  %785 = vrot.lane.b32.xlu0 %v3841_v37, %s3609_s16 }
 0x13f   : >> { %v389_v17 = vpop.permute.xlu1 %388  ;;  %v387_v21 = vpop.permute.xlu0 %386 }
 0x140   : >> { %v4067_v49 = vpop.permute.xlu2 %610  ;;  %v394_v60 = vmul.f32 %v4055_v22, %v389_v17  ;;  %v393_v8 = vmul.f32 %v4055_v22, %v387_v21  ;;  %v4101_v17 = vstv %s6405_s2  ;;  %s6430_s2 = smov 2  }
 0x141   : >> { %6409 = vst [vmem:[#allocation54_spill] sm:$0xff] %v4101_v17 }
 0x142   : >> { %v397_v21 = vadd.f32 %v394_v60, %v384_v52 }
 0x145   : >> { %799 = vrot.lane.b32.xlu1 %v3858_v39, %s3609_s16  ;;  %797 = vrot.lane.b32.xlu0 %v3861_v40, %s3609_s16  ;;  %v411_v40 = vadd.f32 %v408_v1, %v398_v3  ;;  %v4093_v1 = vstv %s3735_s24  ;;  %v4098_v3 = vstv %s3738_s26 }
 0x146   : >> { %6407 = vst [vmem:[#allocation52_spill] sm:$0xff] %v4093_v1 }
 0x147   : >> { %v402_v55 = vpop.permute.xlu1 %401  ;;  %v400_v58 = vpop.permute.xlu0 %399  ;;  %v424_v37 = vadd.f32 %v421_v4, %v411_v40  ;;  %6408 = vst [vmem:[#allocation53_spill] sm:$0xff] %v4098_v3 }
 0x148   : >> { %v4081_v39 = vpop.permute.xlu2 %622  ;;  %v407_v16 = vmul.f32 %v4065_v48, %v402_v55  ;;  %v406_v40 = vmul.f32 %v4065_v48, %v400_v58 }
 0x149   : >> { %v437_v32 = vadd.f32 %v434_v5, %v424_v37  ;;  %v396_v37 = vadd.f32 %v393_v8, %v383_v9 }
 0x14a   : >> { %v410_v58 = vadd.f32 %v407_v16, %v397_v21 }
 0x14b   : >> { %v444_v51 = vmul.f32 %v4090_v61, %v437_v32  ;;  %v461_v5 = vmul.f32 %v4093_v1, %v437_v32  ;;  %v478_v31 = vmul.f32 %v4098_v3, %v437_v32  ;;  %v495_v55 = vmul.f32 %v4101_v17, %v437_v32 }
 0x14c   : >> { %v409_v34 = vadd.f32 %v406_v40, %v396_v37 }
 0x14d   : >> { %v452_v9 = vrot.slane %v444_v51, 1  ;;  %v469_v41 = vrot.slane %v461_v5, 2  ;;  %v486_v42 = vrot.slane %v478_v31, 3  ;;  %v503_v38 = vrot.slane %v495_v55, 4 }
 0x14f   : >> { %v415_v36 = vpop.permute.xlu1 %414  ;;  %v413_v33 = vpop.permute.xlu0 %412 }
 0x150   : >> { %v420_v4 = vmul.f32 %v4071_v59, %v415_v36  ;;  %v419_v50 = vmul.f32 %v4071_v59, %v413_v33  ;;  %v4109_v46 = vpop.permute.xlu2 %634 }
 0x152   : >> { %v423_v8 = vadd.f32 %v420_v4, %v410_v58  ;;  %v422_v52 = vadd.f32 %v419_v50, %v409_v34 }
 0x157   : >> { %v428_v45 = vpop.permute.xlu1 %427  ;;  %v426_v60 = vpop.permute.xlu0 %425 }
 0x158   : >> { %v433_v36 = vmul.f32 %v4077_v2, %v428_v45  ;;  %v432_v33 = vmul.f32 %v4077_v2, %v426_v60  ;;  %v647_v58 = vpop.permute.xlu2 %646 }
 0x15a   : >> { %v436_v35 = vadd.f32 %v433_v36, %v423_v8  ;;  %v435_v32 = vadd.f32 %v432_v33, %v422_v52 }
 0x15c   : >> { %v440_v16 = vmul.f32 %v4114_v43, %v436_v35  ;;  %v443_v34 = vmul.f32 %v4090_v61, %v436_v35  ;;  %v460_v45 = vmul.f32 %v4093_v1, %v436_v35  ;;  %v477_v40 = vmul.f32 %v4098_v3, %v436_v35 }
 0x15d   : >> { %v494_v21 = vmul.f32 %v4101_v17, %v436_v35  ;;  %v439_v37 = vmul.f32 %v4114_v43, %v435_v32  ;;  %v442_v31 = vmul.f32 %v4090_v61, %v435_v32  ;;  %v459_v4 = vmul.f32 %v4093_v1, %v435_v32 }
 0x15e   : >> { %v450_v50 = vrot.slane %v443_v34, 1  ;;  %v467_v51 = vrot.slane %v460_v45, 2  ;;  %v484_v5 = vrot.slane %v477_v40, 3  ;;  %v476_v55 = vmul.f32 %v4098_v3, %v435_v32 }
 0x15f   : >> { %v501_v60 = vrot.slane %v494_v21, 4  ;;  %v449_v8 = vrot.slane %v442_v31, 1  ;;  %v466_v52 = vrot.slane %v459_v4, 2  ;;  %v493_v36 = vmul.f32 %v4101_v17, %v435_v32 }
 0x160   : >> { %v453_v33 = vsel %vm448_vm0, %v450_v50, %v452_v9  ;;  %v470_v35 = vsel %vm465_vm1, %v467_v51, %v469_v41  ;;  %v487_v30 = vsel %vm482_vm2, %v484_v5, %v486_v42  ;;  %v483_v47 = vrot.slane %v476_v55, 3  ;;  %v4134_v24 = vpop.permute.xlu2 %748 }
 0x161   : >> { %v457_v44 = vadd.f32 %v453_v33, %v440_v16  ;;  %v504_v34 = vsel %vm6211_vm3, %v501_v60, %v503_v38  ;;  %v451_v45 = vsel %vm448_vm0, %v449_v8, %v450_v50  ;;  %v468_v40 = vsel %vm465_vm1, %v466_v52, %v467_v51 }
 0x162   : >> { %v456_v27 = vadd.f32 %v451_v45, %v439_v37  ;;  %v485_v21 = vsel %vm482_vm2, %v483_v47, %v484_v5  ;;  %v500_v31 = vrot.slane %v493_v36, 4  ;;  %v605_v37 = vmul.f32 %v3984_v14, %v4062_v23 }
 0x163   : >> { %v474_v4 = vadd.f32 %v470_v35, %v457_v44  ;;  %v614_v47 = vmul.f32 %v4067_v49, %v4055_v22  ;;  %v638_v5 = vmul.f32 %v4109_v46, %v4071_v59  ;;  %v650_v8 = vmul.f32 %v647_v58, %v4077_v2 }
 0x164   : >> { %v473_v32 = vadd.f32 %v468_v40, %v456_v27  ;;  %v502_v9 = vsel %vm6211_vm3, %v500_v31, %v501_v60  ;;  %v626_v27 = vmul.f32 %v4081_v39, %v4065_v48  ;;  %v604_v39 = vmul.f32 %v4000_v62, %v4062_v23 }
 0x165   : >> { %v491_v28 = vadd.f32 %v487_v30, %v474_v4  ;;  %v617_v44 = vadd.f32 %v614_v47, %v605_v37  ;;  %v4160_v58 = vstv %s3722_s15 }
 0x166   : >> { %v490_v41 = vadd.f32 %v485_v21, %v473_v32 }
 0x167   : >> { %v508_v42 = vadd.f32 %v504_v34, %v491_v28  ;;  %v629_v28 = vadd.f32 %v626_v27, %v617_v44  ;;  %v603_v34 = vmul.f32 %v4002_v0, %v4062_v23 }
 0x168   : >> { %v507_v16 = vadd.f32 %v502_v9, %v490_v41  ;;  %v4136_v33 = vpop.permute.xlu2 %758 }
 0x169   : >> { %v641_v60 = vadd.f32 %v638_v5, %v629_v28  ;;  %v4171_v44 = vsub.f32 %v508_v42, %v4160_v58 }
 0x16a   : >> { %v4174_v27 = vsub.f32 %v507_v16, %v4160_v58 }
 0x16b   : >> { %v653_v40 = vadd.f32 %v650_v8, %v641_v60 }
 0x16d   : >> { %v658_v41 = vmul.f32 %v653_v40, %v4090_v61  ;;  %v673_v0 = vmul.f32 %v653_v40, %v4093_v1 }
 0x16f   : >> { %v609_v55 = vpop.permute.xlu1 %608  ;;  %v607_v38 = vpop.permute.xlu0 %606  ;;  %v665_v8 = vrot.slane %v658_v41, 1 }
 0x170   : >> { %v4144_v51 = vpop.permute.xlu2 %768  ;;  %v613_v49 = vmul.f32 %v609_v55, %v4055_v22  ;;  %v612_v36 = vmul.f32 %v607_v38, %v4055_v22  ;;  %v688_v55 = vmul.f32 %v653_v40, %v4098_v3  ;;  %v4168_v38 = vmul.f32 %v653_v40, %v4101_v17 }
 0x171   : >> { %v522_v40 = vmax.f32 %v4174_v27, 0.0 }
 0x172   : >> { %v616_v21 = vadd.f32 %v613_v49, %v604_v39  ;;  %v615_v31 = vadd.f32 %v612_v36, %v603_v34  ;;  %v328_v49 = vstv %s6411_s12  ;;  %v680_v36 = vrot.slane %v673_v0, 2  ;;  %s6416_s12 = smov 127  }
 0x173   : >> { %v695_v39 = vrot.slane %v688_v55, 3  ;;  %v710_v42 = vrot.slane %v4168_v38, 4  ;;  %v523_v34 = vmax.f32 %v4171_v44, 0.0 }
 0x177   : >> { %v621_v30 = vpop.permute.xlu1 %620  ;;  %v619_v50 = vpop.permute.xlu0 %618 }
 0x178   : >> { %v4153_v35 = vpop.permute.xlu2 %777  ;;  %v625_v45 = vmul.f32 %v621_v30, %v4065_v48  ;;  %v624_v46 = vmul.f32 %v619_v50, %v4065_v48 }
 0x17a   : >> { %v628_v9 = vadd.f32 %v625_v45, %v616_v21  ;;  %v627_v62 = vadd.f32 %v624_v46, %v615_v31 }
 0x17f   : >> { %v633_v14 = vpop.permute.xlu1 %632  ;;  %v631_v52 = vpop.permute.xlu0 %630 }
 0x180   : >> { %v637_v4 = vmul.f32 %v633_v14, %v4071_v59  ;;  %v636_v32 = vmul.f32 %v631_v52, %v4071_v59  ;;  %v790_v60 = vpop.permute.xlu2 %789 }
 0x182   : >> { %v640_v30 = vadd.f32 %v637_v4, %v628_v9  ;;  %v639_v50 = vadd.f32 %v636_v32, %v627_v62 }
 0x187   : >> { %v645_v37 = vpop.permute.xlu1 %644  ;;  %v643_v47 = vpop.permute.xlu0 %642 }
 0x188   : >> { %v649_v28 = vmul.f32 %v645_v37, %v4077_v2  ;;  %v648_v5 = vmul.f32 %v643_v47, %v4077_v2 }
 0x18a   : >> { %v652_v14 = vadd.f32 %v649_v28, %v640_v30  ;;  %v651_v52 = vadd.f32 %v648_v5, %v639_v50 }
 0x18c   : >> { %v657_v16 = vmul.f32 %v652_v14, %v4090_v61  ;;  %v672_v45 = vmul.f32 %v652_v14, %v4093_v1  ;;  %v687_v46 = vmul.f32 %v652_v14, %v4098_v3  ;;  %v655_v21 = vmul.f32 %v652_v14, %v4114_v43 }
 0x18d   : >> { %v702_v31 = vmul.f32 %v652_v14, %v4101_v17  ;;  %v656_v4 = vmul.f32 %v651_v52, %v4090_v61  ;;  %v671_v32 = vmul.f32 %v651_v52, %v4093_v1  ;;  %v686_v0 = vmul.f32 %v651_v52, %v4098_v3  ;;  %v802_v61 = vpop.permute.xlu2 %801 }
 0x18e   : >> { %v663_v9 = vrot.slane %v657_v16, 1  ;;  %v678_v62 = vrot.slane %v672_v45, 2  ;;  %v693_v41 = vrot.slane %v687_v46, 3  ;;  %v701_v47 = vmul.f32 %v651_v52, %v4101_v17 }
 0x18f   : >> { %v708_v55 = vrot.slane %v702_v31, 4  ;;  %v662_v38 = vrot.slane %v656_v4, 1  ;;  %v677_v37 = vrot.slane %v671_v32, 2  ;;  %v4192_v30 = vpop.permute.xlu1 %742  ;;  %v4194_v50 = vpop.permute.xlu0 %740  ;;  %v654_v28 = vmul.f32 %v651_v52, %v4114_v43 }
 0x190   : >> { %v692_v5 = vrot.slane %v686_v0, 3  ;;  %v525_v14 = vsub.f32 0.0, %v523_v34  ;;  %v666_v1 = vsel %vm448_vm0, %v663_v9, %v665_v8  ;;  %v707_v16 = vrot.slane %v701_v47, 4 }
 0x191   : >> { %v670_v45 = vadd.f32 %v666_v1, %v655_v21  ;;  %v681_v46 = vsel %vm465_vm1, %v678_v62, %v680_v36  ;;  %v664_v31 = vsel %vm448_vm0, %v662_v38, %v663_v9  ;;  %v679_v32 = vsel %vm465_vm1, %v677_v37, %v678_v62 }
 0x192   : >> { %v669_v4 = vadd.f32 %v664_v31, %v654_v28  ;;  %v694_v17 = vsel %vm482_vm2, %v692_v5, %v693_v41  ;;  %v772_v3 = vmul.f32 %v4144_v51, %v6372_v13  ;;  %v709_v34 = vsel %vm6211_vm3, %v707_v16, %v708_v55 }
 0x193   : >> { %v685_v52 = vadd.f32 %v681_v46, %v670_v45  ;;  %v781_v8 = vmul.f32 %v4153_v35, %v6373_v20  ;;  %v793_v1 = vmul.f32 %v790_v60, %v6374_v26  ;;  %v330_v36 = vadd.s32 %v328_v49, %v6412_v15 }
 0x194   : >> { %v696_v21 = vsel %vm482_vm2, %v693_v41, %v695_v39  ;;  %v524_v9 = vsub.f32 0.0, %v522_v40  ;;  %v684_v62 = vadd.f32 %v679_v32, %v669_v4  ;;  %v512_v0 = vadd.s32 4294967290, %v3746_v7  ;;  %v2994_v4 = vld [vmem:[#allocation2 + $0x8] sm:$0xff] }
 0x195   : >> { %v700_v38 = vadd.f32 %v696_v21, %v685_v52  ;;  %v784_v37 = vadd.f32 %v781_v8, %v772_v3  ;;  %v805_v51 = vadd.f32 %v6375_v29, %v802_v61  ;;  %v711_v47 = vsel %vm6211_vm3, %v708_v55, %v710_v42  ;;  %v2999_v42 = vld [vmem:[#allocation3 + $0x28] sm:$0xff] }
 0x196   : >> { %v329_v28 = vadd.s32 %v328_v49, %v6413_v6  ;;  %v699_v5 = vadd.f32 %v694_v17, %v684_v62  ;;  %v528_v35 = vmul.f32 1.442695, %v525_v14  ;;  %vm332_vm4 = vcmp.ge.s32.totalorder %v330_v36, 0 }
 0x197   : >> { %v715_v16 = vadd.f32 %v711_v47, %v700_v38  ;;  %v4214_v60 = vpop.permute.xlu1 %756  ;;  %v4216_v45 = vpop.permute.xlu0 %750  ;;  %v796_v39 = vadd.f32 %v793_v1, %v784_v37  ;;  %vm334_vm5 = vcmp.lt.s32.totalorder %v330_v36, 48  ;;  %v526_v40 = vmul.f32 1.442695, %v524_v9 }
 0x198   : >> { %v714_v41 = vadd.f32 %v709_v34, %v699_v5  ;;  %vm513_vm6 = vcmp.ge.s32.totalorder %v512_v0, 0  ;;  %vm514_vm7 = vcmp.lt.s32.totalorder %v512_v0, 48  ;;  %v718_v49 = vadd.s32 4294967291, %v3746_v7  ;;  %vm4223_vm10 = vmand %vm332_vm4, %vm334_vm5 }
 0x199   : >> { %v717_v61 = vsub.f32 %v715_v16, %v4160_v58  ;;  %v4219_v3 = vadd.f32 %v805_v51, %v796_v39  ;;  %vm331_vm8 = vcmp.ge.s32.totalorder %v329_v28, 0  ;;  %vm333_vm9 = vcmp.lt.s32.totalorder %v329_v28, 48  ;;  %vm4229_vm11 = vmand %vm513_vm6, %vm514_vm7 }
 0x19a   : >> { %v716_v17 = vsub.f32 %v714_v41, %v4160_v58  ;;  %3408 = vpow2.f32 %v528_v35  ;;  %vm4233_vm12 = vmand %vm331_vm8, %vm333_vm9  ;;  %vm719_vm13 = vcmp.ge.s32.totalorder %v718_v49, 0  ;;  %vm720_vm14 = vcmp.lt.s32.totalorder %v718_v49, 48 }
 0x19b   : >> { %v729_v55 = vmax.f32 %v717_v61, 0.0  ;;  %816 = vrot.lane.b32.xlu2 %v4219_v3, %s6416_s12  ;;  %3410 = vpow2.f32 %v526_v40  ;;  %vm517_vm15 = vmand %vm4223_vm10, %vm4229_vm11  ;;  %vm519_vm4 = vcmp.le.f32.partialorder %v4171_v44, 5.0  ;;  %vm518_vm6 = vcmp.le.f32.partialorder %v4174_v27, 5.0 }
 0x19c   : >> { %v728_v46 = vmax.f32 %v716_v17, 0.0  ;;  %vm516_vm5 = vmand %vm4233_vm12, %vm4229_vm11  ;;  %vm725_vm3 = vcmp.le.f32.partialorder %v717_v61, 5.0 }
 0x19d   : >> { %v731_v31 = vsub.f32 0.0, %v729_v55  ;;  %vm4247_vm7 = vmand %vm719_vm13, %vm720_vm14  ;;  %vm724_vm14 = vcmp.le.f32.partialorder %v716_v17, 5.0 }
 0x19e   : >> { %v730_v32 = vsub.f32 0.0, %v728_v46  ;;  %vm521_vm8 = vmand %vm517_vm15, %vm519_vm4 }
 0x19f   : >> { %v734_v52 = vmul.f32 1.442695, %v731_v31  ;;  %v767_v34 = vpop.permute.xlu1 %766  ;;  %v765_v8 = vpop.permute.xlu0 %764  ;;  %vm520_vm9 = vmand %vm516_vm5, %vm518_vm6 }
 0x1a0   : >> { %v732_v1 = vmul.f32 1.442695, %v730_v32  ;;  %v3409_v36 = vpop.eup %3408  ;;  %vm723_vm11 = vmand %vm4223_vm10, %vm4247_vm7 }
 0x1a1   : >> { %3412 = vpow2.f32 %v734_v52  ;;  %v3411_v9 = vpop.eup %3410  ;;  %v531_v44 = vsel %vm521_vm8, %v3409_v36, 0.0  ;;  %vm722_vm13 = vmand %vm4233_vm12, %vm4247_vm7  ;;  %v6423_v52 = vld [vmem:[#allocation22_spill] sm:$0xff] }
 0x1a2   : >> { %3414 = vpow2.f32 %v732_v1  ;;  %v530_v27 = vsel %vm520_vm9, %v3411_v9, 0.0  ;;  %v555_v0 = vmul.f32 %v3944_v10, %v531_v44  ;;  %vm727_vm15 = vmand %vm723_vm11, %vm725_vm3  ;;  %v539_v38 = vmul.f32 %v3958_v53, %v531_v44 }
 0x1a3   : >> { %828 = vrot.lane.b32.xlu2 %v4219_v3, %s6320_s0  ;;  %v538_v5 = vmul.f32 %v3960_v54, %v530_v27  ;;  %v546_v35 = vmul.f32 %v3934_v63, %v530_v27  ;;  %vm726_vm4 = vmand %vm722_vm13, %vm724_vm14  ;;  %v554_v16 = vmul.f32 %v3968_v56, %v530_v27  ;;  %v547_v56 = vmul.f32 %v3970_v57, %v531_v44 }
 0x1a4   : >> { %v771_v57 = vmul.f32 %v767_v34, %v3754_v12  ;;  %v6426_v34 = vld [vmem:[#allocation42_spill] sm:$0xff]  ;;  %vm6449_vm3 = vcmask 1043456  }
 0x1a5   : >> { %vm6450_vm5 = vmmov %vm6449_vm3 }
 0x1a7   : >> { %v3413_v62 = vpop.eup %3412  ;;  %v776_v37 = vpop.permute.xlu1 %775 }
 0x1a8   : >> { %v774_v51 = vpop.permute.xlu0 %773  ;;  %v3415_v47 = vpop.eup %3414  ;;  %v737_v28 = vsel %vm727_vm15, %v3413_v62, 0.0  ;;  %v780_v46 = vmul.f32 %v776_v37, %v3770_v19  ;;  %v6425_v37 = vld [vmem:[#allocation25_spill] sm:$0xff] }
 0x1a9   : >> { %v4266_v39 = vadd.f32 %v737_v28, %v531_v44  ;;  %v761_v40 = vmul.f32 %v4136_v33, %v737_v28  ;;  %v745_v10 = vmul.f32 %v4192_v30, %v737_v28  ;;  %v736_v41 = vsel %vm726_vm4, %v3415_v47, 0.0 }
 0x1aa   : >> { %v4270_v61 = vadd.f32 %v736_v41, %v530_v27  ;;  %v752_v53 = vmul.f32 %v4134_v24, %v736_v41  ;;  %v744_v49 = vmul.f32 %v4194_v50, %v736_v41  ;;  %v760_v54 = vmul.f32 %v4214_v60, %v736_v41  ;;  %v6434_v41 = vld [vmem:[#allocation39_spill] sm:$0xff] }
 0x1ab   : >> { %v4275_v17 = vadd.f32 %v761_v40, %v555_v0  ;;  %v4277_v63 = vadd.f32 %v745_v10, %v539_v38  ;;  %v753_v55 = vmul.f32 %v4216_v45, %v737_v28  ;;  %840 = vrot.lane.b32.xlu2 %v4219_v3, %s6399_s3  ;;  %v779_v31 = vmul.f32 %v774_v51, %v6371_v18  ;;  %v6424_v0 = vld [vmem:[#allocation26_spill] sm:$0xff]  ;;  %v6432_v40 = vld [vmem:[#allocation40_spill] sm:$0xff]  ;;  %v6433_v10 = vld [vmem:[#allocation41_spill] sm:$0xff] }
 0x1ac   : >> { %v4283_v33 = vadd.f32 %v752_v53, %v546_v35  ;;  %v4285_v30 = vadd.f32 %v744_v49, %v538_v5  ;;  %v4287_v24 = vadd.f32 %v760_v54, %v554_v16  ;;  %v770_v45 = vmul.f32 %v765_v8, %v3752_v11  ;;  %v6427_v8 = vld [vmem:[#allocation45_spill] sm:$0xff]  ;;  %v6428_v5 = vld [vmem:[#allocation28_spill] sm:$0xff]  ;;  %v6435_v53 = vld [vmem:[#allocation43_spill] sm:$0xff] }
 0x1ad   : >> { %v4289_v50 = vadd.f32 %v753_v55, %v547_v56  ;;  %v783_v36 = vadd.f32 %v780_v46, %v771_v57  ;;  %v6429_v35 = vld [vmem:[#allocation33_spill] sm:$0xff]  ;;  %v6431_v16 = vld [vmem:[#allocation36_spill] sm:$0xff]  ;;  %v6439_v55 = vld [vmem:[#allocation30_spill] sm:$0xff] }
 0x1ae   : >> { %v782_v21 = vadd.f32 %v779_v31, %v770_v45  ;;  %v6436_v49 = vld [vmem:[#allocation44_spill] sm:$0xff]  ;;  %v6438_v56 = vld [vmem:[#allocation29_spill] sm:$0xff]  ;;  %v6441_v46 = vld [vmem:[#allocation34_spill] sm:$0xff] }
 0x1af   : >> { %v788_v60 = vpop.permute.xlu1 %787  ;;  %v6437_v54 = vld [vmem:[#allocation32_spill] sm:$0xff]  ;;  %v6442_v31 = vld [vmem:[#allocation35_spill] sm:$0xff]  ;;  %v6443_v45 = vld [vmem:[#allocation37_spill] sm:$0xff] }
 0x1b0   : >> { %v786_v14 = vpop.permute.xlu0 %785  ;;  %v792_v32 = vmul.f32 %v788_v60, %v6370_v25  ;;  %v6440_v60 = vld [vmem:[#allocation31_spill] sm:$0xff] }
 0x1b1   : >> { %v791_v1 = vmul.f32 %v786_v14, %v6423_v52 }
 0x1b2   : >> { %v795_v27 = vadd.f32 %v792_v32, %v783_v36  ;;  %v6444_v32 = vld [vmem:[#allocation38_spill] sm:$0xff] }
 0x1b3   : >> { %852 = vrot.lane.b32.xlu2 %v4219_v3, %s6212_s14  ;;  %v794_v62 = vadd.f32 %v791_v1, %v782_v21  ;;  %s3610_s14 = smov 3  }
 0x1b7   : >> { %v800_v9 = vpop.permute.xlu1 %799 }
 0x1b8   : >> { %v798_v44 = vpop.permute.xlu0 %797  ;;  %v804_v38 = vadd.f32 %v6424_v0, %v800_v9 }
 0x1b9   : >> { %v803_v51 = vadd.f32 %v6425_v37, %v798_v44 }
 0x1ba   : >> { %v807_v47 = vadd.f32 %v804_v38, %v795_v27 }
 0x1bb   : >> { %v806_v28 = vadd.f32 %v803_v51, %v794_v62  ;;  %954 = vrot.lane.b32.xlu2 %v6426_v34, %s3609_s16  ;;  %v811_v51 = vmul.f32 %v4219_v3, %v4062_v23 }
 0x1bc   : >> { %814 = vrot.lane.b32.xlu1 %v807_v47, %s6416_s12 }
 0x1bd   : >> { %812 = vrot.lane.b32.xlu0 %v806_v28, %s6416_s12 }
 0x1c3   : >> { %964 = vrot.lane.b32.xlu2 %v6427_v8, %s3609_s16 }
 0x1c4   : >> { %826 = vrot.lane.b32.xlu1 %v807_v47, %s6320_s0 }
 0x1c5   : >> { %824 = vrot.lane.b32.xlu0 %v806_v28, %s6320_s0 }
 0x1cb   : >> { %974 = vrot.lane.b32.xlu2 %v6428_v5, %s3610_s14 }
 0x1cc   : >> { %838 = vrot.lane.b32.xlu1 %v807_v47, %s6399_s3 }
 0x1cd   : >> { %836 = vrot.lane.b32.xlu0 %v806_v28, %s6399_s3 }
 0x1d3   : >> { %983 = vrot.lane.b32.xlu2 %v6429_v35, %s3610_s14 }
 0x1d4   : >> { %850 = vrot.lane.b32.xlu1 %v807_v47, %s6430_s2 }
 0x1d5   : >> { %848 = vrot.lane.b32.xlu0 %v806_v28, %s6430_s2 }
 0x1db   : >> { %995 = vrot.lane.b32.xlu2 %v6431_v16, %s3610_s14 }
 0x1dc   : >> { %948 = vrot.lane.b32.xlu1 %v6432_v40, %s3609_s16 }
 0x1dd   : >> { %946 = vrot.lane.b32.xlu0 %v6433_v10, %s3609_s16 }
 0x1e3   : >> { %1007 = vrot.lane.b32.xlu2 %v6434_v41, %s3610_s14 }
 0x1e4   : >> { %962 = vrot.lane.b32.xlu1 %v6435_v53, %s3609_s16 }
 0x1e5   : >> { %956 = vrot.lane.b32.xlu0 %v6436_v49, %s3609_s16  ;;  %s3612_s16 = smov 124  }
 0x1ec   : >> { %972 = vrot.lane.b32.xlu1 %v6437_v54, %s3610_s14 }
 0x1ed   : >> { %970 = vrot.lane.b32.xlu0 %v6438_v56, %s3610_s14 }
 0x1f4   : >> { %981 = vrot.lane.b32.xlu1 %v6439_v55, %s3610_s14 }
 0x1f5   : >> { %979 = vrot.lane.b32.xlu0 %v6440_v60, %s3610_s14  ;;  %v817_v14 = vpop.permute.xlu2 %816 }
 0x1f6   : >> { %v820_v34 = vmul.f32 %v817_v14, %v4055_v22 }
 0x1f8   : >> { %v823_v16 = vadd.f32 %v820_v34, %v811_v51  ;;  %v809_v51 = vmul.f32 %v806_v28, %v4062_v23 }
 0x1fc   : >> { %993 = vrot.lane.b32.xlu1 %v6441_v46, %s3610_s14 }
 0x1fd   : >> { %991 = vrot.lane.b32.xlu0 %v6442_v31, %s3610_s14  ;;  %v829_v57 = vpop.permute.xlu2 %828 }
 0x1fe   : >> { %v832_v40 = vmul.f32 %v829_v57, %v4065_v48 }
 0x200   : >> { %v835_v54 = vadd.f32 %v832_v40, %v823_v16  ;;  %v6445_v40 = vld [vmem:[#allocation51_spill] sm:$0xff] }
 0x204   : >> { %1005 = vrot.lane.b32.xlu1 %v6443_v45, %s3610_s14 }
 0x205   : >> { %1003 = vrot.lane.b32.xlu0 %v6444_v32, %s3610_s14  ;;  %v841_v1 = vpop.permute.xlu2 %840 }
 0x206   : >> { %v844_v56 = vmul.f32 %v841_v1, %v4071_v59 }
 0x208   : >> { %v847_v60 = vadd.f32 %v844_v56, %v835_v54 }
 0x20d   : >> { %v853_v36 = vpop.permute.xlu2 %852 }
 0x20e   : >> { %v856_v14 = vmul.f32 %v853_v36, %v4077_v2 }
 0x215   : >> { %v4345_v21 = vpop.permute.xlu2 %954 }
 0x21d   : >> { %v4347_v9 = vpop.permute.xlu2 %964 }
 0x225   : >> { %v975_v44 = vpop.permute.xlu2 %974 }
 0x226   : >> { %v978_v8 = vmul.f32 %v975_v44, %v6372_v13 }
 0x22d   : >> { %v984_v27 = vpop.permute.xlu2 %983 }
 0x22e   : >> { %v815_v62 = vpop.permute.xlu1 %814  ;;  %v987_v5 = vmul.f32 %v984_v27, %v6373_v20  ;;  %v810_v27 = vmul.f32 %v807_v47, %v4062_v23 }
 0x22f   : >> { %v813_v38 = vpop.permute.xlu0 %812  ;;  %v819_v32 = vmul.f32 %v815_v62, %v4055_v22 }
 0x230   : >> { %v990_v53 = vadd.f32 %v987_v5, %v978_v8  ;;  %v818_v57 = vmul.f32 %v813_v38, %v4055_v22  ;;  %v859_v8 = vadd.f32 %v856_v14, %v847_v60 }
 0x231   : >> { %v822_v36 = vadd.f32 %v819_v32, %v810_v27 }
 0x232   : >> { %v821_v5 = vadd.f32 %v818_v57, %v809_v51  ;;  %v864_v47 = vmul.f32 %v859_v8, %v6445_v40 }
 0x234   : >> { %v871_v14 = vrot.slane %v864_v47, 1 }
 0x235   : >> { %v996_v35 = vpop.permute.xlu2 %995 }
 0x236   : >> { %v827_v10 = vpop.permute.xlu1 %826  ;;  %v999_v49 = vmul.f32 %v996_v35, %v6374_v26 }
 0x237   : >> { %v825_v41 = vpop.permute.xlu0 %824  ;;  %v831_v1 = vmul.f32 %v827_v10, %v4065_v48 }
 0x238   : >> { %v1002_v55 = vadd.f32 %v999_v49, %v990_v53  ;;  %v830_v34 = vmul.f32 %v825_v41, %v4065_v48  ;;  %v6446_v53 = vld [vmem:[#allocation52_spill] sm:$0xff] }
 0x239   : >> { %v834_v35 = vadd.f32 %v831_v1, %v822_v36  ;;  %v879_v28 = vmul.f32 %v859_v8, %v6446_v53 }
 0x23a   : >> { %v833_v16 = vadd.f32 %v830_v34, %v821_v5 }
 0x23b   : >> { %v886_v57 = vrot.slane %v879_v28, 2 }
 0x23d   : >> { %v1008_v3 = vpop.permute.xlu2 %1007 }
 0x23e   : >> { %v839_v46 = vpop.permute.xlu1 %838  ;;  %v1011_v45 = vadd.f32 %v6375_v29, %v1008_v3 }
 0x23f   : >> { %v837_v31 = vpop.permute.xlu0 %836  ;;  %v843_v62 = vmul.f32 %v839_v46, %v4071_v59  ;;  %v6447_v46 = vld [vmem:[#allocation53_spill] sm:$0xff] }
 0x240   : >> { %v4361_v44 = vadd.f32 %v1011_v45, %v1002_v55  ;;  %v842_v38 = vmul.f32 %v837_v31, %v4071_v59  ;;  %v894_v45 = vmul.f32 %v859_v8, %v6447_v46  ;;  %v6448_v31 = vld [vmem:[#allocation54_spill] sm:$0xff] }
 0x241   : >> { %v846_v54 = vadd.f32 %v843_v62, %v834_v35  ;;  %v909_v32 = vmul.f32 %v859_v8, %v6448_v31 }
 0x242   : >> { %1022 = vrot.lane.b32.xlu2 %v4361_v44, %s6416_s12  ;;  %v845_v41 = vadd.f32 %v842_v38, %v833_v16 }
 0x243   : >> { %v916_v15 = vrot.slane %v909_v32, 4 }
 0x246   : >> { %v851_v49 = vpop.permute.xlu1 %850 }
 0x247   : >> { %v849_v10 = vpop.permute.xlu0 %848  ;;  %v855_v56 = vmul.f32 %v851_v49, %v4077_v2 }
 0x248   : >> { %v854_v55 = vmul.f32 %v849_v10, %v4077_v2 }
 0x249   : >> { %v858_v3 = vadd.f32 %v855_v56, %v846_v54  ;;  %v901_v56 = vrot.slane %v894_v45, 3 }
 0x24a   : >> { %v857_v60 = vadd.f32 %v854_v55, %v845_v41  ;;  %1034 = vrot.lane.b32.xlu2 %v4361_v44, %s6320_s0 }
 0x24b   : >> { %v863_v27 = vmul.f32 %v858_v3, %v6445_v40  ;;  %v878_v51 = vmul.f32 %v858_v3, %v6446_v53  ;;  %v893_v1 = vmul.f32 %v858_v3, %v6447_v46  ;;  %v861_v34 = vmul.f32 %v858_v3, %v4114_v43 }
 0x24c   : >> { %v908_v36 = vmul.f32 %v858_v3, %v6448_v31  ;;  %v862_v5 = vmul.f32 %v857_v60, %v6445_v40  ;;  %v877_v62 = vmul.f32 %v857_v60, %v6446_v53  ;;  %v892_v16 = vmul.f32 %v857_v60, %v6447_v46 }
 0x24d   : >> { %v869_v38 = vrot.slane %v863_v27, 1  ;;  %v884_v8 = vrot.slane %v878_v51, 2  ;;  %v899_v35 = vrot.slane %v893_v1, 3  ;;  %v907_v10 = vmul.f32 %v857_v60, %v6448_v31 }
 0x24e   : >> { %v914_v47 = vrot.slane %v908_v36, 4  ;;  %v868_v28 = vrot.slane %v862_v5, 1  ;;  %v883_v49 = vrot.slane %v877_v62, 2  ;;  %v949_v54 = vpop.permute.xlu1 %948  ;;  %v860_v55 = vmul.f32 %v857_v60, %v4114_v43 }
 0x24f   : >> { %v947_v41 = vpop.permute.xlu0 %946  ;;  %v898_v3 = vrot.slane %v892_v16, 3  ;;  %v872_v6 = vsel %vm448_vm0, %v869_v38, %v871_v14  ;;  %v913_v53 = vrot.slane %v907_v10, 4  ;;  %v887_v1 = vsel %vm465_vm1, %v884_v8, %v886_v57 }
 0x250   : >> { %v876_v27 = vadd.f32 %v872_v6, %v861_v34  ;;  %v870_v51 = vsel %vm448_vm0, %v868_v28, %v869_v38  ;;  %v885_v5 = vsel %vm465_vm1, %v883_v49, %v884_v8  ;;  %v902_v60 = vsel %vm482_vm2, %v899_v35, %v901_v56 }
 0x251   : >> { %v875_v36 = vadd.f32 %v870_v51, %v860_v55  ;;  %v900_v62 = vsel %vm482_vm2, %v898_v3, %v899_v35  ;;  %v915_v45 = vsel %vm6449_vm3, %v913_v53, %v914_v47  ;;  %v917_v6 = vsel %vm6450_vm5, %v914_v47, %v916_v15  ;;  %v4409_v51 = vld [vmem:[%s3805_s1 + $0x48] sm:$0xff]  ;;  %vm6467_vm5 = vmmov %vm6449_vm3 }
 0x252   : >> { %v891_v31 = vadd.f32 %v887_v1, %v876_v27  ;;  %1046 = vrot.lane.b32.xlu2 %v4361_v44, %s6399_s3  ;;  %v924_v49 = vadd.s32 4294967292, %v3746_v7  ;;  %6453 = vst [vmem:[#allocation42_spill] sm:$0xff] %v4409_v51 }
 0x253   : >> { %v890_v14 = vadd.f32 %v885_v5, %v875_v36 }
 0x254   : >> { %v906_v32 = vadd.f32 %v902_v60, %v891_v31  ;;  %vm925_vm6 = vcmp.ge.s32.totalorder %v924_v49, 0  ;;  %vm926_vm7 = vcmp.lt.s32.totalorder %v924_v49, 48 }
 0x255   : >> { %v905_v34 = vadd.f32 %v900_v62, %v890_v14  ;;  %vm4404_vm8 = vmand %vm925_vm6, %vm926_vm7 }
 0x256   : >> { %v921_v38 = vadd.f32 %v917_v6, %v906_v32  ;;  %v963_v57 = vpop.permute.xlu1 %962  ;;  %vm929_vm9 = vmand %vm4223_vm10, %vm4404_vm8 }
 0x257   : >> { %v957_v16 = vpop.permute.xlu0 %956  ;;  %v920_v28 = vadd.f32 %v915_v45, %v905_v34  ;;  %vm928_vm13 = vmand %vm4233_vm12, %vm4404_vm8 }
 0x258   : >> { %v923_v8 = vsub.f32 %v921_v38, %v4160_v58 }
 0x259   : >> { %v922_v53 = vsub.f32 %v920_v28, %v4160_v58 }
 0x25a   : >> { %v935_v10 = vmax.f32 %v923_v8, 0.0  ;;  %1058 = vrot.lane.b32.xlu2 %v4361_v44, %s6430_s2  ;;  %vm931_vm11 = vcmp.le.f32.partialorder %v923_v8, 5.0 }
 0x25b   : >> { %v934_v35 = vmax.f32 %v922_v53, 0.0  ;;  %vm930_vm14 = vcmp.le.f32.partialorder %v922_v53, 5.0  ;;  %vm933_vm15 = vmand %vm929_vm9, %vm931_vm11 }
 0x25c   : >> { %v937_v31 = vsub.f32 0.0, %v935_v10  ;;  %vm932_vm4 = vmand %vm928_vm13, %vm930_vm14  ;;  %v4436_v10 = vld [vmem:[%s3805_s1 + $0x90] sm:$0xff] }
 0x25d   : >> { %v936_v15 = vsub.f32 0.0, %v934_v35  ;;  %6454 = vst [vmem:[#allocation45_spill] sm:$0xff] %v4436_v10 }
 0x25e   : >> { %v940_v47 = vmul.f32 1.442695, %v937_v31  ;;  %v973_v56 = vpop.permute.xlu1 %972 }
 0x25f   : >> { %v971_v55 = vpop.permute.xlu0 %970  ;;  %v938_v3 = vmul.f32 1.442695, %v936_v15 }
 0x260   : >> { %3416 = vpow2.f32 %v940_v47 }
 0x261   : >> { %3418 = vpow2.f32 %v938_v3 }
 0x262   : >> { %1160 = vrot.lane.b32.xlu2 %v4409_v51, %s3610_s14 }
 0x266   : >> { %v3417_v1 = vpop.eup %3416  ;;  %v982_v36 = vpop.permute.xlu1 %981 }
 0x267   : >> { %v980_v5 = vpop.permute.xlu0 %979  ;;  %v3419_v62 = vpop.eup %3418  ;;  %v943_v45 = vsel %vm933_vm15, %v3417_v1, 0.0 }
 0x268   : >> { %v4422_v60 = vadd.f32 %v943_v45, %v4266_v39  ;;  %v951_v14 = vmul.f32 %v949_v54, %v943_v45  ;;  %v967_v32 = vmul.f32 %v4347_v9, %v943_v45  ;;  %v942_v6 = vsel %vm932_vm4, %v3419_v62, 0.0  ;;  %v4479_v62 = vld [vmem:[%s3805_s1 + $0x96] sm:$0xf] }
 0x269   : >> { %v4426_v34 = vadd.f32 %v942_v6, %v4270_v61  ;;  %v950_v38 = vmul.f32 %v947_v41, %v942_v6  ;;  %v958_v28 = vmul.f32 %v4345_v21, %v942_v6  ;;  %v966_v8 = vmul.f32 %v963_v57, %v942_v6 }
 0x26a   : >> { %v4430_v49 = vadd.f32 %v951_v14, %v4277_v63  ;;  %v4433_v53 = vadd.f32 %v967_v32, %v4275_v17  ;;  %v959_v39 = vmul.f32 %v957_v16, %v943_v45  ;;  %1170 = vrot.lane.b32.xlu2 %v4436_v10, %s3610_s14  ;;  %v986_v41 = vmul.f32 %v982_v36, %v3770_v19  ;;  %v4455_v16 = vld [vmem:[%s3805_s1 + $0x16] sm:$0xf]  ;;  %v4506_v32 = vld [vmem:[%s3805_s1 + $0x8] sm:$0xff] }
 0x26b   : >> { %v4441_v61 = vadd.f32 %v950_v38, %v4285_v30  ;;  %v4444_v9 = vadd.f32 %v958_v28, %v4283_v33  ;;  %v4447_v21 = vadd.f32 %v966_v8, %v4287_v24  ;;  %v985_v57 = vmul.f32 %v980_v5, %v6371_v18  ;;  %v4488_v45 = vld [vmem:[%s3855_s11 + $0x16] sm:$0xf]  ;;  %v4511_v38 = vld [vmem:[%s3805_s1 + $0x88] sm:$0xff] }
 0x26c   : >> { %v4450_v63 = vadd.f32 %v959_v39, %v4289_v50  ;;  %v977_v33 = vmul.f32 %v973_v56, %v3754_v12  ;;  %v976_v30 = vmul.f32 %v971_v55, %v3752_v11  ;;  %v4470_v55 = vld [vmem:[%s3805_s1 + $0x56] sm:$0xf]  ;;  %6455 = vst [vmem:[#allocation28_spill] sm:$0xff] %v4511_v38  ;;  %v4521_v39 = vld [vmem:[%s3805_s1 + $0xe] sm:$0xff] }
 0x26d   : >> { %v4501_v14 = vld [vmem:[%s3805_s1 + $0x10] sm:$0xff]  ;;  %6457 = vst [vmem:[#allocation36_spill] sm:$0xff] %v4521_v39 }
 0x26e   : >> { %v994_v17 = vpop.permute.xlu1 %993  ;;  %v989_v35 = vadd.f32 %v986_v41, %v977_v33  ;;  %v988_v31 = vadd.f32 %v985_v57, %v976_v30  ;;  %v4516_v28 = vld [vmem:[%s3805_s1 + $0x50] sm:$0xff]  ;;  %v4536_v57 = vld [vmem:[%s3805_s1 + $0x46] sm:$0xff] }
 0x26f   : >> { %v992_v54 = vpop.permute.xlu0 %991  ;;  %v998_v24 = vmul.f32 %v994_v17, %v6370_v25  ;;  %6456 = vst [vmem:[#allocation33_spill] sm:$0xff] %v4516_v28  ;;  %v4526_v17 = vld [vmem:[%s3805_s1 + $0x6] sm:$0xff]  ;;  %v4531_v41 = vld [vmem:[%s3805_s1 + $0x4e] sm:$0xff] }
 0x270   : >> { %v997_v50 = vmul.f32 %v992_v54, %v6423_v52  ;;  %6458 = vst [vmem:[#allocation40_spill] sm:$0xff] %v4526_v17  ;;  %v4541_v30 = vld [vmem:[%s3805_s1 + $0x8e] sm:$0xff] }
 0x271   : >> { %v1001_v3 = vadd.f32 %v998_v24, %v989_v35  ;;  %6459 = vst [vmem:[#allocation41_spill] sm:$0xff] %v4531_v41  ;;  %v4546_v24 = vld [vmem:[%s3805_s1 + $0x86] sm:$0xff]  ;;  %v4553_v35 = vld [vmem:[%s3855_s11 + $0xe] sm:$0xff] }
 0x272   : >> { %1180 = vrot.lane.b32.xlu2 %v4455_v16, %s6430_s2  ;;  %v1000_v27 = vadd.f32 %v997_v50, %v988_v31  ;;  %6460 = vst [vmem:[#allocation39_spill] sm:$0xff] %v4536_v57  ;;  %v4558_v31 = vld [vmem:[%s3855_s11 + $0x6] sm:$0xff] }
 0x273   : >> { %6461 = vst [vmem:[#allocation43_spill] sm:$0xff] %v4541_v30 }
 0x274   : >> { %6462 = vst [vmem:[#allocation44_spill] sm:$0xff] %v4546_v24 }
 0x275   : >> { %6463 = vst [vmem:[#allocation32_spill] sm:$0xff] %v4553_v35 }
 0x276   : >> { %v1006_v15 = vpop.permute.xlu1 %1005  ;;  %6464 = vst [vmem:[#allocation29_spill] sm:$0xff] %v4558_v31 }
 0x277   : >> { %v1004_v47 = vpop.permute.xlu0 %1003  ;;  %v1010_v1 = vadd.f32 %v6424_v0, %v1006_v15 }
 0x278   : >> { %v1009_v36 = vadd.f32 %v6425_v37, %v1004_v47 }
 0x279   : >> { %v4465_v5 = vadd.f32 %v1010_v1, %v1001_v3 }
 0x27a   : >> { %v4467_v56 = vadd.f32 %v1009_v36, %v1000_v27  ;;  %1189 = vrot.lane.b32.xlu2 %v4470_v55, %s6430_s2 }
 0x27b   : >> { %1020 = vrot.lane.b32.xlu1 %v4465_v5, %s6416_s12 }
 0x27c   : >> { %1018 = vrot.lane.b32.xlu0 %v4467_v56, %s6416_s12 }
 0x282   : >> { %1201 = vrot.lane.b32.xlu2 %v4479_v62, %s6430_s2 }
 0x283   : >> { %1032 = vrot.lane.b32.xlu1 %v4465_v5, %s6320_s0 }
 0x284   : >> { %1030 = vrot.lane.b32.xlu0 %v4467_v56, %s6320_s0 }
 0x28a   : >> { %1213 = vrot.lane.b32.xlu2 %v4488_v45, %s6430_s2 }
 0x28b   : >> { %1044 = vrot.lane.b32.xlu1 %v4465_v5, %s6399_s3 }
 0x28c   : >> { %1042 = vrot.lane.b32.xlu0 %v4467_v56, %s6399_s3 }
 0x293   : >> { %1056 = vrot.lane.b32.xlu1 %v4465_v5, %s6430_s2 }
 0x294   : >> { %1054 = vrot.lane.b32.xlu0 %v4467_v56, %s6430_s2 }
 0x29b   : >> { %1154 = vrot.lane.b32.xlu1 %v4501_v14, %s3610_s14 }
 0x29c   : >> { %1152 = vrot.lane.b32.xlu0 %v4506_v32, %s3610_s14  ;;  %v1023_v6 = vpop.permute.xlu2 %1022 }
 0x2a3   : >> { %1168 = vrot.lane.b32.xlu1 %v4511_v38, %s3610_s14 }
 0x2a4   : >> { %1162 = vrot.lane.b32.xlu0 %v4516_v28, %s3610_s14  ;;  %v1035_v8 = vpop.permute.xlu2 %1034  ;;  %s3611_s14 = smov 125  }
 0x2ab   : >> { %1178 = vrot.lane.b32.xlu1 %v4521_v39, %s6430_s2 }
 0x2ac   : >> { %1176 = vrot.lane.b32.xlu0 %v4526_v17, %s6430_s2  ;;  %v1047_v54 = vpop.permute.xlu2 %1046 }
 0x2b3   : >> { %1187 = vrot.lane.b32.xlu1 %v4531_v41, %s6430_s2 }
 0x2b4   : >> { %1185 = vrot.lane.b32.xlu0 %v4536_v57, %s6430_s2  ;;  %v1059_v33 = vpop.permute.xlu2 %1058 }
 0x2bb   : >> { %1199 = vrot.lane.b32.xlu1 %v4541_v30, %s6430_s2 }
 0x2bc   : >> { %1197 = vrot.lane.b32.xlu0 %v4546_v24, %s6430_s2  ;;  %v4550_v50 = vpop.permute.xlu2 %1160 }
 0x2c3   : >> { %1211 = vrot.lane.b32.xlu1 %v4553_v35, %s6430_s2 }
 0x2c4   : >> { %1209 = vrot.lane.b32.xlu0 %v4558_v31, %s6430_s2  ;;  %v4562_v15 = vpop.permute.xlu2 %1170 }
 0x2cc   : >> { %v1181_v47 = vpop.permute.xlu2 %1180 }
 0x2cd   : >> { %v1184_v27 = vmul.f32 %v1181_v47, %v6372_v13  ;;  %v1017_v47 = vmul.f32 %v4361_v44, %v4062_v23 }
 0x2d4   : >> { %v1190_v3 = vpop.permute.xlu2 %1189 }
 0x2d5   : >> { %v1193_v1 = vmul.f32 %v1190_v3, %v6373_v20  ;;  %v1026_v3 = vmul.f32 %v1023_v6, %v4055_v22 }
 0x2d7   : >> { %v1196_v24 = vadd.f32 %v1193_v1, %v1184_v27  ;;  %v1029_v27 = vadd.f32 %v1026_v3, %v1017_v47  ;;  %v1015_v47 = vmul.f32 %v4467_v56, %v4062_v23 }
 0x2dc   : >> { %v1202_v36 = vpop.permute.xlu2 %1201 }
 0x2dd   : >> { %v1205_v30 = vmul.f32 %v1202_v36, %v6374_v26  ;;  %v1062_v36 = vmul.f32 %v1059_v33, %v4077_v2 }
 0x2df   : >> { %v1208_v57 = vadd.f32 %v1205_v30, %v1196_v24  ;;  %v1038_v30 = vmul.f32 %v1035_v8, %v4065_v48  ;;  %v1016_v8 = vmul.f32 %v4465_v5, %v4062_v23 }
 0x2e4   : >> { %v1214_v41 = vpop.permute.xlu2 %1213 }
 0x2e5   : >> { %v1217_v35 = vadd.f32 %v6375_v29, %v1214_v41 }
 0x2e7   : >> { %v4568_v17 = vadd.f32 %v1217_v35, %v1208_v57  ;;  %v1041_v57 = vadd.f32 %v1038_v30, %v1029_v27  ;;  %v1050_v35 = vmul.f32 %v1047_v54, %v4071_v59 }
 0x2e9   : >> { %1228 = vrot.lane.b32.xlu2 %v4568_v17, %s6416_s12  ;;  %v1053_v1 = vadd.f32 %v1050_v35, %v1041_v57 }
 0x2eb   : >> { %v1065_v27 = vadd.f32 %v1062_v36, %v1053_v1 }
 0x2ed   : >> { %v1021_v31 = vpop.permute.xlu1 %1020  ;;  %v1070_v5 = vmul.f32 %v1065_v27, %v6445_v40 }
 0x2ee   : >> { %v1019_v39 = vpop.permute.xlu0 %1018  ;;  %v1025_v6 = vmul.f32 %v1021_v31, %v4055_v22 }
 0x2ef   : >> { %v1024_v26 = vmul.f32 %v1019_v39, %v4055_v22  ;;  %v6465_v22 = vld [vmem:[#allocation52_spill] sm:$0xff] }
 0x2f0   : >> { %v1028_v33 = vadd.f32 %v1025_v6, %v1016_v8  ;;  %v1085_v56 = vmul.f32 %v1065_v27, %v6465_v22  ;;  %v1077_v8 = vrot.slane %v1070_v5, 1 }
 0x2f1   : >> { %1240 = vrot.lane.b32.xlu2 %v4568_v17, %s6320_s0  ;;  %v1027_v30 = vadd.f32 %v1024_v26, %v1015_v47 }
 0x2f5   : >> { %v1033_v24 = vpop.permute.xlu1 %1032 }
 0x2f6   : >> { %v1031_v41 = vpop.permute.xlu0 %1030  ;;  %v1037_v54 = vmul.f32 %v1033_v24, %v4065_v48 }
 0x2f7   : >> { %v1036_v3 = vmul.f32 %v1031_v41, %v4065_v48 }
 0x2f8   : >> { %v1040_v57 = vadd.f32 %v1037_v54, %v1028_v33  ;;  %v1092_v54 = vrot.slane %v1085_v56, 2 }
 0x2f9   : >> { %1252 = vrot.lane.b32.xlu2 %v4568_v17, %s6399_s3  ;;  %v1039_v35 = vadd.f32 %v1036_v3, %v1027_v30 }
 0x2fd   : >> { %v1045_v44 = vpop.permute.xlu1 %1044 }
 0x2fe   : >> { %v1043_v29 = vpop.permute.xlu0 %1042  ;;  %v1049_v31 = vmul.f32 %v1045_v44, %v4071_v59  ;;  %v1100_v44 = vmul.f32 %v1065_v27, %v6447_v46 }
 0x2ff   : >> { %v1048_v39 = vmul.f32 %v1043_v29, %v4071_v59  ;;  %v6466_v29 = vld [vmem:[#allocation54_spill] sm:$0xff] }
 0x300   : >> { %v1052_v20 = vadd.f32 %v1049_v31, %v1040_v57  ;;  %v1115_v47 = vmul.f32 %v1065_v27, %v6466_v29  ;;  %v1107_v59 = vrot.slane %v1100_v44, 3 }
 0x301   : >> { %1264 = vrot.lane.b32.xlu2 %v4568_v17, %s6430_s2  ;;  %v1051_v41 = vadd.f32 %v1048_v39, %v1039_v35 }
 0x305   : >> { %v1057_v23 = vpop.permute.xlu1 %1056 }
 0x306   : >> { %v1055_v24 = vpop.permute.xlu0 %1054  ;;  %v1061_v1 = vmul.f32 %v1057_v23, %v4077_v2 }
 0x307   : >> { %v1060_v36 = vmul.f32 %v1055_v24, %v4077_v2 }
 0x308   : >> { %v1064_v6 = vadd.f32 %v1061_v1, %v1052_v20 }
 0x309   : >> { %v1063_v26 = vadd.f32 %v1060_v36, %v1051_v41  ;;  %1366 = vrot.lane.b32.xlu2 %v4409_v51, %s6430_s2  ;;  %v1122_v51 = vrot.slane %v1115_v47, 4 }
 0x30a   : >> { %v1069_v3 = vmul.f32 %v1064_v6, %v6445_v40  ;;  %v1084_v33 = vmul.f32 %v1064_v6, %v6465_v22  ;;  %v1099_v30 = vmul.f32 %v1064_v6, %v6447_v46  ;;  %v1067_v23 = vmul.f32 %v1064_v6, %v4114_v43 }
 0x30b   : >> { %v1114_v20 = vmul.f32 %v1064_v6, %v6466_v29  ;;  %v1068_v31 = vmul.f32 %v1063_v26, %v6445_v40  ;;  %v1083_v39 = vmul.f32 %v1063_v26, %v6465_v22  ;;  %v1098_v5 = vmul.f32 %v1063_v26, %v6447_v46 }
 0x30c   : >> { %v1075_v57 = vrot.slane %v1069_v3, 1  ;;  %v1090_v27 = vrot.slane %v1084_v33, 2  ;;  %v1105_v35 = vrot.slane %v1099_v30, 3  ;;  %v1113_v1 = vmul.f32 %v1063_v26, %v6466_v29 }
 0x30d   : >> { %v1120_v56 = vrot.slane %v1114_v20, 4  ;;  %v1074_v24 = vrot.slane %v1068_v31, 1  ;;  %v1089_v41 = vrot.slane %v1083_v39, 2  ;;  %v1155_v36 = vpop.permute.xlu1 %1154  ;;  %v1066_v48 = vmul.f32 %v1063_v26, %v4114_v43 }
 0x30e   : >> { %v1153_v2 = vpop.permute.xlu0 %1152  ;;  %v1104_v6 = vrot.slane %v1098_v5, 3  ;;  %v1078_v40 = vsel %vm448_vm0, %v1075_v57, %v1077_v8  ;;  %v1119_v22 = vrot.slane %v1113_v1, 4  ;;  %v1093_v30 = vsel %vm465_vm1, %v1090_v27, %v1092_v54 }
 0x30f   : >> { %v1082_v3 = vadd.f32 %v1078_v40, %v1067_v23  ;;  %v1076_v33 = vsel %vm448_vm0, %v1074_v24, %v1075_v57  ;;  %v1091_v31 = vsel %vm465_vm1, %v1089_v41, %v1090_v27  ;;  %v1108_v26 = vsel %vm482_vm2, %v1105_v35, %v1107_v59 }
 0x310   : >> { %v1081_v20 = vadd.f32 %v1076_v33, %v1066_v48  ;;  %v1106_v39 = vsel %vm482_vm2, %v1104_v6, %v1105_v35  ;;  %v1121_v44 = vsel %vm6449_vm3, %v1119_v22, %v1120_v56  ;;  %v1123_v40 = vsel %vm6467_vm5, %v1120_v56, %v1122_v51  ;;  %vm6491_vm5 = vmmov %vm6449_vm3 }
 0x311   : >> { %v1097_v29 = vadd.f32 %v1093_v30, %v1082_v3  ;;  %1376 = vrot.lane.b32.xlu2 %v4436_v10, %s6430_s2  ;;  %v1130_v24 = vadd.s32 4294967293, %v3746_v7 }
 0x312   : >> { %v1096_v8 = vadd.f32 %v1091_v31, %v1081_v20 }
 0x313   : >> { %v1112_v47 = vadd.f32 %v1108_v26, %v1097_v29  ;;  %vm1131_vm6 = vcmp.ge.s32.totalorder %v1130_v24, 0  ;;  %vm1132_vm7 = vcmp.lt.s32.totalorder %v1130_v24, 48 }
 0x314   : >> { %v1111_v23 = vadd.f32 %v1106_v39, %v1096_v8  ;;  %vm4627_vm8 = vmand %vm1131_vm6, %vm1132_vm7 }
 0x315   : >> { %v1127_v57 = vadd.f32 %v1123_v40, %v1112_v47  ;;  %v1169_v54 = vpop.permute.xlu1 %1168  ;;  %vm1135_vm9 = vmand %vm4223_vm10, %vm4627_vm8 }
 0x316   : >> { %v1163_v48 = vpop.permute.xlu0 %1162  ;;  %v1126_v5 = vadd.f32 %v1121_v44, %v1111_v23  ;;  %vm1134_vm13 = vmand %vm4233_vm12, %vm4627_vm8 }
 0x317   : >> { %v1129_v27 = vsub.f32 %v1127_v57, %v4160_v58 }
 0x318   : >> { %v1128_v22 = vsub.f32 %v1126_v5, %v4160_v58 }
 0x319   : >> { %v1141_v41 = vmax.f32 %v1129_v27, 0.0  ;;  %1386 = vrot.lane.b32.xlu2 %v4455_v16, %s6320_s0  ;;  %vm1137_vm11 = vcmp.le.f32.partialorder %v1129_v27, 5.0 }
 0x31a   : >> { %v1140_v59 = vmax.f32 %v1128_v22, 0.0  ;;  %vm1136_vm14 = vcmp.le.f32.partialorder %v1128_v22, 5.0  ;;  %vm1139_vm15 = vmand %vm1135_vm9, %vm1137_vm11 }
 0x31b   : >> { %v1143_v35 = vsub.f32 0.0, %v1141_v41  ;;  %vm1138_vm4 = vmand %vm1134_vm13, %vm1136_vm14 }
 0x31c   : >> { %v1142_v51 = vsub.f32 0.0, %v1140_v59 }
 0x31d   : >> { %v1146_v29 = vmul.f32 1.442695, %v1143_v35  ;;  %v1179_v56 = vpop.permute.xlu1 %1178 }
 0x31e   : >> { %v1177_v1 = vpop.permute.xlu0 %1176  ;;  %v1144_v6 = vmul.f32 1.442695, %v1142_v51 }
 0x31f   : >> { %3420 = vpow2.f32 %v1146_v29 }
 0x320   : >> { %3422 = vpow2.f32 %v1144_v6 }
 0x321   : >> { %1395 = vrot.lane.b32.xlu2 %v4470_v55, %s6320_s0 }
 0x325   : >> { %v3421_v33 = vpop.eup %3420  ;;  %v1188_v30 = vpop.permute.xlu1 %1187 }
 0x326   : >> { %v1186_v20 = vpop.permute.xlu0 %1185  ;;  %v3423_v31 = vpop.eup %3422  ;;  %v1149_v39 = vsel %vm1139_vm15, %v3421_v33, 0.0 }
 0x327   : >> { %v4642_v44 = vadd.f32 %v1149_v39, %v4422_v60  ;;  %v1157_v26 = vmul.f32 %v1155_v36, %v1149_v39  ;;  %v1173_v8 = vmul.f32 %v4562_v15, %v1149_v39  ;;  %v1148_v47 = vsel %vm1138_vm4, %v3423_v31, 0.0 }
 0x328   : >> { %v4646_v40 = vadd.f32 %v1148_v47, %v4426_v34  ;;  %v1156_v23 = vmul.f32 %v1153_v2, %v1148_v47  ;;  %v1164_v57 = vmul.f32 %v4550_v50, %v1148_v47  ;;  %v1172_v5 = vmul.f32 %v1169_v54, %v1148_v47  ;;  %v6472_v47 = vld [vmem:[#allocation41_spill] sm:$0xff] }
 0x329   : >> { %v4650_v27 = vadd.f32 %v1157_v26, %v4430_v49  ;;  %v4653_v24 = vadd.f32 %v1173_v8, %v4433_v53  ;;  %v1165_v22 = vmul.f32 %v1163_v48, %v1149_v39  ;;  %1407 = vrot.lane.b32.xlu2 %v4479_v62, %s6320_s0  ;;  %v1192_v53 = vmul.f32 %v1188_v30, %v3770_v19  ;;  %v6470_v39 = vld [vmem:[#allocation36_spill] sm:$0xff] }
 0x32a   : >> { %v4658_v60 = vadd.f32 %v1156_v23, %v4441_v61  ;;  %v4661_v34 = vadd.f32 %v1164_v57, %v4444_v9  ;;  %v4664_v2 = vadd.f32 %v1172_v5, %v4447_v21  ;;  %v1191_v36 = vmul.f32 %v1186_v20, %v6371_v18  ;;  %v6471_v26 = vld [vmem:[#allocation40_spill] sm:$0xff]  ;;  %v6473_v23 = vld [vmem:[#allocation39_spill] sm:$0xff] }
 0x32b   : >> { %v4667_v50 = vadd.f32 %v1165_v22, %v4450_v63  ;;  %v1183_v61 = vmul.f32 %v1179_v56, %v3754_v12  ;;  %v1182_v9 = vmul.f32 %v1177_v1, %v3752_v11  ;;  %v6474_v5 = vld [vmem:[#allocation43_spill] sm:$0xff]  ;;  %v6475_v22 = vld [vmem:[#allocation44_spill] sm:$0xff] }
 0x32d   : >> { %v1200_v49 = vpop.permute.xlu1 %1199  ;;  %v1195_v48 = vadd.f32 %v1192_v53, %v1183_v61  ;;  %v1194_v63 = vadd.f32 %v1191_v36, %v1182_v9  ;;  %v6477_v53 = vld [vmem:[#allocation29_spill] sm:$0xff] }
 0x32e   : >> { %v1198_v15 = vpop.permute.xlu0 %1197  ;;  %v1204_v54 = vmul.f32 %v1200_v49, %v6370_v25  ;;  %v6478_v61 = vld [vmem:[#allocation21_spill] sm:$0xff] }
 0x32f   : >> { %v1203_v21 = vmul.f32 %v1198_v15, %v6423_v52  ;;  %v6476_v15 = vld [vmem:[#allocation32_spill] sm:$0xff] }
 0x330   : >> { %v1207_v35 = vadd.f32 %v1204_v54, %v1195_v48  ;;  %v6479_v48 = vld [vmem:[#allocation24_spill] sm:$0xff] }
 0x331   : >> { %1419 = vrot.lane.b32.xlu2 %v4488_v45, %s6320_s0  ;;  %v1206_v51 = vadd.f32 %v1203_v21, %v1194_v63 }
 0x335   : >> { %v1212_v41 = vpop.permute.xlu1 %1211 }
 0x336   : >> { %v1210_v59 = vpop.permute.xlu0 %1209  ;;  %v1216_v29 = vadd.f32 %v6424_v0, %v1212_v41 }
 0x337   : >> { %v1215_v6 = vadd.f32 %v6425_v37, %v1210_v59 }
 0x338   : >> { %v4679_v3 = vadd.f32 %v1216_v29, %v1207_v35  ;;  %v6480_v35 = vld [vmem:[#allocation27_spill] sm:$0xff] }
 0x339   : >> { %v4681_v33 = vadd.f32 %v1215_v6, %v1206_v51 }
 0x33a   : >> { %1226 = vrot.lane.b32.xlu1 %v4679_v3, %s6416_s12 }
 0x33b   : >> { %1224 = vrot.lane.b32.xlu0 %v4681_v33, %s6416_s12 }
 0x342   : >> { %1238 = vrot.lane.b32.xlu1 %v4679_v3, %s6320_s0 }
 0x343   : >> { %1236 = vrot.lane.b32.xlu0 %v4681_v33, %s6320_s0  ;;  %v1229_v56 = vpop.permute.xlu2 %1228 }
 0x34a   : >> { %1250 = vrot.lane.b32.xlu1 %v4679_v3, %s6399_s3 }
 0x34b   : >> { %1248 = vrot.lane.b32.xlu0 %v4681_v33, %s6399_s3  ;;  %v1241_v1 = vpop.permute.xlu2 %1240 }
 0x352   : >> { %1262 = vrot.lane.b32.xlu1 %v4679_v3, %s6430_s2 }
 0x353   : >> { %1260 = vrot.lane.b32.xlu0 %v4681_v33, %s6430_s2  ;;  %v1253_v30 = vpop.permute.xlu2 %1252 }
 0x35a   : >> { %1360 = vrot.lane.b32.xlu1 %v4501_v14, %s6430_s2 }
 0x35b   : >> { %1358 = vrot.lane.b32.xlu0 %v4506_v32, %s6430_s2  ;;  %v1265_v20 = vpop.permute.xlu2 %1264 }
 0x362   : >> { %1374 = vrot.lane.b32.xlu1 %v4511_v38, %s6430_s2 }
 0x363   : >> { %1368 = vrot.lane.b32.xlu0 %v4516_v28, %s6430_s2  ;;  %v4707_v31 = vpop.permute.xlu2 %1366 }
 0x36a   : >> { %1384 = vrot.lane.b32.xlu1 %v6470_v39, %s6320_s0 }
 0x36b   : >> { %1382 = vrot.lane.b32.xlu0 %v6471_v26, %s6320_s0  ;;  %v4713_v8 = vpop.permute.xlu2 %1376 }
 0x372   : >> { %1393 = vrot.lane.b32.xlu1 %v6472_v47, %s6320_s0 }
 0x373   : >> { %1391 = vrot.lane.b32.xlu0 %v6473_v23, %s6320_s0  ;;  %v1387_v57 = vpop.permute.xlu2 %1386 }
 0x374   : >> { %v1390_v36 = vmul.f32 %v1387_v57, %v6372_v13 }
 0x37a   : >> { %1405 = vrot.lane.b32.xlu1 %v6474_v5, %s6320_s0 }
 0x37b   : >> { %1403 = vrot.lane.b32.xlu0 %v6475_v22, %s6320_s0  ;;  %v1396_v49 = vpop.permute.xlu2 %1395 }
 0x37c   : >> { %v1399_v9 = vmul.f32 %v1396_v49, %v6478_v61  ;;  %v6482_v49 = vld [vmem:[#allocation47_spill] sm:$0xff] }
 0x37e   : >> { %v1402_v21 = vadd.f32 %v1399_v9, %v1390_v36  ;;  %v1223_v36 = vmul.f32 %v4568_v17, %v6482_v49  ;;  %v6483_v9 = vld [vmem:[#allocation46_spill] sm:$0xff]  ;;  %v1599_v17 = vmul.f32 %v4479_v62, %v6479_v48 }
 0x382   : >> { %1417 = vrot.lane.b32.xlu1 %v6476_v15, %s6320_s0 }
 0x383   : >> { %1415 = vrot.lane.b32.xlu0 %v6477_v53, %s6320_s0  ;;  %v1408_v54 = vpop.permute.xlu2 %1407 }
 0x384   : >> { %v1411_v63 = vmul.f32 %v1408_v54, %v6479_v48  ;;  %v1232_v54 = vmul.f32 %v1229_v56, %v6483_v9  ;;  %v6486_v56 = vld [vmem:[#allocation49_spill] sm:$0xff] }
 0x385   : >> { %v1256_v22 = vmul.f32 %v1253_v30, %v6486_v56  ;;  %v1222_v30 = vmul.f32 %v4679_v3, %v6482_v49  ;;  %v6488_v3 = vld [vmem:[#allocation51_spill] sm:$0xff] }
 0x386   : >> { %v1414_v41 = vadd.f32 %v1411_v63, %v1402_v21  ;;  %v6484_v21 = vld [vmem:[#allocation42_spill] sm:$0xff]  ;;  %v1590_v63 = vmul.f32 %v4455_v16, %v6372_v13  ;;  %v1605_v13 = vadd.f32 %v4488_v45, %v6480_v35 }
 0x38b   : >> { %v1420_v59 = vpop.permute.xlu2 %1419 }
 0x38c   : >> { %v1423_v51 = vadd.f32 %v6480_v35, %v1420_v59  ;;  %v1235_v59 = vadd.f32 %v1232_v54, %v1223_v36  ;;  %v6487_v36 = vld [vmem:[#allocation50_spill] sm:$0xff] }
 0x38d   : >> { %v1268_v54 = vmul.f32 %v1265_v20, %v6487_v36 }
 0x38e   : >> { %v4731_v29 = vadd.f32 %v1423_v51, %v1414_v41  ;;  %v1593_v41 = vmul.f32 %v4470_v55, %v6478_v61  ;;  %v6485_v51 = vld [vmem:[#allocation48_spill] sm:$0xff] }
 0x38f   : >> { %v1244_v53 = vmul.f32 %v1241_v1, %v6485_v51 }
 0x390   : >> { %6481 = vst [vmem:[#allocation30_spill] sm:$0xff] %v4731_v29  ;;  %1434 = vrot.lane.b32.xlu2 %v4731_v29, %s6416_s12  ;;  %v1596_v38 = vadd.f32 %v1593_v41, %v1590_v63 }
 0x391   : >> { %v1247_v15 = vadd.f32 %v1244_v53, %v1235_v59 }
 0x393   : >> { %v1259_v61 = vadd.f32 %v1256_v22, %v1247_v15 }
 0x395   : >> { %v1271_v15 = vadd.f32 %v1268_v54, %v1259_v61 }
 0x398   : >> { %1446 = vrot.lane.b32.xlu2 %v4731_v29, %s6320_s0 }
 0x3a0   : >> { %1458 = vrot.lane.b32.xlu2 %v4731_v29, %s6399_s3 }
 0x3a8   : >> { %1470 = vrot.lane.b32.xlu2 %v4731_v29, %s6430_s2 }
 0x3ac   : >> { %v1227_v6 = vpop.permute.xlu1 %1226 }
 0x3ad   : >> { %v1225_v57 = vpop.permute.xlu0 %1224  ;;  %v1231_v63 = vmul.f32 %v1227_v6, %v6483_v9 }
 0x3ae   : >> { %v1230_v53 = vmul.f32 %v1225_v57, %v6483_v9 }
 0x3b0   : >> { %1572 = vrot.lane.b32.xlu2 %v6484_v21, %s6320_s0  ;;  %v1602_v21 = vadd.f32 %v1599_v17, %v1596_v38  ;;  %v1221_v38 = vmul.f32 %v4681_v33, %v6482_v49 }
 0x3b2   : >> { %v4759_v23 = vadd.f32 %v1605_v13, %v1602_v21  ;;  %v1234_v13 = vadd.f32 %v1231_v63, %v1222_v30  ;;  %v1233_v20 = vadd.f32 %v1230_v53, %v1221_v38  ;;  %v1276_v21 = vmul.f32 %v1271_v15, %v6488_v3 }
 0x3b4   : >> { %v1239_v29 = vpop.permute.xlu1 %1238  ;;  %v1283_v30 = vrot.slane %v1276_v21, 1 }
 0x3b5   : >> { %v1237_v28 = vpop.permute.xlu0 %1236  ;;  %v1243_v41 = vmul.f32 %v1239_v29, %v6485_v51 }
 0x3b6   : >> { %v1242_v22 = vmul.f32 %v1237_v28, %v6485_v51 }
 0x3b7   : >> { %v1246_v59 = vadd.f32 %v1243_v41, %v1234_v13 }
 0x3b8   : >> { %1582 = vrot.lane.b32.xlu2 %v4436_v10, %s6320_s0  ;;  %v1245_v17 = vadd.f32 %v1242_v22, %v1233_v20  ;;  %v6489_v10 = vld [vmem:[#allocation52_spill] sm:$0xff] }
 0x3b9   : >> { %v1291_v33 = vmul.f32 %v1271_v15, %v6489_v10 }
 0x3bb   : >> { %v1298_v41 = vrot.slane %v1291_v33, 2 }
 0x3bc   : >> { %v1251_v1 = vpop.permute.xlu1 %1250 }
 0x3bd   : >> { %v1249_v5 = vpop.permute.xlu0 %1248  ;;  %v1255_v6 = vmul.f32 %v1251_v1, %v6486_v56  ;;  %v1306_v1 = vmul.f32 %v1271_v15, %v6447_v46 }
 0x3be   : >> { %v1254_v57 = vmul.f32 %v1249_v5, %v6486_v56  ;;  %v6490_v5 = vld [vmem:[#allocation54_spill] sm:$0xff] }
 0x3bf   : >> { %v1258_v49 = vadd.f32 %v1255_v6, %v1246_v59  ;;  %v1321_v38 = vmul.f32 %v1271_v15, %v6490_v5  ;;  %v1313_v56 = vrot.slane %v1306_v1, 3 }
 0x3c0   : >> { %1616 = vrot.lane.b32.xlu2 %v4759_v23, %s6416_s12  ;;  %v1257_v28 = vadd.f32 %v1254_v57, %v1245_v17 }
 0x3c1   : >> { %v1328_v35 = vrot.slane %v1321_v38, 4 }
 0x3c4   : >> { %v1263_v9 = vpop.permute.xlu1 %1262 }
 0x3c5   : >> { %v1261_v29 = vpop.permute.xlu0 %1260  ;;  %v1267_v61 = vmul.f32 %v1263_v9, %v6487_v36 }
 0x3c6   : >> { %v1266_v54 = vmul.f32 %v1261_v29, %v6487_v36 }
 0x3c7   : >> { %v1270_v63 = vadd.f32 %v1267_v61, %v1258_v49 }
 0x3c8   : >> { %v1269_v53 = vadd.f32 %v1266_v54, %v1257_v28  ;;  %1628 = vrot.lane.b32.xlu2 %v4759_v23, %s6320_s0 }
 0x3c9   : >> { %v1275_v22 = vmul.f32 %v1270_v63, %v6488_v3  ;;  %v1290_v13 = vmul.f32 %v1270_v63, %v6489_v10  ;;  %v1305_v20 = vmul.f32 %v1270_v63, %v6447_v46  ;;  %v1273_v9 = vmul.f32 %v1270_v63, %v4114_v43 }
 0x3ca   : >> { %v1320_v49 = vmul.f32 %v1270_v63, %v6490_v5  ;;  %v1274_v6 = vmul.f32 %v1269_v53, %v6488_v3  ;;  %v1289_v57 = vmul.f32 %v1269_v53, %v6489_v10  ;;  %v1304_v21 = vmul.f32 %v1269_v53, %v6447_v46 }
 0x3cb   : >> { %v1281_v59 = vrot.slane %v1275_v22, 1  ;;  %v1296_v15 = vrot.slane %v1290_v13, 2  ;;  %v1311_v17 = vrot.slane %v1305_v20, 3  ;;  %v1319_v61 = vmul.f32 %v1269_v53, %v6490_v5 }
 0x3cc   : >> { %v1326_v33 = vrot.slane %v1320_v49, 4  ;;  %v1280_v29 = vrot.slane %v1274_v6, 1  ;;  %v1295_v28 = vrot.slane %v1289_v57, 2  ;;  %v1361_v54 = vpop.permute.xlu1 %1360  ;;  %v1272_v51 = vmul.f32 %v1269_v53, %v4114_v43 }
 0x3cd   : >> { %v1359_v36 = vpop.permute.xlu0 %1358  ;;  %v1310_v63 = vrot.slane %v1304_v21, 3  ;;  %v1284_v3 = vsel %vm448_vm0, %v1281_v59, %v1283_v30  ;;  %v1325_v10 = vrot.slane %v1319_v61, 4  ;;  %v1299_v20 = vsel %vm465_vm1, %v1296_v15, %v1298_v41 }
 0x3ce   : >> { %v1288_v22 = vadd.f32 %v1284_v3, %v1273_v9  ;;  %v1282_v13 = vsel %vm448_vm0, %v1280_v29, %v1281_v59  ;;  %v1297_v6 = vsel %vm465_vm1, %v1295_v28, %v1296_v15  ;;  %v1314_v53 = vsel %vm482_vm2, %v1311_v17, %v1313_v56 }
 0x3cf   : >> { %v1287_v49 = vadd.f32 %v1282_v13, %v1272_v51  ;;  %v1312_v57 = vsel %vm482_vm2, %v1310_v63, %v1311_v17  ;;  %v1327_v1 = vsel %vm6449_vm3, %v1325_v10, %v1326_v33  ;;  %v1329_v3 = vsel %vm6491_vm5, %v1326_v33, %v1328_v35  ;;  %vm6521_vm5 = vmmov %vm6449_vm3 }
 0x3d0   : >> { %v1303_v5 = vadd.f32 %v1299_v20, %v1288_v22  ;;  %1640 = vrot.lane.b32.xlu2 %v4759_v23, %s6399_s3  ;;  %v1336_v29 = vadd.s32 4294967294, %v3746_v7 }
 0x3d1   : >> { %v1302_v30 = vadd.f32 %v1297_v6, %v1287_v49 }
 0x3d2   : >> { %v1318_v38 = vadd.f32 %v1314_v53, %v1303_v5  ;;  %vm1337_vm6 = vcmp.ge.s32.totalorder %v1336_v29, 0  ;;  %vm1338_vm7 = vcmp.lt.s32.totalorder %v1336_v29, 48 }
 0x3d3   : >> { %v1317_v9 = vadd.f32 %v1312_v57, %v1302_v30  ;;  %vm4806_vm8 = vmand %vm1337_vm6, %vm1338_vm7 }
 0x3d4   : >> { %v1333_v59 = vadd.f32 %v1329_v3, %v1318_v38  ;;  %v1375_v41 = vpop.permute.xlu1 %1374  ;;  %vm1341_vm9 = vmand %vm4223_vm10, %vm4806_vm8 }
 0x3d5   : >> { %v1369_v51 = vpop.permute.xlu0 %1368  ;;  %v1332_v21 = vadd.f32 %v1327_v1, %v1317_v9  ;;  %vm1340_vm13 = vmand %vm4233_vm12, %vm4806_vm8 }
 0x3d6   : >> { %v1335_v15 = vsub.f32 %v1333_v59, %v4160_v58 }
 0x3d7   : >> { %v1334_v10 = vsub.f32 %v1332_v21, %v4160_v58 }
 0x3d8   : >> { %v1347_v28 = vmax.f32 %v1335_v15, 0.0  ;;  %1652 = vrot.lane.b32.xlu2 %v4759_v23, %s6430_s2  ;;  %vm1343_vm11 = vcmp.le.f32.partialorder %v1335_v15, 5.0 }
 0x3d9   : >> { %v1346_v56 = vmax.f32 %v1334_v10, 0.0  ;;  %vm1342_vm14 = vcmp.le.f32.partialorder %v1334_v10, 5.0  ;;  %vm1345_vm15 = vmand %vm1341_vm9, %vm1343_vm11 }
 0x3da   : >> { %v1349_v17 = vsub.f32 0.0, %v1347_v28  ;;  %vm1344_vm4 = vmand %vm1340_vm13, %vm1342_vm14 }
 0x3db   : >> { %v1348_v35 = vsub.f32 0.0, %v1346_v56 }
 0x3dc   : >> { %v1352_v5 = vmul.f32 1.442695, %v1349_v17  ;;  %v1385_v33 = vpop.permute.xlu1 %1384 }
 0x3dd   : >> { %v1383_v61 = vpop.permute.xlu0 %1382  ;;  %v1350_v63 = vmul.f32 1.442695, %v1348_v35 }
 0x3de   : >> { %3424 = vpow2.f32 %v1352_v5 }
 0x3df   : >> { %3426 = vpow2.f32 %v1350_v63 }
 0x3e0   : >> { %1761 = vrot.lane.b32.xlu2 %v4455_v16, %s6416_s12 }
 0x3e4   : >> { %v3425_v13 = vpop.eup %3424  ;;  %v1394_v20 = vpop.permute.xlu1 %1393 }
 0x3e5   : >> { %v1392_v49 = vpop.permute.xlu0 %1391  ;;  %v3427_v6 = vpop.eup %3426  ;;  %v1355_v57 = vsel %vm1345_vm15, %v3425_v13, 0.0 }
 0x3e6   : >> { %v4821_v16 = vadd.f32 %v1355_v57, %v4642_v44  ;;  %v1363_v1 = vmul.f32 %v1361_v54, %v1355_v57  ;;  %v1379_v53 = vmul.f32 %v4713_v8, %v1355_v57  ;;  %v1354_v30 = vsel %vm1344_vm4, %v3427_v6, 0.0 }
 0x3e7   : >> { %v4825_v38 = vadd.f32 %v1354_v30, %v4646_v40  ;;  %v1362_v3 = vmul.f32 %v1359_v36, %v1354_v30  ;;  %v1370_v9 = vmul.f32 %v4707_v31, %v1354_v30  ;;  %v1378_v59 = vmul.f32 %v1375_v41, %v1354_v30 }
 0x3e8   : >> { %v4829_v21 = vadd.f32 %v1363_v1, %v4650_v27  ;;  %v4832_v15 = vadd.f32 %v1379_v53, %v4653_v24  ;;  %v1371_v29 = vmul.f32 %v1369_v51, %v1355_v57  ;;  %1770 = vrot.lane.b32.xlu2 %v4470_v55, %s6416_s12  ;;  %v1398_v54 = vmul.f32 %v1394_v20, %v3770_v19  ;;  %v6494_v57 = vld [vmem:[#allocation39_spill] sm:$0xff] }
 0x3e9   : >> { %v4837_v44 = vadd.f32 %v1362_v3, %v4658_v60  ;;  %v4840_v40 = vadd.f32 %v1370_v9, %v4661_v34  ;;  %v4843_v8 = vadd.f32 %v1378_v59, %v4664_v2  ;;  %v1397_v55 = vmul.f32 %v1392_v49, %v6371_v18  ;;  %v6495_v3 = vld [vmem:[#allocation43_spill] sm:$0xff] }
 0x3ea   : >> { %v4846_v31 = vadd.f32 %v1371_v29, %v4667_v50  ;;  %v4848_v27 = vpop.permute.xlu2 %1434  ;;  %v1389_v60 = vmul.f32 %v1385_v33, %v3754_v12  ;;  %v1388_v34 = vmul.f32 %v1383_v61, %v3752_v11  ;;  %v1589_v20 = vmul.f32 %v6470_v39, %v3754_v12 }
 0x3eb   : >> { %v1592_v49 = vmul.f32 %v6472_v47, %v3770_v19  ;;  %v1588_v6 = vmul.f32 %v6471_v26, %v3752_v11  ;;  %v1591_v1 = vmul.f32 %v6494_v57, %v6371_v18  ;;  %v1598_v9 = vmul.f32 %v6495_v3, %v6370_v25 }
 0x3ec   : >> { %v1406_v24 = vpop.permute.xlu1 %1405  ;;  %v1401_v51 = vadd.f32 %v1398_v54, %v1389_v60  ;;  %v1400_v10 = vadd.f32 %v1397_v55, %v1388_v34  ;;  %v6499_v54 = vld [vmem:[#allocation33_spill] sm:$0xff] }
 0x3ed   : >> { %v1404_v36 = vpop.permute.xlu0 %1403  ;;  %v1410_v2 = vmul.f32 %v1406_v24, %v6370_v25  ;;  %v1595_v30 = vadd.f32 %v1592_v49, %v1589_v20  ;;  %v1594_v59 = vadd.f32 %v1591_v1, %v1588_v6  ;;  %v6500_v34 = vld [vmem:[#allocation29_spill] sm:$0xff] }
 0x3ee   : >> { %v1409_v50 = vmul.f32 %v1404_v36, %v6423_v52  ;;  %v6498_v36 = vld [vmem:[#allocation28_spill] sm:$0xff]  ;;  %v6506_v20 = vld [vmem:[#allocation21_spill] sm:$0xff] }
 0x3ef   : >> { %v1413_v17 = vadd.f32 %v1410_v2, %v1401_v51  ;;  %v1601_v55 = vadd.f32 %v1598_v9, %v1595_v30  ;;  %v1603_v2 = vadd.f32 %v6500_v34, %v6425_v37 }
 0x3f0   : >> { %1782 = vrot.lane.b32.xlu2 %v4479_v62, %s6416_s12  ;;  %v1412_v35 = vadd.f32 %v1409_v50, %v1400_v10 }
 0x3f2   : >> { %v4858_v41 = vpop.permute.xlu2 %1446 }
 0x3f4   : >> { %v1418_v28 = vpop.permute.xlu1 %1417 }
 0x3f5   : >> { %v1416_v56 = vpop.permute.xlu0 %1415  ;;  %v1422_v5 = vadd.f32 %v6424_v0, %v1418_v28 }
 0x3f6   : >> { %v1421_v62 = vadd.f32 %v6425_v37, %v1416_v56 }
 0x3f7   : >> { %v4862_v63 = vadd.f32 %v1422_v5, %v1413_v17  ;;  %v6505_v5 = vld [vmem:[#allocation18_spill] sm:$0xff] }
 0x3f8   : >> { %v4864_v33 = vadd.f32 %v1421_v62, %v1412_v35  ;;  %1794 = vrot.lane.b32.xlu2 %v4488_v45, %s6416_s12 }
 0x3f9   : >> { %1432 = vrot.lane.b32.xlu1 %v4862_v63, %s6416_s12 }
 0x3fa   : >> { %1430 = vrot.lane.b32.xlu0 %v4864_v33, %s6416_s12  ;;  %v4872_v61 = vpop.permute.xlu2 %1458 }
 0x401   : >> { %1444 = vrot.lane.b32.xlu1 %v4862_v63, %s6320_s0 }
 0x402   : >> { %1442 = vrot.lane.b32.xlu0 %v4864_v33, %s6320_s0  ;;  %v4878_v22 = vpop.permute.xlu2 %1470 }
 0x409   : >> { %1456 = vrot.lane.b32.xlu1 %v4862_v63, %s6399_s3 }
 0x40a   : >> { %1454 = vrot.lane.b32.xlu0 %v4864_v33, %s6399_s3  ;;  %v4884_v45 = vpop.permute.xlu2 %1572 }
 0x411   : >> { %1468 = vrot.lane.b32.xlu1 %v4862_v63, %s6430_s2 }
 0x412   : >> { %1466 = vrot.lane.b32.xlu0 %v4864_v33, %s6430_s2  ;;  %v4890_v13 = vpop.permute.xlu2 %1582 }
 0x419   : >> { %1566 = vrot.lane.b32.xlu1 %v4501_v14, %s6320_s0  ;;  %v6496_v14 = vld [vmem:[#allocation44_spill] sm:$0xff] }
 0x41a   : >> { %1564 = vrot.lane.b32.xlu0 %v4506_v32, %s6320_s0  ;;  %v4904_v53 = vpop.permute.xlu2 %1616  ;;  %v1597_v29 = vmul.f32 %v6496_v14, %v6423_v52  ;;  %v6497_v32 = vld [vmem:[#allocation32_spill] sm:$0xff] }
 0x41b   : >> { %v1604_v24 = vadd.f32 %v6497_v32, %v6424_v0 }
 0x41c   : >> { %v1600_v60 = vadd.f32 %v1597_v29, %v1594_v59 }
 0x41d   : >> { %v4920_v51 = vadd.f32 %v1604_v24, %v1601_v55 }
 0x41e   : >> { %v4922_v10 = vadd.f32 %v1603_v2, %v1600_v60  ;;  %v6512_v60 = vld [vmem:[#allocation48_spill] sm:$0xff] }
 0x41f   : >> { %6501 = vst [vmem:[#allocation31_spill] sm:$0xff] %v4920_v51 }
 0x420   : >> { %6502 = vst [vmem:[#allocation34_spill] sm:$0xff] %v4922_v10 }
 0x421   : >> { %1580 = vrot.lane.b32.xlu1 %v6498_v36, %s6320_s0 }
 0x422   : >> { %1574 = vrot.lane.b32.xlu0 %v6499_v54, %s6320_s0  ;;  %v4918_v50 = vpop.permute.xlu2 %1628  ;;  %v6511_v54 = vld [vmem:[#allocation46_spill] sm:$0xff] }
 0x429   : >> { %1614 = vrot.lane.b32.xlu1 %v4920_v51, %s6416_s12 }
 0x42a   : >> { %1612 = vrot.lane.b32.xlu0 %v4922_v10, %s6416_s12  ;;  %v4928_v28 = vpop.permute.xlu2 %1640 }
 0x42b   : >> { %6503 = vst [vmem:[#allocation35_spill] sm:$0xff] %v4928_v28 }
 0x431   : >> { %1626 = vrot.lane.b32.xlu1 %v4920_v51, %s6320_s0 }
 0x432   : >> { %1624 = vrot.lane.b32.xlu0 %v4922_v10, %s6320_s0  ;;  %v4934_v56 = vpop.permute.xlu2 %1652 }
 0x433   : >> { %6504 = vst [vmem:[#allocation37_spill] sm:$0xff] %v4934_v56 }
 0x439   : >> { %1638 = vrot.lane.b32.xlu1 %v4920_v51, %s6399_s3 }
 0x43a   : >> { %1636 = vrot.lane.b32.xlu0 %v4922_v10, %s6399_s3  ;;  %v1762_v17 = vpop.permute.xlu2 %1761 }
 0x43b   : >> { %v1765_v62 = vmul.f32 %v1762_v17, %v6505_v5 }
 0x441   : >> { %1650 = vrot.lane.b32.xlu1 %v4920_v51, %s6430_s2 }
 0x442   : >> { %1648 = vrot.lane.b32.xlu0 %v4922_v10, %s6430_s2  ;;  %v1771_v35 = vpop.permute.xlu2 %1770 }
 0x443   : >> { %v1774_v49 = vmul.f32 %v1771_v35, %v6506_v20  ;;  %v6513_v35 = vld [vmem:[#allocation49_spill] sm:$0xff] }
 0x445   : >> { %v1777_v1 = vadd.f32 %v1774_v49, %v1765_v62  ;;  %v1462_v62 = vmul.f32 %v4872_v61, %v6513_v35  ;;  %v4983_v49 = vld [vmem:[%s3805_s1 + $0x48] sm:$0xff] }
 0x449   : >> { %1759 = vrot.lane.b32.xlu1 %v6470_v39, %s6416_s12  ;;  %v6507_v39 = vld [vmem:[#allocation27_spill] sm:$0xff] }
 0x44a   : >> { %1757 = vrot.lane.b32.xlu0 %v6471_v26, %s6416_s12  ;;  %v1783_v6 = vpop.permute.xlu2 %1782 }
 0x44b   : >> { %v1786_v30 = vmul.f32 %v1783_v6, %v6479_v48 }
 0x44d   : >> { %v1789_v9 = vadd.f32 %v1786_v30, %v1777_v1 }
 0x451   : >> { %1768 = vrot.lane.b32.xlu1 %v6472_v47, %s6416_s12 }
 0x452   : >> { %1766 = vrot.lane.b32.xlu0 %v6494_v57, %s6416_s12  ;;  %v1795_v59 = vpop.permute.xlu2 %1794  ;;  %v6509_v57 = vld [vmem:[#allocation47_spill] sm:$0xff] }
 0x453   : >> { %v1798_v29 = vadd.f32 %v6507_v39, %v1795_v59  ;;  %v1427_v61 = vmul.f32 %v4864_v33, %v6509_v57  ;;  %v6517_v33 = vld [vmem:[#allocation52_spill] sm:$0xff] }
 0x455   : >> { %v4956_v24 = vadd.f32 %v1798_v29, %v1789_v9  ;;  %v1428_v29 = vmul.f32 %v4862_v63, %v6509_v57 }
 0x457   : >> { %6508 = vst [vmem:[#allocation38_spill] sm:$0xff] %v4956_v24  ;;  %1809 = vrot.lane.b32.xlu2 %v4956_v24, %s6416_s12 }
 0x459   : >> { %1780 = vrot.lane.b32.xlu1 %v6495_v3, %s6416_s12  ;;  %v6510_v3 = vld [vmem:[#allocation30_spill] sm:$0xff] }
 0x45a   : >> { %1778 = vrot.lane.b32.xlu0 %v6496_v14, %s6416_s12  ;;  %v1429_v36 = vmul.f32 %v6510_v3, %v6509_v57  ;;  %v1438_v14 = vmul.f32 %v4848_v27, %v6511_v54  ;;  %v6514_v27 = vld [vmem:[#allocation50_spill] sm:$0xff] }
 0x45b   : >> { %v1474_v1 = vmul.f32 %v4878_v22, %v6514_v27 }
 0x45c   : >> { %v1441_v55 = vadd.f32 %v1438_v14, %v1429_v36 }
 0x45f   : >> { %1821 = vrot.lane.b32.xlu2 %v4956_v24, %s6320_s0 }
 0x461   : >> { %1792 = vrot.lane.b32.xlu1 %v6497_v32, %s6416_s12  ;;  %v1450_v32 = vmul.f32 %v4858_v41, %v6512_v60 }
 0x462   : >> { %1790 = vrot.lane.b32.xlu0 %v6500_v34, %s6416_s12 }
 0x463   : >> { %v1453_v17 = vadd.f32 %v1450_v32, %v1441_v55  ;;  %v6515_v55 = vld [vmem:[#allocation45_spill] sm:$0xff] }
 0x465   : >> { %v1465_v6 = vadd.f32 %v1462_v62, %v1453_v17  ;;  %v6516_v62 = vld [vmem:[#allocation51_spill] sm:$0xff] }
 0x467   : >> { %1833 = vrot.lane.b32.xlu2 %v4956_v24, %s6399_s3  ;;  %v1477_v14 = vadd.f32 %v1474_v1, %v1465_v6 }
 0x469   : >> { %v1497_v56 = vmul.f32 %v1477_v14, %v6517_v33 }
 0x46b   : >> { %v1433_v26 = vpop.permute.xlu1 %1432 }
 0x46c   : >> { %v1431_v47 = vpop.permute.xlu0 %1430  ;;  %v1437_v59 = vmul.f32 %v1433_v26, %v6511_v54 }
 0x46d   : >> { %v1436_v41 = vmul.f32 %v1431_v47, %v6511_v54 }
 0x46e   : >> { %v1440_v22 = vadd.f32 %v1437_v59, %v1428_v29 }
 0x46f   : >> { %1845 = vrot.lane.b32.xlu2 %v4956_v24, %s6430_s2  ;;  %v1439_v32 = vadd.f32 %v1436_v41, %v1427_v61  ;;  %v1482_v24 = vmul.f32 %v1477_v14, %v6516_v62  ;;  %v6518_v61 = vld [vmem:[#allocation54_spill] sm:$0xff] }
 0x473   : >> { %v1445_v2 = vpop.permute.xlu1 %1444 }
 0x474   : >> { %v1443_v34 = vpop.permute.xlu0 %1442  ;;  %v1449_v3 = vmul.f32 %v1445_v2, %v6512_v60 }
 0x475   : >> { %v1448_v36 = vmul.f32 %v1443_v34, %v6512_v60 }
 0x476   : >> { %v1452_v17 = vadd.f32 %v1449_v3, %v1440_v22  ;;  %v1527_v3 = vmul.f32 %v1477_v14, %v6518_v61 }
 0x477   : >> { %1947 = vrot.lane.b32.xlu2 %v4983_v49, %s6416_s12  ;;  %v1451_v63 = vadd.f32 %v1448_v36, %v1439_v32  ;;  %v5008_v36 = vld [vmem:[%s3805_s1 + $0x16] sm:$0xf] }
 0x478   : >> { %6519 = vst [vmem:[#allocation36_spill] sm:$0xff] %v5008_v36 }
 0x47b   : >> { %v1457_v30 = vpop.permute.xlu1 %1456 }
 0x47c   : >> { %v1455_v9 = vpop.permute.xlu0 %1454  ;;  %v1461_v26 = vmul.f32 %v1457_v30, %v6513_v35  ;;  %v1489_v30 = vrot.slane %v1482_v24, 1 }
 0x47d   : >> { %v1460_v47 = vmul.f32 %v1455_v9, %v6513_v35  ;;  %v1512_v9 = vmul.f32 %v1477_v14, %v6447_v46 }
 0x47e   : >> { %v1464_v34 = vadd.f32 %v1461_v26, %v1452_v17 }
 0x47f   : >> { %1957 = vrot.lane.b32.xlu2 %v6515_v55, %s6416_s12  ;;  %v1463_v6 = vadd.f32 %v1460_v47, %v1451_v63  ;;  %v1504_v55 = vrot.slane %v1497_v56, 2  ;;  %v1519_v35 = vrot.slane %v1512_v9, 3 }
 0x483   : >> { %v1469_v2 = vpop.permute.xlu1 %1468 }
 0x484   : >> { %v1467_v10 = vpop.permute.xlu0 %1466  ;;  %v1473_v1 = vmul.f32 %v1469_v2, %v6514_v27 }
 0x485   : >> { %v1472_v59 = vmul.f32 %v1467_v10, %v6514_v27 }
 0x486   : >> { %v1476_v41 = vadd.f32 %v1473_v1, %v1464_v34 }
 0x487   : >> { %v1475_v29 = vadd.f32 %v1472_v59, %v1463_v6  ;;  %1967 = vrot.lane.b32.xlu2 %v5008_v36, %s6399_s3 }
 0x488   : >> { %v1481_v22 = vmul.f32 %v1476_v41, %v6516_v62  ;;  %v1496_v32 = vmul.f32 %v1476_v41, %v6517_v33  ;;  %v1511_v26 = vmul.f32 %v1476_v41, %v6447_v46  ;;  %v1479_v10 = vmul.f32 %v1476_v41, %v4114_v43 }
 0x489   : >> { %v1526_v24 = vmul.f32 %v1476_v41, %v6518_v61  ;;  %v1480_v47 = vmul.f32 %v1475_v29, %v6516_v62  ;;  %v1495_v14 = vmul.f32 %v1475_v29, %v6517_v33  ;;  %v1510_v34 = vmul.f32 %v1475_v29, %v6447_v46 }
 0x48a   : >> { %v1487_v17 = vrot.slane %v1481_v22, 1  ;;  %v1502_v63 = vrot.slane %v1496_v32, 2  ;;  %v1517_v2 = vrot.slane %v1511_v26, 3  ;;  %v1525_v59 = vmul.f32 %v1475_v29, %v6518_v61 }
 0x48b   : >> { %v1532_v56 = vrot.slane %v1526_v24, 4  ;;  %v1486_v6 = vrot.slane %v1480_v47, 1  ;;  %v1501_v1 = vrot.slane %v1495_v14, 2  ;;  %v1567_v27 = vpop.permute.xlu1 %1566  ;;  %v1478_v41 = vmul.f32 %v1475_v29, %v4114_v43  ;;  %v5029_v29 = vld [vmem:[%s3805_s1 + $0x56] sm:$0xf] }
 0x48c   : >> { %v1565_v28 = vpop.permute.xlu0 %1564  ;;  %v1516_v51 = vrot.slane %v1510_v34, 3  ;;  %v1490_v62 = vsel %vm448_vm0, %v1487_v17, %v1489_v30  ;;  %v1534_v33 = vrot.slane %v1527_v3, 4  ;;  %v1531_v22 = vrot.slane %v1525_v59, 4  ;;  %6520 = vst [vmem:[#allocation40_spill] sm:$0xff] %v5029_v29 }
 0x48d   : >> { %v1494_v32 = vadd.f32 %v1490_v62, %v1479_v10  ;;  %v1488_v26 = vsel %vm448_vm0, %v1486_v6, %v1487_v17  ;;  %v1505_v24 = vsel %vm465_vm1, %v1502_v63, %v1504_v55  ;;  %v1503_v14 = vsel %vm465_vm1, %v1501_v1, %v1502_v63 }
 0x48e   : >> { %v1493_v47 = vadd.f32 %v1488_v26, %v1478_v41  ;;  %v1518_v61 = vsel %vm482_vm2, %v1516_v51, %v1517_v2  ;;  %v1533_v9 = vsel %vm6449_vm3, %v1531_v22, %v1532_v56  ;;  %v1520_v62 = vsel %vm482_vm2, %v1517_v2, %v1519_v35  ;;  %v5039_v22 = vld [vmem:[%s3805_s1 + $0x96] sm:$0xf] }
 0x48f   : >> { %v1509_v46 = vadd.f32 %v1505_v24, %v1494_v32  ;;  %1976 = vrot.lane.b32.xlu2 %v5029_v29, %s6399_s3  ;;  %v1535_v55 = vsel %vm6521_vm5, %v1532_v56, %v1534_v33  ;;  %v1542_v1 = vadd.s32 4294967295, %v3746_v7  ;;  %6522 = vst [vmem:[#allocation41_spill] sm:$0xff] %v5039_v22  ;;  %v5052_v24 = vld [vmem:[%s3855_s11 + $0x16] sm:$0xf]  ;;  %vm6548_vm5 = vmmov %vm6449_vm3 }
 0x490   : >> { %v1508_v30 = vadd.f32 %v1503_v14, %v1493_v47  ;;  %6525 = vst [vmem:[#allocation42_spill] sm:$0xff] %v5052_v24 }
 0x491   : >> { %v1524_v3 = vadd.f32 %v1520_v62, %v1509_v46  ;;  %vm1543_vm6 = vcmp.ge.s32.totalorder %v1542_v1, 0  ;;  %vm1544_vm7 = vcmp.lt.s32.totalorder %v1542_v1, 48 }
 0x492   : >> { %v1523_v10 = vadd.f32 %v1518_v61, %v1508_v30  ;;  %vm5047_vm8 = vmand %vm1543_vm6, %vm1544_vm7  ;;  %vm1724_vm7 = vcmp.ge.s32.totalorder %v3746_v7, 0 }
 0x493   : >> { %v1539_v17 = vadd.f32 %v1535_v55, %v1524_v3  ;;  %v1581_v63 = vpop.permute.xlu1 %1580  ;;  %vm1547_vm9 = vmand %vm4223_vm10, %vm5047_vm8 }
 0x494   : >> { %v1575_v34 = vpop.permute.xlu0 %1574  ;;  %v1538_v51 = vadd.f32 %v1533_v9, %v1523_v10  ;;  %vm1546_vm13 = vmand %vm4233_vm12, %vm5047_vm8  ;;  %vm1725_vm8 = vcmp.lt.s32.totalorder %v3746_v7, 48 }
 0x495   : >> { %v1541_v6 = vsub.f32 %v1539_v17, %v4160_v58  ;;  %vm6549_vm6 = vmmov %vm6449_vm3 }
 0x496   : >> { %v1540_v59 = vsub.f32 %v1538_v51, %v4160_v58 }
 0x497   : >> { %v1553_v41 = vmax.f32 %v1541_v6, 0.0  ;;  %1988 = vrot.lane.b32.xlu2 %v5039_v22, %s6399_s3  ;;  %vm1549_vm11 = vcmp.le.f32.partialorder %v1541_v6, 5.0 }
 0x498   : >> { %v1552_v46 = vmax.f32 %v1540_v59, 0.0  ;;  %vm1548_vm14 = vcmp.le.f32.partialorder %v1540_v59, 5.0  ;;  %vm1551_vm15 = vmand %vm1547_vm9, %vm1549_vm11 }
 0x499   : >> { %v1555_v35 = vsub.f32 0.0, %v1553_v41  ;;  %vm1550_vm4 = vmand %vm1546_vm13, %vm1548_vm14 }
 0x49a   : >> { %v1554_v33 = vsub.f32 0.0, %v1552_v46  ;;  %vm6550_vm9 = vmmov %vm6449_vm3 }
 0x49b   : >> { %v1558_v61 = vmul.f32 1.442695, %v1555_v35  ;;  %v5043_v2 = vpop.permute.xlu1 %1614  ;;  %vm5356_vm11 = vmand %vm1724_vm7, %vm1725_vm8 }
 0x49c   : >> { %v5045_v56 = vpop.permute.xlu0 %1612  ;;  %v1556_v32 = vmul.f32 1.442695, %v1554_v33  ;;  %vm1728_vm13 = vmand %vm4223_vm10, %vm5356_vm11 }
 0x49d   : >> { %3428 = vpow2.f32 %v1558_v61 }
 0x49e   : >> { %3430 = vpow2.f32 %v1556_v32 }
 0x49f   : >> { %2000 = vrot.lane.b32.xlu2 %v5052_v24, %s6399_s3 }
 0x4a3   : >> { %v3429_v47 = vpop.eup %3428  ;;  %v5064_v14 = vpop.permute.xlu1 %1626 }
 0x4a4   : >> { %v5066_v9 = vpop.permute.xlu0 %1624  ;;  %v3431_v62 = vpop.eup %3430  ;;  %v1561_v30 = vsel %vm1551_vm15, %v3429_v47, 0.0  ;;  %vm1727_vm15 = vmand %vm4233_vm12, %vm5356_vm11 }
 0x4a5   : >> { %v5069_v3 = vadd.f32 %v1561_v30, %v4821_v16  ;;  %v1569_v55 = vmul.f32 %v1567_v27, %v1561_v30  ;;  %v1585_v10 = vmul.f32 %v4890_v13, %v1561_v30  ;;  %v1560_v17 = vsel %vm1550_vm4, %v3431_v62, 0.0 }
 0x4a6   : >> { %v5073_v51 = vadd.f32 %v1560_v17, %v4825_v38  ;;  %v1568_v6 = vmul.f32 %v1565_v28, %v1560_v17  ;;  %v1576_v1 = vmul.f32 %v4884_v45, %v1560_v17  ;;  %v1584_v59 = vmul.f32 %v1581_v63, %v1560_v17 }
 0x4a7   : >> { %v5077_v41 = vadd.f32 %v1569_v55, %v4829_v21  ;;  %v5080_v46 = vadd.f32 %v1585_v10, %v4832_v15  ;;  %v1577_v35 = vmul.f32 %v1575_v34, %v1561_v30 }
 0x4a8   : >> { %v5083_v16 = vadd.f32 %v1568_v6, %v4837_v44  ;;  %v5086_v13 = vadd.f32 %v1576_v1, %v4840_v40  ;;  %v5089_v38 = vadd.f32 %v1584_v59, %v4843_v8 }
 0x4a9   : >> { %6526 = vst [vmem:[#allocation39_spill] sm:$0xff] %v5080_v46  ;;  %v5092_v28 = vadd.f32 %v1577_v35, %v4846_v31 }
 0x4aa   : >> { %6527 = vst [vmem:[#allocation43_spill] sm:$0xff] %v5086_v13 }
 0x4ab   : >> { %6528 = vst [vmem:[#allocation44_spill] sm:$0xff] %v5092_v28  ;;  %v5094_v45 = vpop.permute.xlu1 %1638 }
 0x4ac   : >> { %v5096_v21 = vpop.permute.xlu0 %1636 }
 0x4b1   : >> { %v5098_v27 = vpop.permute.xlu2 %1809 }
 0x4b3   : >> { %v5100_v15 = vpop.permute.xlu1 %1650 }
 0x4b4   : >> { %v5102_v63 = vpop.permute.xlu0 %1648 }
 0x4b9   : >> { %v5104_v44 = vpop.permute.xlu2 %1821 }
 0x4bb   : >> { %v1760_v40 = vpop.permute.xlu1 %1759 }
 0x4bc   : >> { %v1758_v34 = vpop.permute.xlu0 %1757  ;;  %v1764_v30 = vmul.f32 %v1760_v40, %v3754_v12 }
 0x4bd   : >> { %v1763_v55 = vmul.f32 %v1758_v34, %v3752_v11 }
 0x4c1   : >> { %v5106_v33 = vpop.permute.xlu2 %1833 }
 0x4c3   : >> { %v1769_v8 = vpop.permute.xlu1 %1768 }
 0x4c4   : >> { %v1767_v61 = vpop.permute.xlu0 %1766  ;;  %v1773_v47 = vmul.f32 %v1769_v8, %v3770_v19 }
 0x4c5   : >> { %v1772_v62 = vmul.f32 %v1767_v61, %v6371_v18 }
 0x4c6   : >> { %v1776_v1 = vadd.f32 %v1773_v47, %v1764_v30  ;;  %v5146_v30 = vld [vmem:[%s3805_s1 + $0x10] sm:$0xff] }
 0x4c7   : >> { %v1775_v59 = vadd.f32 %v1772_v62, %v1763_v55  ;;  %v5151_v55 = vld [vmem:[%s3805_s1 + $0x8] sm:$0xff] }
 0x4c9   : >> { %v5108_v31 = vpop.permute.xlu2 %1845 }
 0x4cb   : >> { %v1781_v32 = vpop.permute.xlu1 %1780 }
 0x4cc   : >> { %v1779_v26 = vpop.permute.xlu0 %1778  ;;  %v1785_v10 = vmul.f32 %v1781_v32, %v6370_v25 }
 0x4cd   : >> { %v1784_v17 = vmul.f32 %v1779_v26, %v6423_v52 }
 0x4ce   : >> { %v1788_v46 = vadd.f32 %v1785_v10, %v1776_v1 }
 0x4cf   : >> { %v1787_v13 = vadd.f32 %v1784_v17, %v1775_v59 }
 0x4d1   : >> { %v5116_v6 = vpop.permute.xlu2 %1947 }
 0x4d3   : >> { %v1793_v35 = vpop.permute.xlu1 %1792 }
 0x4d4   : >> { %v1791_v28 = vpop.permute.xlu0 %1790  ;;  %v1797_v8 = vadd.f32 %v6424_v0, %v1793_v35  ;;  %v5161_v35 = vld [vmem:[%s3805_s1 + $0x88] sm:$0xff] }
 0x4d5   : >> { %v1796_v61 = vadd.f32 %v6425_v37, %v1791_v28 }
 0x4d6   : >> { %v5120_v18 = vadd.f32 %v1797_v8, %v1788_v46  ;;  %v5166_v8 = vld [vmem:[%s3805_s1 + $0x50] sm:$0xff] }
 0x4d7   : >> { %v5122_v40 = vadd.f32 %v1796_v61, %v1787_v13  ;;  %v5173_v61 = vld [vmem:[%s3805_s1 + $0xe] sm:$0xff] }
 0x4d8   : >> { %1807 = vrot.lane.b32.xlu1 %v5120_v18, %s6416_s12  ;;  %6529 = vst [vmem:[#allocation32_spill] sm:$0xff] %v5173_v61 }
 0x4d9   : >> { %1805 = vrot.lane.b32.xlu0 %v5122_v40, %s6416_s12  ;;  %v5128_v34 = vpop.permute.xlu2 %1957 }
 0x4e0   : >> { %1819 = vrot.lane.b32.xlu1 %v5120_v18, %s6320_s0 }
 0x4e1   : >> { %1817 = vrot.lane.b32.xlu0 %v5122_v40, %s6320_s0  ;;  %v1968_v46 = vpop.permute.xlu2 %1967 }
 0x4e2   : >> { %v1971_v28 = vmul.f32 %v1968_v46, %v6505_v5  ;;  %v5178_v46 = vld [vmem:[%s3805_s1 + $0x6] sm:$0xff] }
 0x4e3   : >> { %6530 = vst [vmem:[#allocation28_spill] sm:$0xff] %v5178_v46 }
 0x4e8   : >> { %1831 = vrot.lane.b32.xlu1 %v5120_v18, %s6399_s3 }
 0x4e9   : >> { %1829 = vrot.lane.b32.xlu0 %v5122_v40, %s6399_s3  ;;  %v1977_v13 = vpop.permute.xlu2 %1976 }
 0x4ea   : >> { %v1980_v32 = vmul.f32 %v1977_v13, %v6506_v20  ;;  %v5185_v13 = vld [vmem:[%s3805_s1 + $0x4e] sm:$0xff] }
 0x4eb   : >> { %6531 = vst [vmem:[#allocation33_spill] sm:$0xff] %v5185_v13 }
 0x4ec   : >> { %v1983_v47 = vadd.f32 %v1980_v32, %v1971_v28  ;;  %v5190_v28 = vld [vmem:[%s3805_s1 + $0x46] sm:$0xff]  ;;  %v5197_v32 = vld [vmem:[%s3805_s1 + $0x8e] sm:$0xff] }
 0x4ed   : >> { %6532 = vst [vmem:[#allocation29_spill] sm:$0xff] %v5190_v28 }
 0x4ee   : >> { %6533 = vst [vmem:[#allocation30_spill] sm:$0xff] %v5197_v32 }
 0x4f0   : >> { %1843 = vrot.lane.b32.xlu1 %v5120_v18, %s6430_s2 }
 0x4f1   : >> { %1841 = vrot.lane.b32.xlu0 %v5122_v40, %s6430_s2  ;;  %v1989_v26 = vpop.permute.xlu2 %1988 }
 0x4f2   : >> { %v1992_v62 = vmul.f32 %v1989_v26, %v6479_v48  ;;  %v5202_v26 = vld [vmem:[%s3805_s1 + $0x86] sm:$0xff] }
 0x4f3   : >> { %6534 = vst [vmem:[#allocation45_spill] sm:$0xff] %v5202_v26 }
 0x4f4   : >> { %v1995_v10 = vadd.f32 %v1992_v62, %v1983_v47  ;;  %v5209_v47 = vld [vmem:[%s3855_s11 + $0xe] sm:$0xff]  ;;  %v5214_v62 = vld [vmem:[%s3855_s11 + $0x6] sm:$0xff] }
 0x4f5   : >> { %6535 = vst [vmem:[#allocation56_spill] sm:$0xff] %v5209_v47 }
 0x4f6   : >> { %6536 = vst [vmem:[#allocation57_spill] sm:$0xff] %v5214_v62 }
 0x4f8   : >> { %1941 = vrot.lane.b32.xlu1 %v5146_v30, %s6416_s12 }
 0x4f9   : >> { %1939 = vrot.lane.b32.xlu0 %v5151_v55, %s6416_s12  ;;  %v2001_v17 = vpop.permute.xlu2 %2000 }
 0x4fa   : >> { %v2004_v1 = vadd.f32 %v6507_v39, %v2001_v17  ;;  %v1611_v17 = vmul.f32 %v4759_v23, %v6509_v57  ;;  %v6539_v23 = vld [vmem:[#allocation35_spill] sm:$0xff]  ;;  %v6542_v39 = vld [vmem:[#allocation37_spill] sm:$0xff] }
 0x4fc   : >> { %v5156_v59 = vadd.f32 %v2004_v1, %v1995_v10  ;;  %v5219_v10 = vld [vmem:[%s3805_s1 + $0x90] sm:$0xff]  ;;  %v1620_v1 = vmul.f32 %v4904_v53, %v6511_v54  ;;  %v6540_v53 = vld [vmem:[#allocation34_spill] sm:$0xff] }
 0x4fe   : >> { %2015 = vrot.lane.b32.xlu2 %v5156_v59, %s6416_s12 }
 0x500   : >> { %1955 = vrot.lane.b32.xlu1 %v5161_v35, %s6416_s12 }
 0x501   : >> { %1949 = vrot.lane.b32.xlu0 %v5166_v8, %s6416_s12 }
 0x506   : >> { %2027 = vrot.lane.b32.xlu2 %v5156_v59, %s6320_s0 }
 0x508   : >> { %1965 = vrot.lane.b32.xlu1 %v5173_v61, %s6399_s3 }
 0x509   : >> { %1963 = vrot.lane.b32.xlu0 %v5178_v46, %s6399_s3  ;;  %v6538_v46 = vld [vmem:[#allocation49_spill] sm:$0xff] }
 0x50a   : >> { %v1644_v61 = vmul.f32 %v6539_v23, %v6538_v46 }
 0x50e   : >> { %2039 = vrot.lane.b32.xlu2 %v5156_v59, %s6399_s3 }
 0x510   : >> { %1974 = vrot.lane.b32.xlu1 %v5185_v13, %s6399_s3 }
 0x511   : >> { %1972 = vrot.lane.b32.xlu0 %v5190_v28, %s6399_s3  ;;  %v1619_v28 = vmul.f32 %v5043_v2, %v6511_v54  ;;  %v1643_v2 = vmul.f32 %v5094_v45, %v6538_v46 }
 0x516   : >> { %2051 = vrot.lane.b32.xlu2 %v5156_v59, %s6430_s2 }
 0x518   : >> { %1986 = vrot.lane.b32.xlu1 %v5197_v32, %s6399_s3 }
 0x519   : >> { %1984 = vrot.lane.b32.xlu0 %v5202_v26, %s6399_s3  ;;  %v1623_v26 = vadd.f32 %v1620_v1, %v1611_v17  ;;  %v1609_v17 = vmul.f32 %v6540_v53, %v6509_v57  ;;  %v1631_v1 = vmul.f32 %v5064_v14, %v6512_v60  ;;  %v1642_v53 = vmul.f32 %v5096_v21, %v6538_v46 }
 0x51e   : >> { %2153 = vrot.lane.b32.xlu2 %v4983_v49, %s6399_s3 }
 0x520   : >> { %1998 = vrot.lane.b32.xlu1 %v5209_v47, %s6399_s3  ;;  %v1632_v47 = vmul.f32 %v4918_v50, %v6512_v60  ;;  %v1618_v50 = vmul.f32 %v5045_v56, %v6511_v54 }
 0x521   : >> { %1996 = vrot.lane.b32.xlu0 %v5214_v62, %s6399_s3  ;;  %v6537_v62 = vld [vmem:[#allocation31_spill] sm:$0xff] }
 0x522   : >> { %v1610_v32 = vmul.f32 %v6537_v62, %v6509_v57  ;;  %v1635_v13 = vadd.f32 %v1632_v47, %v1623_v26  ;;  %v1630_v62 = vmul.f32 %v5066_v9, %v6512_v60  ;;  %v6541_v47 = vld [vmem:[#allocation50_spill] sm:$0xff]  ;;  %v1621_v48 = vadd.f32 %v1618_v50, %v1609_v17 }
 0x523   : >> { %v1656_v23 = vmul.f32 %v6542_v39, %v6541_v47  ;;  %v1655_v56 = vmul.f32 %v5100_v15, %v6541_v47  ;;  %v1654_v45 = vmul.f32 %v5102_v63, %v6541_v47 }
 0x524   : >> { %v1647_v26 = vadd.f32 %v1644_v61, %v1635_v13  ;;  %v1633_v14 = vadd.f32 %v1630_v62, %v1621_v48  ;;  %v6544_v48 = vld [vmem:[#allocation52_spill] sm:$0xff] }
 0x526   : >> { %2163 = vrot.lane.b32.xlu2 %v5219_v10, %s6399_s3  ;;  %v1659_v61 = vadd.f32 %v1656_v23, %v1647_v26  ;;  %v1645_v13 = vadd.f32 %v1642_v53, %v1633_v14  ;;  %v6545_v26 = vld [vmem:[#allocation53_spill] sm:$0xff] }
 0x528   : >> { %v1657_v39 = vadd.f32 %v1654_v45, %v1645_v13  ;;  %v1694_v23 = vmul.f32 %v1659_v61, %v6545_v26 }
 0x52a   : >> { %v1701_v0 = vrot.slane %v1694_v23, 3 }
 0x52e   : >> { %2173 = vrot.lane.b32.xlu2 %v5008_v36, %s3611_s14  ;;  %v1622_v36 = vadd.f32 %v1619_v28, %v1610_v32  ;;  %v6543_v32 = vld [vmem:[#allocation51_spill] sm:$0xff] }
 0x52f   : >> { %v1662_v21 = vmul.f32 %v1657_v39, %v6543_v32 }
 0x530   : >> { %v1634_v20 = vadd.f32 %v1631_v1, %v1622_v36  ;;  %v1664_v36 = vmul.f32 %v1659_v61, %v6543_v32 }
 0x531   : >> { %v1668_v63 = vrot.slane %v1662_v21, 1  ;;  %v1692_v21 = vmul.f32 %v1657_v39, %v6545_v26 }
 0x532   : >> { %v1646_v9 = vadd.f32 %v1643_v2, %v1634_v20  ;;  %v1671_v15 = vrot.slane %v1664_v36, 1  ;;  %v1679_v20 = vmul.f32 %v1659_v61, %v6544_v48  ;;  %v1677_v2 = vmul.f32 %v1657_v39, %v6544_v48 }
 0x533   : >> { %v1660_v36 = vmul.f32 %v1657_v39, %v4114_v43 }
 0x534   : >> { %v1658_v28 = vadd.f32 %v1655_v56, %v1646_v9  ;;  %v1686_v56 = vrot.slane %v1679_v20, 2 }
 0x536   : >> { %2182 = vrot.lane.b32.xlu2 %v5029_v29, %s3611_s14  ;;  %v1663_v17 = vmul.f32 %v1658_v28, %v6543_v32  ;;  %v1678_v1 = vmul.f32 %v1658_v28, %v6544_v48  ;;  %v1661_v53 = vmul.f32 %v1658_v28, %v4114_v43  ;;  %v1693_v9 = vmul.f32 %v1658_v28, %v6545_v26 }
 0x538   : >> { %v1669_v50 = vrot.slane %v1663_v17, 1  ;;  %v1684_v14 = vrot.slane %v1678_v1, 2  ;;  %v1683_v17 = vrot.slane %v1677_v2, 2  ;;  %v1699_v20 = vrot.slane %v1693_v9, 3 }
 0x53a   : >> { %v1672_v62 = vsel %vm448_vm0, %v1669_v50, %v1671_v15  ;;  %v1670_v45 = vsel %vm448_vm0, %v1668_v63, %v1669_v50  ;;  %v6546_v15 = vld [vmem:[#allocation54_spill] sm:$0xff]  ;;  %v1685_v50 = vsel %vm465_vm1, %v1683_v17, %v1684_v14  ;;  %v1698_v63 = vrot.slane %v1692_v21, 3 }
 0x53b   : >> { %v1676_v13 = vadd.f32 %v1672_v62, %v1661_v53  ;;  %v1675_v29 = vadd.f32 %v1670_v45, %v1660_v36  ;;  %v1708_v1 = vmul.f32 %v1658_v28, %v6546_v15  ;;  %v1707_v62 = vmul.f32 %v1657_v39, %v6546_v15  ;;  %v6547_v53 = vld [vmem:[#allocation38_spill] sm:$0xff] }
 0x53c   : >> { %v1804_v25 = vmul.f32 %v6547_v53, %v6509_v57 }
 0x53d   : >> { %v1690_v2 = vadd.f32 %v1685_v50, %v1675_v29  ;;  %v1714_v23 = vrot.slane %v1708_v1, 4  ;;  %v1713_v36 = vrot.slane %v1707_v62, 4 }
 0x53e   : >> { %2194 = vrot.lane.b32.xlu2 %v5039_v22, %s3611_s14  ;;  %v1709_v22 = vmul.f32 %v1659_v61, %v6546_v15  ;;  %v1813_v61 = vmul.f32 %v5098_v27, %v6511_v54 }
 0x53f   : >> { %v1715_v27 = vsel %vm6548_vm5, %v1713_v36, %v1714_v23 }
 0x540   : >> { %v1716_v45 = vrot.slane %v1709_v22, 4  ;;  %v1816_v28 = vadd.f32 %v1813_v61, %v1804_v25  ;;  %v1803_v61 = vmul.f32 %v5120_v18, %v6509_v57 }
 0x542   : >> { %v1717_v17 = vsel %vm6449_vm3, %v1714_v23, %v1716_v45  ;;  %v1802_v45 = vmul.f32 %v5122_v40, %v6509_v57 }
 0x546   : >> { %2206 = vrot.lane.b32.xlu2 %v5052_v24, %s3611_s14  ;;  %v1687_v24 = vsel %vm465_vm1, %v1684_v14, %v1686_v56  ;;  %v1702_v56 = vsel %vm482_vm2, %v1699_v20, %v1701_v0  ;;  %v1825_v14 = vmul.f32 %v5104_v44, %v6512_v60  ;;  %v1837_v0 = vmul.f32 %v5106_v33, %v6538_v46 }
 0x547   : >> { %v1691_v52 = vadd.f32 %v1687_v24, %v1676_v13  ;;  %v1700_v24 = vsel %vm482_vm2, %v1698_v63, %v1699_v20  ;;  %v1849_v44 = vmul.f32 %v5108_v31, %v6541_v47 }
 0x548   : >> { %v1705_v13 = vadd.f32 %v1700_v24, %v1690_v2  ;;  %v1828_v22 = vadd.f32 %v1825_v14, %v1816_v28 }
 0x549   : >> { %v1706_v9 = vadd.f32 %v1702_v56, %v1691_v52 }
 0x54a   : >> { %v1808_v5 = vpop.permute.xlu1 %1807  ;;  %v1720_v52 = vadd.f32 %v1715_v27, %v1705_v13  ;;  %v1840_v20 = vadd.f32 %v1837_v0, %v1828_v22 }
 0x54b   : >> { %v1806_v37 = vpop.permute.xlu0 %1805  ;;  %v1721_v21 = vadd.f32 %v1717_v17, %v1706_v9  ;;  %v1812_v2 = vmul.f32 %v1808_v5, %v6511_v54 }
 0x54c   : >> { %v5299_v62 = vsub.f32 %v1720_v52, %v4160_v58  ;;  %v1811_v53 = vmul.f32 %v1806_v37, %v6511_v54  ;;  %v1852_v56 = vadd.f32 %v1849_v44, %v1840_v20 }
 0x54d   : >> { %v5292_v1 = vsub.f32 %v1721_v21, %v4160_v58  ;;  %v1815_v36 = vadd.f32 %v1812_v2, %v1803_v61 }
 0x54e   : >> { %v1733_v9 = vmax.f32 %v5299_v62, 0.0  ;;  %v1814_v24 = vadd.f32 %v1811_v53, %v1802_v45  ;;  %v1857_v17 = vmul.f32 %v1852_v56, %v6543_v32  ;;  %v1872_v40 = vmul.f32 %v1852_v56, %v6544_v48 }
 0x54f   : >> { %v1734_v33 = vmax.f32 %v5292_v1, 0.0  ;;  %v1887_v2 = vmul.f32 %v1852_v56, %v6545_v26  ;;  %v1902_v53 = vmul.f32 %v1852_v56, %v6546_v15  ;;  %vm1730_vm14 = vcmp.le.f32.partialorder %v5292_v1, 5.0 }
 0x550   : >> { %v1879_v61 = vrot.slane %v1872_v40, 2  ;;  %vm1729_vm4 = vcmp.le.f32.partialorder %v5299_v62, 5.0  ;;  %vm1732_vm3 = vmand %vm1728_vm13, %vm1730_vm14 }
 0x551   : >> { %v1736_v18 = vsub.f32 0.0, %v1734_v33  ;;  %vm1731_vm7 = vmand %vm1727_vm15, %vm1729_vm4 }
 0x552   : >> { %v1820_v39 = vpop.permute.xlu1 %1819 }
 0x553   : >> { %v1818_v29 = vpop.permute.xlu0 %1817  ;;  %v1824_v23 = vmul.f32 %v1820_v39, %v6512_v60 }
 0x554   : >> { %v1823_v31 = vmul.f32 %v1818_v29, %v6512_v60  ;;  %v1735_v29 = vsub.f32 0.0, %v1733_v9 }
 0x555   : >> { %v1827_v14 = vadd.f32 %v1824_v23, %v1815_v36 }
 0x556   : >> { %v1826_v13 = vadd.f32 %v1823_v31, %v1814_v24  ;;  %v1737_v33 = vmul.f32 1.442695, %v1735_v29 }
 0x558   : >> { %v5294_v25 = vpop.permute.xlu2 %2015 }
 0x55a   : >> { %v1832_v50 = vpop.permute.xlu1 %1831 }
 0x55b   : >> { %v1830_v63 = vpop.permute.xlu0 %1829  ;;  %v1836_v5 = vmul.f32 %v1832_v50, %v6538_v46  ;;  %v1739_v50 = vmul.f32 1.442695, %v1736_v18 }
 0x55c   : >> { %v1835_v37 = vmul.f32 %v1830_v63, %v6538_v46  ;;  %v1864_v63 = vrot.slane %v1857_v17, 1 }
 0x55d   : >> { %v1839_v27 = vadd.f32 %v1836_v5, %v1827_v14  ;;  %3432 = vpow2.f32 %v1739_v50 }
 0x55e   : >> { %v1838_v22 = vadd.f32 %v1835_v37, %v1826_v13  ;;  %3434 = vpow2.f32 %v1737_v33 }
 0x560   : >> { %v2028_v28 = vpop.permute.xlu2 %2027 }
 0x562   : >> { %v1844_v39 = vpop.permute.xlu1 %1843 }
 0x563   : >> { %v1842_v21 = vpop.permute.xlu0 %1841  ;;  %v1848_v0 = vmul.f32 %v1844_v39, %v6541_v47 }
 0x564   : >> { %v1847_v52 = vmul.f32 %v1842_v21, %v6541_v47 }
 0x565   : >> { %v1851_v20 = vadd.f32 %v1848_v0, %v1839_v27 }
 0x566   : >> { %v1850_v44 = vadd.f32 %v1847_v52, %v1838_v22  ;;  %v1894_v22 = vrot.slane %v1887_v2, 3 }
 0x567   : >> { %v1856_v45 = vmul.f32 %v1851_v20, %v6543_v32  ;;  %v1871_v23 = vmul.f32 %v1851_v20, %v6544_v48  ;;  %v1886_v31 = vmul.f32 %v1851_v20, %v6545_v26  ;;  %v1854_v9 = vmul.f32 %v1851_v20, %v4114_v43 }
 0x568   : >> { %v1901_v36 = vmul.f32 %v1851_v20, %v6546_v15  ;;  %v1855_v24 = vmul.f32 %v1850_v44, %v6543_v32  ;;  %v1870_v5 = vmul.f32 %v1850_v44, %v6544_v48  ;;  %v2040_v37 = vpop.permute.xlu2 %2039  ;;  %v1885_v18 = vmul.f32 %v1850_v44, %v6545_v26 }
 0x569   : >> { %v1862_v14 = vrot.slane %v1856_v45, 1  ;;  %v1877_v13 = vrot.slane %v1871_v23, 2  ;;  %v1892_v56 = vrot.slane %v1886_v31, 3  ;;  %v1900_v21 = vmul.f32 %v1850_v44, %v6546_v15 }
 0x56a   : >> { %v1907_v17 = vrot.slane %v1901_v36, 4  ;;  %v1861_v40 = vrot.slane %v1855_v24, 1  ;;  %v1876_v39 = vrot.slane %v1870_v5, 2  ;;  %v5328_v29 = vpop.permute.xlu1 %1941  ;;  %v1853_v0 = vmul.f32 %v1850_v44, %v4114_v43 }
 0x56b   : >> { %v5330_v27 = vpop.permute.xlu0 %1939  ;;  %v1891_v52 = vrot.slane %v1885_v18, 3  ;;  %v1865_v20 = vsel %vm448_vm0, %v1862_v14, %v1864_v63  ;;  %v1906_v45 = vrot.slane %v1900_v21, 4  ;;  %v1880_v31 = vsel %vm465_vm1, %v1877_v13, %v1879_v61 }
 0x56c   : >> { %v1869_v23 = vadd.f32 %v1865_v20, %v1854_v9  ;;  %v1863_v36 = vsel %vm448_vm0, %v1861_v40, %v1862_v14  ;;  %v1878_v5 = vsel %vm465_vm1, %v1876_v39, %v1877_v13  ;;  %v2010_v26 = vmul.f32 %v5156_v59, %v6509_v57 }
 0x56d   : >> { %v1868_v24 = vadd.f32 %v1863_v36, %v1853_v0  ;;  %v1893_v15 = vsel %vm482_vm2, %v1891_v52, %v1892_v56  ;;  %v1908_v44 = vsel %vm6549_vm6, %v1906_v45, %v1907_v17  ;;  %v2019_v63 = vmul.f32 %v5294_v25, %v6511_v54  ;;  %v3433_v45 = vpop.eup %3432 }
 0x56e   : >> { %v1884_v2 = vadd.f32 %v1880_v31, %v1869_v23  ;;  %v2031_v9 = vmul.f32 %v2028_v28, %v6512_v60  ;;  %v1909_v18 = vrot.slane %v1902_v53, 4  ;;  %v1895_v61 = vsel %vm482_vm2, %v1892_v56, %v1894_v22  ;;  %v3435_v31 = vpop.eup %3434 }
 0x56f   : >> { %v1883_v14 = vadd.f32 %v1878_v5, %v1868_v24  ;;  %v2022_v40 = vadd.f32 %v2019_v63, %v2010_v26  ;;  %v2043_v59 = vmul.f32 %v2040_v37, %v6538_v46  ;;  %v1742_v63 = vsel %vm1732_vm3, %v3433_v45, 0.0 }
 0x570   : >> { %v1899_v13 = vadd.f32 %v1895_v61, %v1884_v2  ;;  %v2052_v39 = vpop.permute.xlu2 %2051  ;;  %v1910_v21 = vsel %vm6550_vm9, %v1907_v17, %v1909_v18  ;;  %v1746_v62 = vmul.f32 %v5146_v30, %v1742_v63  ;;  %v1750_v26 = vmul.f32 %v5166_v8, %v1742_v63 }
 0x571   : >> { %v1898_v0 = vadd.f32 %v1893_v15, %v1883_v14  ;;  %v2034_v52 = vadd.f32 %v2031_v9, %v2022_v40  ;;  %v2055_v56 = vmul.f32 %v2052_v39, %v6541_v47  ;;  %v1917_v15 = vadd.s32 1, %v3746_v7 }
 0x572   : >> { %v1914_v25 = vadd.f32 %v1910_v21, %v1899_v13  ;;  %v5349_v28 = vpop.permute.xlu1 %1955  ;;  %v1741_v9 = vsel %vm1731_vm7, %v3435_v31, 0.0  ;;  %v1744_v21 = vadd.f32 %v1742_v63, %v5069_v3  ;;  %v6556_v3 = vld [vmem:[#allocation39_spill] sm:$0xff]  ;;  %vm6583_vm3 = vcmask 1043456  }
 0x573   : >> { %v5351_v53 = vpop.permute.xlu0 %1949  ;;  %v1913_v37 = vadd.f32 %v1908_v44, %v1898_v0  ;;  %v2046_v17 = vadd.f32 %v2043_v59, %v2034_v52  ;;  %vm1918_vm5 = vcmp.ge.s32.totalorder %v1917_v15, 0  ;;  %vm1919_vm6 = vcmp.lt.s32.totalorder %v1917_v15, 48 }
 0x574   : >> { %v1916_v50 = vsub.f32 %v1914_v25, %v4160_v58  ;;  %vm5377_vm8 = vmand %vm1918_vm5, %vm1919_vm6  ;;  %v1745_v14 = vmul.f32 %v5151_v55, %v1741_v9  ;;  %v1753_v13 = vmul.f32 %v5161_v35, %v1741_v9  ;;  %v1749_v40 = vmul.f32 %v4983_v49, %v1741_v9 }
 0x575   : >> { %v1915_v33 = vsub.f32 %v1913_v37, %v4160_v58  ;;  %v5368_v20 = vadd.f32 %v2055_v56, %v2046_v17  ;;  %vm1922_vm9 = vmand %vm4223_vm10, %vm5377_vm8  ;;  %v1754_v59 = vmul.f32 %v5219_v10, %v1742_v63  ;;  %v1748_v25 = vadd.f32 %v1746_v62, %v5077_v41 }
 0x576   : >> { %v1928_v22 = vmax.f32 %v1916_v50, 0.0  ;;  %vm1924_vm11 = vcmp.le.f32.partialorder %v1916_v50, 5.0  ;;  %vm1921_vm13 = vmand %vm4233_vm12, %vm5377_vm8  ;;  %v1743_v52 = vadd.f32 %v1741_v9, %v5073_v51  ;;  %v1747_v56 = vadd.f32 %v1745_v14, %v5083_v16  ;;  %v6557_v9 = vld [vmem:[#allocation44_spill] sm:$0xff] }
 0x577   : >> { %v1927_v23 = vmax.f32 %v1915_v33, 0.0  ;;  %vm1923_vm14 = vcmp.le.f32.partialorder %v1915_v33, 5.0  ;;  %vm1926_vm15 = vmand %vm1922_vm9, %vm1924_vm11  ;;  %v1755_v33 = vadd.f32 %v1753_v13, %v5089_v38 }
 0x578   : >> { %v1930_v36 = vsub.f32 0.0, %v1928_v22  ;;  %v5375_v24 = vpop.permute.xlu2 %2153  ;;  %vm1925_vm4 = vmand %vm1921_vm13, %vm1923_vm14  ;;  %v6555_v22 = vld [vmem:[#allocation43_spill] sm:$0xff] }
 0x579   : >> { %v1929_v1 = vsub.f32 0.0, %v1927_v23  ;;  %v1751_v45 = vadd.f32 %v1749_v40, %v6555_v22  ;;  %v1756_v23 = vadd.f32 %v1754_v59, %v6556_v3  ;;  %v6558_v59 = vld [vmem:[#allocation20_spill] sm:$0xff]  ;;  %vm6584_vm5 = vmmov %vm6583_vm3 }
 0x57a   : >> { %v1933_v5 = vmul.f32 1.442695, %v1930_v36  ;;  %v1966_v2 = vpop.permute.xlu1 %1965 }
 0x57b   : >> { %v1964_v44 = vpop.permute.xlu0 %1963  ;;  %v1931_v18 = vmul.f32 1.442695, %v1929_v1 }
 0x57c   : >> { %3436 = vpow2.f32 %v1933_v5 }
 0x57d   : >> { %3438 = vpow2.f32 %v1931_v18  ;;  %v1752_v18 = vadd.f32 %v1750_v26, %v6557_v9 }
 0x580   : >> { %v5394_v39 = vpop.permute.xlu2 %2163 }
 0x582   : >> { %v3437_v0 = vpop.eup %3436  ;;  %v1975_v37 = vpop.permute.xlu1 %1974 }
 0x583   : >> { %v1973_v50 = vpop.permute.xlu0 %1972  ;;  %v3439_v17 = vpop.eup %3438  ;;  %v1936_v15 = vsel %vm1926_vm15, %v3437_v0, 0.0  ;;  %v1970_v0 = vmul.f32 %v1966_v2, %v3754_v12  ;;  %v6563_v2 = vld [vmem:[#allocation18_spill] sm:$0xff] }
 0x584   : >> { %v5404_v31 = vadd.f32 %v1936_v15, %v1744_v21  ;;  %v1944_v41 = vmul.f32 %v5328_v29, %v1936_v15  ;;  %v1960_v51 = vmul.f32 %v5128_v34, %v1936_v15  ;;  %v1935_v16 = vsel %vm1925_vm4, %v3439_v17, 0.0 }
 0x585   : >> { %v5408_v36 = vadd.f32 %v1935_v16, %v1743_v52  ;;  %v1943_v1 = vmul.f32 %v5330_v27, %v1935_v16  ;;  %v1951_v5 = vmul.f32 %v5116_v6, %v1935_v16  ;;  %v1959_v63 = vmul.f32 %v5349_v28, %v1935_v16 }
 0x586   : >> { %v5413_v38 = vadd.f32 %v1944_v41, %v1748_v25  ;;  %v1952_v61 = vmul.f32 %v5351_v53, %v1936_v15  ;;  %v5423_v14 = vadd.f32 %v1960_v51, %v1756_v23  ;;  %v1979_v28 = vmul.f32 %v1975_v37, %v3770_v19  ;;  %v6559_v25 = vld [vmem:[#allocation23_spill] sm:$0xff]  ;;  %v6561_v41 = vld [vmem:[#allocation26_spill] sm:$0xff]  ;;  %v6562_v37 = vld [vmem:[#allocation25_spill] sm:$0xff] }
 0x587   : >> { %v5417_v62 = vadd.f32 %v1943_v1, %v1747_v56  ;;  %v5419_v29 = vadd.f32 %v1959_v63, %v1755_v33  ;;  %v5421_v34 = vadd.f32 %v1951_v5, %v1751_v45  ;;  %v1978_v21 = vmul.f32 %v1973_v50, %v6558_v59  ;;  %v6560_v56 = vld [vmem:[#allocation22_spill] sm:$0xff]  ;;  %v6564_v5 = vld [vmem:[#allocation21_spill] sm:$0xff] }
 0x588   : >> { %v5425_v13 = vadd.f32 %v1952_v61, %v1752_v18  ;;  %v2174_v27 = vpop.permute.xlu2 %2173  ;;  %v1969_v53 = vmul.f32 %v1964_v44, %v3752_v11  ;;  %v1982_v15 = vadd.f32 %v1979_v28, %v1970_v0  ;;  %v6565_v61 = vld [vmem:[#allocation24_spill] sm:$0xff] }
 0x589   : >> { %v2177_v44 = vmul.f32 %v2174_v27, %v6563_v2  ;;  %v6567_v27 = vld [vmem:[#allocation32_spill] sm:$0xff] }
 0x58a   : >> { %v1987_v6 = vpop.permute.xlu1 %1986  ;;  %v1981_v33 = vadd.f32 %v1978_v21, %v1969_v53  ;;  %v6566_v21 = vld [vmem:[#allocation27_spill] sm:$0xff] }
 0x58b   : >> { %v1985_v40 = vpop.permute.xlu0 %1984  ;;  %v1991_v52 = vmul.f32 %v1987_v6, %v6559_v25 }
 0x58c   : >> { %v1990_v26 = vmul.f32 %v1985_v40, %v6560_v56 }
 0x58d   : >> { %v1994_v3 = vadd.f32 %v1991_v52, %v1982_v15  ;;  %v6568_v52 = vld [vmem:[#allocation28_spill] sm:$0xff] }
 0x58e   : >> { %v1993_v23 = vadd.f32 %v1990_v26, %v1981_v33  ;;  %v6569_v26 = vld [vmem:[#allocation33_spill] sm:$0xff]  ;;  %v6571_v15 = vld [vmem:[#allocation36_spill] sm:$0xff] }
 0x58f   : >> { %v6573_v33 = vld [vmem:[#allocation45_spill] sm:$0xff] }
 0x590   : >> { %v2183_v17 = vpop.permute.xlu2 %2182 }
 0x591   : >> { %v2186_v63 = vmul.f32 %v2183_v17, %v6564_v5  ;;  %v6570_v17 = vld [vmem:[#allocation29_spill] sm:$0xff] }
 0x592   : >> { %v1999_v22 = vpop.permute.xlu1 %1998 }
 0x593   : >> { %v1997_v45 = vpop.permute.xlu0 %1996  ;;  %v2003_v51 = vadd.f32 %v6561_v41, %v1999_v22  ;;  %v2189_v18 = vadd.f32 %v2186_v63, %v2177_v44  ;;  %v6574_v22 = vld [vmem:[#allocation40_spill] sm:$0xff] }
 0x594   : >> { %v2002_v16 = vadd.f32 %v6562_v37, %v1997_v45  ;;  %v6575_v45 = vld [vmem:[#allocation56_spill] sm:$0xff] }
 0x595   : >> { %v2006_v50 = vadd.f32 %v2003_v51, %v1994_v3  ;;  %v6576_v3 = vld [vmem:[#allocation57_spill] sm:$0xff]  ;;  %v6578_v51 = vld [vmem:[#allocation42_spill] sm:$0xff] }
 0x596   : >> { %v2005_v1 = vadd.f32 %v2002_v16, %v1993_v23  ;;  %v6577_v23 = vld [vmem:[#allocation41_spill] sm:$0xff] }
 0x597   : >> { %2013 = vrot.lane.b32.xlu1 %v2006_v50, %s6416_s12 }
 0x598   : >> { %2011 = vrot.lane.b32.xlu0 %v2005_v1, %s6416_s12  ;;  %v2195_v9 = vpop.permute.xlu2 %2194 }
 0x599   : >> { %v2198_v6 = vmul.f32 %v2195_v9, %v6565_v61 }
 0x59b   : >> { %v2201_v40 = vadd.f32 %v2198_v6, %v2189_v18 }
 0x59f   : >> { %2025 = vrot.lane.b32.xlu1 %v2006_v50, %s6320_s0 }
 0x5a0   : >> { %2023 = vrot.lane.b32.xlu0 %v2005_v1, %s6320_s0  ;;  %v2207_v28 = vpop.permute.xlu2 %2206 }
 0x5a1   : >> { %v2210_v0 = vadd.f32 %v6566_v21, %v2207_v28  ;;  %v2009_v28 = vmul.f32 %v2006_v50, %v6509_v57 }
 0x5a3   : >> { %v2213_v53 = vadd.f32 %v2210_v0, %v2201_v40 }
 0x5a5   : >> { %2221 = vrot.lane.b32.xlu2 %v2213_v53, %s6416_s12  ;;  %v2216_v44 = vmul.f32 %v2213_v53, %v6509_v57 }
 0x5a7   : >> { %2037 = vrot.lane.b32.xlu1 %v2006_v50, %s6399_s3 }
 0x5a8   : >> { %2035 = vrot.lane.b32.xlu0 %v2005_v1, %s6399_s3 }
 0x5ad   : >> { %2233 = vrot.lane.b32.xlu2 %v2213_v53, %s6320_s0 }
 0x5af   : >> { %2049 = vrot.lane.b32.xlu1 %v2006_v50, %s6430_s2 }
 0x5b0   : >> { %2047 = vrot.lane.b32.xlu0 %v2005_v1, %s6430_s2 }
 0x5b5   : >> { %2245 = vrot.lane.b32.xlu2 %v2213_v53, %s6399_s3 }
 0x5b7   : >> { %2147 = vrot.lane.b32.xlu1 %v5146_v30, %s6399_s3 }
 0x5b8   : >> { %2145 = vrot.lane.b32.xlu0 %v5151_v55, %s6399_s3 }
 0x5bd   : >> { %2257 = vrot.lane.b32.xlu2 %v2213_v53, %s6430_s2 }
 0x5bf   : >> { %2161 = vrot.lane.b32.xlu1 %v5161_v35, %s6399_s3 }
 0x5c0   : >> { %2155 = vrot.lane.b32.xlu0 %v5166_v8, %s6399_s3 }
 0x5c5   : >> { %2359 = vrot.lane.b32.xlu2 %v4983_v49, %s3611_s14  ;;  %v6572_v49 = vld [vmem:[#allocation30_spill] sm:$0xff] }
 0x5c7   : >> { %2171 = vrot.lane.b32.xlu1 %v6567_v27, %s3611_s14 }
 0x5c8   : >> { %2169 = vrot.lane.b32.xlu0 %v6568_v52, %s3611_s14 }
 0x5cd   : >> { %2369 = vrot.lane.b32.xlu2 %v5219_v10, %s3611_s14 }
 0x5cf   : >> { %2180 = vrot.lane.b32.xlu1 %v6569_v26, %s3611_s14 }
 0x5d0   : >> { %2178 = vrot.lane.b32.xlu0 %v6570_v17, %s3611_s14 }
 0x5d5   : >> { %2379 = vrot.lane.b32.xlu2 %v6571_v15, %s3612_s16 }
 0x5d7   : >> { %2192 = vrot.lane.b32.xlu1 %v6572_v49, %s3611_s14 }
 0x5d8   : >> { %2190 = vrot.lane.b32.xlu0 %v6573_v33, %s3611_s14 }
 0x5dd   : >> { %2388 = vrot.lane.b32.xlu2 %v6574_v22, %s3612_s16  ;;  %v2008_v22 = vmul.f32 %v2005_v1, %v6509_v57 }
 0x5df   : >> { %2204 = vrot.lane.b32.xlu1 %v6575_v45, %s3611_s14 }
 0x5e0   : >> { %2202 = vrot.lane.b32.xlu0 %v6576_v3, %s3611_s14 }
 0x5e5   : >> { %2400 = vrot.lane.b32.xlu2 %v6577_v23, %s3612_s16 }
 0x5ed   : >> { %2412 = vrot.lane.b32.xlu2 %v6578_v51, %s3612_s16 }
 0x5ff   : >> { %v2222_v16 = vpop.permute.xlu2 %2221 }
 0x600   : >> { %v2225_v63 = vmul.f32 %v2222_v16, %v6511_v54 }
 0x602   : >> { %v2228_v9 = vadd.f32 %v2225_v63, %v2216_v44 }
 0x607   : >> { %v2234_v18 = vpop.permute.xlu2 %2233 }
 0x608   : >> { %v2237_v6 = vmul.f32 %v2234_v18, %v6512_v60 }
 0x609   : >> { %v2014_v40 = vpop.permute.xlu1 %2013 }
 0x60a   : >> { %v2012_v0 = vpop.permute.xlu0 %2011  ;;  %v2018_v15 = vmul.f32 %v2014_v40, %v6511_v54  ;;  %v2240_v51 = vadd.f32 %v2237_v6, %v2228_v9 }
 0x60b   : >> { %v2017_v23 = vmul.f32 %v2012_v0, %v6511_v54 }
 0x60c   : >> { %v2021_v3 = vadd.f32 %v2018_v15, %v2009_v28 }
 0x60d   : >> { %v2020_v45 = vadd.f32 %v2017_v23, %v2008_v22  ;;  %v2063_v22 = vmul.f32 %v5368_v20, %v6543_v32  ;;  %v2078_v23 = vmul.f32 %v5368_v20, %v6544_v48 }
 0x60f   : >> { %v2246_v53 = vpop.permute.xlu2 %2245 }
 0x610   : >> { %v2249_v16 = vmul.f32 %v2246_v53, %v6538_v46 }
 0x611   : >> { %v2026_v44 = vpop.permute.xlu1 %2025 }
 0x612   : >> { %v2024_v63 = vpop.permute.xlu0 %2023  ;;  %v2030_v18 = vmul.f32 %v2026_v44, %v6512_v60  ;;  %v2252_v50 = vadd.f32 %v2249_v16, %v2240_v51  ;;  %v6580_v51 = vld [vmem:[#allocation53_spill] sm:$0xff] }
 0x613   : >> { %v2029_v33 = vmul.f32 %v2024_v63, %v6512_v60  ;;  %v2070_v63 = vrot.slane %v2063_v22, 1 }
 0x614   : >> { %v2033_v49 = vadd.f32 %v2030_v18, %v2021_v3  ;;  %v2085_v18 = vrot.slane %v2078_v23, 2 }
 0x615   : >> { %v2032_v17 = vadd.f32 %v2029_v33, %v2020_v45  ;;  %v2093_v33 = vmul.f32 %v5368_v20, %v6580_v51  ;;  %v6581_v45 = vld [vmem:[#allocation54_spill] sm:$0xff] }
 0x616   : >> { %v2108_v3 = vmul.f32 %v5368_v20, %v6581_v45 }
 0x617   : >> { %v2258_v40 = vpop.permute.xlu2 %2257 }
 0x619   : >> { %v2038_v26 = vpop.permute.xlu1 %2037 }
 0x61a   : >> { %v2036_v1 = vpop.permute.xlu0 %2035  ;;  %v2042_v0 = vmul.f32 %v2038_v26, %v6538_v46 }
 0x61b   : >> { %v2041_v9 = vmul.f32 %v2036_v1, %v6538_v46  ;;  %v2100_v1 = vrot.slane %v2093_v33, 3 }
 0x61c   : >> { %v2045_v6 = vadd.f32 %v2042_v0, %v2033_v49  ;;  %v2115_v0 = vrot.slane %v2108_v3, 4 }
 0x61d   : >> { %v2044_v28 = vadd.f32 %v2041_v9, %v2032_v17 }
 0x61f   : >> { %v5499_v15 = vpop.permute.xlu2 %2359 }
 0x620   : >> { %6579 = vst [vmem:[#allocation31_spill] sm:$0xff] %v5499_v15 }
 0x621   : >> { %v2050_v53 = vpop.permute.xlu1 %2049 }
 0x622   : >> { %v2048_v26 = vpop.permute.xlu0 %2047  ;;  %v2054_v16 = vmul.f32 %v2050_v53, %v6541_v47 }
 0x623   : >> { %v2053_v17 = vmul.f32 %v2048_v26, %v6541_v47 }
 0x624   : >> { %v2057_v49 = vadd.f32 %v2054_v16, %v2045_v6 }
 0x625   : >> { %v2056_v44 = vadd.f32 %v2053_v17, %v2044_v28 }
 0x626   : >> { %v2060_v9 = vmul.f32 %v2057_v49, %v4114_v43  ;;  %v2062_v15 = vmul.f32 %v2057_v49, %v6543_v32  ;;  %v2077_v46 = vmul.f32 %v2057_v49, %v6544_v48  ;;  %v2092_v20 = vmul.f32 %v2057_v49, %v6580_v51 }
 0x627   : >> { %v2107_v60 = vmul.f32 %v2057_v49, %v6581_v45  ;;  %v2059_v53 = vmul.f32 %v2056_v44, %v4114_v43  ;;  %v2061_v26 = vmul.f32 %v2056_v44, %v6543_v32  ;;  %v2076_v6 = vmul.f32 %v2056_v44, %v6544_v48  ;;  %v5519_v28 = vpop.permute.xlu2 %2369 }
 0x628   : >> { %6582 = vst [vmem:[#allocation35_spill] sm:$0xff] %v5519_v28  ;;  %v2068_v22 = vrot.slane %v2062_v15, 1  ;;  %v2083_v23 = vrot.slane %v2077_v46, 2  ;;  %v2098_v33 = vrot.slane %v2092_v20, 3  ;;  %v2091_v3 = vmul.f32 %v2056_v44, %v6580_v51 }
 0x629   : >> { %v2113_v16 = vrot.slane %v2107_v60, 4  ;;  %v2067_v17 = vrot.slane %v2061_v26, 1  ;;  %v2082_v54 = vrot.slane %v2076_v6, 2  ;;  %v2106_v57 = vmul.f32 %v2056_v44, %v6581_v45  ;;  %v2148_v52 = vpop.permute.xlu1 %2147 }
 0x62a   : >> { %v2146_v49 = vpop.permute.xlu0 %2145  ;;  %v2097_v27 = vrot.slane %v2091_v3, 3  ;;  %v2071_v43 = vsel %vm448_vm0, %v2068_v22, %v2070_v63  ;;  %v2086_v32 = vsel %vm465_vm1, %v2083_v23, %v2085_v18  ;;  %v2101_v48 = vsel %vm482_vm2, %v2098_v33, %v2100_v1 }
 0x62b   : >> { %v2112_v28 = vrot.slane %v2106_v57, 4  ;;  %v2075_v15 = vadd.f32 %v2071_v43, %v2060_v9  ;;  %v2116_v46 = vsel %vm6583_vm3, %v2113_v16, %v2115_v0  ;;  %v2069_v20 = vsel %vm448_vm0, %v2067_v17, %v2068_v22 }
 0x62c   : >> { %v2074_v60 = vadd.f32 %v2069_v20, %v2059_v53  ;;  %v2084_v26 = vsel %vm465_vm1, %v2082_v54, %v2083_v23  ;;  %v2099_v44 = vsel %vm482_vm2, %v2097_v27, %v2098_v33  ;;  %v2261_v6 = vmul.f32 %v2258_v40, %v6541_v47 }
 0x62d   : >> { %v2090_v3 = vadd.f32 %v2086_v32, %v2075_v15  ;;  %v2114_v63 = vsel %vm6584_vm5, %v2112_v28, %v2113_v16  ;;  %v2123_v54 = vadd.s32 2, %v3746_v7  ;;  %vm6611_vm5 = vmmov %vm6583_vm3 }
 0x62e   : >> { %v2089_v45 = vadd.f32 %v2084_v26, %v2074_v60  ;;  %v5532_v18 = vadd.f32 %v2261_v6, %v2252_v50 }
 0x62f   : >> { %v2105_v1 = vadd.f32 %v2101_v48, %v2090_v3  ;;  %v2380_v57 = vpop.permute.xlu2 %2379  ;;  %vm2124_vm6 = vcmp.ge.s32.totalorder %v2123_v54, 0  ;;  %vm2125_vm7 = vcmp.lt.s32.totalorder %v2123_v54, 48 }
 0x630   : >> { %v2104_v43 = vadd.f32 %v2099_v44, %v2089_v45  ;;  %vm5537_vm8 = vmand %vm2124_vm6, %vm2125_vm7  ;;  %v2383_v15 = vmul.f32 %v2380_v57, %v6563_v2 }
 0x631   : >> { %v2120_v9 = vadd.f32 %v2116_v46, %v2105_v1  ;;  %v2162_v0 = vpop.permute.xlu1 %2161  ;;  %vm2128_vm9 = vmand %vm4223_vm10, %vm5537_vm8 }
 0x632   : >> { %v2156_v51 = vpop.permute.xlu0 %2155  ;;  %v2119_v22 = vadd.f32 %v2114_v63, %v2104_v43  ;;  %vm2127_vm13 = vmand %vm4233_vm12, %vm5537_vm8 }
 0x633   : >> { %v2122_v53 = vsub.f32 %v2120_v9, %v4160_v58 }
 0x634   : >> { %v2121_v27 = vsub.f32 %v2119_v22, %v4160_v58 }
 0x635   : >> { %v2134_v40 = vmax.f32 %v2122_v53, 0.0  ;;  %vm2130_vm11 = vcmp.le.f32.partialorder %v2122_v53, 5.0 }
 0x636   : >> { %v2133_v32 = vmax.f32 %v2121_v27, 0.0  ;;  %vm2129_vm14 = vcmp.le.f32.partialorder %v2121_v27, 5.0  ;;  %vm2132_vm15 = vmand %vm2128_vm9, %vm2130_vm11 }
 0x637   : >> { %v2136_v23 = vsub.f32 0.0, %v2134_v40  ;;  %v2389_v28 = vpop.permute.xlu2 %2388  ;;  %vm2131_vm4 = vmand %vm2127_vm13, %vm2129_vm14 }
 0x638   : >> { %v2135_v50 = vsub.f32 0.0, %v2133_v32  ;;  %v2392_v46 = vmul.f32 %v2389_v28, %v6564_v5 }
 0x639   : >> { %v2139_v48 = vmul.f32 1.442695, %v2136_v23  ;;  %v2172_v33 = vpop.permute.xlu1 %2171 }
 0x63a   : >> { %v2170_v45 = vpop.permute.xlu0 %2169  ;;  %v2137_v16 = vmul.f32 1.442695, %v2135_v50  ;;  %v2395_v6 = vadd.f32 %v2392_v46, %v2383_v15 }
 0x63b   : >> { %3440 = vpow2.f32 %v2139_v48 }
 0x63c   : >> { %3442 = vpow2.f32 %v2137_v16 }
 0x63f   : >> { %v2401_v20 = vpop.permute.xlu2 %2400 }
 0x640   : >> { %v2404_v3 = vmul.f32 %v2401_v20, %v6565_v61 }
 0x641   : >> { %v3441_v60 = vpop.eup %3440  ;;  %v2181_v26 = vpop.permute.xlu1 %2180 }
 0x642   : >> { %v2179_v44 = vpop.permute.xlu0 %2178  ;;  %v3443_v63 = vpop.eup %3442  ;;  %v2142_v1 = vsel %vm2132_vm15, %v3441_v60, 0.0  ;;  %v2407_v28 = vadd.f32 %v2404_v3, %v2395_v6 }
 0x643   : >> { %v5553_v57 = vadd.f32 %v2142_v1, %v5404_v31  ;;  %v2150_v43 = vmul.f32 %v2148_v52, %v2142_v1  ;;  %v2166_v9 = vmul.f32 %v5394_v39, %v2142_v1  ;;  %v2141_v22 = vsel %vm2131_vm4, %v3443_v63, 0.0  ;;  %v5629_v63 = vld [vmem:[%s3805_s1 + $0x96] sm:$0xf] }
 0x644   : >> { %v5557_v53 = vadd.f32 %v2141_v22, %v5408_v36  ;;  %v2149_v54 = vmul.f32 %v2146_v49, %v2141_v22  ;;  %v2157_v27 = vmul.f32 %v5375_v24, %v2141_v22  ;;  %v2165_v40 = vmul.f32 %v2162_v0, %v2141_v22  ;;  %6592 = vst [vmem:[#allocation43_spill] sm:$0xff] %v5629_v63  ;;  %v6598_v22 = vld [vmem:[#allocation56_spill] sm:$0xff] }
 0x645   : >> { %v5561_v32 = vadd.f32 %v2150_v43, %v5413_v38  ;;  %v2158_v23 = vmul.f32 %v2156_v51, %v2142_v1  ;;  %v5573_v36 = vadd.f32 %v2166_v9, %v5423_v14  ;;  %v2175_v14 = vmul.f32 %v2170_v45, %v3752_v11  ;;  %v5611_v45 = vld [vmem:[%s3805_s1 + $0x16] sm:$0xf]  ;;  %v6596_v43 = vld [vmem:[#allocation30_spill] sm:$0xff]  ;;  %v6597_v9 = vld [vmem:[#allocation45_spill] sm:$0xff] }
 0x646   : >> { %v5564_v50 = vadd.f32 %v2149_v54, %v5417_v62  ;;  %v5567_v31 = vadd.f32 %v2165_v40, %v5419_v29  ;;  %v5570_v39 = vadd.f32 %v2157_v27, %v5421_v34  ;;  %v2185_v62 = vmul.f32 %v2181_v26, %v3770_v19  ;;  %6588 = vst [vmem:[#allocation37_spill] sm:$0xff] %v5611_v45  ;;  %v5638_v1 = vld [vmem:[%s3855_s11 + $0x16] sm:$0xf]  ;;  %v6599_v54 = vld [vmem:[#allocation57_spill] sm:$0xff] }
 0x647   : >> { %v5576_v24 = vadd.f32 %v2158_v23, %v5425_v13  ;;  %v2413_v52 = vpop.permute.xlu2 %2412  ;;  %v2184_v29 = vmul.f32 %v2179_v44, %v6558_v59  ;;  %v2176_v34 = vmul.f32 %v2172_v33, %v3754_v12  ;;  %v5598_v33 = vld [vmem:[%s3805_s1 + $0x48] sm:$0xff]  ;;  %6595 = vst [vmem:[#allocation39_spill] sm:$0xff] %v5638_v1  ;;  %v6600_v27 = vld [vmem:[#allocation47_spill] sm:$0xff] }
 0x648   : >> { %v2416_v38 = vadd.f32 %v6566_v21, %v2413_v52  ;;  %6587 = vst [vmem:[#allocation34_spill] sm:$0xff] %v5598_v33 }
 0x649   : >> { %v2193_v51 = vpop.permute.xlu1 %2192  ;;  %v2188_v16 = vadd.f32 %v2185_v62, %v2176_v34  ;;  %v2187_v17 = vadd.f32 %v2184_v29, %v2175_v14  ;;  %v6603_v14 = vld [vmem:[#allocation49_spill] sm:$0xff] }
 0x64a   : >> { %v2191_v49 = vpop.permute.xlu0 %2190  ;;  %v2419_v0 = vadd.f32 %v2416_v38, %v2407_v28  ;;  %v2197_v48 = vmul.f32 %v2193_v51, %v6559_v25  ;;  %v6601_v28 = vld [vmem:[#allocation46_spill] sm:$0xff] }
 0x64b   : >> { %v2196_v13 = vmul.f32 %v2191_v49, %v6560_v56  ;;  %v6602_v49 = vld [vmem:[#allocation48_spill] sm:$0xff] }
 0x64c   : >> { %2427 = vrot.lane.b32.xlu2 %v2419_v0, %s6416_s12  ;;  %v2200_v20 = vadd.f32 %v2197_v48, %v2188_v16  ;;  %v2422_v40 = vmul.f32 %v2419_v0, %v6600_v27 }
 0x64d   : >> { %v2199_v60 = vadd.f32 %v2196_v13, %v2187_v17 }
 0x651   : >> { %v2205_v15 = vpop.permute.xlu1 %2204 }
 0x652   : >> { %v2203_v46 = vpop.permute.xlu0 %2202  ;;  %v2209_v26 = vadd.f32 %v6561_v41, %v2205_v15 }
 0x653   : >> { %v2208_v44 = vadd.f32 %v6562_v37, %v2203_v46 }
 0x654   : >> { %v2212_v6 = vadd.f32 %v2209_v26, %v2200_v20  ;;  %2439 = vrot.lane.b32.xlu2 %v2419_v0, %s6320_s0 }
 0x655   : >> { %v2211_v3 = vadd.f32 %v2208_v44, %v2199_v60 }
 0x656   : >> { %2219 = vrot.lane.b32.xlu1 %v2212_v6, %s6416_s12  ;;  %v2215_v60 = vmul.f32 %v2212_v6, %v6600_v27 }
 0x657   : >> { %2217 = vrot.lane.b32.xlu0 %v2211_v3, %s6416_s12  ;;  %v2214_v44 = vmul.f32 %v2211_v3, %v6600_v27 }
 0x65c   : >> { %2451 = vrot.lane.b32.xlu2 %v2419_v0, %s6399_s3 }
 0x65e   : >> { %2231 = vrot.lane.b32.xlu1 %v2212_v6, %s6320_s0 }
 0x65f   : >> { %2229 = vrot.lane.b32.xlu0 %v2211_v3, %s6320_s0  ;;  %s6331_s0 = smov 123  }
 0x664   : >> { %2463 = vrot.lane.b32.xlu2 %v2419_v0, %s6430_s2 }
 0x666   : >> { %2243 = vrot.lane.b32.xlu1 %v2212_v6, %s6399_s3 }
 0x667   : >> { %2241 = vrot.lane.b32.xlu0 %v2211_v3, %s6399_s3 }
 0x66c   : >> { %2565 = vrot.lane.b32.xlu2 %v5598_v33, %s3612_s16 }
 0x66e   : >> { %2255 = vrot.lane.b32.xlu1 %v2212_v6, %s6430_s2 }
 0x66f   : >> { %2253 = vrot.lane.b32.xlu0 %v2211_v3, %s6430_s2 }
 0x674   : >> { %2575 = vrot.lane.b32.xlu2 %v5219_v10, %s3612_s16  ;;  %v5620_v10 = vld [vmem:[%s3805_s1 + $0x56] sm:$0xf] }
 0x675   : >> { %6589 = vst [vmem:[#allocation38_spill] sm:$0xff] %v5620_v10 }
 0x676   : >> { %2353 = vrot.lane.b32.xlu1 %v5146_v30, %s3611_s14  ;;  %v6590_v30 = vld [vmem:[#allocation32_spill] sm:$0xff] }
 0x677   : >> { %2351 = vrot.lane.b32.xlu0 %v5151_v55, %s3611_s14  ;;  %v6591_v55 = vld [vmem:[#allocation28_spill] sm:$0xff] }
 0x67c   : >> { %2585 = vrot.lane.b32.xlu2 %v5611_v45, %s6331_s0 }
 0x67e   : >> { %2367 = vrot.lane.b32.xlu1 %v5161_v35, %s3611_s14  ;;  %v6593_v35 = vld [vmem:[#allocation33_spill] sm:$0xff] }
 0x67f   : >> { %2361 = vrot.lane.b32.xlu0 %v5166_v8, %s3611_s14  ;;  %v6594_v8 = vld [vmem:[#allocation29_spill] sm:$0xff]  ;;  %s6333_s14 = smov 122  }
 0x684   : >> { %2594 = vrot.lane.b32.xlu2 %v5620_v10, %s6331_s0 }
 0x686   : >> { %2377 = vrot.lane.b32.xlu1 %v6590_v30, %s3612_s16 }
 0x687   : >> { %2375 = vrot.lane.b32.xlu0 %v6591_v55, %s3612_s16 }
 0x68c   : >> { %2606 = vrot.lane.b32.xlu2 %v5629_v63, %s6331_s0 }
 0x68e   : >> { %2386 = vrot.lane.b32.xlu1 %v6593_v35, %s3612_s16 }
 0x68f   : >> { %2384 = vrot.lane.b32.xlu0 %v6594_v8, %s3612_s16 }
 0x694   : >> { %2618 = vrot.lane.b32.xlu2 %v5638_v1, %s6331_s0  ;;  %s6616_s0 = smov 1  }
 0x696   : >> { %2398 = vrot.lane.b32.xlu1 %v6596_v43, %s3612_s16 }
 0x697   : >> { %2396 = vrot.lane.b32.xlu0 %v6597_v9, %s3612_s16 }
 0x69e   : >> { %2410 = vrot.lane.b32.xlu1 %v6598_v22, %s3612_s16 }
 0x69f   : >> { %2408 = vrot.lane.b32.xlu0 %v6599_v54, %s3612_s16 }
 0x6a6   : >> { %v2428_v23 = vpop.permute.xlu2 %2427 }
 0x6a7   : >> { %v2431_v52 = vmul.f32 %v2428_v23, %v6601_v28 }
 0x6a9   : >> { %v2434_v38 = vadd.f32 %v2431_v52, %v2422_v40 }
 0x6ae   : >> { %v2440_v51 = vpop.permute.xlu2 %2439 }
 0x6af   : >> { %v2443_v62 = vmul.f32 %v2440_v51, %v6602_v49 }
 0x6b1   : >> { %v2446_v29 = vadd.f32 %v2443_v62, %v2434_v38 }
 0x6b6   : >> { %v2452_v34 = vpop.permute.xlu2 %2451 }
 0x6b7   : >> { %v2455_v48 = vmul.f32 %v2452_v34, %v6603_v14 }
 0x6b9   : >> { %v2458_v13 = vadd.f32 %v2455_v48, %v2446_v29  ;;  %v6606_v48 = vld [vmem:[#allocation51_spill] sm:$0xff] }
 0x6be   : >> { %v2464_v16 = vpop.permute.xlu2 %2463 }
 0x6bf   : >> { %v2467_v17 = vmul.f32 %v2464_v16, %v6541_v47  ;;  %v6607_v16 = vld [vmem:[#allocation52_spill] sm:$0xff] }
 0x6c1   : >> { %v5655_v15 = vadd.f32 %v2467_v17, %v2458_v13  ;;  %v2269_v13 = vmul.f32 %v5532_v18, %v6606_v48  ;;  %v2284_v17 = vmul.f32 %v5532_v18, %v6607_v16 }
 0x6c6   : >> { %v5657_v46 = vpop.permute.xlu2 %2565 }
 0x6c7   : >> { %6604 = vst [vmem:[#allocation44_spill] sm:$0xff] %v5657_v46 }
 0x6c8   : >> { %v2220_v0 = vpop.permute.xlu1 %2219 }
 0x6c9   : >> { %v2218_v20 = vpop.permute.xlu0 %2217  ;;  %v2224_v26 = vmul.f32 %v2220_v0, %v6601_v28  ;;  %v6608_v0 = vld [vmem:[#allocation53_spill] sm:$0xff] }
 0x6ca   : >> { %v2223_v30 = vmul.f32 %v2218_v20, %v6601_v28  ;;  %v2299_v20 = vmul.f32 %v5532_v18, %v6608_v0 }
 0x6cb   : >> { %v2227_v55 = vadd.f32 %v2224_v26, %v2215_v60  ;;  %v6609_v60 = vld [vmem:[#allocation54_spill] sm:$0xff] }
 0x6cc   : >> { %v2226_v35 = vadd.f32 %v2223_v30, %v2214_v44  ;;  %v2314_v26 = vmul.f32 %v5532_v18, %v6609_v60 }
 0x6ce   : >> { %v5663_v8 = vpop.permute.xlu2 %2575 }
 0x6cf   : >> { %6605 = vst [vmem:[#allocation36_spill] sm:$0xff] %v5663_v8 }
 0x6d0   : >> { %v2232_v43 = vpop.permute.xlu1 %2231 }
 0x6d1   : >> { %v2230_v9 = vpop.permute.xlu0 %2229  ;;  %v2236_v22 = vmul.f32 %v2232_v43, %v6602_v49 }
 0x6d2   : >> { %v2235_v54 = vmul.f32 %v2230_v9, %v6602_v49 }
 0x6d3   : >> { %v2239_v40 = vadd.f32 %v2236_v22, %v2227_v55  ;;  %v2276_v22 = vrot.slane %v2269_v13, 1 }
 0x6d4   : >> { %v2238_v23 = vadd.f32 %v2235_v54, %v2226_v35  ;;  %v2291_v54 = vrot.slane %v2284_v17, 2 }
 0x6d6   : >> { %v2586_v52 = vpop.permute.xlu2 %2585 }
 0x6d8   : >> { %v2244_v6 = vpop.permute.xlu1 %2243 }
 0x6d9   : >> { %v2242_v38 = vpop.permute.xlu0 %2241  ;;  %v2248_v51 = vmul.f32 %v2244_v6, %v6603_v14  ;;  %v6610_v6 = vld [vmem:[#allocation55_spill] sm:$0xff] }
 0x6da   : >> { %v2247_v3 = vmul.f32 %v2242_v38, %v6603_v14 }
 0x6db   : >> { %v2251_v62 = vadd.f32 %v2248_v51, %v2239_v40  ;;  %v2306_v40 = vrot.slane %v2299_v20, 3 }
 0x6dc   : >> { %v2250_v29 = vadd.f32 %v2247_v3, %v2238_v23  ;;  %v2321_v23 = vrot.slane %v2314_v26, 4 }
 0x6de   : >> { %v2595_v34 = vpop.permute.xlu2 %2594 }
 0x6e0   : >> { %v2256_v44 = vpop.permute.xlu1 %2255 }
 0x6e1   : >> { %v2254_v30 = vpop.permute.xlu0 %2253  ;;  %v2260_v55 = vmul.f32 %v2256_v44, %v6541_v47 }
 0x6e2   : >> { %v2259_v35 = vmul.f32 %v2254_v30, %v6541_v47  ;;  %v2589_v47 = vmul.f32 %v2586_v52, %v6563_v2 }
 0x6e3   : >> { %v2263_v43 = vadd.f32 %v2260_v55, %v2251_v62 }
 0x6e4   : >> { %v2262_v9 = vadd.f32 %v2259_v35, %v2250_v29 }
 0x6e5   : >> { %v2266_v38 = vmul.f32 %v2263_v43, %v6610_v6  ;;  %v2268_v51 = vmul.f32 %v2263_v43, %v6606_v48  ;;  %v2283_v3 = vmul.f32 %v2263_v43, %v6607_v16  ;;  %v2298_v18 = vmul.f32 %v2263_v43, %v6608_v0 }
 0x6e6   : >> { %v2313_v33 = vmul.f32 %v2263_v43, %v6609_v60  ;;  %v2265_v44 = vmul.f32 %v2262_v9, %v6610_v6  ;;  %v2267_v30 = vmul.f32 %v2262_v9, %v6606_v48  ;;  %v2282_v62 = vmul.f32 %v2262_v9, %v6607_v16  ;;  %v2607_v29 = vpop.permute.xlu2 %2606 }
 0x6e7   : >> { %v2274_v13 = vrot.slane %v2268_v51, 1  ;;  %v2289_v17 = vrot.slane %v2283_v3, 2  ;;  %v2304_v20 = vrot.slane %v2298_v18, 3  ;;  %v2297_v26 = vmul.f32 %v2262_v9, %v6608_v0 }
 0x6e8   : >> { %v2319_v55 = vrot.slane %v2313_v33, 4  ;;  %v2273_v35 = vrot.slane %v2267_v30, 1  ;;  %v2288_v1 = vrot.slane %v2282_v62, 2  ;;  %v2312_v63 = vmul.f32 %v2262_v9, %v6609_v60  ;;  %v2354_v10 = vpop.permute.xlu1 %2353 }
 0x6e9   : >> { %v5689_v45 = vpop.permute.xlu0 %2351  ;;  %v2303_v43 = vrot.slane %v2297_v26, 3  ;;  %v2277_v8 = vsel %vm448_vm0, %v2274_v13, %v2276_v22  ;;  %v2292_v46 = vsel %vm465_vm1, %v2289_v17, %v2291_v54  ;;  %v2307_v6 = vsel %vm482_vm2, %v2304_v20, %v2306_v40 }
 0x6ea   : >> { %v2318_v51 = vrot.slane %v2312_v63, 4  ;;  %v2281_v3 = vadd.f32 %v2277_v8, %v2266_v38  ;;  %v2322_v18 = vsel %vm6583_vm3, %v2319_v55, %v2321_v23  ;;  %v2275_v33 = vsel %vm448_vm0, %v2273_v35, %v2274_v13 }
 0x6eb   : >> { %v2280_v30 = vadd.f32 %v2275_v33, %v2265_v44  ;;  %v2290_v62 = vsel %vm465_vm1, %v2288_v1, %v2289_v17  ;;  %v2305_v9 = vsel %vm482_vm2, %v2303_v43, %v2304_v20  ;;  %v2598_v54 = vmul.f32 %v2595_v34, %v6564_v5 }
 0x6ec   : >> { %v2296_v26 = vadd.f32 %v2292_v46, %v2281_v3  ;;  %v2320_v22 = vsel %vm6611_vm5, %v2318_v51, %v2319_v55  ;;  %v2610_v40 = vmul.f32 %v2607_v29, %v6565_v61  ;;  %v2329_v34 = vadd.s32 3, %v3746_v7  ;;  %vm6626_vm5 = vmmov %vm6583_vm3 }
 0x6ed   : >> { %v2295_v63 = vadd.f32 %v2290_v62, %v2280_v30  ;;  %v2601_v38 = vadd.f32 %v2598_v54, %v2589_v47  ;;  %v5715_v30 = vld [vmem:[%s3805_s1 + $0x6] sm:$0xff] }
 0x6ee   : >> { %v2311_v8 = vadd.f32 %v2307_v6, %v2296_v26  ;;  %v2619_v23 = vpop.permute.xlu2 %2618  ;;  %vm2330_vm6 = vcmp.ge.s32.totalorder %v2329_v34, 0  ;;  %vm2331_vm7 = vcmp.lt.s32.totalorder %v2329_v34, 48 }
 0x6ef   : >> { %v2310_v60 = vadd.f32 %v2305_v9, %v2295_v63  ;;  %v2622_v44 = vadd.f32 %v6566_v21, %v2619_v23  ;;  %v2613_v20 = vadd.f32 %v2610_v40, %v2601_v38  ;;  %vm5710_vm8 = vmand %vm2330_vm6, %vm2331_vm7 }
 0x6f0   : >> { %v2326_v13 = vadd.f32 %v2322_v18, %v2311_v8  ;;  %v2368_v1 = vpop.permute.xlu1 %2367  ;;  %vm2334_vm9 = vmand %vm4223_vm10, %vm5710_vm8 }
 0x6f1   : >> { %v2362_v17 = vpop.permute.xlu0 %2361  ;;  %v2325_v35 = vadd.f32 %v2320_v22, %v2310_v60  ;;  %v5704_v52 = vadd.f32 %v2622_v44, %v2613_v20  ;;  %vm2333_vm13 = vmand %vm4233_vm12, %vm5710_vm8 }
 0x6f2   : >> { %v2328_v46 = vsub.f32 %v2326_v13, %v4160_v58 }
 0x6f3   : >> { %v2327_v29 = vsub.f32 %v2325_v35, %v4160_v58  ;;  %2633 = vrot.lane.b32.xlu2 %v5704_v52, %s6416_s12 }
 0x6f4   : >> { %v2340_v6 = vmax.f32 %v2328_v46, 0.0  ;;  %vm2336_vm11 = vcmp.le.f32.partialorder %v2328_v46, 5.0  ;;  %v3502_v46 = vld [vmem:[%s3805_s1 + $0x46] sm:$0xff] }
 0x6f5   : >> { %v2339_v47 = vmax.f32 %v2327_v29, 0.0  ;;  %vm2335_vm14 = vcmp.le.f32.partialorder %v2327_v29, 5.0  ;;  %vm2338_vm15 = vmand %vm2334_vm9, %vm2336_vm11 }
 0x6f6   : >> { %v2342_v55 = vsub.f32 0.0, %v2340_v6  ;;  %vm2337_vm4 = vmand %vm2333_vm13, %vm2335_vm14 }
 0x6f7   : >> { %v2341_v43 = vsub.f32 0.0, %v2339_v47 }
 0x6f8   : >> { %v2345_v51 = vmul.f32 1.442695, %v2342_v55  ;;  %v2378_v60 = vpop.permute.xlu1 %2377  ;;  %v3503_v55 = vld [vmem:[%s3805_s1 + $0x86] sm:$0xff] }
 0x6f9   : >> { %v2376_v3 = vpop.permute.xlu0 %2375  ;;  %v2343_v18 = vmul.f32 1.442695, %v2341_v43 }
 0x6fa   : >> { %3444 = vpow2.f32 %v2345_v51 }
 0x6fb   : >> { %3446 = vpow2.f32 %v2343_v18  ;;  %2787 = vrot.lane.b32.xlu2 %v5715_v30, %s6333_s14 }
 0x700   : >> { %v3445_v62 = vpop.eup %3444  ;;  %v2387_v9 = vpop.permute.xlu1 %2386 }
 0x701   : >> { %v2385_v26 = vpop.permute.xlu0 %2384  ;;  %v3447_v22 = vpop.eup %3446  ;;  %v2348_v54 = vsel %vm2338_vm15, %v3445_v62, 0.0  ;;  %v2391_v6 = vmul.f32 %v2387_v9, %v3770_v19 }
 0x702   : >> { %v5728_v40 = vadd.f32 %v2348_v54, %v5553_v57  ;;  %v2356_v63 = vmul.f32 %v2354_v10, %v2348_v54  ;;  %v2347_v8 = vsel %vm2337_vm4, %v3447_v22, 0.0  ;;  %v2364_v38 = vmul.f32 %v2362_v17, %v2348_v54  ;;  %v6614_v57 = vld [vmem:[#allocation31_spill] sm:$0xff] }
 0x703   : >> { %v5731_v23 = vadd.f32 %v2347_v8, %v5557_v53  ;;  %v2355_v44 = vmul.f32 %v5689_v45, %v2347_v8  ;;  %v2371_v13 = vmul.f32 %v2368_v1, %v2347_v8  ;;  %2796 = vrot.lane.b32.xlu2 %v3502_v46, %s6333_s14  ;;  %v2363_v10 = vmul.f32 %v6614_v57, %v2347_v8  ;;  %v6615_v45 = vld [vmem:[#allocation35_spill] sm:$0xff]  ;;  %v5784_v8 = vld [vmem:[%s3805_s1 + $0x8] sm:$0xff] }
 0x704   : >> { %v5735_v20 = vadd.f32 %v2356_v63, %v5561_v32  ;;  %v5738_v35 = vadd.f32 %v2364_v38, %v5576_v24  ;;  %v2372_v34 = vmul.f32 %v6615_v45, %v2348_v54  ;;  %v2390_v47 = vmul.f32 %v2385_v26, %v6558_v59  ;;  %v5779_v63 = vld [vmem:[%s3805_s1 + $0x10] sm:$0xff]  ;;  %6618 = vst [vmem:[#allocation41_spill] sm:$0xff] %v5784_v8  ;;  %v5789_v38 = vld [vmem:[%s3805_s1 + $0x88] sm:$0xff] }
 0x705   : >> { %v5744_v17 = vadd.f32 %v2355_v44, %v5564_v50  ;;  %v5747_v53 = vadd.f32 %v2371_v13, %v5567_v31  ;;  %v5751_v1 = vadd.f32 %v2363_v10, %v5570_v39  ;;  %v2382_v50 = vmul.f32 %v2378_v60, %v3754_v12  ;;  %6617 = vst [vmem:[#allocation40_spill] sm:$0xff] %v5779_v63  ;;  %v5794_v44 = vld [vmem:[%s3805_s1 + $0x50] sm:$0xff] }
 0x706   : >> { %v5754_v32 = vadd.f32 %v2372_v34, %v5573_v36  ;;  %v2381_v31 = vmul.f32 %v2376_v3, %v3752_v11  ;;  %v3504_v3 = vld [vmem:[%s3855_s11 + $0x6] sm:$0xff]  ;;  %6619 = vst [vmem:[#allocation42_spill] sm:$0xff] %v5789_v38  ;;  %v5799_v13 = vld [vmem:[%s3805_s1 + $0xe] sm:$0xff] }
 0x707   : >> { %v2394_v36 = vadd.f32 %v2391_v6, %v2382_v50  ;;  %6620 = vst [vmem:[#allocation32_spill] sm:$0xff] %v5794_v44  ;;  %v5806_v57 = vld [vmem:[%s3805_s1 + $0x4e] sm:$0xff] }
 0x708   : >> { %v2399_v24 = vpop.permute.xlu1 %2398  ;;  %v2393_v51 = vadd.f32 %v2390_v47, %v2381_v31  ;;  %v5814_v45 = vld [vmem:[%s3805_s1 + $0x8e] sm:$0xff] }
 0x709   : >> { %v2397_v29 = vpop.permute.xlu0 %2396  ;;  %v2403_v39 = vmul.f32 %v2399_v24, %v6559_v25  ;;  %v5820_v24 = vld [vmem:[%s3855_s11 + $0xe] sm:$0xff]  ;;  %s6629_s11 = smov 122  }
 0x70a   : >> { %v2402_v43 = vmul.f32 %v2397_v29, %v6560_v56 }
 0x70b   : >> { %2808 = vrot.lane.b32.xlu2 %v3503_v55, %s6333_s14  ;;  %v2406_v62 = vadd.f32 %v2403_v39, %v2394_v36 }
 0x70c   : >> { %v2405_v9 = vadd.f32 %v2402_v43, %v2393_v51 }
 0x710   : >> { %v2411_v18 = vpop.permute.xlu1 %2410 }
 0x711   : >> { %v2409_v33 = vpop.permute.xlu0 %2408  ;;  %v2415_v26 = vadd.f32 %v6561_v41, %v2411_v18 }
 0x712   : >> { %v2414_v22 = vadd.f32 %v6562_v37, %v2409_v33 }
 0x713   : >> { %v2418_v54 = vadd.f32 %v2415_v26, %v2406_v62  ;;  %2820 = vrot.lane.b32.xlu2 %v3504_v3, %s6333_s14  ;;  %s6621_s14 = smov 123  }
 0x714   : >> { %v2417_v60 = vadd.f32 %v2414_v22, %v2405_v9 }
 0x715   : >> { %2425 = vrot.lane.b32.xlu1 %v2418_v54, %s6416_s12  ;;  %v2421_v18 = vmul.f32 %v2418_v54, %v6600_v27 }
 0x716   : >> { %2423 = vrot.lane.b32.xlu0 %v2417_v60, %s6416_s12  ;;  %v2420_v62 = vmul.f32 %v2417_v60, %v6600_v27 }
 0x71b   : >> { %2645 = vrot.lane.b32.xlu2 %v5704_v52, %s6616_s0 }
 0x71d   : >> { %2437 = vrot.lane.b32.xlu1 %v2418_v54, %s6616_s0 }
 0x71e   : >> { %2435 = vrot.lane.b32.xlu0 %v2417_v60, %s6616_s0 }
 0x725   : >> { %2449 = vrot.lane.b32.xlu1 %v2418_v54, %s6399_s3 }
 0x726   : >> { %2447 = vrot.lane.b32.xlu0 %v2417_v60, %s6399_s3 }
 0x72d   : >> { %2461 = vrot.lane.b32.xlu1 %v2418_v54, %s6430_s2 }
 0x72e   : >> { %2459 = vrot.lane.b32.xlu0 %v2417_v60, %s6430_s2 }
 0x735   : >> { %2559 = vrot.lane.b32.xlu1 %v5779_v63, %s3612_s16 }
 0x736   : >> { %2557 = vrot.lane.b32.xlu0 %v5784_v8, %s3612_s16 }
 0x73d   : >> { %2573 = vrot.lane.b32.xlu1 %v5789_v38, %s3612_s16 }
 0x73e   : >> { %2567 = vrot.lane.b32.xlu0 %v5794_v44, %s3612_s16 }
 0x745   : >> { %2583 = vrot.lane.b32.xlu1 %v5799_v13, %s6621_s14 }
 0x746   : >> { %2581 = vrot.lane.b32.xlu0 %v5715_v30, %s6621_s14 }
 0x74d   : >> { %2592 = vrot.lane.b32.xlu1 %v5806_v57, %s6621_s14  ;;  %v5811_v10 = vpop.permute.xlu2 %2633 }
 0x74e   : >> { %2590 = vrot.lane.b32.xlu0 %v3502_v46, %s6621_s14  ;;  %6622 = vst [vmem:[#allocation28_spill] sm:$0xff] %v5811_v10 }
 0x755   : >> { %2604 = vrot.lane.b32.xlu1 %v5814_v45, %s6621_s14  ;;  %v2788_v34 = vpop.permute.xlu2 %2787 }
 0x756   : >> { %2602 = vrot.lane.b32.xlu0 %v3503_v55, %s6621_s14  ;;  %v2793_v46 = vmul.f32 %v2788_v34, %v3752_v11 }
 0x75d   : >> { %2616 = vrot.lane.b32.xlu1 %v5820_v24, %s6621_s14  ;;  %v2797_v30 = vpop.permute.xlu2 %2796 }
 0x75e   : >> { %2614 = vrot.lane.b32.xlu0 %v3504_v3, %s6621_s14  ;;  %v2802_v29 = vmul.f32 %v2797_v30, %v6558_v59 }
 0x760   : >> { %v2805_v47 = vadd.f32 %v2802_v29, %v2793_v46 }
 0x765   : >> { %v2809_v6 = vpop.permute.xlu2 %2808 }
 0x766   : >> { %v2814_v50 = vmul.f32 %v2809_v6, %v6560_v56 }
 0x768   : >> { %v2817_v31 = vadd.f32 %v2814_v50, %v2805_v47 }
 0x76d   : >> { %v2821_v39 = vpop.permute.xlu2 %2820 }
 0x76e   : >> { %v2826_v55 = vadd.f32 %v6562_v37, %v2821_v39 }
 0x770   : >> { %v5829_v43 = vadd.f32 %v2826_v55, %v2817_v31  ;;  %v2475_v55 = vmul.f32 %v5655_v15, %v6606_v48 }
 0x772   : >> { %2835 = vrot.lane.b32.xlu2 %v5829_v43, %s6416_s12 }
 0x77a   : >> { %2657 = vrot.lane.b32.xlu2 %v5704_v52, %s6399_s3 }
 0x787   : >> { %v2426_v36 = vpop.permute.xlu1 %2425 }
 0x788   : >> { %v2424_v51 = vpop.permute.xlu0 %2423  ;;  %v2430_v33 = vmul.f32 %v2426_v36, %v6601_v28  ;;  %v2490_v36 = vmul.f32 %v5655_v15, %v6607_v16 }
 0x789   : >> { %v2429_v9 = vmul.f32 %v2424_v51, %v6601_v28  ;;  %v2505_v51 = vmul.f32 %v5655_v15, %v6608_v0 }
 0x78a   : >> { %v2433_v26 = vadd.f32 %v2430_v33, %v2421_v18  ;;  %v6623_v18 = vld [vmem:[#allocation54_spill] sm:$0xff] }
 0x78b   : >> { %v2432_v22 = vadd.f32 %v2429_v9, %v2420_v62  ;;  %v2520_v33 = vmul.f32 %v5655_v15, %v6623_v18 }
 0x78f   : >> { %v2438_v3 = vpop.permute.xlu1 %2437 }
 0x790   : >> { %v2436_v34 = vpop.permute.xlu0 %2435  ;;  %v2442_v30 = vmul.f32 %v2438_v3, %v6602_v49 }
 0x791   : >> { %v2441_v46 = vmul.f32 %v2436_v34, %v6602_v49 }
 0x792   : >> { %v2445_v29 = vadd.f32 %v2442_v30, %v2433_v26  ;;  %v6624_v26 = vld [vmem:[#allocation50_spill] sm:$0xff] }
 0x793   : >> { %v2444_v6 = vadd.f32 %v2441_v46, %v2432_v22  ;;  %v2482_v46 = vrot.slane %v2475_v55, 1 }
 0x797   : >> { %v2450_v47 = vpop.permute.xlu1 %2449 }
 0x798   : >> { %v2448_v50 = vpop.permute.xlu0 %2447  ;;  %v2454_v54 = vmul.f32 %v2450_v47, %v6603_v14  ;;  %v2527_v47 = vrot.slane %v2520_v33, 4 }
 0x799   : >> { %v2453_v31 = vmul.f32 %v2448_v50, %v6603_v14  ;;  %v6625_v50 = vld [vmem:[#allocation55_spill] sm:$0xff] }
 0x79a   : >> { %v2457_v39 = vadd.f32 %v2454_v54, %v2445_v29  ;;  %v2497_v29 = vrot.slane %v2490_v36, 2 }
 0x79b   : >> { %v2456_v60 = vadd.f32 %v2453_v31, %v2444_v6  ;;  %v2512_v6 = vrot.slane %v2505_v51, 3 }
 0x79f   : >> { %v2462_v62 = vpop.permute.xlu1 %2461 }
 0x7a0   : >> { %v2460_v9 = vpop.permute.xlu0 %2459  ;;  %v2466_v22 = vmul.f32 %v2462_v62, %v6624_v26 }
 0x7a1   : >> { %v2465_v3 = vmul.f32 %v2460_v9, %v6624_v26 }
 0x7a2   : >> { %v2469_v34 = vadd.f32 %v2466_v22, %v2457_v39 }
 0x7a3   : >> { %v2468_v30 = vadd.f32 %v2465_v3, %v2456_v60 }
 0x7a4   : >> { %v2472_v54 = vmul.f32 %v2469_v34, %v6625_v50  ;;  %v2474_v31 = vmul.f32 %v2469_v34, %v6606_v48  ;;  %v2489_v14 = vmul.f32 %v2469_v34, %v6607_v16  ;;  %v2504_v15 = vmul.f32 %v2469_v34, %v6608_v0 }
 0x7a5   : >> { %v2519_v10 = vmul.f32 %v2469_v34, %v6623_v18  ;;  %v2471_v62 = vmul.f32 %v2468_v30, %v6625_v50  ;;  %v2473_v9 = vmul.f32 %v2468_v30, %v6606_v48  ;;  %v2488_v39 = vmul.f32 %v2468_v30, %v6607_v16 }
 0x7a6   : >> { %v2480_v60 = vrot.slane %v2474_v31, 1  ;;  %v2495_v55 = vrot.slane %v2489_v14, 2  ;;  %v2510_v36 = vrot.slane %v2504_v15, 3  ;;  %v2503_v51 = vmul.f32 %v2468_v30, %v6608_v0 }
 0x7a7   : >> { %v2525_v33 = vrot.slane %v2519_v10, 4  ;;  %v2479_v22 = vrot.slane %v2473_v9, 1  ;;  %v2494_v3 = vrot.slane %v2488_v39, 2  ;;  %v2518_v26 = vmul.f32 %v2468_v30, %v6623_v18  ;;  %v2560_v44 = vpop.permute.xlu1 %2559 }
 0x7a8   : >> { %v2558_v38 = vpop.permute.xlu0 %2557  ;;  %v2509_v8 = vrot.slane %v2503_v51, 3  ;;  %v2483_v34 = vsel %vm448_vm0, %v2480_v60, %v2482_v46  ;;  %v2498_v50 = vsel %vm465_vm1, %v2495_v55, %v2497_v29  ;;  %v2513_v48 = vsel %vm482_vm2, %v2510_v36, %v2512_v6 }
 0x7a9   : >> { %v2524_v16 = vrot.slane %v2518_v26, 4  ;;  %v2487_v31 = vadd.f32 %v2483_v34, %v2472_v54  ;;  %v2528_v14 = vsel %vm6583_vm3, %v2525_v33, %v2527_v47  ;;  %v2481_v15 = vsel %vm448_vm0, %v2479_v22, %v2480_v60 }
 0x7aa   : >> { %v2486_v10 = vadd.f32 %v2481_v15, %v2471_v62  ;;  %v2496_v9 = vsel %vm465_vm1, %v2494_v3, %v2495_v55  ;;  %v2511_v30 = vsel %vm482_vm2, %v2509_v8, %v2510_v36  ;;  %v2535_v47 = vadd.s32 4, %v3746_v7 }
 0x7ab   : >> { %v2502_v39 = vadd.f32 %v2498_v50, %v2487_v31  ;;  %v2526_v51 = vsel %vm6626_vm5, %v2524_v16, %v2525_v33  ;;  %vm6647_vm5 = vmmov %vm6583_vm3 }
 0x7ac   : >> { %v2501_v18 = vadd.f32 %v2496_v9, %v2486_v10  ;;  %vm2536_vm6 = vcmp.ge.s32.totalorder %v2535_v47, 0  ;;  %vm2537_vm7 = vcmp.lt.s32.totalorder %v2535_v47, 48 }
 0x7ad   : >> { %v2517_v46 = vadd.f32 %v2513_v48, %v2502_v39  ;;  %vm2538_vm8 = vmand %vm2536_vm6, %vm2537_vm7 }
 0x7ae   : >> { %v2516_v0 = vadd.f32 %v2511_v30, %v2501_v18  ;;  %vm2540_vm9 = vmand %vm4223_vm10, %vm2538_vm8 }
 0x7af   : >> { %v2532_v29 = vadd.f32 %v2528_v14, %v2517_v46  ;;  %v2574_v63 = vpop.permute.xlu1 %2573  ;;  %vm2539_vm13 = vmand %vm4233_vm12, %vm2538_vm8 }
 0x7b0   : >> { %v2568_v6 = vpop.permute.xlu0 %2567  ;;  %v2531_v26 = vadd.f32 %v2526_v51, %v2516_v0  ;;  %vm6648_vm8 = vmmov %vm6583_vm3 }
 0x7b1   : >> { %v2534_v54 = vsub.f32 %v2532_v29, %v4160_v58  ;;  %v6627_v29 = vld [vmem:[#allocation44_spill] sm:$0xff] }
 0x7b2   : >> { %v2533_v62 = vsub.f32 %v2531_v26, %v4160_v58 }
 0x7b3   : >> { %v2546_v60 = vmax.f32 %v2534_v54, 0.0  ;;  %vm2542_vm11 = vcmp.le.f32.partialorder %v2534_v54, 5.0 }
 0x7b4   : >> { %v2545_v55 = vmax.f32 %v2533_v62, 0.0  ;;  %vm2541_vm14 = vcmp.le.f32.partialorder %v2533_v62, 5.0  ;;  %vm2544_vm15 = vmand %vm2540_vm9, %vm2542_vm11 }
 0x7b5   : >> { %v2548_v22 = vsub.f32 0.0, %v2546_v60  ;;  %vm2543_vm4 = vmand %vm2539_vm13, %vm2541_vm14 }
 0x7b6   : >> { %v2547_v8 = vsub.f32 0.0, %v2545_v55 }
 0x7b7   : >> { %v2551_v16 = vmul.f32 1.442695, %v2548_v22  ;;  %v2584_v50 = vpop.permute.xlu1 %2583 }
 0x7b8   : >> { %v2582_v48 = vpop.permute.xlu0 %2581  ;;  %v2549_v18 = vmul.f32 1.442695, %v2547_v8 }
 0x7b9   : >> { %3448 = vpow2.f32 %v2551_v16  ;;  %v2587_v62 = vmul.f32 %v2582_v48, %v3752_v11  ;;  %v6633_v48 = vld [vmem:[#allocation39_spill] sm:$0xff] }
 0x7ba   : >> { %3450 = vpow2.f32 %v2549_v18 }
 0x7bf   : >> { %v3449_v0 = vpop.eup %3448  ;;  %v2593_v36 = vpop.permute.xlu1 %2592 }
 0x7c0   : >> { %v2591_v33 = vpop.permute.xlu0 %2590  ;;  %v3451_v3 = vpop.eup %3450  ;;  %v2554_v34 = vsel %vm2544_vm15, %v3449_v0, 0.0 }
 0x7c1   : >> { %v5879_v31 = vadd.f32 %v2554_v34, %v5728_v40  ;;  %v2562_v14 = vmul.f32 %v2560_v44, %v2554_v34  ;;  %v2553_v15 = vsel %vm2543_vm4, %v3451_v3, 0.0  ;;  %v2570_v10 = vmul.f32 %v2568_v6, %v2554_v34  ;;  %v6628_v44 = vld [vmem:[#allocation36_spill] sm:$0xff] }
 0x7c2   : >> { %v5882_v9 = vadd.f32 %v2553_v15, %v5731_v23  ;;  %v2561_v30 = vmul.f32 %v2558_v38, %v2553_v15  ;;  %v2577_v39 = vmul.f32 %v2574_v63, %v2553_v15  ;;  %v2569_v26 = vmul.f32 %v6627_v29, %v2553_v15 }
 0x7c3   : >> { %v5885_v51 = vadd.f32 %v2562_v14, %v5735_v20  ;;  %v5888_v46 = vadd.f32 %v2570_v10, %v5738_v35  ;;  %v2578_v6 = vmul.f32 %v6628_v44, %v2554_v34  ;;  %v2597_v35 = vmul.f32 %v2593_v36, %v3770_v19 }
 0x7c4   : >> { %v5892_v54 = vadd.f32 %v2561_v30, %v5744_v17  ;;  %v5895_v40 = vadd.f32 %v2577_v39, %v5747_v53  ;;  %v5899_v23 = vadd.f32 %v2569_v26, %v5751_v1  ;;  %v2596_v47 = vmul.f32 %v2591_v33, %v6558_v59 }
 0x7c5   : >> { %v5902_v63 = vadd.f32 %v2578_v6, %v5754_v32  ;;  %v2588_v17 = vmul.f32 %v2584_v50, %v3754_v12  ;;  %v6631_v50 = vld [vmem:[#allocation38_spill] sm:$0xff] }
 0x7c6   : >> { %v2599_v1 = vadd.f32 %v2596_v47, %v2587_v62 }
 0x7c7   : >> { %v2605_v20 = vpop.permute.xlu1 %2604  ;;  %v2600_v55 = vadd.f32 %v2597_v35, %v2588_v17 }
 0x7c8   : >> { %v2603_v38 = vpop.permute.xlu0 %2602  ;;  %v2609_v53 = vmul.f32 %v2605_v20, %v6559_v25 }
 0x7c9   : >> { %v2608_v60 = vmul.f32 %v2603_v38, %v6560_v56  ;;  %v6630_v56 = vld [vmem:[#allocation37_spill] sm:$0xff] }
 0x7ca   : >> { %v2612_v32 = vadd.f32 %v2609_v53, %v2600_v55 }
 0x7cb   : >> { %v2611_v16 = vadd.f32 %v2608_v60, %v2599_v1 }
 0x7cf   : >> { %v2617_v22 = vpop.permute.xlu1 %2616 }
 0x7d0   : >> { %v2615_v8 = vpop.permute.xlu0 %2614  ;;  %v2621_v18 = vadd.f32 %v6561_v41, %v2617_v22 }
 0x7d1   : >> { %v2620_v0 = vadd.f32 %v6562_v37, %v2615_v8  ;;  %v6632_v37 = vld [vmem:[#allocation43_spill] sm:$0xff] }
 0x7d2   : >> { %v2624_v36 = vadd.f32 %v2621_v18, %v2612_v32 }
 0x7d3   : >> { %v2623_v59 = vadd.f32 %v2620_v0, %v2611_v16 }
 0x7d4   : >> { %2631 = vrot.lane.b32.xlu1 %v2624_v36, %s6416_s12  ;;  %v2627_v34 = vmul.f32 %v2624_v36, %v6600_v27 }
 0x7d5   : >> { %2629 = vrot.lane.b32.xlu0 %v2623_v59, %s6416_s12 }
 0x7dc   : >> { %2643 = vrot.lane.b32.xlu1 %v2624_v36, %s6616_s0 }
 0x7dd   : >> { %2641 = vrot.lane.b32.xlu0 %v2623_v59, %s6616_s0 }
 0x7e4   : >> { %2791 = vrot.lane.b32.xlu1 %v6630_v56, %s6629_s11 }
 0x7e5   : >> { %2789 = vrot.lane.b32.xlu0 %v5799_v13, %s6629_s11 }
 0x7ec   : >> { %2800 = vrot.lane.b32.xlu1 %v6631_v50, %s6629_s11 }
 0x7ed   : >> { %2798 = vrot.lane.b32.xlu0 %v5806_v57, %s6629_s11 }
 0x7f4   : >> { %2812 = vrot.lane.b32.xlu1 %v6632_v37, %s6629_s11 }
 0x7f5   : >> { %2810 = vrot.lane.b32.xlu0 %v5814_v45, %s6629_s11  ;;  %v2626_v45 = vmul.f32 %v2623_v59, %v6600_v27 }
 0x7fc   : >> { %2824 = vrot.lane.b32.xlu1 %v6633_v48, %s6629_s11 }
 0x7fd   : >> { %2822 = vrot.lane.b32.xlu0 %v5820_v24, %s6629_s11 }
 0x804   : >> { %2655 = vrot.lane.b32.xlu1 %v2624_v36, %s6399_s3 }
 0x805   : >> { %2653 = vrot.lane.b32.xlu0 %v2623_v59, %s6399_s3 }
 0x846   : >> { %v2632_v13 = vpop.permute.xlu1 %2631 }
 0x847   : >> { %v2630_v33 = vpop.permute.xlu0 %2629  ;;  %v2636_v57 = vmul.f32 %v2632_v13, %v6601_v28 }
 0x848   : >> { %v2635_v3 = vmul.f32 %v2630_v33, %v6601_v28 }
 0x849   : >> { %v2639_v10 = vadd.f32 %v2636_v57, %v2627_v34  ;;  %v2628_v34 = vmul.f32 %v5704_v52, %v6600_v27 }
 0x84a   : >> { %v2638_v30 = vadd.f32 %v2635_v3, %v2626_v45  ;;  %v6639_v45 = vld [vmem:[#allocation28_spill] sm:$0xff] }
 0x84e   : >> { %v2644_v14 = vpop.permute.xlu1 %2643 }
 0x84f   : >> { %v2642_v15 = vpop.permute.xlu0 %2641  ;;  %v2648_v24 = vmul.f32 %v2644_v14, %v6602_v49  ;;  %v2637_v14 = vmul.f32 %v6639_v45, %v6601_v28 }
 0x850   : >> { %v2647_v39 = vmul.f32 %v2642_v15, %v6602_v49 }
 0x851   : >> { %v5940_v29 = vadd.f32 %v2648_v24, %v2639_v10  ;;  %v2640_v10 = vadd.f32 %v2637_v14, %v2628_v34 }
 0x852   : >> { %v5942_v26 = vadd.f32 %v2647_v39, %v2638_v30 }
 0x856   : >> { %v2792_v44 = vpop.permute.xlu1 %2791 }
 0x857   : >> { %v2790_v6 = vpop.permute.xlu0 %2789  ;;  %v2795_v53 = vmul.f32 %v2792_v44, %v6563_v2  ;;  %v3513_v2 = vld [vmem:[%s3805_s1 + $0x90] sm:$0xff]  ;;  %s3615_s1 = smov (%p292_p13), 120  }
 0x858   : >> { %v2794_v60 = vmul.f32 %v2790_v6, %v3754_v12  ;;  %v6640_v6 = vld [vmem:[#allocation49_spill] sm:$0xff] }
 0x85e   : >> { %v2801_v20 = vpop.permute.xlu1 %2800 }
 0x85f   : >> { %v2799_v38 = vpop.permute.xlu0 %2798  ;;  %v2804_v17 = vmul.f32 %v2801_v20, %v6564_v5 }
 0x860   : >> { %v2803_v62 = vmul.f32 %v2799_v38, %v3770_v19  ;;  %v6641_v38 = vld [vmem:[#allocation50_spill] sm:$0xff] }
 0x861   : >> { %v2807_v22 = vadd.f32 %v2804_v17, %v2795_v53 }
 0x862   : >> { %v2806_v8 = vadd.f32 %v2803_v62, %v2794_v60 }
 0x866   : >> { %v2813_v35 = vpop.permute.xlu1 %2812 }
 0x867   : >> { %v2811_v47 = vpop.permute.xlu0 %2810  ;;  %v2816_v55 = vmul.f32 %v2813_v35, %v6565_v61  ;;  %v6636_v61 = vld [vmem:[#allocation41_spill] sm:$0xff] }
 0x868   : >> { %v2815_v1 = vmul.f32 %v2811_v47, %v6559_v25  ;;  %v6634_v25 = vld [vmem:[#allocation34_spill] sm:$0xff] }
 0x869   : >> { %v2819_v18 = vadd.f32 %v2816_v55, %v2807_v22 }
 0x86a   : >> { %v2818_v0 = vadd.f32 %v2815_v1, %v2806_v8 }
 0x86e   : >> { %v2825_v32 = vpop.permute.xlu1 %2824 }
 0x86f   : >> { %v2823_v16 = vpop.permute.xlu0 %2822  ;;  %v2828_v56 = vadd.f32 %v6566_v21, %v2825_v32  ;;  %v6637_v21 = vld [vmem:[#allocation42_spill] sm:$0xff]  ;;  %v6642_v32 = vld [vmem:[#allocation51_spill] sm:$0xff] }
 0x870   : >> { %v2827_v5 = vadd.f32 %v6561_v41, %v2823_v16  ;;  %v6635_v41 = vld [vmem:[#allocation40_spill] sm:$0xff] }
 0x871   : >> { %v2831_v50 = vadd.f32 %v2828_v56, %v2819_v18 }
 0x872   : >> { %v5952_v37 = vadd.f32 %v2827_v5, %v2818_v0  ;;  %v6643_v0 = vld [vmem:[#allocation52_spill] sm:$0xff]  ;;  %v6644_v5 = vld [vmem:[#allocation53_spill] sm:$0xff] }
 0x873   : >> { %2851 = vrot.lane.b32.xlu2 %v2831_v50, %s6616_s0  ;;  %2839 = vrot.lane.b32.xlu1 %v2831_v50, %s6416_s12  ;;  %v2834_v55 = vmul.f32 %v2831_v50, %v6600_v27 }
 0x874   : >> { %2837 = vrot.lane.b32.xlu0 %v5952_v37, %s6416_s12  ;;  %v2833_v45 = vmul.f32 %v5952_v37, %v6600_v27 }
 0x876   : >> { %v2656_v57 = vpop.permute.xlu1 %2655 }
 0x877   : >> { %v2654_v3 = vpop.permute.xlu0 %2653  ;;  %v2660_v1 = vmul.f32 %v2656_v57, %v6640_v6 }
 0x878   : >> { %v2659_v8 = vmul.f32 %v2654_v3, %v6640_v6 }
 0x87b   : >> { %2669 = vrot.lane.b32.xlu2 %v5704_v52, %s6430_s2  ;;  %2849 = vrot.lane.b32.xlu1 %v5952_v37, %s6616_s0 }
 0x87c   : >> { %2847 = vrot.lane.b32.xlu0 %v5829_v43, %s6616_s0 }
 0x883   : >> { %2863 = vrot.lane.b32.xlu2 %v2831_v50, %s6399_s3  ;;  %2667 = vrot.lane.b32.xlu1 %v2624_v36, %s6430_s2  ;;  %v6638_v36 = vld [vmem:[#allocation32_spill] sm:$0xff] }
 0x884   : >> { %2665 = vrot.lane.b32.xlu0 %v2623_v59, %s6430_s2  ;;  %v2646_v59 = vpop.permute.xlu2 %2645 }
 0x885   : >> { %v2649_v30 = vmul.f32 %v2646_v59, %v6602_v49 }
 0x887   : >> { %v2652_v44 = vadd.f32 %v2649_v30, %v2640_v10 }
 0x88b   : >> { %2875 = vrot.lane.b32.xlu2 %v2831_v50, %s6430_s2  ;;  %2861 = vrot.lane.b32.xlu1 %v5952_v37, %s6399_s3 }
 0x88c   : >> { %2859 = vrot.lane.b32.xlu0 %v5829_v43, %s6399_s3  ;;  %v2836_v48 = vpop.permute.xlu2 %2835  ;;  %s6654_s3 = sand.u32 (%p292_p13), 1, %s3586_s21  }
 0x88d   : >> { %v2841_v50 = vmul.f32 %v2836_v48, %v6601_v28  ;;  %s3093_s15 = scalar_lea.sflag (%p292_p13), [#allocation6], %s6654_s3 }
 0x893   : >> { %2873 = vrot.lane.b32.xlu1 %v5952_v37, %s6430_s2  ;;  %2771 = vrot.lane.b32.xlu2 %v6634_v25, %s6621_s14  ;;  %v6646_v37 = vld [vmem:[#allocation55_spill] sm:$0xff] }
 0x894   : >> { %2871 = vrot.lane.b32.xlu0 %v5829_v43, %s6430_s2  ;;  %v2658_v13 = vpop.permute.xlu2 %2657 }
 0x895   : >> { %v2661_v20 = vmul.f32 %v2658_v13, %v6640_v6 }
 0x897   : >> { %v2664_v17 = vadd.f32 %v2661_v20, %v2652_v44 }
 0x89b   : >> { %2765 = vrot.lane.b32.xlu1 %v6635_v41, %s6621_s14  ;;  %2781 = vrot.lane.b32.xlu2 %v3513_v2, %s6621_s14 }
 0x89c   : >> { %2763 = vrot.lane.b32.xlu0 %v6636_v61, %s6621_s14 }
 0x8a3   : >> { %2779 = vrot.lane.b32.xlu1 %v6637_v21, %s6621_s14  ;;  %2977 = vrot.lane.b32.xlu2 %v6634_v25, %s6629_s11 }
 0x8a4   : >> { %2773 = vrot.lane.b32.xlu0 %v6638_v36, %s6621_s14 }
 0x8ab   : >> { %2971 = vrot.lane.b32.xlu1 %v6635_v41, %s6629_s11  ;;  %2987 = vrot.lane.b32.xlu2 %v3513_v2, %s6629_s11  ;;  %v2832_v41 = vmul.f32 %v5829_v43, %v6600_v27  ;;  %v6645_v2 = vld [vmem:[#allocation54_spill] sm:$0xff] }
 0x8ac   : >> { %2969 = vrot.lane.b32.xlu0 %v6636_v61, %s6629_s11 }
 0x8b3   : >> { %2985 = vrot.lane.b32.xlu1 %v6637_v21, %s6629_s11 }
 0x8b4   : >> { %2979 = vrot.lane.b32.xlu0 %v6638_v36, %s6629_s11  ;;  %v2663_v36 = vadd.f32 %v2660_v1, %v5940_v29 }
 0x8cd   : >> { %v2852_v33 = vpop.permute.xlu2 %2851 }
 0x8ce   : >> { %v2855_v18 = vmul.f32 %v2852_v33, %v6602_v49  ;;  %v2662_v33 = vadd.f32 %v2659_v8, %v5942_v26 }
 0x8d5   : >> { %v2670_v15 = vpop.permute.xlu2 %2669 }
 0x8d6   : >> { %v2673_v35 = vmul.f32 %v2670_v15, %v6641_v38 }
 0x8d8   : >> { %v2676_v60 = vadd.f32 %v2673_v35, %v2664_v17 }
 0x8da   : >> { %v2681_v16 = vmul.f32 %v2676_v60, %v6642_v32  ;;  %v2696_v56 = vmul.f32 %v2676_v60, %v6643_v0  ;;  %v2711_v25 = vmul.f32 %v2676_v60, %v6644_v5  ;;  %v2726_v61 = vmul.f32 %v2676_v60, %v6645_v2 }
 0x8dc   : >> { %v2688_v34 = vrot.slane %v2681_v16, 1  ;;  %v2703_v14 = vrot.slane %v2696_v56, 2  ;;  %v2718_v15 = vrot.slane %v2711_v25, 3  ;;  %v2733_v30 = vrot.slane %v2726_v61, 4 }
 0x8dd   : >> { %v2864_v47 = vpop.permute.xlu2 %2863 }
 0x8de   : >> { %v2867_v10 = vmul.f32 %v2864_v47, %v6640_v6 }
 0x8e5   : >> { %v2840_v24 = vpop.permute.xlu1 %2839  ;;  %v2876_v59 = vpop.permute.xlu2 %2875 }
 0x8e6   : >> { %v2838_v39 = vpop.permute.xlu0 %2837  ;;  %v2843_v53 = vmul.f32 %v2840_v24, %v6601_v28  ;;  %v2879_v29 = vmul.f32 %v2876_v59, %v6641_v38 }
 0x8e7   : >> { %v2842_v24 = vmul.f32 %v2838_v39, %v6601_v28 }
 0x8e8   : >> { %v2846_v22 = vadd.f32 %v2843_v53, %v2834_v55 }
 0x8ea   : >> { %v2858_v13 = vadd.f32 %v2855_v18, %v2846_v22 }
 0x8ec   : >> { %v2870_v20 = vadd.f32 %v2867_v10, %v2858_v13 }
 0x8ed   : >> { %v2850_v62 = vpop.permute.xlu1 %2849 }
 0x8ee   : >> { %v2848_v52 = vpop.permute.xlu0 %2847  ;;  %v2882_v13 = vadd.f32 %v2879_v29, %v2870_v20  ;;  %v2845_v29 = vadd.f32 %v2842_v24, %v2833_v45 }
 0x8f5   : >> { %v2668_v21 = vpop.permute.xlu1 %2667 }
 0x8f6   : >> { %v2672_v57 = vmul.f32 %v2668_v21, %v6641_v38  ;;  %v2666_v3 = vpop.permute.xlu0 %2665 }
 0x8f7   : >> { %v2671_v43 = vmul.f32 %v2666_v3, %v6641_v38 }
 0x8f8   : >> { %v2675_v48 = vadd.f32 %v2672_v57, %v2663_v36 }
 0x8f9   : >> { %v2674_v44 = vadd.f32 %v2671_v43, %v2662_v33  ;;  %v2854_v43 = vmul.f32 %v2850_v62, %v6602_v49 }
 0x8fa   : >> { %v2680_v26 = vmul.f32 %v2675_v48, %v6642_v32  ;;  %v2695_v35 = vmul.f32 %v2675_v48, %v6643_v0  ;;  %v2710_v27 = vmul.f32 %v2675_v48, %v6644_v5  ;;  %v2678_v17 = vmul.f32 %v2675_v48, %v6646_v37 }
 0x8fb   : >> { %v2725_v53 = vmul.f32 %v2675_v48, %v6645_v2  ;;  %v2679_v47 = vmul.f32 %v2674_v44, %v6642_v32  ;;  %v2694_v60 = vmul.f32 %v2674_v44, %v6643_v0  ;;  %v2709_v28 = vmul.f32 %v2674_v44, %v6644_v5 }
 0x8fc   : >> { %v2686_v55 = vrot.slane %v2680_v26, 1  ;;  %v2701_v1 = vrot.slane %v2695_v35, 2  ;;  %v2716_v22 = vrot.slane %v2710_v27, 3  ;;  %v2724_v18 = vmul.f32 %v2674_v44, %v6645_v2 }
 0x8fd   : >> { %v2731_v39 = vrot.slane %v2725_v53, 4  ;;  %v2685_v8 = vrot.slane %v2679_v47, 1  ;;  %v2700_v16 = vrot.slane %v2694_v60, 2  ;;  %v2862_v56 = vpop.permute.xlu1 %2861  ;;  %v2677_v25 = vmul.f32 %v2674_v44, %v6646_v37 }
 0x8fe   : >> { %v2715_v61 = vrot.slane %v2709_v28, 3  ;;  %v2860_v21 = vpop.permute.xlu0 %2859  ;;  %v2689_v36 = vsel %vm448_vm0, %v2686_v55, %v2688_v34  ;;  %v2704_v59 = vsel %vm465_vm1, %v2701_v1, %v2703_v14  ;;  %v2730_v57 = vrot.slane %v2724_v18, 4 }
 0x8ff   : >> { %v2687_v3 = vsel %vm448_vm0, %v2685_v8, %v2686_v55  ;;  %v2702_v33 = vsel %vm465_vm1, %v2700_v16, %v2701_v1  ;;  %v2693_v26 = vadd.f32 %v2689_v36, %v2678_v17  ;;  %v2853_v44 = vmul.f32 %v2848_v52, %v6602_v49 }
 0x900   : >> { %v2692_v10 = vadd.f32 %v2687_v3, %v2677_v25  ;;  %v2717_v48 = vsel %vm482_vm2, %v2715_v61, %v2716_v22  ;;  %v2732_v35 = vsel %vm6583_vm3, %v2730_v57, %v2731_v39  ;;  %v2719_v34 = vsel %vm482_vm2, %v2716_v22, %v2718_v15 }
 0x901   : >> { %v2734_v14 = vsel %vm6647_vm5, %v2731_v39, %v2733_v30  ;;  %v2866_v20 = vmul.f32 %v2862_v56, %v6640_v6  ;;  %v2708_v53 = vadd.f32 %v2704_v59, %v2693_v26  ;;  %v2844_v47 = vadd.f32 %v2841_v50, %v2832_v41  ;;  %v6059_v59 = vpop.permute.xlu2 %2771 }
 0x902   : >> { %v2707_v27 = vadd.f32 %v2702_v33, %v2692_v10  ;;  %v2865_v62 = vmul.f32 %v2860_v21, %v6640_v6  ;;  %v2857_v60 = vadd.f32 %v2854_v43, %v2845_v29  ;;  %v2887_v17 = vmul.f32 %v2882_v13, %v6642_v32 }
 0x903   : >> { %v2723_v1 = vadd.f32 %v2719_v34, %v2708_v53  ;;  %v2902_v49 = vmul.f32 %v2882_v13, %v6643_v0  ;;  %v2856_v52 = vadd.f32 %v2853_v44, %v2844_v47  ;;  %v2741_v15 = vadd.s32 5, %v3746_v7 }
 0x904   : >> { %v2722_v55 = vadd.f32 %v2717_v48, %v2707_v27  ;;  %v2869_v30 = vadd.f32 %v2866_v20, %v2857_v60  ;;  %v2917_v50 = vmul.f32 %v2882_v13, %v6644_v5  ;;  %v2932_v16 = vmul.f32 %v2882_v13, %v6645_v2 }
 0x905   : >> { %v2874_v28 = vpop.permute.xlu1 %2873  ;;  %v2738_v39 = vadd.f32 %v2734_v14, %v2723_v1  ;;  %v2868_v41 = vadd.f32 %v2865_v62, %v2856_v52  ;;  %v2894_v18 = vrot.slane %v2887_v17, 1  ;;  %v2909_v56 = vrot.slane %v2902_v49, 2 }
 0x906   : >> { %v2878_v45 = vmul.f32 %v2874_v28, %v6641_v38  ;;  %v2872_v24 = vpop.permute.xlu0 %2871  ;;  %v2737_v22 = vadd.f32 %v2732_v35, %v2722_v55  ;;  %vm2742_vm6 = vcmp.ge.s32.totalorder %v2741_v15, 0  ;;  %vm2743_vm7 = vcmp.lt.s32.totalorder %v2741_v15, 48 }
 0x907   : >> { %v2877_v6 = vmul.f32 %v2872_v24, %v6641_v38  ;;  %v2740_v33 = vsub.f32 %v2738_v39, %v4160_v58  ;;  %v2924_v43 = vrot.slane %v2917_v50, 3  ;;  %v2939_v26 = vrot.slane %v2932_v16, 4  ;;  %vm6079_vm9 = vmand %vm2742_vm6, %vm2743_vm7  ;;  %v3000_v50 = vld [vmem:[#allocation3 + $0x10] sm:$0xff] }
 0x908   : >> { %v2881_v8 = vadd.f32 %v2878_v45, %v2869_v30  ;;  %v2739_v38 = vsub.f32 %v2737_v22, %v4160_v58  ;;  %v2947_v15 = vadd.s32 6, %v3746_v7  ;;  %vm2746_vm11 = vmand %vm4223_vm10, %vm6079_vm9 }
 0x909   : >> { %v2880_v25 = vadd.f32 %v2877_v6, %v2868_v41  ;;  %v2752_v60 = vmax.f32 %v2740_v33, 0.0  ;;  %vm2748_vm13 = vcmp.le.f32.partialorder %v2740_v33, 5.0 }
 0x90a   : >> { %v2886_v61 = vmul.f32 %v2881_v8, %v6642_v32  ;;  %v2901_v21 = vmul.f32 %v2881_v8, %v6643_v0  ;;  %v2916_v36 = vmul.f32 %v2881_v8, %v6644_v5  ;;  %v2931_v57 = vmul.f32 %v2881_v8, %v6645_v2  ;;  %vm2750_vm15 = vmand %vm2746_vm11, %vm2748_vm13 }
 0x90b   : >> { %v2885_v3 = vmul.f32 %v2880_v25, %v6642_v32  ;;  %v2900_v13 = vmul.f32 %v2880_v25, %v6643_v0  ;;  %v2915_v48 = vmul.f32 %v2880_v25, %v6644_v5  ;;  %v2930_v14 = vmul.f32 %v2880_v25, %v6645_v2 }
 0x90c   : >> { %v2892_v10 = vrot.slane %v2886_v61, 1  ;;  %v2907_v44 = vrot.slane %v2901_v21, 2  ;;  %v2922_v20 = vrot.slane %v2916_v36, 3  ;;  %v2937_v27 = vrot.slane %v2931_v57, 4 }
 0x90d   : >> { %v2891_v35 = vrot.slane %v2885_v3, 1  ;;  %v2906_v34 = vrot.slane %v2900_v13, 2  ;;  %v2766_v29 = vpop.permute.xlu1 %2765  ;;  %v2883_v53 = vmul.f32 %v2880_v25, %v6646_v37  ;;  %v2751_v32 = vmax.f32 %v2739_v38, 0.0 }
 0x90e   : >> { %v2764_v47 = vpop.permute.xlu0 %2763  ;;  %v2884_v0 = vmul.f32 %v2881_v8, %v6646_v37  ;;  %v2921_v62 = vrot.slane %v2915_v48, 3  ;;  %v2936_v5 = vrot.slane %v2930_v14, 4  ;;  %v2895_v49 = vsel %vm448_vm0, %v2892_v10, %v2894_v18  ;;  %v2782_v8 = vpop.permute.xlu2 %2781 }
 0x90f   : >> { %v2893_v55 = vsel %vm448_vm0, %v2891_v35, %v2892_v10  ;;  %v2753_v1 = vsub.f32 0.0, %v2751_v32  ;;  %v2754_v52 = vsub.f32 0.0, %v2752_v60  ;;  %v2908_v2 = vsel %vm465_vm1, %v2906_v34, %v2907_v44  ;;  %vm6651_vm0 = vmmov %vm6583_vm3 }
 0x910   : >> { %v2898_v17 = vadd.f32 %v2893_v55, %v2883_v53  ;;  %v2899_v28 = vadd.f32 %v2895_v49, %v2884_v0  ;;  %v2910_v30 = vsel %vm465_vm1, %v2907_v44, %v2909_v56  ;;  %v2925_v22 = vsel %vm482_vm2, %v2922_v20, %v2924_v43  ;;  %vm2745_vm1 = vmand %vm4233_vm12, %vm6079_vm9 }
 0x911   : >> { %v2755_v45 = vmul.f32 1.442695, %v2753_v1  ;;  %v2940_v37 = vsel %vm6648_vm8, %v2937_v27, %v2939_v26  ;;  %v2757_v39 = vmul.f32 1.442695, %v2754_v52  ;;  %v2923_v41 = vsel %vm482_vm2, %v2921_v62, %v2922_v20 }
 0x912   : >> { %v2913_v24 = vadd.f32 %v2908_v2, %v2898_v17  ;;  %v2914_v6 = vadd.f32 %v2910_v30, %v2899_v28  ;;  %v2938_v56 = vsel %vm6651_vm0, %v2936_v5, %v2937_v27  ;;  %vm2747_vm2 = vcmp.le.f32.partialorder %v2739_v38, 5.0 }
 0x913   : >> { %3452 = vpow2.f32 %v2755_v45  ;;  %vm2749_vm14 = vmand %vm2745_vm1, %vm2747_vm2  ;;  %vm2948_vm4 = vcmp.ge.s32.totalorder %v2947_v15, 0  ;;  %vm2949_vm3 = vcmp.lt.s32.totalorder %v2947_v15, 48  ;;  %v3006_v45 = vld [vmem:[#allocation3 + $0x8] sm:$0xff] }
 0x914   : >> { %v2928_v16 = vadd.f32 %v2923_v41, %v2913_v24  ;;  %3454 = vpow2.f32 %v2757_v39  ;;  %v2929_v25 = vadd.f32 %v2925_v22, %v2914_v6  ;;  %vm6106_vm5 = vmand %vm2948_vm4, %vm2949_vm3  ;;  %vm3085_vm3 = vcmask (%p292_p13), 392192  }
 0x915   : >> { %v2780_v18 = vpop.permute.xlu1 %2779  ;;  %vm2951_vm6 = vmand %vm4233_vm12, %vm6106_vm5 }
 0x916   : >> { %v2774_v61 = vpop.permute.xlu0 %2773  ;;  %v2943_v21 = vadd.f32 %v2938_v56, %v2928_v16  ;;  %v2944_v36 = vadd.f32 %v2940_v37, %v2929_v25  ;;  %v2978_v0 = vpop.permute.xlu2 %2977  ;;  %vm2952_vm8 = vmand %vm4223_vm10, %vm6106_vm5  ;;  %v3014_v16 = vld [vmem:[#allocation3 + $0x20] sm:$0xff] }
 0x918   : >> { %v2945_v57 = vsub.f32 %v2943_v21, %v4160_v58  ;;  %v2946_v3 = vsub.f32 %v2944_v36, %v4160_v58  ;;  %v3013_v21 = vld [vmem:[#allocation3 + $0x18] sm:$0xff] }
 0x919   : >> { %v3453_v13 = vpop.eup %3452 }
 0x91a   : >> { %v2957_v43 = vmax.f32 %v2945_v57, 0.0  ;;  %v3455_v10 = vpop.eup %3454  ;;  %v2759_v48 = vsel %vm2749_vm14, %v3453_v13, 0.0  ;;  %v2958_v38 = vmax.f32 %v2946_v3, 0.0  ;;  %vm2953_vm7 = vcmp.le.f32.partialorder %v2945_v57, 5.0 }
 0x91b   : >> { %v2761_v26 = vadd.f32 %v2759_v48, %v5882_v9  ;;  %v2775_v44 = vmul.f32 %v6059_v59, %v2759_v48  ;;  %v2760_v35 = vsel %vm2750_vm15, %v3455_v10, 0.0  ;;  %v2767_v34 = vmul.f32 %v2764_v47, %v2759_v48  ;;  %vm2955_vm0 = vmand %vm2951_vm6, %vm2953_vm7 }
 0x91c   : >> { %v2762_v33 = vadd.f32 %v2760_v35, %v5879_v31  ;;  %v2768_v14 = vmul.f32 %v2766_v29, %v2760_v35  ;;  %v2784_v20 = vmul.f32 %v2782_v8, %v2760_v35  ;;  %v2783_v58 = vmul.f32 %v2780_v18, %v2759_v48 }
 0x91d   : >> { %v2777_v27 = vadd.f32 %v2775_v44, %v5899_v23  ;;  %v2769_v53 = vadd.f32 %v2767_v34, %v5892_v54  ;;  %v2776_v32 = vmul.f32 %v2774_v61, %v2760_v35  ;;  %v2959_v62 = vsub.f32 0.0, %v2957_v43  ;;  %v2972_v60 = vpop.permute.xlu1 %2971 }
 0x91e   : >> { %v2770_v55 = vadd.f32 %v2768_v14, %v5885_v51  ;;  %v2786_v9 = vadd.f32 %v2784_v20, %v5902_v63  ;;  %v2785_v59 = vadd.f32 %v2783_v58, %v5895_v40  ;;  %v2960_v47 = vsub.f32 0.0, %v2958_v38  ;;  %v2970_v5 = vpop.permute.xlu0 %2969  ;;  %v2993_v63 = vld [vmem:[#allocation2] sm:$0xff] }
 0x91f   : >> { %v2778_v31 = vadd.f32 %v2776_v32, %v5888_v46  ;;  %v2961_v29 = vmul.f32 1.442695, %v2959_v62  ;;  %vm2954_vm9 = vcmp.le.f32.partialorder %v2946_v3, 5.0  ;;  %v2988_v46 = vpop.permute.xlu2 %2987  ;;  %v3007_v3 = vld [vmem:[#allocation3] sm:$0xff] }
 0x920   : >> { %v2963_v1 = vmul.f32 1.442695, %v2960_v47  ;;  %vm2956_vm1 = vmand %vm2952_vm8, %vm2954_vm9 }
 0x921   : >> { %3456 = vpow2.f32 %v2961_v29 }
 0x922   : >> { %3458 = vpow2.f32 %v2963_v1 }
 0x925   : >> { %v2986_v40 = vpop.permute.xlu1 %2985 }
 0x926   : >> { %v2980_v49 = vpop.permute.xlu0 %2979 }
 0x927   : >> { %v3457_v51 = vpop.eup %3456 }
 0x928   : >> { %v3459_v23 = vpop.eup %3458  ;;  %v2965_v17 = vsel %vm2955_vm0, %v3457_v51, 0.0 }
 0x929   : >> { %v2967_v52 = vadd.f32 %v2965_v17, %v2761_v26  ;;  %v2981_v2 = vmul.f32 %v2978_v0, %v2965_v17  ;;  %v2966_v28 = vsel %vm2956_vm1, %v3459_v23, 0.0  ;;  %v2973_v30 = vmul.f32 %v2970_v5, %v2965_v17 }
 0x92a   : >> { %v2968_v24 = vadd.f32 %v2966_v28, %v2762_v33  ;;  %v2974_v22 = vmul.f32 %v2972_v60, %v2966_v28  ;;  %v2990_v37 = vmul.f32 %v2988_v46, %v2966_v28  ;;  %v2989_v39 = vmul.f32 %v2986_v40, %v2965_v17 }
 0x92b   : >> { %v2983_v41 = vadd.f32 %v2981_v2, %v2777_v27  ;;  %v2995_v6 = vadd.f32 %v2993_v63, %v2967_v52  ;;  %v2975_v8 = vadd.f32 %v2973_v30, %v2769_v53  ;;  %v2982_v18 = vmul.f32 %v2980_v49, %v2966_v28 }
 0x92c   : >> { %v2976_v56 = vadd.f32 %v2974_v22, %v2770_v55  ;;  %v2996_v25 = vadd.f32 %v2994_v4, %v2968_v24  ;;  %v2992_v61 = vadd.f32 %v2990_v37, %v2786_v9  ;;  %v2991_v15 = vadd.f32 %v2989_v39, %v2785_v59 }
 0x92d   : >> { %2997 = vst [vmem:[#allocation2] sm:$0xff] %v2995_v6  ;;  %v3008_v36 = vadd.f32 %v3006_v45, %v2983_v41  ;;  %v3001_v57 = vadd.f32 %v2999_v42, %v2975_v8  ;;  %v2984_v13 = vadd.f32 %v2982_v18, %v2778_v31 }
 0x92e   : >> { %2998 = vst [vmem:[#allocation2 + $0x8] sm:$0xff] %v2996_v25  ;;  %v3002_v43 = vadd.f32 %v3000_v50, %v2976_v56  ;;  %v3016_v10 = vadd.f32 %v3014_v16, %v2992_v61  ;;  %v3015_v48 = vadd.f32 %v3013_v21, %v2991_v15 }
 0x92f   : >> { %3010 = vst [vmem:[#allocation3 + $0x8] sm:$0xff] %v3008_v36  ;;  %v3009_v38 = vadd.f32 %v3007_v3, %v2984_v13 }
 0x930   : >> { %3004 = vst [vmem:[#allocation3 + $0x10] sm:$0xff] %v3002_v43  ;;  %294 = sbr.rel (!%p292_p13) target bundleno = 54 (0x36), region = 106 }
 0x931   : >> { %3003 = vst [vmem:[#allocation3 + $0x28] sm:$0xff] %v3001_v57 }
 0x932   : >> { %3018 = vst [vmem:[#allocation3 + $0x20] sm:$0xff] %v3016_v10 }
 0x933   : >> { %3017 = vst [vmem:[#allocation3 + $0x18] sm:$0xff] %v3015_v48 }
 0x934   : >> { %3011 = vst [vmem:[#allocation3] sm:$0xff] %v3009_v38  ;;  %v3019_v26 = vld [vmem:[#allocation2] sm:$0xff] (%p292_p13) }
 0x935   : > { %3514 = vrcp.f32 %v3019_v26  ;;  %v3020_v44 = vld [vmem:[#allocation2 + $0x8] sm:$0xff]  ;;  %v3032_v14 = vand.u32 2147483648, %v3019_v26  ;;  %vm3026_vm10 = vweird.f32 %v3019_v26  ;;  %v3030_v27 = vand.u32 2147483647, %v3019_v26 }
 0x936   : > { %3516 = vrcp.f32 %v3020_v44  ;;  %vm3040_vm2 = vweird.f32 %v3020_v44  ;;  %v3044_v7 = vand.u32 2147483647, %v3020_v44  ;;  %v3046_v11 = vand.u32 2147483648, %v3020_v44  ;;  %v3051_v19 = vld [vmem:[#allocation3 + $0x8] sm:$0xff] }
 0x937   : > { %v3033_v0 = vor.u32 1.1754944e-38, %v3032_v14  ;;  %vm3031_vm14 = vcmp.eq.f32.partialorder %v3030_v27, 8.507059e+37  ;;  %v3050_v40 = vld [vmem:[#allocation3 + $0x10] sm:$0xff] }
 0x938   : > { %v3049_v60 = vld [vmem:[#allocation3 + $0x28] sm:$0xff]  ;;  %vm3045_vm4 = vcmp.eq.f32.partialorder %v3044_v7, 8.507059e+37  ;;  %v3047_v5 = vor.u32 1.1754944e-38, %v3046_v11 }
 0x939   : > { %v3054_v23 = vld [vmem:[#allocation3 + $0x20] sm:$0xff] }
 0x93a   : > { %v3053_v9 = vld [vmem:[#allocation3 + $0x18] sm:$0xff] }
 0x93b   : > { %v3515_v35 = vpop.eup %3514  ;;  %v3052_v46 = vld [vmem:[#allocation3] sm:$0xff] }
 0x93c   : > { %v3517_v34 = vpop.eup %3516  ;;  %v3022_v33 = vmul.f32 %v3515_v35, %v3019_v26  ;;  %vm3027_vm12 = vweird.f32 %v3515_v35 }
 0x93d   : > { %v3036_v20 = vmul.f32 %v3517_v34, %v3020_v44  ;;  %vm3041_vm11 = vweird.f32 %v3517_v34  ;;  %vm3028_vm13 = vmor %vm3026_vm10, %vm3027_vm12 }
 0x93e   : > { %v3023_v58 = vsub.f32 1.0, %v3022_v33  ;;  %vm3042_vm15 = vmor %vm3040_vm2, %vm3041_vm11 }
 0x93f   : > { %v3037_v53 = vsub.f32 1.0, %v3036_v20 }
 0x940   : > { %v3024_v32 = vmul.f32 %v3515_v35, %v3023_v58 }
 0x941   : > { %v3038_v62 = vmul.f32 %v3517_v34, %v3037_v53 }
 0x942   : > { %v3025_v12 = vadd.f32 %v3515_v35, %v3024_v32 }
 0x943   : > { %v3039_v55 = vadd.f32 %v3517_v34, %v3038_v62 }
 0x944   : > { %v3029_v59 = vsel %vm3028_vm13, %v3515_v35, %v3025_v12 }
 0x945   : > { %v3034_v47 = vsel %vm3031_vm14, %v3033_v0, %v3029_v59  ;;  %v3043_v1 = vsel %vm3042_vm15, %v3517_v34, %v3039_v55 }
 0x946   : > { %v3057_v31 = vmul.f32 %v3051_v19, %v3034_v47  ;;  %v3055_v29 = vmul.f32 %v3049_v60, %v3034_v47  ;;  %v3059_v54 = vmul.f32 %v3053_v9, %v3034_v47  ;;  %v3048_v51 = vsel %vm3045_vm4, %v3047_v5, %v3043_v1 }
 0x947   : > { %v3058_v63 = vmul.f32 %v3052_v46, %v3048_v51  ;;  %v3056_v17 = vmul.f32 %v3050_v40, %v3048_v51  ;;  %v3060_v49 = vmul.f32 %v3054_v23, %v3048_v51 }
 0x948   : > { %3071 = vrot.lane.b32.xlu1 %v3057_v31, %s3615_s1  ;;  %3067 = vrot.lane.b32.xlu0 %v3055_v29, %s3615_s1 }
 0x949   : > { %3075 = vrot.lane.b32.xlu2 %v3059_v54, %s3615_s1 }
 0x950   : > { %3073 = vrot.lane.b32.xlu1 %v3058_v63, %s3615_s1  ;;  %3069 = vrot.lane.b32.xlu0 %v3056_v17, %s3615_s1 }
 0x951   : > { %3077 = vrot.lane.b32.xlu2 %v3060_v49, %s3615_s1 }
 0x9a3   : > { %v3076_v52 = vpop.permute.xlu2 %3075 }
 0x9a4   : > { %3090 = vst.msk [vmem:[%s3791_s10 + $0x20] sm:$0xff] %vm3085_vm3, %v3076_v52 }
 0x9ab   : > { %v3078_v2 = vpop.permute.xlu2 %3077 }
 0x9ac   : > { %3091 = vst.msk [vmem:[%s3791_s10 + $0x28] sm:$0xff] %vm3085_vm3, %v3078_v2 }
 0x9ba   : > { %v3072_v4 = vpop.permute.xlu1 %3071  ;;  %v3068_v28 = vpop.permute.xlu0 %3067 }
 0x9bb   : > { %3088 = vst.msk [vmem:[%s3791_s10 + $0x10] sm:$0xff] %vm3085_vm3, %v3072_v4 }
 0x9bc   : > { %3086 = vst.msk [vmem:[%s3791_s10] sm:$0xff] %vm3085_vm3, %v3068_v28 }
 0x9c2   : > { %v3074_v30 = vpop.permute.xlu1 %3073  ;;  %v3070_v45 = vpop.permute.xlu0 %3069 }
 0x9c3   : > { %3089 = vst.msk [vmem:[%s3791_s10 + $0x18] sm:$0xff] %vm3085_vm3, %v3074_v30 }
 0x9c4   : > { %3087 = vst.msk [vmem:[%s3791_s10 + $0x8] sm:$0xff] %vm3085_vm3, %v3070_v45 }
 0x9c5   : > { %s3104_s24 = scalar_lea.hbm %s6170_s5, %s3733_s19  ;;  %s3115_s26 = sshll.u32 %s3791_s10, 4  ;;  %s3116_s26 = int_to_ptr.vmem [resolvable:$true] %s3115_s26 }
 0x9c6   : > { %s3117_s2 = sshll.u32 %s3104_s24, 4  ;;  %s3616_s8 = smov 256   ;;  %s3118_s2 = int_to_ptr.hbm [resolvable:$true] %s3117_s2 }
 0x9c7   : > { %3321 = sst [smem:[#allocation12]] (%p3694_p5), %s3616_s8  ;;  %s3617_s9 = smov 768  }
 0x9c8   : > { %3322 = sst [smem:[#allocation12 + $0x1]] (%p3694_p5), %s3617_s9  ;;  %s3618_s13 = smov 2  }
 0x9c9   : > { %3323 = sst [smem:[#allocation12 + $0x2]] (%p3694_p5), %s3618_s13  ;;  %s3619_s27 = smov 128  }
 0x9ca   : > { %3324 = sst [smem:[#allocation12 + $0x3]] (%p3694_p5), %s3619_s27  ;;  %s3620_s19 = smov 8  }
 0x9cb   : > { %3325 = sst [smem:[#allocation12 + $0x4]] (%p3694_p5), %s3619_s27  ;;  %s3621_s6 = smov [#allocation11]  }
 0x9cc   : > { %3326 = sst [smem:[#allocation12 + $0x5]] (%p3694_p5), %s3620_s19  ;;  %s3622_s10 = smov 0  }
 0x9cd   : > { %3327 = dma.general (%p3694_p5), %s3116_s26, 768, %s3118_s2, %s3093_s15, %s3621_s6, [#allocation12], %s3622_s10, 0  }
 0x9ce PF: > { %p3344_p0 = scmp.ge.s32.totalorder %s3594_s23, 2  ;;  %s3145_s7 = sand.u32 1, %s3582_s20  }
 0x9cf   : > { %s3146_s0 = scalar_lea.sflag [#allocation6], %s3145_s7 }
 0x9d0   : > { %p3337_p1 = pnand %p3344_p0, %p3698_p6 }
 0x9d2   : > { %p3338_p2 = pneg %p3337_p1 }
 0x9d4   : > { %3577 = dma.done.wait (%p3338_p2), %s3146_s0, 768  }
 0x9d5   : > { %3579 = vsyncadd (%p3338_p2), %s3146_s0, 4294966528  ;;  %p18_p3 = scmp.ge.s32.totalorder %s3681_s25, 5   ;;  %s6655_s20 = smov %s3586_s21 }
 0x9d6   : > { %s6656_s21 = smov %s3590_s22  ;;  %s6657_s22 = smov %s3692_s28 }
 0x9d7   : > { %s6658_s23 = smov %s3681_s25  ;;  %20 = sbr.rel (!%p18_p3) target bundleno = 10 (0xa), region = 117 }
 0x9dc   :  { %3152 = vsyncpa [#allocation6], 1 }
 0x9dd   :  { %3154 = vsyncpa [#allocation6 + $0x1], 1 }
 0x9de   :  { %3155 = vsyncpa [#allocation7], 1 }
 0x9df   :  { %3157 = vsyncpa [#allocation7 + $0x1], 1 }
 0x9e0   :  { %3158 = vsyncpa [#allocation9], 1 }

</bundles_post_ra>
